<compile_context>
chip_gen: v6e
topology: v6e:2x2x1
jax: 0.10.0
libtpu: 0.0.40
codegen_flags: <defaults>
</compile_context>

<pallas_src>
import functools

import numpy as np
import jax
import jax.numpy as jnp
from jax import lax, random
from jax.experimental import pallas as pl
from jax.experimental.pallas import tpu as pltpu

START_TAG = "<START>"
STOP_TAG = "<STOP>"

VMEM_SPEC = pl.BlockSpec(memory_space=pltpu.MemorySpace.VMEM)
SMEM_SPEC = pl.BlockSpec(memory_space=pltpu.MemorySpace.SMEM)


def _round_up(x, m):
    return (x + m - 1) // m * m


def _sigmoid(x):
    # exact sigmoid via tanh: stays on the EUP slot, no VPU divide on the serial chain.
    return 0.5 * jnp.tanh(0.5 * x) + 0.5


# ----------------------------------------------------------------------------
# In-kernel fused bidirectional LSTM (single layer, PyTorch gate order i,f,g,o)
# ----------------------------------------------------------------------------
def _bidir_lstm(x, wih, b, whh, h0, c0, gx_scr, hf_scr, hr_scr, h2, hpad):
    """Fused fwd+rev LSTM over x [T, in]; returns [T, hpad] = [h_fwd(t) | h_rev(t) | 0-pad].

    wih:  [in(_pad), 4*hpad]  both directions' input weights, gate-major, lanes per gate =
                              [fwd 0:h2 | rev h2:2*h2 | zero pad], gate stride hpad (128-mult)
    b:    [1, 4*hpad]         b_ih + b_hh in the same lane layout (pad lanes zero)
    whh:  [hpad, 4*hpad]      block-diagonal recurrent weights (rows = [fwd h | rev h | pad])
    h0,c0:[1, hpad]           initial states as [fwd | rev | pad]
    gx_scr [T, 4*hpad], hf_scr/hr_scr [T, hpad]: VMEM scratch.
    """
    seq = x.shape[0]
    gw = 4 * hpad

    # Both directions' input projections in ONE MXU matmul (bf16/f32 operands, f32 accum).
    gx_scr[...] = jnp.dot(x, wih, preferred_element_type=jnp.float32) + b

    # Lane mask selecting the reverse-direction columns inside each gate block (hoisted).
    lane = lax.broadcasted_iota(jnp.int32, (1, gw), 1)
    rev_lane = functools.reduce(
        lambda a, d: a | d,
        [(lane >= g * hpad + h2) & (lane < g * hpad + 2 * h2) for g in range(4)])

    def step(t, carry):
        h, c = carry                                                   # [1, hpad] each
        g_fwd = gx_scr[pl.ds(t, 1), :]                                 # fwd gates: row t
        g_rev = gx_scr[pl.ds(seq - 1 - t, 1), :]                       # rev gates: row S-1-t
        g = (jnp.where(rev_lane, g_rev, g_fwd)
             + jnp.dot(h, whh, preferred_element_type=jnp.float32))    # [1, 4*hpad]
        # 128-aligned, full-vreg gate slices.
        i_a = _sigmoid(g[:, 0 * hpad:1 * hpad])
        f_a = _sigmoid(g[:, 1 * hpad:2 * hpad])
        g_a = jnp.tanh(g[:, 2 * hpad:3 * hpad])
        o_a = _sigmoid(g[:, 3 * hpad:4 * hpad])
        c_new = f_a * c + i_a * g_a                                    # pad lanes stay 0
        h_new = o_a * jnp.tanh(c_new)
        hf_scr[pl.ds(t, 1), :] = h_new                                 # fwd half valid at t
        hr_scr[pl.ds(seq - 1 - t, 1), :] = h_new                       # rev half valid at S-1-t
        return (h_new, c_new)

    lax.fori_loop(0, seq, step, (h0, c0), unroll=True)

    out_lane = lax.broadcasted_iota(jnp.int32, (seq, hpad), 1)
    return jnp.where(out_lane < h2, hf_scr[...], hr_scr[...])          # [T, hpad], original time


# ----------------------------------------------------------------------------
# The fused forward kernel
# ----------------------------------------------------------------------------
def _fused_forward_kernel(
    # inputs
    idx_ref,        # SMEM [steps+1] int32   recipe-step boundary indices (torch `indices`)
    sent_ref,       # [S, 1024] bf16         ELMo sentence embeddings
    ing0_ref,       # [1, 1024] bf16         ELMo embedding of ingredient 0 (only one consumed)
    s_wih_ref, s_whh_ref, s_b_ref, s_hc0_ref,      # sentence BiLSTM (packed/padded)
    attn_w_ref, attn_b_ref,                        # bi_attention: [1024, hpad] bf16, [1, hpad]
    e_wih_ref, e_whh_ref, e_b_ref, e_hc0_ref,      # entity BiLSTM (packed/padded)
    h2t_w_ref, h2t_b_ref,                          # hid2tag: [hpad, n_tag], [1, n_tag]
    trans_ref,                                     # [n_tag, n_tag] transitions[to, from]
    # outputs
    score_ref,      # [1, 1] float32   Viterbi path score
    path_ref,       # [1, steps] int32 Viterbi best path
    # scratch
    s_gx_scr, s_hf_scr, s_hr_scr, e_gx_scr, e_hf_scr, e_hr_scr,
    feat_scr,       # [steps, n_tag] f32
    bptr_scr,       # [steps, n_tag] int32
    *, start_ix, stop_ix, h2, hpad,
):
    S = sent_ref.shape[0]
    steps = path_ref.shape[1]
    n_tag = trans_ref.shape[0]

    # ---------------- sentence BiLSTM over ELMo features --------------------
    lstm_out = _bidir_lstm(sent_ref[...], s_wih_ref[...], s_b_ref[...], s_whh_ref[...],
                           s_hc0_ref[0:1, :], s_hc0_ref[1:2, :],
                           s_gx_scr, s_hf_scr, s_hr_scr, h2, hpad)              # [S, hpad]

    # ---------------- per-step segment attention ----------------------------
    # Only attn_scores[:, 0] (ingredient 0) feeds the output -> score against that row only,
    # with a single MXU contraction over the hidden dim (a0 . lstm_out^T).
    a0 = (jnp.dot(ing0_ref[...], attn_w_ref[...], preferred_element_type=jnp.float32)
          + attn_b_ref[...])                                                    # [1, hpad]
    scores = lax.dot_general(a0, lstm_out, (((1,), (1,)), ((), ())),
                             preferred_element_type=jnp.float32)                # [1, S]

    # token s belongs to step p  iff  idx[p] < s <= idx[p+1]  (scalar SMEM reads)
    s_iota = lax.broadcasted_iota(jnp.int32, (1, S), 1)
    step_id = jnp.full((1, S), -1, jnp.int32)
    for p in range(steps + 1):
        step_id = step_id + (idx_ref[p] < s_iota).astype(jnp.int32)
    p_iota = lax.broadcasted_iota(jnp.int32, (steps, S), 0)
    valid = step_id == p_iota                                                   # [steps, S]

    masked = jnp.where(valid, scores, jnp.float32(-1e30))
    m = jnp.max(masked, axis=1, keepdims=True)
    e = jnp.where(valid, jnp.exp(masked - m), jnp.float32(0.0))
    denom = jnp.sum(e, axis=1, keepdims=True)
    probs = e * pl.reciprocal(jnp.maximum(denom, jnp.float32(1e-30)), approx=True)
    # empty segment -> zero feature row (matches torch.mm on an empty slice)
    step_feats = jnp.dot(probs, lstm_out, preferred_element_type=jnp.float32)   # [steps, hpad]

    # ---------------- entity BiLSTM over step features ----------------------
    ent_out = _bidir_lstm(step_feats, e_wih_ref[...], e_b_ref[...], e_whh_ref[...],
                          e_hc0_ref[0:1, :], e_hc0_ref[1:2, :],
                          e_gx_scr, e_hf_scr, e_hr_scr, h2, hpad)               # [steps, hpad]

    # ---------------- hid2tag -----------------------------------------------
    feat_scr[...] = (jnp.dot(ent_out, h2t_w_ref[...], preferred_element_type=jnp.float32)
                     + h2t_b_ref[...])                                          # [steps, n_tag]

    # ---------------- CRF Viterbi: forward recursion + on-device backtrace ---
    trans = trans_ref[...]
    lane_tag = lax.broadcasted_iota(jnp.int32, (1, n_tag), 1)
    lane_tag_f = lane_tag.astype(jnp.float32)
    lane_nn_f = lax.broadcasted_iota(jnp.int32, (n_tag, n_tag), 1).astype(jnp.float32)
    eye_f = (lax.broadcasted_iota(jnp.int32, (n_tag, n_tag), 0)
             == lax.broadcasted_iota(jnp.int32, (n_tag, n_tag), 1)).astype(jnp.float32)
    big = jnp.float32(n_tag)

    fv0 = jnp.where(lane_tag == start_ix, jnp.float32(0.0), jnp.float32(-10000.0))  # [1, n_tag]

    def vit_fwd(t, fv):
        ntv = trans + fv                                                  # [to, from]
        maxv = jnp.max(ntv, axis=1, keepdims=True)                        # [n_tag, 1]
        bp_col = jnp.min(jnp.where(ntv == maxv, lane_nn_f, big),
                         axis=1, keepdims=True)                           # first argmax ("from")
        # tiny column->row transpose via diagonal select + sublane reduce (n_tag x n_tag)
        maxv_row = jnp.sum(eye_f * maxv, axis=0, keepdims=True)           # [1, n_tag]
        bp_row = jnp.sum(eye_f * bp_col, axis=0, keepdims=True)
        bptr_scr[pl.ds(t, 1), :] = bp_row.astype(jnp.int32)               # int32 backpointers
        return maxv_row + feat_scr[pl.ds(t, 1), :]

    fv = lax.fori_loop(0, steps, vit_fwd, fv0, unroll=True)

    terminal = fv + trans_ref[stop_ix:stop_ix + 1, :]
    best_score = jnp.max(terminal, axis=1, keepdims=True)                 # [1, 1]
    best = jnp.min(jnp.where(terminal == best_score, lane_tag_f, big),
                   axis=1, keepdims=True).astype(jnp.int32)               # [1, 1] int32 final tag

    lane_step = lax.broadcasted_iota(jnp.int32, (1, steps), 1)
    path0 = jnp.where(lane_step == steps - 1, best, 0)                    # [1, steps] int32

    def backtrace(k, carry):
        best_i, path = carry
        t = steps - 1 - k
        row = bptr_scr[pl.ds(t, 1), :].astype(jnp.float32)                # [1, n_tag]
        sel = lane_tag == best_i                                          # integer index compare
        best_i = jnp.sum(jnp.where(sel, row, 0.0),
                         axis=1, keepdims=True).astype(jnp.int32)         # backpointers[t][best]
        path = jnp.where(lane_step == t - 1, best_i, path)
        return best_i, path

    _, path = lax.fori_loop(0, steps - 1, backtrace, (best, path0), unroll=True)
    # (backpointers[0][path[0]] is the START tag; torch asserts and discards it.)

    score_ref[...] = best_score
    path_ref[...] = path


# ----------------------------------------------------------------------------
# Wrapper: full forward pass (end-to-end jittable, single pallas_call)
# ----------------------------------------------------------------------------
@functools.partial(jax.jit, static_argnames=("start_ix", "stop_ix", "hidden_dim"))
def elmo_ncrf_forward(params, elmo_sent, elmo_ings, indices, *, start_ix, stop_ix, hidden_dim):
    S = elmo_sent.shape[0]
    steps = indices.shape[0] - 1
    h2 = hidden_dim // 2
    hpad = params["lstm_sent"]["whh"].shape[0]
    gw = 4 * hpad
    n_tag = params["transitions"].shape[0]

    # Big input-projection operands in bf16 (f32 MXU accumulation in-kernel).
    sent_bf = elmo_sent.astype(jnp.bfloat16)
    ing0_bf = elmo_ings[0:1, :].astype(jnp.bfloat16)   # only ingredient 0 is ever consumed
    s_wih_bf = params["lstm_sent"]["wih"].astype(jnp.bfloat16)
    attn_w_bf = params["bi_attention"]["w_t"].astype(jnp.bfloat16)

    kern = functools.partial(_fused_forward_kernel,
                             start_ix=start_ix, stop_ix=stop_ix, h2=h2, hpad=hpad)
    score, path = pl.pallas_call(
        kern,
        out_shape=(jax.ShapeDtypeStruct((1, 1), jnp.float32),
                   jax.ShapeDtypeStruct((1, steps), jnp.int32)),
        in_specs=[SMEM_SPEC] + [VMEM_SPEC] * 15,
        out_specs=(VMEM_SPEC, VMEM_SPEC),
        scratch_shapes=[
            pltpu.VMEM((S, gw), jnp.float32),        # sentence LSTM gx
            pltpu.VMEM((S, hpad), jnp.float32),      # sentence LSTM fwd hidden trace
            pltpu.VMEM((S, hpad), jnp.float32),      # sentence LSTM rev hidden trace
            pltpu.VMEM((steps, gw), jnp.float32),    # entity LSTM gx
            pltpu.VMEM((steps, hpad), jnp.float32),  # entity LSTM fwd hidden trace
            pltpu.VMEM((steps, hpad), jnp.float32),  # entity LSTM rev hidden trace
            pltpu.VMEM((steps, n_tag), jnp.float32), # hid2tag features (CRF emissions)
            pltpu.VMEM((steps, n_tag), jnp.int32),   # Viterbi backpointers
        ],
        compiler_params=pltpu.CompilerParams(vmem_limit_bytes=32 * 1024 * 1024),
    )(indices.astype(jnp.int32), sent_bf, ing0_bf,
      s_wih_bf, params["lstm_sent"]["whh"], params["lstm_sent"]["b"], params["hc0_sent"],
      attn_w_bf, params["bi_attention"]["b"],
      params["lstm_entity"]["wih"], params["lstm_entity"]["whh"], params["lstm_entity"]["b"],
      params["hc0_ent"],
      params["hid2tag"]["w_t"], params["hid2tag"]["b"],
      params["transitions"])
    return score[0, 0], path[0]


# ----------------------------------------------------------------------------
# Parameter packing (torch layouts -> padded fused-kernel layouts) + deterministic init
# ----------------------------------------------------------------------------
def pack_bidir_lstm(w_ih_f, w_hh_f, b_f, w_ih_r, w_hh_r, b_r, in_pad=None):
    """torch per-direction LSTM weights -> padded gate-major / direction-minor layout.

    w_ih_d: [4*h2, din], w_hh_d: [4*h2, h2], b_d: [4*h2] (= b_ih + b_hh).
    Gate stride hpad = round_up(2*h2, 128).  For gate g in (i,f,g,o), lanes
    [g*hpad, g*hpad+h2) are the forward direction, [g*hpad+h2, g*hpad+2*h2) the reverse,
    remaining lanes are zero pad (so the padded hidden/cell state stays exactly zero).
    """
    h2 = w_hh_f.shape[1]
    din = w_ih_f.shape[1]
    hpad = _round_up(2 * h2, 128)
    gw = 4 * hpad
    din_p = din if in_pad is None else in_pad

    wih = jnp.zeros((din_p, gw), jnp.float32)
    whh = jnp.zeros((hpad, gw), jnp.float32)
    b = jnp.zeros((1, gw), jnp.float32)
    for g in range(4):
        c0 = g * hpad
        wih = wih.at[:din, c0:c0 + h2].set(jnp.transpose(w_ih_f[g * h2:(g + 1) * h2, :]))
        wih = wih.at[:din, c0 + h2:c0 + 2 * h2].set(jnp.transpose(w_ih_r[g * h2:(g + 1) * h2, :]))
        whh = whh.at[:h2, c0:c0 + h2].set(jnp.transpose(w_hh_f[g * h2:(g + 1) * h2, :]))
        whh = whh.at[h2:2 * h2, c0 + h2:c0 + 2 * h2].set(
            jnp.transpose(w_hh_r[g * h2:(g + 1) * h2, :]))
        b = b.at[0, c0:c0 + h2].set(b_f[g * h2:(g + 1) * h2])
        b = b.at[0, c0 + h2:c0 + 2 * h2].set(b_r[g * h2:(g + 1) * h2])
    return dict(wih=wih, whh=whh, b=b)


def _pack_hc0(h0, c0, hpad):
    """torch (direction, h2) init states -> [2, hpad] rows [h | c] as [fwd | rev | 0-pad]."""
    h2 = h0.shape[1]
    out = jnp.zeros((2, hpad), jnp.float32)
    out = out.at[0, :h2].set(h0[0]).at[0, h2:2 * h2].set(h0[1])
    out = out.at[1, :h2].set(c0[0]).at[1, h2:2 * h2].set(c0[1])
    return out


def init_params(key, hidden_dim, tag_to_ix, elmo_dim=1024):
    h, h2, n_tag = hidden_dim, hidden_dim // 2, len(tag_to_ix)
    hpad = _round_up(2 * h2, 128)
    ks = list(random.split(key, 8))

    def linear_t(k, fan_in, fan_out):
        kw, kb = random.split(k)
        bound = 1.0 / float(np.sqrt(fan_in))
        return (random.uniform(kw, (fan_in, fan_out), jnp.float32, -bound, bound),
                random.uniform(kb, (fan_out,), jnp.float32, -bound, bound))

    def lstm_dir(k, din, hid):
        k1, k2, k3, k4 = random.split(k, 4)
        bound = 1.0 / float(np.sqrt(hid))
        w_ih = random.uniform(k1, (4 * hid, din), jnp.float32, -bound, bound)
        w_hh = random.uniform(k2, (4 * hid, hid), jnp.float32, -bound, bound)
        b = (random.uniform(k3, (4 * hid,), jnp.float32, -bound, bound)
             + random.uniform(k4, (4 * hid,), jnp.float32, -bound, bound))
        return w_ih, w_hh, b

    def bilstm(k, din, hid, in_pad=None):
        kf, kr = random.split(k)
        return pack_bidir_lstm(*lstm_dir(kf, din, hid), *lstm_dir(kr, din, hid), in_pad=in_pad)

    attn_w, attn_b = linear_t(ks[3], elmo_dim, h)
    attn_w_p = jnp.zeros((elmo_dim, hpad), jnp.float32).at[:, :h].set(attn_w)
    attn_b_p = jnp.zeros((1, hpad), jnp.float32).at[0, :h].set(attn_b)

    h2t_w, h2t_b = linear_t(ks[4], h, n_tag)
    h2t_w_p = jnp.zeros((hpad, n_tag), jnp.float32).at[:h, :].set(h2t_w)

    transitions = random.normal(ks[0], (n_tag, n_tag), jnp.float32)
    transitions = transitions.at[tag_to_ix[START_TAG], :].set(-10000.0)
    transitions = transitions.at[:, tag_to_ix[STOP_TAG]].set(-10000.0)

    def hc(k):   # torch init_hidden(): fresh randn per call; fixed deterministic draws here
        kh, kc = random.split(k)
        return _pack_hc0(random.normal(kh, (2, h2), jnp.float32),
                         random.normal(kc, (2, h2), jnp.float32), hpad)

    return dict(
        lstm_sent=bilstm(ks[1], elmo_dim, h2),
        lstm_entity=bilstm(ks[2], h, h2, in_pad=hpad),   # entity LSTM input is padded to hpad
        bi_attention=dict(w_t=attn_w_p, b=attn_b_p),
        hid2tag=dict(w_t=h2t_w_p, b=h2t_b.reshape(1, n_tag)),
        # ing_sent / ing_red exist in the torch __init__ but never affect forward() output.
        transitions=transitions,
        hc0_sent=hc(ks[5]),
        hc0_ent=hc(ks[6]),
    )


if __name__ == "__main__":
    key = random.PRNGKey(0)
    hidden_dim = 32
    tag_to_ix = {"O": 0, "B": 1, "I": 2, START_TAG: 3, STOP_TAG: 4}

    seq_len = 16          # sentence length (ELMo tokens)
    n_ing = 4             # number of ingredients
    # 3 recipe steps; segments are lstm_out[idx[s]+1 : idx[s+1]+1]; idx[-1]+1 == seq_len
    indices = jnp.array([-1, 4, 9, 15], dtype=jnp.int32)

    k_par, k_sent, k_ing = random.split(key, 3)
    params = init_params(k_par, hidden_dim, tag_to_ix)

    # TODO(synk): the AllenNLP ELMo embedder (pretrained char-CNN + 2x biLSTM, downloaded
    # weights) has no in-script Pallas equivalent; substitute deterministic synthetic
    # 1024-d embeddings for the sentence tokens and the (token-averaged) ingredients.
    elmo_sent = random.normal(k_sent, (seq_len, 1024), jnp.float32)
    elmo_ings = random.normal(k_ing, (n_ing, 1024), jnp.float32)

    score, tag_seq = elmo_ncrf_forward(
        params, elmo_sent, elmo_ings, indices,
        start_ix=tag_to_ix[START_TAG], stop_ix=tag_to_ix[STOP_TAG], hidden_dim=hidden_dim)
    jax.block_until_ready(score)
    jax.block_until_ready(tag_seq)
    assert tag_seq.shape[0] == indices.shape[0] - 1
    print("KERNEL_OK")
</pallas_src>

<mosaic_0001>
module attributes {stable_mosaic.version = 11 : i64} {
  func.func @_fused_forward_kernel(%arg0: memref<4xi32, #tpu.memory_space<smem>>, %arg1: memref<16x1024xbf16, #tpu.memory_space<vmem>>, %arg2: memref<1x1024xbf16, #tpu.memory_space<vmem>>, %arg3: memref<1024x512xbf16, #tpu.memory_space<vmem>>, %arg4: memref<128x512xf32, #tpu.memory_space<vmem>>, %arg5: memref<1x512xf32, #tpu.memory_space<vmem>>, %arg6: memref<2x128xf32, #tpu.memory_space<vmem>>, %arg7: memref<1024x128xbf16, #tpu.memory_space<vmem>>, %arg8: memref<1x128xf32, #tpu.memory_space<vmem>>, %arg9: memref<128x512xf32, #tpu.memory_space<vmem>>, %arg10: memref<128x512xf32, #tpu.memory_space<vmem>>, %arg11: memref<1x512xf32, #tpu.memory_space<vmem>>, %arg12: memref<2x128xf32, #tpu.memory_space<vmem>>, %arg13: memref<128x5xf32, #tpu.memory_space<vmem>>, %arg14: memref<1x5xf32, #tpu.memory_space<vmem>>, %arg15: memref<5x5xf32, #tpu.memory_space<vmem>>, %arg16: memref<1x1xf32, #tpu.memory_space<vmem>>, %arg17: memref<1x3xi32, #tpu.memory_space<vmem>>, %arg18: memref<16x512xf32, #tpu.memory_space<vmem>>, %arg19: memref<16x128xf32, #tpu.memory_space<vmem>>, %arg20: memref<16x128xf32, #tpu.memory_space<vmem>>, %arg21: memref<3x512xf32, #tpu.memory_space<vmem>>, %arg22: memref<3x128xf32, #tpu.memory_space<vmem>>, %arg23: memref<3x128xf32, #tpu.memory_space<vmem>>, %arg24: memref<3x5xf32, #tpu.memory_space<vmem>>, %arg25: memref<3x5xi32, #tpu.memory_space<vmem>>) attributes {dimension_semantics = [], scalar_prefetch = 0 : i64, scratch_operands = 8 : i64, tpu.core_type = #tpu.core_type<tc>} {
    %c0 = arith.constant 0 : index
    %c0_0 = arith.constant 0 : index
    %0 = vector.load %arg1[%c0, %c0_0] : memref<16x1024xbf16, #tpu.memory_space<vmem>>, vector<16x1024xbf16>
    %c0_1 = arith.constant 0 : index
    %c0_2 = arith.constant 0 : index
    %1 = vector.load %arg3[%c0_1, %c0_2] : memref<1024x512xbf16, #tpu.memory_space<vmem>>, vector<1024x512xbf16>
    %c0_3 = arith.constant 0 : index
    %c0_4 = arith.constant 0 : index
    %2 = vector.load %arg5[%c0_3, %c0_4] : memref<1x512xf32, #tpu.memory_space<vmem>>, vector<1x512xf32>
    %c0_5 = arith.constant 0 : index
    %c0_6 = arith.constant 0 : index
    %3 = vector.load %arg4[%c0_5, %c0_6] : memref<128x512xf32, #tpu.memory_space<vmem>>, vector<128x512xf32>
    %c0_7 = arith.constant 0 : index
    %c0_8 = arith.constant 0 : index
    %4 = vector.load %arg6[%c0_7, %c0_8] : memref<2x128xf32, #tpu.memory_space<vmem>>, vector<1x128xf32>
    %c1 = arith.constant 1 : index
    %c0_9 = arith.constant 0 : index
    %5 = vector.load %arg6[%c1, %c0_9] : memref<2x128xf32, #tpu.memory_space<vmem>>, vector<1x128xf32>
    %cst = arith.constant dense<0.000000e+00> : vector<16x512xf32>
    %6 = tpu.matmul %0, %1, %cst {dimension_numbers = #tpu.dot_dimension_numbers<[1], [0], [0], [1], [0, 0, 1, 1], [], []>} : vector<16x1024xbf16>, vector<1024x512xbf16>, vector<16x512xf32> -> vector<16x512xf32>
    %7 = vector.broadcast %2 : vector<1x512xf32> to vector<16x512xf32>
    %8 = arith.addf %6, %7 : vector<16x512xf32>
    %c0_10 = arith.constant 0 : index
    %c0_11 = arith.constant 0 : index
    %9 = vector.load %arg18[%c0_10, %c0_11] : memref<16x512xf32, #tpu.memory_space<vmem>>, vector<16x512xf32>
    tpu.vector_store %arg18[%c0_10, %c0_11], %8 {strides = array<i32>} : memref<16x512xf32, #tpu.memory_space<vmem>>, vector<16x512xf32>,
    %10 = tpu.iota {dimensions = array<i32: 1>} : vector<1x512xi32>
    %c16_i32 = arith.constant 16 : i32
    %11 = vector.broadcast %c16_i32 : i32 to vector<1x512xi32>
    %12 = arith.cmpi sge, %10, %11 : vector<1x512xi32>
    %c32_i32 = arith.constant 32 : i32
    %13 = vector.broadcast %c32_i32 : i32 to vector<1x512xi32>
    %14 = arith.cmpi slt, %10, %13 : vector<1x512xi32>
    %15 = arith.andi %12, %14 : vector<1x512xi1>
    %c144_i32 = arith.constant 144 : i32
    %16 = vector.broadcast %c144_i32 : i32 to vector<1x512xi32>
    %17 = arith.cmpi sge, %10, %16 : vector<1x512xi32>
    %c160_i32 = arith.constant 160 : i32
    %18 = vector.broadcast %c160_i32 : i32 to vector<1x512xi32>
    %19 = arith.cmpi slt, %10, %18 : vector<1x512xi32>
    %20 = arith.andi %17, %19 : vector<1x512xi1>
    %c272_i32 = arith.constant 272 : i32
    %21 = vector.broadcast %c272_i32 : i32 to vector<1x512xi32>
    %22 = arith.cmpi sge, %10, %21 : vector<1x512xi32>
    %c288_i32 = arith.constant 288 : i32
    %23 = vector.broadcast %c288_i32 : i32 to vector<1x512xi32>
    %24 = arith.cmpi slt, %10, %23 : vector<1x512xi32>
    %25 = arith.andi %22, %24 : vector<1x512xi1>
    %c400_i32 = arith.constant 400 : i32
    %26 = vector.broadcast %c400_i32 : i32 to vector<1x512xi32>
    %27 = arith.cmpi sge, %10, %26 : vector<1x512xi32>
    %c416_i32 = arith.constant 416 : i32
    %28 = vector.broadcast %c416_i32 : i32 to vector<1x512xi32>
    %29 = arith.cmpi slt, %10, %28 : vector<1x512xi32>
    %30 = arith.andi %27, %29 : vector<1x512xi1>
    %31 = arith.ori %15, %20 : vector<1x512xi1>
    %32 = arith.ori %31, %25 : vector<1x512xi1>
    %33 = arith.ori %32, %30 : vector<1x512xi1>
    %c0_i32 = arith.constant 0 : i32
    %34 = arith.index_cast %c0_i32 : i32 to index
    %c0_12 = arith.constant 0 : index
    %35 = vector.load %arg18[%34, %c0_12] : memref<16x512xf32, #tpu.memory_space<vmem>>, vector<1x512xf32>
    %c15_i32 = arith.constant 15 : i32
    %36 = arith.subi %c15_i32, %c0_i32 : i32
    %37 = arith.index_cast %36 : i32 to index
    %c0_13 = arith.constant 0 : index
    %38 = vector.load %arg18[%37, %c0_13] : memref<16x512xf32, #tpu.memory_space<vmem>>, vector<1x512xf32>
    %39 = arith.select %33, %38, %35 : vector<1x512xi1>, vector<1x512xf32>
    %cst_14 = arith.constant dense<0.000000e+00> : vector<1x512xf32>
    %40 = tpu.matmul %4, %3, %cst_14 {dimension_numbers = #tpu.dot_dimension_numbers<[1], [0], [0], [1], [0, 0, 1, 1], [], []>} : vector<1x128xf32>, vector<128x512xf32>, vector<1x512xf32> -> vector<1x512xf32>
    %41 = arith.addf %39, %40 : vector<1x512xf32>
    %42 = vector.extract_strided_slice %41 {offsets = [0, 0], sizes = [1, 128], strides = [1, 1]} : vector<1x512xf32> to vector<1x128xf32>
    %cst_15 = arith.constant 5.000000e-01 : f32
    %43 = vector.broadcast %cst_15 : f32 to vector<1x128xf32>
    %44 = arith.mulf %43, %42 : vector<1x128xf32>
    %45 = math.tanh %44 : vector<1x128xf32>
    %cst_16 = arith.constant 5.000000e-01 : f32
    %46 = vector.broadcast %cst_16 : f32 to vector<1x128xf32>
    %47 = arith.mulf %46, %45 : vector<1x128xf32>
    %cst_17 = arith.constant 5.000000e-01 : f32
    %48 = vector.broadcast %cst_17 : f32 to vector<1x128xf32>
    %49 = arith.addf %47, %48 : vector<1x128xf32>
    %50 = vector.extract_strided_slice %41 {offsets = [0, 128], sizes = [1, 128], strides = [1, 1]} : vector<1x512xf32> to vector<1x128xf32>
    %cst_18 = arith.constant 5.000000e-01 : f32
    %51 = vector.broadcast %cst_18 : f32 to vector<1x128xf32>
    %52 = arith.mulf %51, %50 : vector<1x128xf32>
    %53 = math.tanh %52 : vector<1x128xf32>
    %cst_19 = arith.constant 5.000000e-01 : f32
    %54 = vector.broadcast %cst_19 : f32 to vector<1x128xf32>
    %55 = arith.mulf %54, %53 : vector<1x128xf32>
    %cst_20 = arith.constant 5.000000e-01 : f32
    %56 = vector.broadcast %cst_20 : f32 to vector<1x128xf32>
    %57 = arith.addf %55, %56 : vector<1x128xf32>
    %58 = vector.extract_strided_slice %41 {offsets = [0, 256], sizes = [1, 128], strides = [1, 1]} : vector<1x512xf32> to vector<1x128xf32>
    %59 = math.tanh %58 : vector<1x128xf32>
    %60 = vector.extract_strided_slice %41 {offsets = [0, 384], sizes = [1, 128], strides = [1, 1]} : vector<1x512xf32> to vector<1x128xf32>
    %cst_21 = arith.constant 5.000000e-01 : f32
    %61 = vector.broadcast %cst_21 : f32 to vector<1x128xf32>
    %62 = arith.mulf %61, %60 : vector<1x128xf32>
    %63 = math.tanh %62 : vector<1x128xf32>
    %cst_22 = arith.constant 5.000000e-01 : f32
    %64 = vector.broadcast %cst_22 : f32 to vector<1x128xf32>
    %65 = arith.mulf %64, %63 : vector<1x128xf32>
    %cst_23 = arith.constant 5.000000e-01 : f32
    %66 = vector.broadcast %cst_23 : f32 to vector<1x128xf32>
    %67 = arith.addf %65, %66 : vector<1x128xf32>
    %68 = arith.mulf %57, %5 : vector<1x128xf32>
    %69 = arith.mulf %49, %59 : vector<1x128xf32>
    %70 = arith.addf %68, %69 : vector<1x128xf32>
    %71 = math.tanh %70 : vector<1x128xf32>
    %72 = arith.mulf %67, %71 : vector<1x128xf32>
    %73 = arith.index_cast %c0_i32 : i32 to index
    %c0_24 = arith.constant 0 : index
    %74 = vector.load %arg19[%73, %c0_24] : memref<16x128xf32, #tpu.memory_space<vmem>>, vector<1x128xf32>
    tpu.vector_store %arg19[%73, %c0_24], %72 {strides = array<i32>} : memref<16x128xf32, #tpu.memory_space<vmem>>, vector<1x128xf32>,
    %c15_i32_25 = arith.constant 15 : i32
    %75 = arith.subi %c15_i32_25, %c0_i32 : i32
    %76 = arith.index_cast %75 : i32 to index
    %c0_26 = arith.constant 0 : index
    %77 = vector.load %arg20[%76, %c0_26] : memref<16x128xf32, #tpu.memory_space<vmem>>, vector<1x128xf32>
    tpu.vector_store %arg20[%76, %c0_26], %72 {strides = array<i32>} : memref<16x128xf32, #tpu.memory_space<vmem>>, vector<1x128xf32>,
    %c1_i32 = arith.constant 1 : i32
    %78 = arith.index_cast %c1_i32 : i32 to index
    %c0_27 = arith.constant 0 : index
    %79 = vector.load %arg18[%78, %c0_27] : memref<16x512xf32, #tpu.memory_space<vmem>>, vector<1x512xf32>
    %c15_i32_28 = arith.constant 15 : i32
    %80 = arith.subi %c15_i32_28, %c1_i32 : i32
    %81 = arith.index_cast %80 : i32 to index
    %c0_29 = arith.constant 0 : index
    %82 = vector.load %arg18[%81, %c0_29] : memref<16x512xf32, #tpu.memory_space<vmem>>, vector<1x512xf32>
    %83 = arith.select %33, %82, %79 : vector<1x512xi1>, vector<1x512xf32>
    %cst_30 = arith.constant dense<0.000000e+00> : vector<1x512xf32>
    %84 = tpu.matmul %72, %3, %cst_30 {dimension_numbers = #tpu.dot_dimension_numbers<[1], [0], [0], [1], [0, 0, 1, 1], [], []>} : vector<1x128xf32>, vector<128x512xf32>, vector<1x512xf32> -> vector<1x512xf32>
    %85 = arith.addf %83, %84 : vector<1x512xf32>
    %86 = vector.extract_strided_slice %85 {offsets = [0, 0], sizes = [1, 128], strides = [1, 1]} : vector<1x512xf32> to vector<1x128xf32>
    %cst_31 = arith.constant 5.000000e-01 : f32
    %87 = vector.broadcast %cst_31 : f32 to vector<1x128xf32>
    %88 = arith.mulf %87, %86 : vector<1x128xf32>
    %89 = math.tanh %88 : vector<1x128xf32>
    %cst_32 = arith.constant 5.000000e-01 : f32
    %90 = vector.broadcast %cst_32 : f32 to vector<1x128xf32>
    %91 = arith.mulf %90, %89 : vector<1x128xf32>
    %cst_33 = arith.constant 5.000000e-01 : f32
    %92 = vector.broadcast %cst_33 : f32 to vector<1x128xf32>
    %93 = arith.addf %91, %92 : vector<1x128xf32>
    %94 = vector.extract_strided_slice %85 {offsets = [0, 128], sizes = [1, 128], strides = [1, 1]} : vector<1x512xf32> to vector<1x128xf32>
    %cst_34 = arith.constant 5.000000e-01 : f32
    %95 = vector.broadcast %cst_34 : f32 to vector<1x128xf32>
    %96 = arith.mulf %95, %94 : vector<1x128xf32>
    %97 = math.tanh %96 : vector<1x128xf32>
    %cst_35 = arith.constant 5.000000e-01 : f32
    %98 = vector.broadcast %cst_35 : f32 to vector<1x128xf32>
    %99 = arith.mulf %98, %97 : vector<1x128xf32>
    %cst_36 = arith.constant 5.000000e-01 : f32
    %100 = vector.broadcast %cst_36 : f32 to vector<1x128xf32>
    %101 = arith.addf %99, %100 : vector<1x128xf32>
    %102 = vector.extract_strided_slice %85 {offsets = [0, 256], sizes = [1, 128], strides = [1, 1]} : vector<1x512xf32> to vector<1x128xf32>
    %103 = math.tanh %102 : vector<1x128xf32>
    %104 = vector.extract_strided_slice %85 {offsets = [0, 384], sizes = [1, 128], strides = [1, 1]} : vector<1x512xf32> to vector<1x128xf32>
    %cst_37 = arith.constant 5.000000e-01 : f32
    %105 = vector.broadcast %cst_37 : f32 to vector<1x128xf32>
    %106 = arith.mulf %105, %104 : vector<1x128xf32>
    %107 = math.tanh %106 : vector<1x128xf32>
    %cst_38 = arith.constant 5.000000e-01 : f32
    %108 = vector.broadcast %cst_38 : f32 to vector<1x128xf32>
    %109 = arith.mulf %108, %107 : vector<1x128xf32>
    %cst_39 = arith.constant 5.000000e-01 : f32
    %110 = vector.broadcast %cst_39 : f32 to vector<1x128xf32>
    %111 = arith.addf %109, %110 : vector<1x128xf32>
    %112 = arith.mulf %101, %70 : vector<1x128xf32>
    %113 = arith.mulf %93, %103 : vector<1x128xf32>
    %114 = arith.addf %112, %113 : vector<1x128xf32>
    %115 = math.tanh %114 : vector<1x128xf32>
    %116 = arith.mulf %111, %115 : vector<1x128xf32>
    %117 = arith.index_cast %c1_i32 : i32 to index
    %c0_40 = arith.constant 0 : index
    %118 = vector.load %arg19[%117, %c0_40] : memref<16x128xf32, #tpu.memory_space<vmem>>, vector<1x128xf32>
    tpu.vector_store %arg19[%117, %c0_40], %116 {strides = array<i32>} : memref<16x128xf32, #tpu.memory_space<vmem>>, vector<1x128xf32>,
    %c15_i32_41 = arith.constant 15 : i32
    %119 = arith.subi %c15_i32_41, %c1_i32 : i32
    %120 = arith.index_cast %119 : i32 to index
    %c0_42 = arith.constant 0 : index
    %121 = vector.load %arg20[%120, %c0_42] : memref<16x128xf32, #tpu.memory_space<vmem>>, vector<1x128xf32>
    tpu.vector_store %arg20[%120, %c0_42], %116 {strides = array<i32>} : memref<16x128xf32, #tpu.memory_space<vmem>>, vector<1x128xf32>,
    %c2_i32 = arith.constant 2 : i32
    %122 = arith.index_cast %c2_i32 : i32 to index
    %c0_43 = arith.constant 0 : index
    %123 = vector.load %arg18[%122, %c0_43] : memref<16x512xf32, #tpu.memory_space<vmem>>, vector<1x512xf32>
    %c15_i32_44 = arith.constant 15 : i32
    %124 = arith.subi %c15_i32_44, %c2_i32 : i32
    %125 = arith.index_cast %124 : i32 to index
    %c0_45 = arith.constant 0 : index
    %126 = vector.load %arg18[%125, %c0_45] : memref<16x512xf32, #tpu.memory_space<vmem>>, vector<1x512xf32>
    %127 = arith.select %33, %126, %123 : vector<1x512xi1>, vector<1x512xf32>
    %cst_46 = arith.constant dense<0.000000e+00> : vector<1x512xf32>
    %128 = tpu.matmul %116, %3, %cst_46 {dimension_numbers = #tpu.dot_dimension_numbers<[1], [0], [0], [1], [0, 0, 1, 1], [], []>} : vector<1x128xf32>, vector<128x512xf32>, vector<1x512xf32> -> vector<1x512xf32>
    %129 = arith.addf %127, %128 : vector<1x512xf32>
    %130 = vector.extract_strided_slice %129 {offsets = [0, 0], sizes = [1, 128], strides = [1, 1]} : vector<1x512xf32> to vector<1x128xf32>
    %cst_47 = arith.constant 5.000000e-01 : f32
    %131 = vector.broadcast %cst_47 : f32 to vector<1x128xf32>
    %132 = arith.mulf %131, %130 : vector<1x128xf32>
    %133 = math.tanh %132 : vector<1x128xf32>
    %cst_48 = arith.constant 5.000000e-01 : f32
    %134 = vector.broadcast %cst_48 : f32 to vector<1x128xf32>
    %135 = arith.mulf %134, %133 : vector<1x128xf32>
    %cst_49 = arith.constant 5.000000e-01 : f32
    %136 = vector.broadcast %cst_49 : f32 to vector<1x128xf32>
    %137 = arith.addf %135, %136 : vector<1x128xf32>
    %138 = vector.extract_strided_slice %129 {offsets = [0, 128], sizes = [1, 128], strides = [1, 1]} : vector<1x512xf32> to vector<1x128xf32>
    %cst_50 = arith.constant 5.000000e-01 : f32
    %139 = vector.broadcast %cst_50 : f32 to vector<1x128xf32>
    %140 = arith.mulf %139, %138 : vector<1x128xf32>
    %141 = math.tanh %140 : vector<1x128xf32>
    %cst_51 = arith.constant 5.000000e-01 : f32
    %142 = vector.broadcast %cst_51 : f32 to vector<1x128xf32>
    %143 = arith.mulf %142, %141 : vector<1x128xf32>
    %cst_52 = arith.constant 5.000000e-01 : f32
    %144 = vector.broadcast %cst_52 : f32 to vector<1x128xf32>
    %145 = arith.addf %143, %144 : vector<1x128xf32>
    %146 = vector.extract_strided_slice %129 {offsets = [0, 256], sizes = [1, 128], strides = [1, 1]} : vector<1x512xf32> to vector<1x128xf32>
    %147 = math.tanh %146 : vector<1x128xf32>
    %148 = vector.extract_strided_slice %129 {offsets = [0, 384], sizes = [1, 128], strides = [1, 1]} : vector<1x512xf32> to vector<1x128xf32>
    %cst_53 = arith.constant 5.000000e-01 : f32
    %149 = vector.broadcast %cst_53 : f32 to vector<1x128xf32>
    %150 = arith.mulf %149, %148 : vector<1x128xf32>
    %151 = math.tanh %150 : vector<1x128xf32>
    %cst_54 = arith.constant 5.000000e-01 : f32
    %152 = vector.broadcast %cst_54 : f32 to vector<1x128xf32>
    %153 = arith.mulf %152, %151 : vector<1x128xf32>
    %cst_55 = arith.constant 5.000000e-01 : f32
    %154 = vector.broadcast %cst_55 : f32 to vector<1x128xf32>
    %155 = arith.addf %153, %154 : vector<1x128xf32>
    %156 = arith.mulf %145, %114 : vector<1x128xf32>
    %157 = arith.mulf %137, %147 : vector<1x128xf32>
    %158 = arith.addf %156, %157 : vector<1x128xf32>
    %159 = math.tanh %158 : vector<1x128xf32>
    %160 = arith.mulf %155, %159 : vector<1x128xf32>
    %161 = arith.index_cast %c2_i32 : i32 to index
    %c0_56 = arith.constant 0 : index
    %162 = vector.load %arg19[%161, %c0_56] : memref<16x128xf32, #tpu.memory_space<vmem>>, vector<1x128xf32>
    tpu.vector_store %arg19[%161, %c0_56], %160 {strides = array<i32>} : memref<16x128xf32, #tpu.memory_space<vmem>>, vector<1x128xf32>,
    %c15_i32_57 = arith.constant 15 : i32
    %163 = arith.subi %c15_i32_57, %c2_i32 : i32
    %164 = arith.index_cast %163 : i32 to index
    %c0_58 = arith.constant 0 : index
    %165 = vector.load %arg20[%164, %c0_58] : memref<16x128xf32, #tpu.memory_space<vmem>>, vector<1x128xf32>
    tpu.vector_store %arg20[%164, %c0_58], %160 {strides = array<i32>} : memref<16x128xf32, #tpu.memory_space<vmem>>, vector<1x128xf32>,
    %c3_i32 = arith.constant 3 : i32
    %166 = arith.index_cast %c3_i32 : i32 to index
    %c0_59 = arith.constant 0 : index
    %167 = vector.load %arg18[%166, %c0_59] : memref<16x512xf32, #tpu.memory_space<vmem>>, vector<1x512xf32>
    %c15_i32_60 = arith.constant 15 : i32
    %168 = arith.subi %c15_i32_60, %c3_i32 : i32
    %169 = arith.index_cast %168 : i32 to index
    %c0_61 = arith.constant 0 : index
    %170 = vector.load %arg18[%169, %c0_61] : memref<16x512xf32, #tpu.memory_space<vmem>>, vector<1x512xf32>
    %171 = arith.select %33, %170, %167 : vector<1x512xi1>, vector<1x512xf32>
    %cst_62 = arith.constant dense<0.000000e+00> : vector<1x512xf32>
    %172 = tpu.matmul %160, %3, %cst_62 {dimension_numbers = #tpu.dot_dimension_numbers<[1], [0], [0], [1], [0, 0, 1, 1], [], []>} : vector<1x128xf32>, vector<128x512xf32>, vector<1x512xf32> -> vector<1x512xf32>
    %173 = arith.addf %171, %172 : vector<1x512xf32>
    %174 = vector.extract_strided_slice %173 {offsets = [0, 0], sizes = [1, 128], strides = [1, 1]} : vector<1x512xf32> to vector<1x128xf32>
    %cst_63 = arith.constant 5.000000e-01 : f32
    %175 = vector.broadcast %cst_63 : f32 to vector<1x128xf32>
    %176 = arith.mulf %175, %174 : vector<1x128xf32>
    %177 = math.tanh %176 : vector<1x128xf32>
    %cst_64 = arith.constant 5.000000e-01 : f32
    %178 = vector.broadcast %cst_64 : f32 to vector<1x128xf32>
    %179 = arith.mulf %178, %177 : vector<1x128xf32>
    %cst_65 = arith.constant 5.000000e-01 : f32
    %180 = vector.broadcast %cst_65 : f32 to vector<1x128xf32>
    %181 = arith.addf %179, %180 : vector<1x128xf32>
    %182 = vector.extract_strided_slice %173 {offsets = [0, 128], sizes = [1, 128], strides = [1, 1]} : vector<1x512xf32> to vector<1x128xf32>
    %cst_66 = arith.constant 5.000000e-01 : f32
    %183 = vector.broadcast %cst_66 : f32 to vector<1x128xf32>
    %184 = arith.mulf %183, %182 : vector<1x128xf32>
    %185 = math.tanh %184 : vector<1x128xf32>
    %cst_67 = arith.constant 5.000000e-01 : f32
    %186 = vector.broadcast %cst_67 : f32 to vector<1x128xf32>
    %187 = arith.mulf %186, %185 : vector<1x128xf32>
    %cst_68 = arith.constant 5.000000e-01 : f32
    %188 = vector.broadcast %cst_68 : f32 to vector<1x128xf32>
    %189 = arith.addf %187, %188 : vector<1x128xf32>
    %190 = vector.extract_strided_slice %173 {offsets = [0, 256], sizes = [1, 128], strides = [1, 1]} : vector<1x512xf32> to vector<1x128xf32>
    %191 = math.tanh %190 : vector<1x128xf32>
    %192 = vector.extract_strided_slice %173 {offsets = [0, 384], sizes = [1, 128], strides = [1, 1]} : vector<1x512xf32> to vector<1x128xf32>
    %cst_69 = arith.constant 5.000000e-01 : f32
    %193 = vector.broadcast %cst_69 : f32 to vector<1x128xf32>
    %194 = arith.mulf %193, %192 : vector<1x128xf32>
    %195 = math.tanh %194 : vector<1x128xf32>
    %cst_70 = arith.constant 5.000000e-01 : f32
    %196 = vector.broadcast %cst_70 : f32 to vector<1x128xf32>
    %197 = arith.mulf %196, %195 : vector<1x128xf32>
    %cst_71 = arith.constant 5.000000e-01 : f32
    %198 = vector.broadcast %cst_71 : f32 to vector<1x128xf32>
    %199 = arith.addf %197, %198 : vector<1x128xf32>
    %200 = arith.mulf %189, %158 : vector<1x128xf32>
    %201 = arith.mulf %181, %191 : vector<1x128xf32>
    %202 = arith.addf %200, %201 : vector<1x128xf32>
    %203 = math.tanh %202 : vector<1x128xf32>
    %204 = arith.mulf %199, %203 : vector<1x128xf32>
    %205 = arith.index_cast %c3_i32 : i32 to index
    %c0_72 = arith.constant 0 : index
    %206 = vector.load %arg19[%205, %c0_72] : memref<16x128xf32, #tpu.memory_space<vmem>>, vector<1x128xf32>
    tpu.vector_store %arg19[%205, %c0_72], %204 {strides = array<i32>} : memref<16x128xf32, #tpu.memory_space<vmem>>, vector<1x128xf32>,
    %c15_i32_73 = arith.constant 15 : i32
    %207 = arith.subi %c15_i32_73, %c3_i32 : i32
    %208 = arith.index_cast %207 : i32 to index
    %c0_74 = arith.constant 0 : index
    %209 = vector.load %arg20[%208, %c0_74] : memref<16x128xf32, #tpu.memory_space<vmem>>, vector<1x128xf32>
    tpu.vector_store %arg20[%208, %c0_74], %204 {strides = array<i32>} : memref<16x128xf32, #tpu.memory_space<vmem>>, vector<1x128xf32>,
    %c4_i32 = arith.constant 4 : i32
    %210 = arith.index_cast %c4_i32 : i32 to index
    %c0_75 = arith.constant 0 : index
    %211 = vector.load %arg18[%210, %c0_75] : memref<16x512xf32, #tpu.memory_space<vmem>>, vector<1x512xf32>
    %c15_i32_76 = arith.constant 15 : i32
    %212 = arith.subi %c15_i32_76, %c4_i32 : i32
    %213 = arith.index_cast %212 : i32 to index
    %c0_77 = arith.constant 0 : index
    %214 = vector.load %arg18[%213, %c0_77] : memref<16x512xf32, #tpu.memory_space<vmem>>, vector<1x512xf32>
    %215 = arith.select %33, %214, %211 : vector<1x512xi1>, vector<1x512xf32>
    %cst_78 = arith.constant dense<0.000000e+00> : vector<1x512xf32>
    %216 = tpu.matmul %204, %3, %cst_78 {dimension_numbers = #tpu.dot_dimension_numbers<[1], [0], [0], [1], [0, 0, 1, 1], [], []>} : vector<1x128xf32>, vector<128x512xf32>, vector<1x512xf32> -> vector<1x512xf32>
    %217 = arith.addf %215, %216 : vector<1x512xf32>
    %218 = vector.extract_strided_slice %217 {offsets = [0, 0], sizes = [1, 128], strides = [1, 1]} : vector<1x512xf32> to vector<1x128xf32>
    %cst_79 = arith.constant 5.000000e-01 : f32
    %219 = vector.broadcast %cst_79 : f32 to vector<1x128xf32>
    %220 = arith.mulf %219, %218 : vector<1x128xf32>
    %221 = math.tanh %220 : vector<1x128xf32>
    %cst_80 = arith.constant 5.000000e-01 : f32
    %222 = vector.broadcast %cst_80 : f32 to vector<1x128xf32>
    %223 = arith.mulf %222, %221 : vector<1x128xf32>
    %cst_81 = arith.constant 5.000000e-01 : f32
    %224 = vector.broadcast %cst_81 : f32 to vector<1x128xf32>
    %225 = arith.addf %223, %224 : vector<1x128xf32>
    %226 = vector.extract_strided_slice %217 {offsets = [0, 128], sizes = [1, 128], strides = [1, 1]} : vector<1x512xf32> to vector<1x128xf32>
    %cst_82 = arith.constant 5.000000e-01 : f32
    %227 = vector.broadcast %cst_82 : f32 to vector<1x128xf32>
    %228 = arith.mulf %227, %226 : vector<1x128xf32>
    %229 = math.tanh %228 : vector<1x128xf32>
    %cst_83 = arith.constant 5.000000e-01 : f32
    %230 = vector.broadcast %cst_83 : f32 to vector<1x128xf32>
    %231 = arith.mulf %230, %229 : vector<1x128xf32>
    %cst_84 = arith.constant 5.000000e-01 : f32
    %232 = vector.broadcast %cst_84 : f32 to vector<1x128xf32>
    %233 = arith.addf %231, %232 : vector<1x128xf32>
    %234 = vector.extract_strided_slice %217 {offsets = [0, 256], sizes = [1, 128], strides = [1, 1]} : vector<1x512xf32> to vector<1x128xf32>
    %235 = math.tanh %234 : vector<1x128xf32>
    %236 = vector.extract_strided_slice %217 {offsets = [0, 384], sizes = [1, 128], strides = [1, 1]} : vector<1x512xf32> to vector<1x128xf32>
    %cst_85 = arith.constant 5.000000e-01 : f32
    %237 = vector.broadcast %cst_85 : f32 to vector<1x128xf32>
    %238 = arith.mulf %237, %236 : vector<1x128xf32>
    %239 = math.tanh %238 : vector<1x128xf32>
    %cst_86 = arith.constant 5.000000e-01 : f32
    %240 = vector.broadcast %cst_86 : f32 to vector<1x128xf32>
    %241 = arith.mulf %240, %239 : vector<1x128xf32>
    %cst_87 = arith.constant 5.000000e-01 : f32
    %242 = vector.broadcast %cst_87 : f32 to vector<1x128xf32>
    %243 = arith.addf %241, %242 : vector<1x128xf32>
    %244 = arith.mulf %233, %202 : vector<1x128xf32>
    %245 = arith.mulf %225, %235 : vector<1x128xf32>
    %246 = arith.addf %244, %245 : vector<1x128xf32>
    %247 = math.tanh %246 : vector<1x128xf32>
    %248 = arith.mulf %243, %247 : vector<1x128xf32>
    %249 = arith.index_cast %c4_i32 : i32 to index
    %c0_88 = arith.constant 0 : index
    %250 = vector.load %arg19[%249, %c0_88] : memref<16x128xf32, #tpu.memory_space<vmem>>, vector<1x128xf32>
    tpu.vector_store %arg19[%249, %c0_88], %248 {strides = array<i32>} : memref<16x128xf32, #tpu.memory_space<vmem>>, vector<1x128xf32>,
    %c15_i32_89 = arith.constant 15 : i32
    %251 = arith.subi %c15_i32_89, %c4_i32 : i32
    %252 = arith.index_cast %251 : i32 to index
    %c0_90 = arith.constant 0 : index
    %253 = vector.load %arg20[%252, %c0_90] : memref<16x128xf32, #tpu.memory_space<vmem>>, vector<1x128xf32>
    tpu.vector_store %arg20[%252, %c0_90], %248 {strides = array<i32>} : memref<16x128xf32, #tpu.memory_space<vmem>>, vector<1x128xf32>,
    %c5_i32 = arith.constant 5 : i32
    %254 = arith.index_cast %c5_i32 : i32 to index
    %c0_91 = arith.constant 0 : index
    %255 = vector.load %arg18[%254, %c0_91] : memref<16x512xf32, #tpu.memory_space<vmem>>, vector<1x512xf32>
    %c15_i32_92 = arith.constant 15 : i32
    %256 = arith.subi %c15_i32_92, %c5_i32 : i32
    %257 = arith.index_cast %256 : i32 to index
    %c0_93 = arith.constant 0 : index
    %258 = vector.load %arg18[%257, %c0_93] : memref<16x512xf32, #tpu.memory_space<vmem>>, vector<1x512xf32>
    %259 = arith.select %33, %258, %255 : vector<1x512xi1>, vector<1x512xf32>
    %cst_94 = arith.constant dense<0.000000e+00> : vector<1x512xf32>
    %260 = tpu.matmul %248, %3, %cst_94 {dimension_numbers = #tpu.dot_dimension_numbers<[1], [0], [0], [1], [0, 0, 1, 1], [], []>} : vector<1x128xf32>, vector<128x512xf32>, vector<1x512xf32> -> vector<1x512xf32>
    %261 = arith.addf %259, %260 : vector<1x512xf32>
    %262 = vector.extract_strided_slice %261 {offsets = [0, 0], sizes = [1, 128], strides = [1, 1]} : vector<1x512xf32> to vector<1x128xf32>
    %cst_95 = arith.constant 5.000000e-01 : f32
    %263 = vector.broadcast %cst_95 : f32 to vector<1x128xf32>
    %264 = arith.mulf %263, %262 : vector<1x128xf32>
    %265 = math.tanh %264 : vector<1x128xf32>
    %cst_96 = arith.constant 5.000000e-01 : f32
    %266 = vector.broadcast %cst_96 : f32 to vector<1x128xf32>
    %267 = arith.mulf %266, %265 : vector<1x128xf32>
    %cst_97 = arith.constant 5.000000e-01 : f32
    %268 = vector.broadcast %cst_97 : f32 to vector<1x128xf32>
    %269 = arith.addf %267, %268 : vector<1x128xf32>
    %270 = vector.extract_strided_slice %261 {offsets = [0, 128], sizes = [1, 128], strides = [1, 1]} : vector<1x512xf32> to vector<1x128xf32>
    %cst_98 = arith.constant 5.000000e-01 : f32
    %271 = vector.broadcast %cst_98 : f32 to vector<1x128xf32>
    %272 = arith.mulf %271, %270 : vector<1x128xf32>
    %273 = math.tanh %272 : vector<1x128xf32>
    %cst_99 = arith.constant 5.000000e-01 : f32
    %274 = vector.broadcast %cst_99 : f32 to vector<1x128xf32>
    %275 = arith.mulf %274, %273 : vector<1x128xf32>
    %cst_100 = arith.constant 5.000000e-01 : f32
    %276 = vector.broadcast %cst_100 : f32 to vector<1x128xf32>
    %277 = arith.addf %275, %276 : vector<1x128xf32>
    %278 = vector.extract_strided_slice %261 {offsets = [0, 256], sizes = [1, 128], strides = [1, 1]} : vector<1x512xf32> to vector<1x128xf32>
    %279 = math.tanh %278 : vector<1x128xf32>
    %280 = vector.extract_strided_slice %261 {offsets = [0, 384], sizes = [1, 128], strides = [1, 1]} : vector<1x512xf32> to vector<1x128xf32>
    %cst_101 = arith.constant 5.000000e-01 : f32
    %281 = vector.broadcast %cst_101 : f32 to vector<1x128xf32>
    %282 = arith.mulf %281, %280 : vector<1x128xf32>
    %283 = math.tanh %282 : vector<1x128xf32>
    %cst_102 = arith.constant 5.000000e-01 : f32
    %284 = vector.broadcast %cst_102 : f32 to vector<1x128xf32>
    %285 = arith.mulf %284, %283 : vector<1x128xf32>
    %cst_103 = arith.constant 5.000000e-01 : f32
    %286 = vector.broadcast %cst_103 : f32 to vector<1x128xf32>
    %287 = arith.addf %285, %286 : vector<1x128xf32>
    %288 = arith.mulf %277, %246 : vector<1x128xf32>
    %289 = arith.mulf %269, %279 : vector<1x128xf32>
    %290 = arith.addf %288, %289 : vector<1x128xf32>
    %291 = math.tanh %290 : vector<1x128xf32>
    %292 = arith.mulf %287, %291 : vector<1x128xf32>
    %293 = arith.index_cast %c5_i32 : i32 to index
    %c0_104 = arith.constant 0 : index
    %294 = vector.load %arg19[%293, %c0_104] : memref<16x128xf32, #tpu.memory_space<vmem>>, vector<1x128xf32>
    tpu.vector_store %arg19[%293, %c0_104], %292 {strides = array<i32>} : memref<16x128xf32, #tpu.memory_space<vmem>>, vector<1x128xf32>,
    %c15_i32_105 = arith.constant 15 : i32
    %295 = arith.subi %c15_i32_105, %c5_i32 : i32
    %296 = arith.index_cast %295 : i32 to index
    %c0_106 = arith.constant 0 : index
    %297 = vector.load %arg20[%296, %c0_106] : memref<16x128xf32, #tpu.memory_space<vmem>>, vector<1x128xf32>
    tpu.vector_store %arg20[%296, %c0_106], %292 {strides = array<i32>} : memref<16x128xf32, #tpu.memory_space<vmem>>, vector<1x128xf32>,
    %c6_i32 = arith.constant 6 : i32
    %298 = arith.index_cast %c6_i32 : i32 to index
    %c0_107 = arith.constant 0 : index
    %299 = vector.load %arg18[%298, %c0_107] : memref<16x512xf32, #tpu.memory_space<vmem>>, vector<1x512xf32>
    %c15_i32_108 = arith.constant 15 : i32
    %300 = arith.subi %c15_i32_108, %c6_i32 : i32
    %301 = arith.index_cast %300 : i32 to index
    %c0_109 = arith.constant 0 : index
    %302 = vector.load %arg18[%301, %c0_109] : memref<16x512xf32, #tpu.memory_space<vmem>>, vector<1x512xf32>
    %303 = arith.select %33, %302, %299 : vector<1x512xi1>, vector<1x512xf32>
    %cst_110 = arith.constant dense<0.000000e+00> : vector<1x512xf32>
    %304 = tpu.matmul %292, %3, %cst_110 {dimension_numbers = #tpu.dot_dimension_numbers<[1], [0], [0], [1], [0, 0, 1, 1], [], []>} : vector<1x128xf32>, vector<128x512xf32>, vector<1x512xf32> -> vector<1x512xf32>
    %305 = arith.addf %303, %304 : vector<1x512xf32>
    %306 = vector.extract_strided_slice %305 {offsets = [0, 0], sizes = [1, 128], strides = [1, 1]} : vector<1x512xf32> to vector<1x128xf32>
    %cst_111 = arith.constant 5.000000e-01 : f32
    %307 = vector.broadcast %cst_111 : f32 to vector<1x128xf32>
    %308 = arith.mulf %307, %306 : vector<1x128xf32>
    %309 = math.tanh %308 : vector<1x128xf32>
    %cst_112 = arith.constant 5.000000e-01 : f32
    %310 = vector.broadcast %cst_112 : f32 to vector<1x128xf32>
    %311 = arith.mulf %310, %309 : vector<1x128xf32>
    %cst_113 = arith.constant 5.000000e-01 : f32
    %312 = vector.broadcast %cst_113 : f32 to vector<1x128xf32>
    %313 = arith.addf %311, %312 : vector<1x128xf32>
    %314 = vector.extract_strided_slice %305 {offsets = [0, 128], sizes = [1, 128], strides = [1, 1]} : vector<1x512xf32> to vector<1x128xf32>
    %cst_114 = arith.constant 5.000000e-01 : f32
    %315 = vector.broadcast %cst_114 : f32 to vector<1x128xf32>
    %316 = arith.mulf %315, %314 : vector<1x128xf32>
    %317 = math.tanh %316 : vector<1x128xf32>
    %cst_115 = arith.constant 5.000000e-01 : f32
    %318 = vector.broadcast %cst_115 : f32 to vector<1x128xf32>
    %319 = arith.mulf %318, %317 : vector<1x128xf32>
    %cst_116 = arith.constant 5.000000e-01 : f32
    %320 = vector.broadcast %cst_116 : f32 to vector<1x128xf32>
    %321 = arith.addf %319, %320 : vector<1x128xf32>
    %322 = vector.extract_strided_slice %305 {offsets = [0, 256], sizes = [1, 128], strides = [1, 1]} : vector<1x512xf32> to vector<1x128xf32>
    %323 = math.tanh %322 : vector<1x128xf32>
    %324 = vector.extract_strided_slice %305 {offsets = [0, 384], sizes = [1, 128], strides = [1, 1]} : vector<1x512xf32> to vector<1x128xf32>
    %cst_117 = arith.constant 5.000000e-01 : f32
    %325 = vector.broadcast %cst_117 : f32 to vector<1x128xf32>
    %326 = arith.mulf %325, %324 : vector<1x128xf32>
    %327 = math.tanh %326 : vector<1x128xf32>
    %cst_118 = arith.constant 5.000000e-01 : f32
    %328 = vector.broadcast %cst_118 : f32 to vector<1x128xf32>
    %329 = arith.mulf %328, %327 : vector<1x128xf32>
    %cst_119 = arith.constant 5.000000e-01 : f32
    %330 = vector.broadcast %cst_119 : f32 to vector<1x128xf32>
    %331 = arith.addf %329, %330 : vector<1x128xf32>
    %332 = arith.mulf %321, %290 : vector<1x128xf32>
    %333 = arith.mulf %313, %323 : vector<1x128xf32>
    %334 = arith.addf %332, %333 : vector<1x128xf32>
    %335 = math.tanh %334 : vector<1x128xf32>
    %336 = arith.mulf %331, %335 : vector<1x128xf32>
    %337 = arith.index_cast %c6_i32 : i32 to index
    %c0_120 = arith.constant 0 : index
    %338 = vector.load %arg19[%337, %c0_120] : memref<16x128xf32, #tpu.memory_space<vmem>>, vector<1x128xf32>
    tpu.vector_store %arg19[%337, %c0_120], %336 {strides = array<i32>} : memref<16x128xf32, #tpu.memory_space<vmem>>, vector<1x128xf32>,
    %c15_i32_121 = arith.constant 15 : i32
    %339 = arith.subi %c15_i32_121, %c6_i32 : i32
    %340 = arith.index_cast %339 : i32 to index
    %c0_122 = arith.constant 0 : index
    %341 = vector.load %arg20[%340, %c0_122] : memref<16x128xf32, #tpu.memory_space<vmem>>, vector<1x128xf32>
    tpu.vector_store %arg20[%340, %c0_122], %336 {strides = array<i32>} : memref<16x128xf32, #tpu.memory_space<vmem>>, vector<1x128xf32>,
    %c7_i32 = arith.constant 7 : i32
    %342 = arith.index_cast %c7_i32 : i32 to index
    %c0_123 = arith.constant 0 : index
    %343 = vector.load %arg18[%342, %c0_123] : memref<16x512xf32, #tpu.memory_space<vmem>>, vector<1x512xf32>
    %c15_i32_124 = arith.constant 15 : i32
    %344 = arith.subi %c15_i32_124, %c7_i32 : i32
    %345 = arith.index_cast %344 : i32 to index
    %c0_125 = arith.constant 0 : index
    %346 = vector.load %arg18[%345, %c0_125] : memref<16x512xf32, #tpu.memory_space<vmem>>, vector<1x512xf32>
    %347 = arith.select %33, %346, %343 : vector<1x512xi1>, vector<1x512xf32>
    %cst_126 = arith.constant dense<0.000000e+00> : vector<1x512xf32>
    %348 = tpu.matmul %336, %3, %cst_126 {dimension_numbers = #tpu.dot_dimension_numbers<[1], [0], [0], [1], [0, 0, 1, 1], [], []>} : vector<1x128xf32>, vector<128x512xf32>, vector<1x512xf32> -> vector<1x512xf32>
    %349 = arith.addf %347, %348 : vector<1x512xf32>
    %350 = vector.extract_strided_slice %349 {offsets = [0, 0], sizes = [1, 128], strides = [1, 1]} : vector<1x512xf32> to vector<1x128xf32>
    %cst_127 = arith.constant 5.000000e-01 : f32
    %351 = vector.broadcast %cst_127 : f32 to vector<1x128xf32>
    %352 = arith.mulf %351, %350 : vector<1x128xf32>
    %353 = math.tanh %352 : vector<1x128xf32>
    %cst_128 = arith.constant 5.000000e-01 : f32
    %354 = vector.broadcast %cst_128 : f32 to vector<1x128xf32>
    %355 = arith.mulf %354, %353 : vector<1x128xf32>
    %cst_129 = arith.constant 5.000000e-01 : f32
    %356 = vector.broadcast %cst_129 : f32 to vector<1x128xf32>
    %357 = arith.addf %355, %356 : vector<1x128xf32>
    %358 = vector.extract_strided_slice %349 {offsets = [0, 128], sizes = [1, 128], strides = [1, 1]} : vector<1x512xf32> to vector<1x128xf32>
    %cst_130 = arith.constant 5.000000e-01 : f32
    %359 = vector.broadcast %cst_130 : f32 to vector<1x128xf32>
    %360 = arith.mulf %359, %358 : vector<1x128xf32>
    %361 = math.tanh %360 : vector<1x128xf32>
    %cst_131 = arith.constant 5.000000e-01 : f32
    %362 = vector.broadcast %cst_131 : f32 to vector<1x128xf32>
    %363 = arith.mulf %362, %361 : vector<1x128xf32>
    %cst_132 = arith.constant 5.000000e-01 : f32
    %364 = vector.broadcast %cst_132 : f32 to vector<1x128xf32>
    %365 = arith.addf %363, %364 : vector<1x128xf32>
    %366 = vector.extract_strided_slice %349 {offsets = [0, 256], sizes = [1, 128], strides = [1, 1]} : vector<1x512xf32> to vector<1x128xf32>
    %367 = math.tanh %366 : vector<1x128xf32>
    %368 = vector.extract_strided_slice %349 {offsets = [0, 384], sizes = [1, 128], strides = [1, 1]} : vector<1x512xf32> to vector<1x128xf32>
    %cst_133 = arith.constant 5.000000e-01 : f32
    %369 = vector.broadcast %cst_133 : f32 to vector<1x128xf32>
    %370 = arith.mulf %369, %368 : vector<1x128xf32>
    %371 = math.tanh %370 : vector<1x128xf32>
    %cst_134 = arith.constant 5.000000e-01 : f32
    %372 = vector.broadcast %cst_134 : f32 to vector<1x128xf32>
    %373 = arith.mulf %372, %371 : vector<1x128xf32>
    %cst_135 = arith.constant 5.000000e-01 : f32
    %374 = vector.broadcast %cst_135 : f32 to vector<1x128xf32>
    %375 = arith.addf %373, %374 : vector<1x128xf32>
    %376 = arith.mulf %365, %334 : vector<1x128xf32>
    %377 = arith.mulf %357, %367 : vector<1x128xf32>
    %378 = arith.addf %376, %377 : vector<1x128xf32>
    %379 = math.tanh %378 : vector<1x128xf32>
    %380 = arith.mulf %375, %379 : vector<1x128xf32>
    %381 = arith.index_cast %c7_i32 : i32 to index
    %c0_136 = arith.constant 0 : index
    %382 = vector.load %arg19[%381, %c0_136] : memref<16x128xf32, #tpu.memory_space<vmem>>, vector<1x128xf32>
    tpu.vector_store %arg19[%381, %c0_136], %380 {strides = array<i32>} : memref<16x128xf32, #tpu.memory_space<vmem>>, vector<1x128xf32>,
    %c15_i32_137 = arith.constant 15 : i32
    %383 = arith.subi %c15_i32_137, %c7_i32 : i32
    %384 = arith.index_cast %383 : i32 to index
    %c0_138 = arith.constant 0 : index
    %385 = vector.load %arg20[%384, %c0_138] : memref<16x128xf32, #tpu.memory_space<vmem>>, vector<1x128xf32>
    tpu.vector_store %arg20[%384, %c0_138], %380 {strides = array<i32>} : memref<16x128xf32, #tpu.memory_space<vmem>>, vector<1x128xf32>,
    %c8_i32 = arith.constant 8 : i32
    %386 = arith.index_cast %c8_i32 : i32 to index
    %c0_139 = arith.constant 0 : index
    %387 = vector.load %arg18[%386, %c0_139] : memref<16x512xf32, #tpu.memory_space<vmem>>, vector<1x512xf32>
    %c15_i32_140 = arith.constant 15 : i32
    %388 = arith.subi %c15_i32_140, %c8_i32 : i32
    %389 = arith.index_cast %388 : i32 to index
    %c0_141 = arith.constant 0 : index
    %390 = vector.load %arg18[%389, %c0_141] : memref<16x512xf32, #tpu.memory_space<vmem>>, vector<1x512xf32>
    %391 = arith.select %33, %390, %387 : vector<1x512xi1>, vector<1x512xf32>
    %cst_142 = arith.constant dense<0.000000e+00> : vector<1x512xf32>
    %392 = tpu.matmul %380, %3, %cst_142 {dimension_numbers = #tpu.dot_dimension_numbers<[1], [0], [0], [1], [0, 0, 1, 1], [], []>} : vector<1x128xf32>, vector<128x512xf32>, vector<1x512xf32> -> vector<1x512xf32>
    %393 = arith.addf %391, %392 : vector<1x512xf32>
    %394 = vector.extract_strided_slice %393 {offsets = [0, 0], sizes = [1, 128], strides = [1, 1]} : vector<1x512xf32> to vector<1x128xf32>
    %cst_143 = arith.constant 5.000000e-01 : f32
    %395 = vector.broadcast %cst_143 : f32 to vector<1x128xf32>
    %396 = arith.mulf %395, %394 : vector<1x128xf32>
    %397 = math.tanh %396 : vector<1x128xf32>
    %cst_144 = arith.constant 5.000000e-01 : f32
    %398 = vector.broadcast %cst_144 : f32 to vector<1x128xf32>
    %399 = arith.mulf %398, %397 : vector<1x128xf32>
    %cst_145 = arith.constant 5.000000e-01 : f32
    %400 = vector.broadcast %cst_145 : f32 to vector<1x128xf32>
    %401 = arith.addf %399, %400 : vector<1x128xf32>
    %402 = vector.extract_strided_slice %393 {offsets = [0, 128], sizes = [1, 128], strides = [1, 1]} : vector<1x512xf32> to vector<1x128xf32>
    %cst_146 = arith.constant 5.000000e-01 : f32
    %403 = vector.broadcast %cst_146 : f32 to vector<1x128xf32>
    %404 = arith.mulf %403, %402 : vector<1x128xf32>
    %405 = math.tanh %404 : vector<1x128xf32>
    %cst_147 = arith.constant 5.000000e-01 : f32
    %406 = vector.broadcast %cst_147 : f32 to vector<1x128xf32>
    %407 = arith.mulf %406, %405 : vector<1x128xf32>
    %cst_148 = arith.constant 5.000000e-01 : f32
    %408 = vector.broadcast %cst_148 : f32 to vector<1x128xf32>
    %409 = arith.addf %407, %408 : vector<1x128xf32>
    %410 = vector.extract_strided_slice %393 {offsets = [0, 256], sizes = [1, 128], strides = [1, 1]} : vector<1x512xf32> to vector<1x128xf32>
    %411 = math.tanh %410 : vector<1x128xf32>
    %412 = vector.extract_strided_slice %393 {offsets = [0, 384], sizes = [1, 128], strides = [1, 1]} : vector<1x512xf32> to vector<1x128xf32>
    %cst_149 = arith.constant 5.000000e-01 : f32
    %413 = vector.broadcast %cst_149 : f32 to vector<1x128xf32>
    %414 = arith.mulf %413, %412 : vector<1x128xf32>
    %415 = math.tanh %414 : vector<1x128xf32>
    %cst_150 = arith.constant 5.000000e-01 : f32
    %416 = vector.broadcast %cst_150 : f32 to vector<1x128xf32>
    %417 = arith.mulf %416, %415 : vector<1x128xf32>
    %cst_151 = arith.constant 5.000000e-01 : f32
    %418 = vector.broadcast %cst_151 : f32 to vector<1x128xf32>
    %419 = arith.addf %417, %418 : vector<1x128xf32>
    %420 = arith.mulf %409, %378 : vector<1x128xf32>
    %421 = arith.mulf %401, %411 : vector<1x128xf32>
    %422 = arith.addf %420, %421 : vector<1x128xf32>
    %423 = math.tanh %422 : vector<1x128xf32>
    %424 = arith.mulf %419, %423 : vector<1x128xf32>
    %425 = arith.index_cast %c8_i32 : i32 to index
    %c0_152 = arith.constant 0 : index
    %426 = vector.load %arg19[%425, %c0_152] : memref<16x128xf32, #tpu.memory_space<vmem>>, vector<1x128xf32>
    tpu.vector_store %arg19[%425, %c0_152], %424 {strides = array<i32>} : memref<16x128xf32, #tpu.memory_space<vmem>>, vector<1x128xf32>,
    %c15_i32_153 = arith.constant 15 : i32
    %427 = arith.subi %c15_i32_153, %c8_i32 : i32
    %428 = arith.index_cast %427 : i32 to index
    %c0_154 = arith.constant 0 : index
    %429 = vector.load %arg20[%428, %c0_154] : memref<16x128xf32, #tpu.memory_space<vmem>>, vector<1x128xf32>
    tpu.vector_store %arg20[%428, %c0_154], %424 {strides = array<i32>} : memref<16x128xf32, #tpu.memory_space<vmem>>, vector<1x128xf32>,
    %c9_i32 = arith.constant 9 : i32
    %430 = arith.index_cast %c9_i32 : i32 to index
    %c0_155 = arith.constant 0 : index
    %431 = vector.load %arg18[%430, %c0_155] : memref<16x512xf32, #tpu.memory_space<vmem>>, vector<1x512xf32>
    %c15_i32_156 = arith.constant 15 : i32
    %432 = arith.subi %c15_i32_156, %c9_i32 : i32
    %433 = arith.index_cast %432 : i32 to index
    %c0_157 = arith.constant 0 : index
    %434 = vector.load %arg18[%433, %c0_157] : memref<16x512xf32, #tpu.memory_space<vmem>>, vector<1x512xf32>
    %435 = arith.select %33, %434, %431 : vector<1x512xi1>, vector<1x512xf32>
    %cst_158 = arith.constant dense<0.000000e+00> : vector<1x512xf32>
    %436 = tpu.matmul %424, %3, %cst_158 {dimension_numbers = #tpu.dot_dimension_numbers<[1], [0], [0], [1], [0, 0, 1, 1], [], []>} : vector<1x128xf32>, vector<128x512xf32>, vector<1x512xf32> -> vector<1x512xf32>
    %437 = arith.addf %435, %436 : vector<1x512xf32>
    %438 = vector.extract_strided_slice %437 {offsets = [0, 0], sizes = [1, 128], strides = [1, 1]} : vector<1x512xf32> to vector<1x128xf32>
    %cst_159 = arith.constant 5.000000e-01 : f32
    %439 = vector.broadcast %cst_159 : f32 to vector<1x128xf32>
    %440 = arith.mulf %439, %438 : vector<1x128xf32>
    %441 = math.tanh %440 : vector<1x128xf32>
    %cst_160 = arith.constant 5.000000e-01 : f32
    %442 = vector.broadcast %cst_160 : f32 to vector<1x128xf32>
    %443 = arith.mulf %442, %441 : vector<1x128xf32>
    %cst_161 = arith.constant 5.000000e-01 : f32
    %444 = vector.broadcast %cst_161 : f32 to vector<1x128xf32>
    %445 = arith.addf %443, %444 : vector<1x128xf32>
    %446 = vector.extract_strided_slice %437 {offsets = [0, 128], sizes = [1, 128], strides = [1, 1]} : vector<1x512xf32> to vector<1x128xf32>
    %cst_162 = arith.constant 5.000000e-01 : f32
    %447 = vector.broadcast %cst_162 : f32 to vector<1x128xf32>
    %448 = arith.mulf %447, %446 : vector<1x128xf32>
    %449 = math.tanh %448 : vector<1x128xf32>
    %cst_163 = arith.constant 5.000000e-01 : f32
    %450 = vector.broadcast %cst_163 : f32 to vector<1x128xf32>
    %451 = arith.mulf %450, %449 : vector<1x128xf32>
    %cst_164 = arith.constant 5.000000e-01 : f32
    %452 = vector.broadcast %cst_164 : f32 to vector<1x128xf32>
    %453 = arith.addf %451, %452 : vector<1x128xf32>
    %454 = vector.extract_strided_slice %437 {offsets = [0, 256], sizes = [1, 128], strides = [1, 1]} : vector<1x512xf32> to vector<1x128xf32>
    %455 = math.tanh %454 : vector<1x128xf32>
    %456 = vector.extract_strided_slice %437 {offsets = [0, 384], sizes = [1, 128], strides = [1, 1]} : vector<1x512xf32> to vector<1x128xf32>
    %cst_165 = arith.constant 5.000000e-01 : f32
    %457 = vector.broadcast %cst_165 : f32 to vector<1x128xf32>
    %458 = arith.mulf %457, %456 : vector<1x128xf32>
    %459 = math.tanh %458 : vector<1x128xf32>
    %cst_166 = arith.constant 5.000000e-01 : f32
    %460 = vector.broadcast %cst_166 : f32 to vector<1x128xf32>
    %461 = arith.mulf %460, %459 : vector<1x128xf32>
    %cst_167 = arith.constant 5.000000e-01 : f32
    %462 = vector.broadcast %cst_167 : f32 to vector<1x128xf32>
    %463 = arith.addf %461, %462 : vector<1x128xf32>
    %464 = arith.mulf %453, %422 : vector<1x128xf32>
    %465 = arith.mulf %445, %455 : vector<1x128xf32>
    %466 = arith.addf %464, %465 : vector<1x128xf32>
    %467 = math.tanh %466 : vector<1x128xf32>
    %468 = arith.mulf %463, %467 : vector<1x128xf32>
    %469 = arith.index_cast %c9_i32 : i32 to index
    %c0_168 = arith.constant 0 : index
    %470 = vector.load %arg19[%469, %c0_168] : memref<16x128xf32, #tpu.memory_space<vmem>>, vector<1x128xf32>
    tpu.vector_store %arg19[%469, %c0_168], %468 {strides = array<i32>} : memref<16x128xf32, #tpu.memory_space<vmem>>, vector<1x128xf32>,
    %c15_i32_169 = arith.constant 15 : i32
    %471 = arith.subi %c15_i32_169, %c9_i32 : i32
    %472 = arith.index_cast %471 : i32 to index
    %c0_170 = arith.constant 0 : index
    %473 = vector.load %arg20[%472, %c0_170] : memref<16x128xf32, #tpu.memory_space<vmem>>, vector<1x128xf32>
    tpu.vector_store %arg20[%472, %c0_170], %468 {strides = array<i32>} : memref<16x128xf32, #tpu.memory_space<vmem>>, vector<1x128xf32>,
    %c10_i32 = arith.constant 10 : i32
    %474 = arith.index_cast %c10_i32 : i32 to index
    %c0_171 = arith.constant 0 : index
    %475 = vector.load %arg18[%474, %c0_171] : memref<16x512xf32, #tpu.memory_space<vmem>>, vector<1x512xf32>
    %c15_i32_172 = arith.constant 15 : i32
    %476 = arith.subi %c15_i32_172, %c10_i32 : i32
    %477 = arith.index_cast %476 : i32 to index
    %c0_173 = arith.constant 0 : index
    %478 = vector.load %arg18[%477, %c0_173] : memref<16x512xf32, #tpu.memory_space<vmem>>, vector<1x512xf32>
    %479 = arith.select %33, %478, %475 : vector<1x512xi1>, vector<1x512xf32>
    %cst_174 = arith.constant dense<0.000000e+00> : vector<1x512xf32>
    %480 = tpu.matmul %468, %3, %cst_174 {dimension_numbers = #tpu.dot_dimension_numbers<[1], [0], [0], [1], [0, 0, 1, 1], [], []>} : vector<1x128xf32>, vector<128x512xf32>, vector<1x512xf32> -> vector<1x512xf32>
    %481 = arith.addf %479, %480 : vector<1x512xf32>
    %482 = vector.extract_strided_slice %481 {offsets = [0, 0], sizes = [1, 128], strides = [1, 1]} : vector<1x512xf32> to vector<1x128xf32>
    %cst_175 = arith.constant 5.000000e-01 : f32
    %483 = vector.broadcast %cst_175 : f32 to vector<1x128xf32>
    %484 = arith.mulf %483, %482 : vector<1x128xf32>
    %485 = math.tanh %484 : vector<1x128xf32>
    %cst_176 = arith.constant 5.000000e-01 : f32
    %486 = vector.broadcast %cst_176 : f32 to vector<1x128xf32>
    %487 = arith.mulf %486, %485 : vector<1x128xf32>
    %cst_177 = arith.constant 5.000000e-01 : f32
    %488 = vector.broadcast %cst_177 : f32 to vector<1x128xf32>
    %489 = arith.addf %487, %488 : vector<1x128xf32>
    %490 = vector.extract_strided_slice %481 {offsets = [0, 128], sizes = [1, 128], strides = [1, 1]} : vector<1x512xf32> to vector<1x128xf32>
    %cst_178 = arith.constant 5.000000e-01 : f32
    %491 = vector.broadcast %cst_178 : f32 to vector<1x128xf32>
    %492 = arith.mulf %491, %490 : vector<1x128xf32>
    %493 = math.tanh %492 : vector<1x128xf32>
    %cst_179 = arith.constant 5.000000e-01 : f32
    %494 = vector.broadcast %cst_179 : f32 to vector<1x128xf32>
    %495 = arith.mulf %494, %493 : vector<1x128xf32>
    %cst_180 = arith.constant 5.000000e-01 : f32
    %496 = vector.broadcast %cst_180 : f32 to vector<1x128xf32>
    %497 = arith.addf %495, %496 : vector<1x128xf32>
    %498 = vector.extract_strided_slice %481 {offsets = [0, 256], sizes = [1, 128], strides = [1, 1]} : vector<1x512xf32> to vector<1x128xf32>
    %499 = math.tanh %498 : vector<1x128xf32>
    %500 = vector.extract_strided_slice %481 {offsets = [0, 384], sizes = [1, 128], strides = [1, 1]} : vector<1x512xf32> to vector<1x128xf32>
    %cst_181 = arith.constant 5.000000e-01 : f32
    %501 = vector.broadcast %cst_181 : f32 to vector<1x128xf32>
    %502 = arith.mulf %501, %500 : vector<1x128xf32>
    %503 = math.tanh %502 : vector<1x128xf32>
    %cst_182 = arith.constant 5.000000e-01 : f32
    %504 = vector.broadcast %cst_182 : f32 to vector<1x128xf32>
    %505 = arith.mulf %504, %503 : vector<1x128xf32>
    %cst_183 = arith.constant 5.000000e-01 : f32
    %506 = vector.broadcast %cst_183 : f32 to vector<1x128xf32>
    %507 = arith.addf %505, %506 : vector<1x128xf32>
    %508 = arith.mulf %497, %466 : vector<1x128xf32>
    %509 = arith.mulf %489, %499 : vector<1x128xf32>
    %510 = arith.addf %508, %509 : vector<1x128xf32>
    %511 = math.tanh %510 : vector<1x128xf32>
    %512 = arith.mulf %507, %511 : vector<1x128xf32>
    %513 = arith.index_cast %c10_i32 : i32 to index
    %c0_184 = arith.constant 0 : index
    %514 = vector.load %arg19[%513, %c0_184] : memref<16x128xf32, #tpu.memory_space<vmem>>, vector<1x128xf32>
    tpu.vector_store %arg19[%513, %c0_184], %512 {strides = array<i32>} : memref<16x128xf32, #tpu.memory_space<vmem>>, vector<1x128xf32>,
    %c15_i32_185 = arith.constant 15 : i32
    %515 = arith.subi %c15_i32_185, %c10_i32 : i32
    %516 = arith.index_cast %515 : i32 to index
    %c0_186 = arith.constant 0 : index
    %517 = vector.load %arg20[%516, %c0_186] : memref<16x128xf32, #tpu.memory_space<vmem>>, vector<1x128xf32>
    tpu.vector_store %arg20[%516, %c0_186], %512 {strides = array<i32>} : memref<16x128xf32, #tpu.memory_space<vmem>>, vector<1x128xf32>,
    %c11_i32 = arith.constant 11 : i32
    %518 = arith.index_cast %c11_i32 : i32 to index
    %c0_187 = arith.constant 0 : index
    %519 = vector.load %arg18[%518, %c0_187] : memref<16x512xf32, #tpu.memory_space<vmem>>, vector<1x512xf32>
    %c15_i32_188 = arith.constant 15 : i32
    %520 = arith.subi %c15_i32_188, %c11_i32 : i32
    %521 = arith.index_cast %520 : i32 to index
    %c0_189 = arith.constant 0 : index
    %522 = vector.load %arg18[%521, %c0_189] : memref<16x512xf32, #tpu.memory_space<vmem>>, vector<1x512xf32>
    %523 = arith.select %33, %522, %519 : vector<1x512xi1>, vector<1x512xf32>
    %cst_190 = arith.constant dense<0.000000e+00> : vector<1x512xf32>
    %524 = tpu.matmul %512, %3, %cst_190 {dimension_numbers = #tpu.dot_dimension_numbers<[1], [0], [0], [1], [0, 0, 1, 1], [], []>} : vector<1x128xf32>, vector<128x512xf32>, vector<1x512xf32> -> vector<1x512xf32>
    %525 = arith.addf %523, %524 : vector<1x512xf32>
    %526 = vector.extract_strided_slice %525 {offsets = [0, 0], sizes = [1, 128], strides = [1, 1]} : vector<1x512xf32> to vector<1x128xf32>
    %cst_191 = arith.constant 5.000000e-01 : f32
    %527 = vector.broadcast %cst_191 : f32 to vector<1x128xf32>
    %528 = arith.mulf %527, %526 : vector<1x128xf32>
    %529 = math.tanh %528 : vector<1x128xf32>
    %cst_192 = arith.constant 5.000000e-01 : f32
    %530 = vector.broadcast %cst_192 : f32 to vector<1x128xf32>
    %531 = arith.mulf %530, %529 : vector<1x128xf32>
    %cst_193 = arith.constant 5.000000e-01 : f32
    %532 = vector.broadcast %cst_193 : f32 to vector<1x128xf32>
    %533 = arith.addf %531, %532 : vector<1x128xf32>
    %534 = vector.extract_strided_slice %525 {offsets = [0, 128], sizes = [1, 128], strides = [1, 1]} : vector<1x512xf32> to vector<1x128xf32>
    %cst_194 = arith.constant 5.000000e-01 : f32
    %535 = vector.broadcast %cst_194 : f32 to vector<1x128xf32>
    %536 = arith.mulf %535, %534 : vector<1x128xf32>
    %537 = math.tanh %536 : vector<1x128xf32>
    %cst_195 = arith.constant 5.000000e-01 : f32
    %538 = vector.broadcast %cst_195 : f32 to vector<1x128xf32>
    %539 = arith.mulf %538, %537 : vector<1x128xf32>
    %cst_196 = arith.constant 5.000000e-01 : f32
    %540 = vector.broadcast %cst_196 : f32 to vector<1x128xf32>
    %541 = arith.addf %539, %540 : vector<1x128xf32>
    %542 = vector.extract_strided_slice %525 {offsets = [0, 256], sizes = [1, 128], strides = [1, 1]} : vector<1x512xf32> to vector<1x128xf32>
    %543 = math.tanh %542 : vector<1x128xf32>
    %544 = vector.extract_strided_slice %525 {offsets = [0, 384], sizes = [1, 128], strides = [1, 1]} : vector<1x512xf32> to vector<1x128xf32>
    %cst_197 = arith.constant 5.000000e-01 : f32
    %545 = vector.broadcast %cst_197 : f32 to vector<1x128xf32>
    %546 = arith.mulf %545, %544 : vector<1x128xf32>
    %547 = math.tanh %546 : vector<1x128xf32>
    %cst_198 = arith.constant 5.000000e-01 : f32
    %548 = vector.broadcast %cst_198 : f32 to vector<1x128xf32>
    %549 = arith.mulf %548, %547 : vector<1x128xf32>
    %cst_199 = arith.constant 5.000000e-01 : f32
    %550 = vector.broadcast %cst_199 : f32 to vector<1x128xf32>
    %551 = arith.addf %549, %550 : vector<1x128xf32>
    %552 = arith.mulf %541, %510 : vector<1x128xf32>
    %553 = arith.mulf %533, %543 : vector<1x128xf32>
    %554 = arith.addf %552, %553 : vector<1x128xf32>
    %555 = math.tanh %554 : vector<1x128xf32>
    %556 = arith.mulf %551, %555 : vector<1x128xf32>
    %557 = arith.index_cast %c11_i32 : i32 to index
    %c0_200 = arith.constant 0 : index
    %558 = vector.load %arg19[%557, %c0_200] : memref<16x128xf32, #tpu.memory_space<vmem>>, vector<1x128xf32>
    tpu.vector_store %arg19[%557, %c0_200], %556 {strides = array<i32>} : memref<16x128xf32, #tpu.memory_space<vmem>>, vector<1x128xf32>,
    %c15_i32_201 = arith.constant 15 : i32
    %559 = arith.subi %c15_i32_201, %c11_i32 : i32
    %560 = arith.index_cast %559 : i32 to index
    %c0_202 = arith.constant 0 : index
    %561 = vector.load %arg20[%560, %c0_202] : memref<16x128xf32, #tpu.memory_space<vmem>>, vector<1x128xf32>
    tpu.vector_store %arg20[%560, %c0_202], %556 {strides = array<i32>} : memref<16x128xf32, #tpu.memory_space<vmem>>, vector<1x128xf32>,
    %c12_i32 = arith.constant 12 : i32
    %562 = arith.index_cast %c12_i32 : i32 to index
    %c0_203 = arith.constant 0 : index
    %563 = vector.load %arg18[%562, %c0_203] : memref<16x512xf32, #tpu.memory_space<vmem>>, vector<1x512xf32>
    %c15_i32_204 = arith.constant 15 : i32
    %564 = arith.subi %c15_i32_204, %c12_i32 : i32
    %565 = arith.index_cast %564 : i32 to index
    %c0_205 = arith.constant 0 : index
    %566 = vector.load %arg18[%565, %c0_205] : memref<16x512xf32, #tpu.memory_space<vmem>>, vector<1x512xf32>
    %567 = arith.select %33, %566, %563 : vector<1x512xi1>, vector<1x512xf32>
    %cst_206 = arith.constant dense<0.000000e+00> : vector<1x512xf32>
    %568 = tpu.matmul %556, %3, %cst_206 {dimension_numbers = #tpu.dot_dimension_numbers<[1], [0], [0], [1], [0, 0, 1, 1], [], []>} : vector<1x128xf32>, vector<128x512xf32>, vector<1x512xf32> -> vector<1x512xf32>
    %569 = arith.addf %567, %568 : vector<1x512xf32>
    %570 = vector.extract_strided_slice %569 {offsets = [0, 0], sizes = [1, 128], strides = [1, 1]} : vector<1x512xf32> to vector<1x128xf32>
    %cst_207 = arith.constant 5.000000e-01 : f32
    %571 = vector.broadcast %cst_207 : f32 to vector<1x128xf32>
    %572 = arith.mulf %571, %570 : vector<1x128xf32>
    %573 = math.tanh %572 : vector<1x128xf32>
    %cst_208 = arith.constant 5.000000e-01 : f32
    %574 = vector.broadcast %cst_208 : f32 to vector<1x128xf32>
    %575 = arith.mulf %574, %573 : vector<1x128xf32>
    %cst_209 = arith.constant 5.000000e-01 : f32
    %576 = vector.broadcast %cst_209 : f32 to vector<1x128xf32>
    %577 = arith.addf %575, %576 : vector<1x128xf32>
    %578 = vector.extract_strided_slice %569 {offsets = [0, 128], sizes = [1, 128], strides = [1, 1]} : vector<1x512xf32> to vector<1x128xf32>
    %cst_210 = arith.constant 5.000000e-01 : f32
    %579 = vector.broadcast %cst_210 : f32 to vector<1x128xf32>
    %580 = arith.mulf %579, %578 : vector<1x128xf32>
    %581 = math.tanh %580 : vector<1x128xf32>
    %cst_211 = arith.constant 5.000000e-01 : f32
    %582 = vector.broadcast %cst_211 : f32 to vector<1x128xf32>
    %583 = arith.mulf %582, %581 : vector<1x128xf32>
    %cst_212 = arith.constant 5.000000e-01 : f32
    %584 = vector.broadcast %cst_212 : f32 to vector<1x128xf32>
    %585 = arith.addf %583, %584 : vector<1x128xf32>
    %586 = vector.extract_strided_slice %569 {offsets = [0, 256], sizes = [1, 128], strides = [1, 1]} : vector<1x512xf32> to vector<1x128xf32>
    %587 = math.tanh %586 : vector<1x128xf32>
    %588 = vector.extract_strided_slice %569 {offsets = [0, 384], sizes = [1, 128], strides = [1, 1]} : vector<1x512xf32> to vector<1x128xf32>
    %cst_213 = arith.constant 5.000000e-01 : f32
    %589 = vector.broadcast %cst_213 : f32 to vector<1x128xf32>
    %590 = arith.mulf %589, %588 : vector<1x128xf32>
    %591 = math.tanh %590 : vector<1x128xf32>
    %cst_214 = arith.constant 5.000000e-01 : f32
    %592 = vector.broadcast %cst_214 : f32 to vector<1x128xf32>
    %593 = arith.mulf %592, %591 : vector<1x128xf32>
    %cst_215 = arith.constant 5.000000e-01 : f32
    %594 = vector.broadcast %cst_215 : f32 to vector<1x128xf32>
    %595 = arith.addf %593, %594 : vector<1x128xf32>
    %596 = arith.mulf %585, %554 : vector<1x128xf32>
    %597 = arith.mulf %577, %587 : vector<1x128xf32>
    %598 = arith.addf %596, %597 : vector<1x128xf32>
    %599 = math.tanh %598 : vector<1x128xf32>
    %600 = arith.mulf %595, %599 : vector<1x128xf32>
    %601 = arith.index_cast %c12_i32 : i32 to index
    %c0_216 = arith.constant 0 : index
    %602 = vector.load %arg19[%601, %c0_216] : memref<16x128xf32, #tpu.memory_space<vmem>>, vector<1x128xf32>
    tpu.vector_store %arg19[%601, %c0_216], %600 {strides = array<i32>} : memref<16x128xf32, #tpu.memory_space<vmem>>, vector<1x128xf32>,
    %c15_i32_217 = arith.constant 15 : i32
    %603 = arith.subi %c15_i32_217, %c12_i32 : i32
    %604 = arith.index_cast %603 : i32 to index
    %c0_218 = arith.constant 0 : index
    %605 = vector.load %arg20[%604, %c0_218] : memref<16x128xf32, #tpu.memory_space<vmem>>, vector<1x128xf32>
    tpu.vector_store %arg20[%604, %c0_218], %600 {strides = array<i32>} : memref<16x128xf32, #tpu.memory_space<vmem>>, vector<1x128xf32>,
    %c13_i32 = arith.constant 13 : i32
    %606 = arith.index_cast %c13_i32 : i32 to index
    %c0_219 = arith.constant 0 : index
    %607 = vector.load %arg18[%606, %c0_219] : memref<16x512xf32, #tpu.memory_space<vmem>>, vector<1x512xf32>
    %c15_i32_220 = arith.constant 15 : i32
    %608 = arith.subi %c15_i32_220, %c13_i32 : i32
    %609 = arith.index_cast %608 : i32 to index
    %c0_221 = arith.constant 0 : index
    %610 = vector.load %arg18[%609, %c0_221] : memref<16x512xf32, #tpu.memory_space<vmem>>, vector<1x512xf32>
    %611 = arith.select %33, %610, %607 : vector<1x512xi1>, vector<1x512xf32>
    %cst_222 = arith.constant dense<0.000000e+00> : vector<1x512xf32>
    %612 = tpu.matmul %600, %3, %cst_222 {dimension_numbers = #tpu.dot_dimension_numbers<[1], [0], [0], [1], [0, 0, 1, 1], [], []>} : vector<1x128xf32>, vector<128x512xf32>, vector<1x512xf32> -> vector<1x512xf32>
    %613 = arith.addf %611, %612 : vector<1x512xf32>
    %614 = vector.extract_strided_slice %613 {offsets = [0, 0], sizes = [1, 128], strides = [1, 1]} : vector<1x512xf32> to vector<1x128xf32>
    %cst_223 = arith.constant 5.000000e-01 : f32
    %615 = vector.broadcast %cst_223 : f32 to vector<1x128xf32>
    %616 = arith.mulf %615, %614 : vector<1x128xf32>
    %617 = math.tanh %616 : vector<1x128xf32>
    %cst_224 = arith.constant 5.000000e-01 : f32
    %618 = vector.broadcast %cst_224 : f32 to vector<1x128xf32>
    %619 = arith.mulf %618, %617 : vector<1x128xf32>
    %cst_225 = arith.constant 5.000000e-01 : f32
    %620 = vector.broadcast %cst_225 : f32 to vector<1x128xf32>
    %621 = arith.addf %619, %620 : vector<1x128xf32>
    %622 = vector.extract_strided_slice %613 {offsets = [0, 128], sizes = [1, 128], strides = [1, 1]} : vector<1x512xf32> to vector<1x128xf32>
    %cst_226 = arith.constant 5.000000e-01 : f32
    %623 = vector.broadcast %cst_226 : f32 to vector<1x128xf32>
    %624 = arith.mulf %623, %622 : vector<1x128xf32>
    %625 = math.tanh %624 : vector<1x128xf32>
    %cst_227 = arith.constant 5.000000e-01 : f32
    %626 = vector.broadcast %cst_227 : f32 to vector<1x128xf32>
    %627 = arith.mulf %626, %625 : vector<1x128xf32>
    %cst_228 = arith.constant 5.000000e-01 : f32
    %628 = vector.broadcast %cst_228 : f32 to vector<1x128xf32>
    %629 = arith.addf %627, %628 : vector<1x128xf32>
    %630 = vector.extract_strided_slice %613 {offsets = [0, 256], sizes = [1, 128], strides = [1, 1]} : vector<1x512xf32> to vector<1x128xf32>
    %631 = math.tanh %630 : vector<1x128xf32>
    %632 = vector.extract_strided_slice %613 {offsets = [0, 384], sizes = [1, 128], strides = [1, 1]} : vector<1x512xf32> to vector<1x128xf32>
    %cst_229 = arith.constant 5.000000e-01 : f32
    %633 = vector.broadcast %cst_229 : f32 to vector<1x128xf32>
    %634 = arith.mulf %633, %632 : vector<1x128xf32>
    %635 = math.tanh %634 : vector<1x128xf32>
    %cst_230 = arith.constant 5.000000e-01 : f32
    %636 = vector.broadcast %cst_230 : f32 to vector<1x128xf32>
    %637 = arith.mulf %636, %635 : vector<1x128xf32>
    %cst_231 = arith.constant 5.000000e-01 : f32
    %638 = vector.broadcast %cst_231 : f32 to vector<1x128xf32>
    %639 = arith.addf %637, %638 : vector<1x128xf32>
    %640 = arith.mulf %629, %598 : vector<1x128xf32>
    %641 = arith.mulf %621, %631 : vector<1x128xf32>
    %642 = arith.addf %640, %641 : vector<1x128xf32>
    %643 = math.tanh %642 : vector<1x128xf32>
    %644 = arith.mulf %639, %643 : vector<1x128xf32>
    %645 = arith.index_cast %c13_i32 : i32 to index
    %c0_232 = arith.constant 0 : index
    %646 = vector.load %arg19[%645, %c0_232] : memref<16x128xf32, #tpu.memory_space<vmem>>, vector<1x128xf32>
    tpu.vector_store %arg19[%645, %c0_232], %644 {strides = array<i32>} : memref<16x128xf32, #tpu.memory_space<vmem>>, vector<1x128xf32>,
    %c15_i32_233 = arith.constant 15 : i32
    %647 = arith.subi %c15_i32_233, %c13_i32 : i32
    %648 = arith.index_cast %647 : i32 to index
    %c0_234 = arith.constant 0 : index
    %649 = vector.load %arg20[%648, %c0_234] : memref<16x128xf32, #tpu.memory_space<vmem>>, vector<1x128xf32>
    tpu.vector_store %arg20[%648, %c0_234], %644 {strides = array<i32>} : memref<16x128xf32, #tpu.memory_space<vmem>>, vector<1x128xf32>,
    %c14_i32 = arith.constant 14 : i32
    %650 = arith.index_cast %c14_i32 : i32 to index
    %c0_235 = arith.constant 0 : index
    %651 = vector.load %arg18[%650, %c0_235] : memref<16x512xf32, #tpu.memory_space<vmem>>, vector<1x512xf32>
    %c15_i32_236 = arith.constant 15 : i32
    %652 = arith.subi %c15_i32_236, %c14_i32 : i32
    %653 = arith.index_cast %652 : i32 to index
    %c0_237 = arith.constant 0 : index
    %654 = vector.load %arg18[%653, %c0_237] : memref<16x512xf32, #tpu.memory_space<vmem>>, vector<1x512xf32>
    %655 = arith.select %33, %654, %651 : vector<1x512xi1>, vector<1x512xf32>
    %cst_238 = arith.constant dense<0.000000e+00> : vector<1x512xf32>
    %656 = tpu.matmul %644, %3, %cst_238 {dimension_numbers = #tpu.dot_dimension_numbers<[1], [0], [0], [1], [0, 0, 1, 1], [], []>} : vector<1x128xf32>, vector<128x512xf32>, vector<1x512xf32> -> vector<1x512xf32>
    %657 = arith.addf %655, %656 : vector<1x512xf32>
    %658 = vector.extract_strided_slice %657 {offsets = [0, 0], sizes = [1, 128], strides = [1, 1]} : vector<1x512xf32> to vector<1x128xf32>
    %cst_239 = arith.constant 5.000000e-01 : f32
    %659 = vector.broadcast %cst_239 : f32 to vector<1x128xf32>
    %660 = arith.mulf %659, %658 : vector<1x128xf32>
    %661 = math.tanh %660 : vector<1x128xf32>
    %cst_240 = arith.constant 5.000000e-01 : f32
    %662 = vector.broadcast %cst_240 : f32 to vector<1x128xf32>
    %663 = arith.mulf %662, %661 : vector<1x128xf32>
    %cst_241 = arith.constant 5.000000e-01 : f32
    %664 = vector.broadcast %cst_241 : f32 to vector<1x128xf32>
    %665 = arith.addf %663, %664 : vector<1x128xf32>
    %666 = vector.extract_strided_slice %657 {offsets = [0, 128], sizes = [1, 128], strides = [1, 1]} : vector<1x512xf32> to vector<1x128xf32>
    %cst_242 = arith.constant 5.000000e-01 : f32
    %667 = vector.broadcast %cst_242 : f32 to vector<1x128xf32>
    %668 = arith.mulf %667, %666 : vector<1x128xf32>
    %669 = math.tanh %668 : vector<1x128xf32>
    %cst_243 = arith.constant 5.000000e-01 : f32
    %670 = vector.broadcast %cst_243 : f32 to vector<1x128xf32>
    %671 = arith.mulf %670, %669 : vector<1x128xf32>
    %cst_244 = arith.constant 5.000000e-01 : f32
    %672 = vector.broadcast %cst_244 : f32 to vector<1x128xf32>
    %673 = arith.addf %671, %672 : vector<1x128xf32>
    %674 = vector.extract_strided_slice %657 {offsets = [0, 256], sizes = [1, 128], strides = [1, 1]} : vector<1x512xf32> to vector<1x128xf32>
    %675 = math.tanh %674 : vector<1x128xf32>
    %676 = vector.extract_strided_slice %657 {offsets = [0, 384], sizes = [1, 128], strides = [1, 1]} : vector<1x512xf32> to vector<1x128xf32>
    %cst_245 = arith.constant 5.000000e-01 : f32
    %677 = vector.broadcast %cst_245 : f32 to vector<1x128xf32>
    %678 = arith.mulf %677, %676 : vector<1x128xf32>
    %679 = math.tanh %678 : vector<1x128xf32>
    %cst_246 = arith.constant 5.000000e-01 : f32
    %680 = vector.broadcast %cst_246 : f32 to vector<1x128xf32>
    %681 = arith.mulf %680, %679 : vector<1x128xf32>
    %cst_247 = arith.constant 5.000000e-01 : f32
    %682 = vector.broadcast %cst_247 : f32 to vector<1x128xf32>
    %683 = arith.addf %681, %682 : vector<1x128xf32>
    %684 = arith.mulf %673, %642 : vector<1x128xf32>
    %685 = arith.mulf %665, %675 : vector<1x128xf32>
    %686 = arith.addf %684, %685 : vector<1x128xf32>
    %687 = math.tanh %686 : vector<1x128xf32>
    %688 = arith.mulf %683, %687 : vector<1x128xf32>
    %689 = arith.index_cast %c14_i32 : i32 to index
    %c0_248 = arith.constant 0 : index
    %690 = vector.load %arg19[%689, %c0_248] : memref<16x128xf32, #tpu.memory_space<vmem>>, vector<1x128xf32>
    tpu.vector_store %arg19[%689, %c0_248], %688 {strides = array<i32>} : memref<16x128xf32, #tpu.memory_space<vmem>>, vector<1x128xf32>,
    %c15_i32_249 = arith.constant 15 : i32
    %691 = arith.subi %c15_i32_249, %c14_i32 : i32
    %692 = arith.index_cast %691 : i32 to index
    %c0_250 = arith.constant 0 : index
    %693 = vector.load %arg20[%692, %c0_250] : memref<16x128xf32, #tpu.memory_space<vmem>>, vector<1x128xf32>
    tpu.vector_store %arg20[%692, %c0_250], %688 {strides = array<i32>} : memref<16x128xf32, #tpu.memory_space<vmem>>, vector<1x128xf32>,
    %c15_i32_251 = arith.constant 15 : i32
    %694 = arith.index_cast %c15_i32_251 : i32 to index
    %c0_252 = arith.constant 0 : index
    %695 = vector.load %arg18[%694, %c0_252] : memref<16x512xf32, #tpu.memory_space<vmem>>, vector<1x512xf32>
    %c15_i32_253 = arith.constant 15 : i32
    %696 = arith.subi %c15_i32_253, %c15_i32_251 : i32
    %697 = arith.index_cast %696 : i32 to index
    %c0_254 = arith.constant 0 : index
    %698 = vector.load %arg18[%697, %c0_254] : memref<16x512xf32, #tpu.memory_space<vmem>>, vector<1x512xf32>
    %699 = arith.select %33, %698, %695 : vector<1x512xi1>, vector<1x512xf32>
    %cst_255 = arith.constant dense<0.000000e+00> : vector<1x512xf32>
    %700 = tpu.matmul %688, %3, %cst_255 {dimension_numbers = #tpu.dot_dimension_numbers<[1], [0], [0], [1], [0, 0, 1, 1], [], []>} : vector<1x128xf32>, vector<128x512xf32>, vector<1x512xf32> -> vector<1x512xf32>
    %701 = arith.addf %699, %700 : vector<1x512xf32>
    %702 = vector.extract_strided_slice %701 {offsets = [0, 0], sizes = [1, 128], strides = [1, 1]} : vector<1x512xf32> to vector<1x128xf32>
    %cst_256 = arith.constant 5.000000e-01 : f32
    %703 = vector.broadcast %cst_256 : f32 to vector<1x128xf32>
    %704 = arith.mulf %703, %702 : vector<1x128xf32>
    %705 = math.tanh %704 : vector<1x128xf32>
    %cst_257 = arith.constant 5.000000e-01 : f32
    %706 = vector.broadcast %cst_257 : f32 to vector<1x128xf32>
    %707 = arith.mulf %706, %705 : vector<1x128xf32>
    %cst_258 = arith.constant 5.000000e-01 : f32
    %708 = vector.broadcast %cst_258 : f32 to vector<1x128xf32>
    %709 = arith.addf %707, %708 : vector<1x128xf32>
    %710 = vector.extract_strided_slice %701 {offsets = [0, 128], sizes = [1, 128], strides = [1, 1]} : vector<1x512xf32> to vector<1x128xf32>
    %cst_259 = arith.constant 5.000000e-01 : f32
    %711 = vector.broadcast %cst_259 : f32 to vector<1x128xf32>
    %712 = arith.mulf %711, %710 : vector<1x128xf32>
    %713 = math.tanh %712 : vector<1x128xf32>
    %cst_260 = arith.constant 5.000000e-01 : f32
    %714 = vector.broadcast %cst_260 : f32 to vector<1x128xf32>
    %715 = arith.mulf %714, %713 : vector<1x128xf32>
    %cst_261 = arith.constant 5.000000e-01 : f32
    %716 = vector.broadcast %cst_261 : f32 to vector<1x128xf32>
    %717 = arith.addf %715, %716 : vector<1x128xf32>
    %718 = vector.extract_strided_slice %701 {offsets = [0, 256], sizes = [1, 128], strides = [1, 1]} : vector<1x512xf32> to vector<1x128xf32>
    %719 = math.tanh %718 : vector<1x128xf32>
    %720 = vector.extract_strided_slice %701 {offsets = [0, 384], sizes = [1, 128], strides = [1, 1]} : vector<1x512xf32> to vector<1x128xf32>
    %cst_262 = arith.constant 5.000000e-01 : f32
    %721 = vector.broadcast %cst_262 : f32 to vector<1x128xf32>
    %722 = arith.mulf %721, %720 : vector<1x128xf32>
    %723 = math.tanh %722 : vector<1x128xf32>
    %cst_263 = arith.constant 5.000000e-01 : f32
    %724 = vector.broadcast %cst_263 : f32 to vector<1x128xf32>
    %725 = arith.mulf %724, %723 : vector<1x128xf32>
    %cst_264 = arith.constant 5.000000e-01 : f32
    %726 = vector.broadcast %cst_264 : f32 to vector<1x128xf32>
    %727 = arith.addf %725, %726 : vector<1x128xf32>
    %728 = arith.mulf %717, %686 : vector<1x128xf32>
    %729 = arith.mulf %709, %719 : vector<1x128xf32>
    %730 = arith.addf %728, %729 : vector<1x128xf32>
    %731 = math.tanh %730 : vector<1x128xf32>
    %732 = arith.mulf %727, %731 : vector<1x128xf32>
    %733 = arith.index_cast %c15_i32_251 : i32 to index
    %c0_265 = arith.constant 0 : index
    %734 = vector.load %arg19[%733, %c0_265] : memref<16x128xf32, #tpu.memory_space<vmem>>, vector<1x128xf32>
    tpu.vector_store %arg19[%733, %c0_265], %732 {strides = array<i32>} : memref<16x128xf32, #tpu.memory_space<vmem>>, vector<1x128xf32>,
    %c15_i32_266 = arith.constant 15 : i32
    %735 = arith.subi %c15_i32_266, %c15_i32_251 : i32
    %736 = arith.index_cast %735 : i32 to index
    %c0_267 = arith.constant 0 : index
    %737 = vector.load %arg20[%736, %c0_267] : memref<16x128xf32, #tpu.memory_space<vmem>>, vector<1x128xf32>
    tpu.vector_store %arg20[%736, %c0_267], %732 {strides = array<i32>} : memref<16x128xf32, #tpu.memory_space<vmem>>, vector<1x128xf32>,
    %c16_i32_268 = arith.constant 16 : i32
    %738 = tpu.iota {dimensions = array<i32: 1>} : vector<16x128xi32>
    %c16_i32_269 = arith.constant 16 : i32
    %739 = vector.broadcast %c16_i32_269 : i32 to vector<16x128xi32>
    %740 = arith.cmpi slt, %738, %739 : vector<16x128xi32>
    %c0_270 = arith.constant 0 : index
    %c0_271 = arith.constant 0 : index
    %741 = vector.load %arg19[%c0_270, %c0_271] : memref<16x128xf32, #tpu.memory_space<vmem>>, vector<16x128xf32>
    %c0_272 = arith.constant 0 : index
    %c0_273 = arith.constant 0 : index
    %742 = vector.load %arg20[%c0_272, %c0_273] : memref<16x128xf32, #tpu.memory_space<vmem>>, vector<16x128xf32>
    %743 = arith.select %740, %741, %742 : vector<16x128xi1>, vector<16x128xf32>
    %c0_274 = arith.constant 0 : index
    %c0_275 = arith.constant 0 : index
    %744 = vector.load %arg2[%c0_274, %c0_275] : memref<1x1024xbf16, #tpu.memory_space<vmem>>, vector<1x1024xbf16>
    %c0_276 = arith.constant 0 : index
    %c0_277 = arith.constant 0 : index
    %745 = vector.load %arg7[%c0_276, %c0_277] : memref<1024x128xbf16, #tpu.memory_space<vmem>>, vector<1024x128xbf16>
    %cst_278 = arith.constant dense<0.000000e+00> : vector<1x128xf32>
    %746 = tpu.matmul %744, %745, %cst_278 {dimension_numbers = #tpu.dot_dimension_numbers<[1], [0], [0], [1], [0, 0, 1, 1], [], []>} : vector<1x1024xbf16>, vector<1024x128xbf16>, vector<1x128xf32> -> vector<1x128xf32>
    %c0_279 = arith.constant 0 : index
    %c0_280 = arith.constant 0 : index
    %747 = vector.load %arg8[%c0_279, %c0_280] : memref<1x128xf32, #tpu.memory_space<vmem>>, vector<1x128xf32>
    %748 = arith.addf %746, %747 : vector<1x128xf32>
    %cst_281 = arith.constant dense<0.000000e+00> : vector<1x16xf32>
    %749 = tpu.matmul %748, %743, %cst_281 {dimension_numbers = #tpu.dot_dimension_numbers<[1], [1], [0], [0], [0, 0, 1, 0], [], []>} : vector<1x128xf32>, vector<16x128xf32>, vector<1x16xf32> -> vector<1x16xf32>
    %750 = tpu.iota {dimensions = array<i32: 1>} : vector<1x16xi32>
    %c-1_i32 = arith.constant -1 : i32
    %751 = vector.broadcast %c-1_i32 : i32 to vector<1x16xi32>
    %c0_282 = arith.constant 0 : index
    %752 = memref.load %arg0[%c0_282] : memref<4xi32, #tpu.memory_space<smem>>
    %753 = vector.broadcast %752 : i32 to vector<1x16xi32>
    %754 = arith.cmpi slt, %753, %750 : vector<1x16xi32>
    %755 = arith.extui %754 : vector<1x16xi1> to vector<1x16xi32>
    %756 = arith.addi %751, %755 : vector<1x16xi32>
    %c1_283 = arith.constant 1 : index
    %757 = memref.load %arg0[%c1_283] : memref<4xi32, #tpu.memory_space<smem>>
    %758 = vector.broadcast %757 : i32 to vector<1x16xi32>
    %759 = arith.cmpi slt, %758, %750 : vector<1x16xi32>
    %760 = arith.extui %759 : vector<1x16xi1> to vector<1x16xi32>
    %761 = arith.addi %756, %760 : vector<1x16xi32>
    %c2 = arith.constant 2 : index
    %762 = memref.load %arg0[%c2] : memref<4xi32, #tpu.memory_space<smem>>
    %763 = vector.broadcast %762 : i32 to vector<1x16xi32>
    %764 = arith.cmpi slt, %763, %750 : vector<1x16xi32>
    %765 = arith.extui %764 : vector<1x16xi1> to vector<1x16xi32>
    %766 = arith.addi %761, %765 : vector<1x16xi32>
    %c3 = arith.constant 3 : index
    %767 = memref.load %arg0[%c3] : memref<4xi32, #tpu.memory_space<smem>>
    %768 = vector.broadcast %767 : i32 to vector<1x16xi32>
    %769 = arith.cmpi slt, %768, %750 : vector<1x16xi32>
    %770 = arith.extui %769 : vector<1x16xi1> to vector<1x16xi32>
    %771 = arith.addi %766, %770 : vector<1x16xi32>
    %772 = tpu.iota {dimensions = array<i32: 0>} : vector<3x16xi32>
    %773 = vector.broadcast %771 : vector<1x16xi32> to vector<3x16xi32>
    %774 = arith.cmpi eq, %773, %772 : vector<3x16xi32>
    %cst_284 = arith.constant -1.000000e+30 : f32
    %775 = vector.shape_cast %749 : vector<1x16xf32> to vector<1x16xf32>
    %776 = vector.broadcast %775 : vector<1x16xf32> to vector<3x16xf32>
    %777 = vector.broadcast %cst_284 : f32 to vector<3x16xf32>
    %778 = arith.select %774, %776, %777 : vector<3x16xi1>, vector<3x16xf32>
    %cst_285 = arith.constant dense<0xFF800000> : vector<3xf32>
    %779 = vector.multi_reduction <maximumf>, %778, %cst_285 [1] : vector<3x16xf32> to vector<3xf32>
    %780 = vector.shape_cast %779 : vector<3xf32> to vector<3x1xf32>
    %781 = vector.broadcast %780 : vector<3x1xf32> to vector<3x16xf32>
    %782 = arith.subf %778, %781 : vector<3x16xf32>
    %783 = math.exp %782 : vector<3x16xf32>
    %cst_286 = arith.constant 0.000000e+00 : f32
    %784 = vector.broadcast %cst_286 : f32 to vector<3x16xf32>
    %785 = arith.select %774, %783, %784 : vector<3x16xi1>, vector<3x16xf32>
    %cst_287 = arith.constant dense<0.000000e+00> : vector<3xf32>
    %786 = vector.multi_reduction <add>, %785, %cst_287 [1] : vector<3x16xf32> to vector<3xf32>
    %787 = vector.shape_cast %786 : vector<3xf32> to vector<3x1xf32>
    %cst_288 = arith.constant 1.000000e-30 : f32
    %788 = vector.broadcast %cst_288 : f32 to vector<3x1xf32>
    %789 = arith.maximumf %787, %788 : vector<3x1xf32>
    %790 = tpu.reciprocal %789 {approx = true} : vector<3x1xf32> -> vector<3x1xf32>
    %791 = vector.broadcast %790 : vector<3x1xf32> to vector<3x16xf32>
    %792 = arith.mulf %785, %791 : vector<3x16xf32>
    %cst_289 = arith.constant dense<0.000000e+00> : vector<3x128xf32>
    %793 = tpu.matmul %792, %743, %cst_289 {dimension_numbers = #tpu.dot_dimension_numbers<[1], [0], [0], [1], [0, 0, 1, 1], [], []>} : vector<3x16xf32>, vector<16x128xf32>, vector<3x128xf32> -> vector<3x128xf32>
    %c0_290 = arith.constant 0 : index
    %c0_291 = arith.constant 0 : index
    %794 = vector.load %arg9[%c0_290, %c0_291] : memref<128x512xf32, #tpu.memory_space<vmem>>, vector<128x512xf32>
    %c0_292 = arith.constant 0 : index
    %c0_293 = arith.constant 0 : index
    %795 = vector.load %arg11[%c0_292, %c0_293] : memref<1x512xf32, #tpu.memory_space<vmem>>, vector<1x512xf32>
    %c0_294 = arith.constant 0 : index
    %c0_295 = arith.constant 0 : index
    %796 = vector.load %arg10[%c0_294, %c0_295] : memref<128x512xf32, #tpu.memory_space<vmem>>, vector<128x512xf32>
    %c0_296 = arith.constant 0 : index
    %c0_297 = arith.constant 0 : index
    %797 = vector.load %arg12[%c0_296, %c0_297] : memref<2x128xf32, #tpu.memory_space<vmem>>, vector<1x128xf32>
    %c1_298 = arith.constant 1 : index
    %c0_299 = arith.constant 0 : index
    %798 = vector.load %arg12[%c1_298, %c0_299] : memref<2x128xf32, #tpu.memory_space<vmem>>, vector<1x128xf32>
    %cst_300 = arith.constant dense<0.000000e+00> : vector<3x512xf32>
    %799 = tpu.matmul %793, %794, %cst_300 {dimension_numbers = #tpu.dot_dimension_numbers<[1], [0], [0], [1], [0, 0, 1, 1], [], []>} : vector<3x128xf32>, vector<128x512xf32>, vector<3x512xf32> -> vector<3x512xf32>
    %800 = vector.broadcast %795 : vector<1x512xf32> to vector<3x512xf32>
    %801 = arith.addf %799, %800 : vector<3x512xf32>
    %c0_301 = arith.constant 0 : index
    %c0_302 = arith.constant 0 : index
    %802 = vector.load %arg21[%c0_301, %c0_302] : memref<3x512xf32, #tpu.memory_space<vmem>>, vector<3x512xf32>
    tpu.vector_store %arg21[%c0_301, %c0_302], %801 {strides = array<i32>} : memref<3x512xf32, #tpu.memory_space<vmem>>, vector<3x512xf32>,
    %803 = tpu.iota {dimensions = array<i32: 1>} : vector<1x512xi32>
    %c16_i32_303 = arith.constant 16 : i32
    %804 = vector.broadcast %c16_i32_303 : i32 to vector<1x512xi32>
    %805 = arith.cmpi sge, %803, %804 : vector<1x512xi32>
    %c32_i32_304 = arith.constant 32 : i32
    %806 = vector.broadcast %c32_i32_304 : i32 to vector<1x512xi32>
    %807 = arith.cmpi slt, %803, %806 : vector<1x512xi32>
    %808 = arith.andi %805, %807 : vector<1x512xi1>
    %c144_i32_305 = arith.constant 144 : i32
    %809 = vector.broadcast %c144_i32_305 : i32 to vector<1x512xi32>
    %810 = arith.cmpi sge, %803, %809 : vector<1x512xi32>
    %c160_i32_306 = arith.constant 160 : i32
    %811 = vector.broadcast %c160_i32_306 : i32 to vector<1x512xi32>
    %812 = arith.cmpi slt, %803, %811 : vector<1x512xi32>
    %813 = arith.andi %810, %812 : vector<1x512xi1>
    %c272_i32_307 = arith.constant 272 : i32
    %814 = vector.broadcast %c272_i32_307 : i32 to vector<1x512xi32>
    %815 = arith.cmpi sge, %803, %814 : vector<1x512xi32>
    %c288_i32_308 = arith.constant 288 : i32
    %816 = vector.broadcast %c288_i32_308 : i32 to vector<1x512xi32>
    %817 = arith.cmpi slt, %803, %816 : vector<1x512xi32>
    %818 = arith.andi %815, %817 : vector<1x512xi1>
    %c400_i32_309 = arith.constant 400 : i32
    %819 = vector.broadcast %c400_i32_309 : i32 to vector<1x512xi32>
    %820 = arith.cmpi sge, %803, %819 : vector<1x512xi32>
    %c416_i32_310 = arith.constant 416 : i32
    %821 = vector.broadcast %c416_i32_310 : i32 to vector<1x512xi32>
    %822 = arith.cmpi slt, %803, %821 : vector<1x512xi32>
    %823 = arith.andi %820, %822 : vector<1x512xi1>
    %824 = arith.ori %808, %813 : vector<1x512xi1>
    %825 = arith.ori %824, %818 : vector<1x512xi1>
    %826 = arith.ori %825, %823 : vector<1x512xi1>
    %c0_i32_311 = arith.constant 0 : i32
    %827 = arith.index_cast %c0_i32_311 : i32 to index
    %c0_312 = arith.constant 0 : index
    %828 = vector.load %arg21[%827, %c0_312] : memref<3x512xf32, #tpu.memory_space<vmem>>, vector<1x512xf32>
    %c2_i32_313 = arith.constant 2 : i32
    %829 = arith.subi %c2_i32_313, %c0_i32_311 : i32
    %830 = arith.index_cast %829 : i32 to index
    %c0_314 = arith.constant 0 : index
    %831 = vector.load %arg21[%830, %c0_314] : memref<3x512xf32, #tpu.memory_space<vmem>>, vector<1x512xf32>
    %832 = arith.select %826, %831, %828 : vector<1x512xi1>, vector<1x512xf32>
    %cst_315 = arith.constant dense<0.000000e+00> : vector<1x512xf32>
    %833 = tpu.matmul %797, %796, %cst_315 {dimension_numbers = #tpu.dot_dimension_numbers<[1], [0], [0], [1], [0, 0, 1, 1], [], []>} : vector<1x128xf32>, vector<128x512xf32>, vector<1x512xf32> -> vector<1x512xf32>
    %834 = arith.addf %832, %833 : vector<1x512xf32>
    %835 = vector.extract_strided_slice %834 {offsets = [0, 0], sizes = [1, 128], strides = [1, 1]} : vector<1x512xf32> to vector<1x128xf32>
    %cst_316 = arith.constant 5.000000e-01 : f32
    %836 = vector.broadcast %cst_316 : f32 to vector<1x128xf32>
    %837 = arith.mulf %836, %835 : vector<1x128xf32>
    %838 = math.tanh %837 : vector<1x128xf32>
    %cst_317 = arith.constant 5.000000e-01 : f32
    %839 = vector.broadcast %cst_317 : f32 to vector<1x128xf32>
    %840 = arith.mulf %839, %838 : vector<1x128xf32>
    %cst_318 = arith.constant 5.000000e-01 : f32
    %841 = vector.broadcast %cst_318 : f32 to vector<1x128xf32>
    %842 = arith.addf %840, %841 : vector<1x128xf32>
    %843 = vector.extract_strided_slice %834 {offsets = [0, 128], sizes = [1, 128], strides = [1, 1]} : vector<1x512xf32> to vector<1x128xf32>
    %cst_319 = arith.constant 5.000000e-01 : f32
    %844 = vector.broadcast %cst_319 : f32 to vector<1x128xf32>
    %845 = arith.mulf %844, %843 : vector<1x128xf32>
    %846 = math.tanh %845 : vector<1x128xf32>
    %cst_320 = arith.constant 5.000000e-01 : f32
    %847 = vector.broadcast %cst_320 : f32 to vector<1x128xf32>
    %848 = arith.mulf %847, %846 : vector<1x128xf32>
    %cst_321 = arith.constant 5.000000e-01 : f32
    %849 = vector.broadcast %cst_321 : f32 to vector<1x128xf32>
    %850 = arith.addf %848, %849 : vector<1x128xf32>
    %851 = vector.extract_strided_slice %834 {offsets = [0, 256], sizes = [1, 128], strides = [1, 1]} : vector<1x512xf32> to vector<1x128xf32>
    %852 = math.tanh %851 : vector<1x128xf32>
    %853 = vector.extract_strided_slice %834 {offsets = [0, 384], sizes = [1, 128], strides = [1, 1]} : vector<1x512xf32> to vector<1x128xf32>
    %cst_322 = arith.constant 5.000000e-01 : f32
    %854 = vector.broadcast %cst_322 : f32 to vector<1x128xf32>
    %855 = arith.mulf %854, %853 : vector<1x128xf32>
    %856 = math.tanh %855 : vector<1x128xf32>
    %cst_323 = arith.constant 5.000000e-01 : f32
    %857 = vector.broadcast %cst_323 : f32 to vector<1x128xf32>
    %858 = arith.mulf %857, %856 : vector<1x128xf32>
    %cst_324 = arith.constant 5.000000e-01 : f32
    %859 = vector.broadcast %cst_324 : f32 to vector<1x128xf32>
    %860 = arith.addf %858, %859 : vector<1x128xf32>
    %861 = arith.mulf %850, %798 : vector<1x128xf32>
    %862 = arith.mulf %842, %852 : vector<1x128xf32>
    %863 = arith.addf %861, %862 : vector<1x128xf32>
    %864 = math.tanh %863 : vector<1x128xf32>
    %865 = arith.mulf %860, %864 : vector<1x128xf32>
    %866 = arith.index_cast %c0_i32_311 : i32 to index
    %c0_325 = arith.constant 0 : index
    %867 = vector.load %arg22[%866, %c0_325] : memref<3x128xf32, #tpu.memory_space<vmem>>, vector<1x128xf32>
    tpu.vector_store %arg22[%866, %c0_325], %865 {strides = array<i32>} : memref<3x128xf32, #tpu.memory_space<vmem>>, vector<1x128xf32>,
    %c2_i32_326 = arith.constant 2 : i32
    %868 = arith.subi %c2_i32_326, %c0_i32_311 : i32
    %869 = arith.index_cast %868 : i32 to index
    %c0_327 = arith.constant 0 : index
    %870 = vector.load %arg23[%869, %c0_327] : memref<3x128xf32, #tpu.memory_space<vmem>>, vector<1x128xf32>
    tpu.vector_store %arg23[%869, %c0_327], %865 {strides = array<i32>} : memref<3x128xf32, #tpu.memory_space<vmem>>, vector<1x128xf32>,
    %c1_i32_328 = arith.constant 1 : i32
    %871 = arith.index_cast %c1_i32_328 : i32 to index
    %c0_329 = arith.constant 0 : index
    %872 = vector.load %arg21[%871, %c0_329] : memref<3x512xf32, #tpu.memory_space<vmem>>, vector<1x512xf32>
    %c2_i32_330 = arith.constant 2 : i32
    %873 = arith.subi %c2_i32_330, %c1_i32_328 : i32
    %874 = arith.index_cast %873 : i32 to index
    %c0_331 = arith.constant 0 : index
    %875 = vector.load %arg21[%874, %c0_331] : memref<3x512xf32, #tpu.memory_space<vmem>>, vector<1x512xf32>
    %876 = arith.select %826, %875, %872 : vector<1x512xi1>, vector<1x512xf32>
    %cst_332 = arith.constant dense<0.000000e+00> : vector<1x512xf32>
    %877 = tpu.matmul %865, %796, %cst_332 {dimension_numbers = #tpu.dot_dimension_numbers<[1], [0], [0], [1], [0, 0, 1, 1], [], []>} : vector<1x128xf32>, vector<128x512xf32>, vector<1x512xf32> -> vector<1x512xf32>
    %878 = arith.addf %876, %877 : vector<1x512xf32>
    %879 = vector.extract_strided_slice %878 {offsets = [0, 0], sizes = [1, 128], strides = [1, 1]} : vector<1x512xf32> to vector<1x128xf32>
    %cst_333 = arith.constant 5.000000e-01 : f32
    %880 = vector.broadcast %cst_333 : f32 to vector<1x128xf32>
    %881 = arith.mulf %880, %879 : vector<1x128xf32>
    %882 = math.tanh %881 : vector<1x128xf32>
    %cst_334 = arith.constant 5.000000e-01 : f32
    %883 = vector.broadcast %cst_334 : f32 to vector<1x128xf32>
    %884 = arith.mulf %883, %882 : vector<1x128xf32>
    %cst_335 = arith.constant 5.000000e-01 : f32
    %885 = vector.broadcast %cst_335 : f32 to vector<1x128xf32>
    %886 = arith.addf %884, %885 : vector<1x128xf32>
    %887 = vector.extract_strided_slice %878 {offsets = [0, 128], sizes = [1, 128], strides = [1, 1]} : vector<1x512xf32> to vector<1x128xf32>
    %cst_336 = arith.constant 5.000000e-01 : f32
    %888 = vector.broadcast %cst_336 : f32 to vector<1x128xf32>
    %889 = arith.mulf %888, %887 : vector<1x128xf32>
    %890 = math.tanh %889 : vector<1x128xf32>
    %cst_337 = arith.constant 5.000000e-01 : f32
    %891 = vector.broadcast %cst_337 : f32 to vector<1x128xf32>
    %892 = arith.mulf %891, %890 : vector<1x128xf32>
    %cst_338 = arith.constant 5.000000e-01 : f32
    %893 = vector.broadcast %cst_338 : f32 to vector<1x128xf32>
    %894 = arith.addf %892, %893 : vector<1x128xf32>
    %895 = vector.extract_strided_slice %878 {offsets = [0, 256], sizes = [1, 128], strides = [1, 1]} : vector<1x512xf32> to vector<1x128xf32>
    %896 = math.tanh %895 : vector<1x128xf32>
    %897 = vector.extract_strided_slice %878 {offsets = [0, 384], sizes = [1, 128], strides = [1, 1]} : vector<1x512xf32> to vector<1x128xf32>
    %cst_339 = arith.constant 5.000000e-01 : f32
    %898 = vector.broadcast %cst_339 : f32 to vector<1x128xf32>
    %899 = arith.mulf %898, %897 : vector<1x128xf32>
    %900 = math.tanh %899 : vector<1x128xf32>
    %cst_340 = arith.constant 5.000000e-01 : f32
    %901 = vector.broadcast %cst_340 : f32 to vector<1x128xf32>
    %902 = arith.mulf %901, %900 : vector<1x128xf32>
    %cst_341 = arith.constant 5.000000e-01 : f32
    %903 = vector.broadcast %cst_341 : f32 to vector<1x128xf32>
    %904 = arith.addf %902, %903 : vector<1x128xf32>
    %905 = arith.mulf %894, %863 : vector<1x128xf32>
    %906 = arith.mulf %886, %896 : vector<1x128xf32>
    %907 = arith.addf %905, %906 : vector<1x128xf32>
    %908 = math.tanh %907 : vector<1x128xf32>
    %909 = arith.mulf %904, %908 : vector<1x128xf32>
    %910 = arith.index_cast %c1_i32_328 : i32 to index
    %c0_342 = arith.constant 0 : index
    %911 = vector.load %arg22[%910, %c0_342] : memref<3x128xf32, #tpu.memory_space<vmem>>, vector<1x128xf32>
    tpu.vector_store %arg22[%910, %c0_342], %909 {strides = array<i32>} : memref<3x128xf32, #tpu.memory_space<vmem>>, vector<1x128xf32>,
    %c2_i32_343 = arith.constant 2 : i32
    %912 = arith.subi %c2_i32_343, %c1_i32_328 : i32
    %913 = arith.index_cast %912 : i32 to index
    %c0_344 = arith.constant 0 : index
    %914 = vector.load %arg23[%913, %c0_344] : memref<3x128xf32, #tpu.memory_space<vmem>>, vector<1x128xf32>
    tpu.vector_store %arg23[%913, %c0_344], %909 {strides = array<i32>} : memref<3x128xf32, #tpu.memory_space<vmem>>, vector<1x128xf32>,
    %c2_i32_345 = arith.constant 2 : i32
    %915 = arith.index_cast %c2_i32_345 : i32 to index
    %c0_346 = arith.constant 0 : index
    %916 = vector.load %arg21[%915, %c0_346] : memref<3x512xf32, #tpu.memory_space<vmem>>, vector<1x512xf32>
    %c2_i32_347 = arith.constant 2 : i32
    %917 = arith.subi %c2_i32_347, %c2_i32_345 : i32
    %918 = arith.index_cast %917 : i32 to index
    %c0_348 = arith.constant 0 : index
    %919 = vector.load %arg21[%918, %c0_348] : memref<3x512xf32, #tpu.memory_space<vmem>>, vector<1x512xf32>
    %920 = arith.select %826, %919, %916 : vector<1x512xi1>, vector<1x512xf32>
    %cst_349 = arith.constant dense<0.000000e+00> : vector<1x512xf32>
    %921 = tpu.matmul %909, %796, %cst_349 {dimension_numbers = #tpu.dot_dimension_numbers<[1], [0], [0], [1], [0, 0, 1, 1], [], []>} : vector<1x128xf32>, vector<128x512xf32>, vector<1x512xf32> -> vector<1x512xf32>
    %922 = arith.addf %920, %921 : vector<1x512xf32>
    %923 = vector.extract_strided_slice %922 {offsets = [0, 0], sizes = [1, 128], strides = [1, 1]} : vector<1x512xf32> to vector<1x128xf32>
    %cst_350 = arith.constant 5.000000e-01 : f32
    %924 = vector.broadcast %cst_350 : f32 to vector<1x128xf32>
    %925 = arith.mulf %924, %923 : vector<1x128xf32>
    %926 = math.tanh %925 : vector<1x128xf32>
    %cst_351 = arith.constant 5.000000e-01 : f32
    %927 = vector.broadcast %cst_351 : f32 to vector<1x128xf32>
    %928 = arith.mulf %927, %926 : vector<1x128xf32>
    %cst_352 = arith.constant 5.000000e-01 : f32
    %929 = vector.broadcast %cst_352 : f32 to vector<1x128xf32>
    %930 = arith.addf %928, %929 : vector<1x128xf32>
    %931 = vector.extract_strided_slice %922 {offsets = [0, 128], sizes = [1, 128], strides = [1, 1]} : vector<1x512xf32> to vector<1x128xf32>
    %cst_353 = arith.constant 5.000000e-01 : f32
    %932 = vector.broadcast %cst_353 : f32 to vector<1x128xf32>
    %933 = arith.mulf %932, %931 : vector<1x128xf32>
    %934 = math.tanh %933 : vector<1x128xf32>
    %cst_354 = arith.constant 5.000000e-01 : f32
    %935 = vector.broadcast %cst_354 : f32 to vector<1x128xf32>
    %936 = arith.mulf %935, %934 : vector<1x128xf32>
    %cst_355 = arith.constant 5.000000e-01 : f32
    %937 = vector.broadcast %cst_355 : f32 to vector<1x128xf32>
    %938 = arith.addf %936, %937 : vector<1x128xf32>
    %939 = vector.extract_strided_slice %922 {offsets = [0, 256], sizes = [1, 128], strides = [1, 1]} : vector<1x512xf32> to vector<1x128xf32>
    %940 = math.tanh %939 : vector<1x128xf32>
    %941 = vector.extract_strided_slice %922 {offsets = [0, 384], sizes = [1, 128], strides = [1, 1]} : vector<1x512xf32> to vector<1x128xf32>
    %cst_356 = arith.constant 5.000000e-01 : f32
    %942 = vector.broadcast %cst_356 : f32 to vector<1x128xf32>
    %943 = arith.mulf %942, %941 : vector<1x128xf32>
    %944 = math.tanh %943 : vector<1x128xf32>
    %cst_357 = arith.constant 5.000000e-01 : f32
    %945 = vector.broadcast %cst_357 : f32 to vector<1x128xf32>
    %946 = arith.mulf %945, %944 : vector<1x128xf32>
    %cst_358 = arith.constant 5.000000e-01 : f32
    %947 = vector.broadcast %cst_358 : f32 to vector<1x128xf32>
    %948 = arith.addf %946, %947 : vector<1x128xf32>
    %949 = arith.mulf %938, %907 : vector<1x128xf32>
    %950 = arith.mulf %930, %940 : vector<1x128xf32>
    %951 = arith.addf %949, %950 : vector<1x128xf32>
    %952 = math.tanh %951 : vector<1x128xf32>
    %953 = arith.mulf %948, %952 : vector<1x128xf32>
    %954 = arith.index_cast %c2_i32_345 : i32 to index
    %c0_359 = arith.constant 0 : index
    %955 = vector.load %arg22[%954, %c0_359] : memref<3x128xf32, #tpu.memory_space<vmem>>, vector<1x128xf32>
    tpu.vector_store %arg22[%954, %c0_359], %953 {strides = array<i32>} : memref<3x128xf32, #tpu.memory_space<vmem>>, vector<1x128xf32>,
    %c2_i32_360 = arith.constant 2 : i32
    %956 = arith.subi %c2_i32_360, %c2_i32_345 : i32
    %957 = arith.index_cast %956 : i32 to index
    %c0_361 = arith.constant 0 : index
    %958 = vector.load %arg23[%957, %c0_361] : memref<3x128xf32, #tpu.memory_space<vmem>>, vector<1x128xf32>
    tpu.vector_store %arg23[%957, %c0_361], %953 {strides = array<i32>} : memref<3x128xf32, #tpu.memory_space<vmem>>, vector<1x128xf32>,
    %c3_i32_362 = arith.constant 3 : i32
    %959 = tpu.iota {dimensions = array<i32: 1>} : vector<3x128xi32>
    %c16_i32_363 = arith.constant 16 : i32
    %960 = vector.broadcast %c16_i32_363 : i32 to vector<3x128xi32>
    %961 = arith.cmpi slt, %959, %960 : vector<3x128xi32>
    %c0_364 = arith.constant 0 : index
    %c0_365 = arith.constant 0 : index
    %962 = vector.load %arg22[%c0_364, %c0_365] : memref<3x128xf32, #tpu.memory_space<vmem>>, vector<3x128xf32>
    %c0_366 = arith.constant 0 : index
    %c0_367 = arith.constant 0 : index
    %963 = vector.load %arg23[%c0_366, %c0_367] : memref<3x128xf32, #tpu.memory_space<vmem>>, vector<3x128xf32>
    %964 = arith.select %961, %962, %963 : vector<3x128xi1>, vector<3x128xf32>
    %c0_368 = arith.constant 0 : index
    %c0_369 = arith.constant 0 : index
    %965 = vector.load %arg13[%c0_368, %c0_369] : memref<128x5xf32, #tpu.memory_space<vmem>>, vector<128x5xf32>
    %cst_370 = arith.constant dense<0.000000e+00> : vector<3x5xf32>
    %966 = tpu.matmul %964, %965, %cst_370 {dimension_numbers = #tpu.dot_dimension_numbers<[1], [0], [0], [1], [0, 0, 1, 1], [], []>} : vector<3x128xf32>, vector<128x5xf32>, vector<3x5xf32> -> vector<3x5xf32>
    %c0_371 = arith.constant 0 : index
    %c0_372 = arith.constant 0 : index
    %967 = vector.load %arg14[%c0_371, %c0_372] : memref<1x5xf32, #tpu.memory_space<vmem>>, vector<1x5xf32>
    %968 = vector.broadcast %967 : vector<1x5xf32> to vector<3x5xf32>
    %969 = arith.addf %966, %968 : vector<3x5xf32>
    %c0_373 = arith.constant 0 : index
    %c0_374 = arith.constant 0 : index
    %970 = vector.load %arg24[%c0_373, %c0_374] : memref<3x5xf32, #tpu.memory_space<vmem>>, vector<3x5xf32>
    tpu.vector_store %arg24[%c0_373, %c0_374], %969 {strides = array<i32>} : memref<3x5xf32, #tpu.memory_space<vmem>>, vector<3x5xf32>,
    %c0_375 = arith.constant 0 : index
    %c0_376 = arith.constant 0 : index
    %971 = vector.load %arg15[%c0_375, %c0_376] : memref<5x5xf32, #tpu.memory_space<vmem>>, vector<5x5xf32>
    %972 = tpu.iota {dimensions = array<i32: 1>} : vector<1x5xi32>
    %973 = arith.sitofp %972 : vector<1x5xi32> to vector<1x5xf32>
    %974 = tpu.iota {dimensions = array<i32: 1>} : vector<5x5xi32>
    %975 = arith.sitofp %974 : vector<5x5xi32> to vector<5x5xf32>
    %976 = tpu.iota {dimensions = array<i32: 0>} : vector<5x5xi32>
    %977 = tpu.iota {dimensions = array<i32: 1>} : vector<5x5xi32>
    %978 = arith.cmpi eq, %976, %977 : vector<5x5xi32>
    %979 = arith.extui %978 : vector<5x5xi1> to vector<5x5xi32>
    %980 = arith.sitofp %979 : vector<5x5xi32> to vector<5x5xf32>
    %c3_i32_377 = arith.constant 3 : i32
    %981 = vector.broadcast %c3_i32_377 : i32 to vector<1x5xi32>
    %982 = arith.cmpi eq, %972, %981 : vector<1x5xi32>
    %cst_378 = arith.constant 0.000000e+00 : f32
    %cst_379 = arith.constant -1.000000e+04 : f32
    %983 = vector.broadcast %cst_378 : f32 to vector<1x5xf32>
    %984 = vector.broadcast %cst_379 : f32 to vector<1x5xf32>
    %985 = arith.select %982, %983, %984 : vector<1x5xi1>, vector<1x5xf32>
    %cst_380 = arith.constant 5.000000e+00 : f32
    %c0_i32_381 = arith.constant 0 : i32
    %986 = vector.broadcast %985 : vector<1x5xf32> to vector<5x5xf32>
    %987 = arith.addf %971, %986 : vector<5x5xf32>
    %cst_382 = arith.constant dense<0xFF800000> : vector<5xf32>
    %988 = vector.multi_reduction <maximumf>, %987, %cst_382 [1] : vector<5x5xf32> to vector<5xf32>
    %989 = vector.shape_cast %988 : vector<5xf32> to vector<5x1xf32>
    %990 = vector.broadcast %989 : vector<5x1xf32> to vector<5x5xf32>
    %991 = arith.cmpf oeq, %987, %990 : vector<5x5xf32>
    %992 = vector.broadcast %cst_380 : f32 to vector<5x5xf32>
    %993 = arith.select %991, %975, %992 : vector<5x5xi1>, vector<5x5xf32>
    %cst_383 = arith.constant dense<0x7F800000> : vector<5xf32>
    %994 = vector.multi_reduction <minimumf>, %993, %cst_383 [1] : vector<5x5xf32> to vector<5xf32>
    %995 = vector.shape_cast %994 : vector<5xf32> to vector<5x1xf32>
    %996 = vector.broadcast %989 : vector<5x1xf32> to vector<5x5xf32>
    %997 = arith.mulf %980, %996 : vector<5x5xf32>
    %cst_384 = arith.constant dense<0.000000e+00> : vector<5xf32>
    %998 = vector.multi_reduction <add>, %997, %cst_384 [0] : vector<5x5xf32> to vector<5xf32>
    %999 = vector.shape_cast %998 : vector<5xf32> to vector<1x5xf32>
    %1000 = vector.broadcast %995 : vector<5x1xf32> to vector<5x5xf32>
    %1001 = arith.mulf %980, %1000 : vector<5x5xf32>
    %cst_385 = arith.constant dense<0.000000e+00> : vector<5xf32>
    %1002 = vector.multi_reduction <add>, %1001, %cst_385 [0] : vector<5x5xf32> to vector<5xf32>
    %1003 = vector.shape_cast %1002 : vector<5xf32> to vector<1x5xf32>
    %1004 = arith.fptosi %1003 : vector<1x5xf32> to vector<1x5xi32>
    %1005 = arith.index_cast %c0_i32_381 : i32 to index
    %c0_386 = arith.constant 0 : index
    %1006 = vector.load %arg25[%1005, %c0_386] : memref<3x5xi32, #tpu.memory_space<vmem>>, vector<1x5xi32>
    tpu.vector_store %arg25[%1005, %c0_386], %1004 {strides = array<i32>} : memref<3x5xi32, #tpu.memory_space<vmem>>, vector<1x5xi32>,
    %1007 = arith.index_cast %c0_i32_381 : i32 to index
    %c0_387 = arith.constant 0 : index
    %1008 = vector.load %arg24[%1007, %c0_387] : memref<3x5xf32, #tpu.memory_space<vmem>>, vector<1x5xf32>
    %1009 = arith.addf %999, %1008 : vector<1x5xf32>
    %c1_i32_388 = arith.constant 1 : i32
    %1010 = vector.broadcast %1009 : vector<1x5xf32> to vector<5x5xf32>
    %1011 = arith.addf %971, %1010 : vector<5x5xf32>
    %cst_389 = arith.constant dense<0xFF800000> : vector<5xf32>
    %1012 = vector.multi_reduction <maximumf>, %1011, %cst_389 [1] : vector<5x5xf32> to vector<5xf32>
    %1013 = vector.shape_cast %1012 : vector<5xf32> to vector<5x1xf32>
    %1014 = vector.broadcast %1013 : vector<5x1xf32> to vector<5x5xf32>
    %1015 = arith.cmpf oeq, %1011, %1014 : vector<5x5xf32>
    %1016 = vector.broadcast %cst_380 : f32 to vector<5x5xf32>
    %1017 = arith.select %1015, %975, %1016 : vector<5x5xi1>, vector<5x5xf32>
    %cst_390 = arith.constant dense<0x7F800000> : vector<5xf32>
    %1018 = vector.multi_reduction <minimumf>, %1017, %cst_390 [1] : vector<5x5xf32> to vector<5xf32>
    %1019 = vector.shape_cast %1018 : vector<5xf32> to vector<5x1xf32>
    %1020 = vector.broadcast %1013 : vector<5x1xf32> to vector<5x5xf32>
    %1021 = arith.mulf %980, %1020 : vector<5x5xf32>
    %cst_391 = arith.constant dense<0.000000e+00> : vector<5xf32>
    %1022 = vector.multi_reduction <add>, %1021, %cst_391 [0] : vector<5x5xf32> to vector<5xf32>
    %1023 = vector.shape_cast %1022 : vector<5xf32> to vector<1x5xf32>
    %1024 = vector.broadcast %1019 : vector<5x1xf32> to vector<5x5xf32>
    %1025 = arith.mulf %980, %1024 : vector<5x5xf32>
    %cst_392 = arith.constant dense<0.000000e+00> : vector<5xf32>
    %1026 = vector.multi_reduction <add>, %1025, %cst_392 [0] : vector<5x5xf32> to vector<5xf32>
    %1027 = vector.shape_cast %1026 : vector<5xf32> to vector<1x5xf32>
    %1028 = arith.fptosi %1027 : vector<1x5xf32> to vector<1x5xi32>
    %1029 = arith.index_cast %c1_i32_388 : i32 to index
    %c0_393 = arith.constant 0 : index
    %1030 = vector.load %arg25[%1029, %c0_393] : memref<3x5xi32, #tpu.memory_space<vmem>>, vector<1x5xi32>
    tpu.vector_store %arg25[%1029, %c0_393], %1028 {strides = array<i32>} : memref<3x5xi32, #tpu.memory_space<vmem>>, vector<1x5xi32>,
    %1031 = arith.index_cast %c1_i32_388 : i32 to index
    %c0_394 = arith.constant 0 : index
    %1032 = vector.load %arg24[%1031, %c0_394] : memref<3x5xf32, #tpu.memory_space<vmem>>, vector<1x5xf32>
    %1033 = arith.addf %1023, %1032 : vector<1x5xf32>
    %c2_i32_395 = arith.constant 2 : i32
    %1034 = vector.broadcast %1033 : vector<1x5xf32> to vector<5x5xf32>
    %1035 = arith.addf %971, %1034 : vector<5x5xf32>
    %cst_396 = arith.constant dense<0xFF800000> : vector<5xf32>
    %1036 = vector.multi_reduction <maximumf>, %1035, %cst_396 [1] : vector<5x5xf32> to vector<5xf32>
    %1037 = vector.shape_cast %1036 : vector<5xf32> to vector<5x1xf32>
    %1038 = vector.broadcast %1037 : vector<5x1xf32> to vector<5x5xf32>
    %1039 = arith.cmpf oeq, %1035, %1038 : vector<5x5xf32>
    %1040 = vector.broadcast %cst_380 : f32 to vector<5x5xf32>
    %1041 = arith.select %1039, %975, %1040 : vector<5x5xi1>, vector<5x5xf32>
    %cst_397 = arith.constant dense<0x7F800000> : vector<5xf32>
    %1042 = vector.multi_reduction <minimumf>, %1041, %cst_397 [1] : vector<5x5xf32> to vector<5xf32>
    %1043 = vector.shape_cast %1042 : vector<5xf32> to vector<5x1xf32>
    %1044 = vector.broadcast %1037 : vector<5x1xf32> to vector<5x5xf32>
    %1045 = arith.mulf %980, %1044 : vector<5x5xf32>
    %cst_398 = arith.constant dense<0.000000e+00> : vector<5xf32>
    %1046 = vector.multi_reduction <add>, %1045, %cst_398 [0] : vector<5x5xf32> to vector<5xf32>
    %1047 = vector.shape_cast %1046 : vector<5xf32> to vector<1x5xf32>
    %1048 = vector.broadcast %1043 : vector<5x1xf32> to vector<5x5xf32>
    %1049 = arith.mulf %980, %1048 : vector<5x5xf32>
    %cst_399 = arith.constant dense<0.000000e+00> : vector<5xf32>
    %1050 = vector.multi_reduction <add>, %1049, %cst_399 [0] : vector<5x5xf32> to vector<5xf32>
    %1051 = vector.shape_cast %1050 : vector<5xf32> to vector<1x5xf32>
    %1052 = arith.fptosi %1051 : vector<1x5xf32> to vector<1x5xi32>
    %1053 = arith.index_cast %c2_i32_395 : i32 to index
    %c0_400 = arith.constant 0 : index
    %1054 = vector.load %arg25[%1053, %c0_400] : memref<3x5xi32, #tpu.memory_space<vmem>>, vector<1x5xi32>
    tpu.vector_store %arg25[%1053, %c0_400], %1052 {strides = array<i32>} : memref<3x5xi32, #tpu.memory_space<vmem>>, vector<1x5xi32>,
    %1055 = arith.index_cast %c2_i32_395 : i32 to index
    %c0_401 = arith.constant 0 : index
    %1056 = vector.load %arg24[%1055, %c0_401] : memref<3x5xf32, #tpu.memory_space<vmem>>, vector<1x5xf32>
    %1057 = arith.addf %1047, %1056 : vector<1x5xf32>
    %c3_i32_402 = arith.constant 3 : i32
    %c4 = arith.constant 4 : index
    %c0_403 = arith.constant 0 : index
    %1058 = vector.load %arg15[%c4, %c0_403] : memref<5x5xf32, #tpu.memory_space<vmem>>, vector<1x5xf32>
    %1059 = arith.addf %1057, %1058 : vector<1x5xf32>
    %cst_404 = arith.constant dense<0xFF800000> : vector<1xf32>
    %1060 = vector.multi_reduction <maximumf>, %1059, %cst_404 [1] : vector<1x5xf32> to vector<1xf32>
    %1061 = vector.shape_cast %1060 : vector<1xf32> to vector<1x1xf32>
    %1062 = vector.broadcast %1061 : vector<1x1xf32> to vector<1x5xf32>
    %1063 = arith.cmpf oeq, %1059, %1062 : vector<1x5xf32>
    %cst_405 = arith.constant 5.000000e+00 : f32
    %1064 = vector.broadcast %cst_405 : f32 to vector<1x5xf32>
    %1065 = arith.select %1063, %973, %1064 : vector<1x5xi1>, vector<1x5xf32>
    %cst_406 = arith.constant dense<0x7F800000> : vector<1xf32>
    %1066 = vector.multi_reduction <minimumf>, %1065, %cst_406 [1] : vector<1x5xf32> to vector<1xf32>
    %1067 = vector.shape_cast %1066 : vector<1xf32> to vector<1x1xf32>
    %1068 = arith.fptosi %1067 : vector<1x1xf32> to vector<1x1xi32>
    %1069 = tpu.iota {dimensions = array<i32: 1>} : vector<1x3xi32>
    %c2_i32_407 = arith.constant 2 : i32
    %1070 = vector.broadcast %c2_i32_407 : i32 to vector<1x3xi32>
    %1071 = arith.cmpi eq, %1069, %1070 : vector<1x3xi32>
    %c0_i32_408 = arith.constant 0 : i32
    %1072 = vector.shape_cast %1068 : vector<1x1xi32> to vector<1x1xi32>
    %1073 = vector.broadcast %1072 : vector<1x1xi32> to vector<1x3xi32>
    %1074 = vector.broadcast %c0_i32_408 : i32 to vector<1x3xi32>
    %1075 = arith.select %1071, %1073, %1074 : vector<1x3xi1>, vector<1x3xi32>
    %c0_i32_409 = arith.constant 0 : i32
    %c2_i32_410 = arith.constant 2 : i32
    %1076 = arith.subi %c2_i32_410, %c0_i32_409 : i32
    %1077 = arith.index_cast %1076 : i32 to index
    %c0_411 = arith.constant 0 : index
    %1078 = vector.load %arg25[%1077, %c0_411] : memref<3x5xi32, #tpu.memory_space<vmem>>, vector<1x5xi32>
    %1079 = arith.sitofp %1078 : vector<1x5xi32> to vector<1x5xf32>
    %1080 = vector.broadcast %1068 : vector<1x1xi32> to vector<1x5xi32>
    %1081 = arith.cmpi eq, %972, %1080 : vector<1x5xi32>
    %cst_412 = arith.constant 0.000000e+00 : f32
    %1082 = vector.broadcast %cst_412 : f32 to vector<1x5xf32>
    %1083 = arith.select %1081, %1079, %1082 : vector<1x5xi1>, vector<1x5xf32>
    %cst_413 = arith.constant dense<0.000000e+00> : vector<1xf32>
    %1084 = vector.multi_reduction <add>, %1083, %cst_413 [1] : vector<1x5xf32> to vector<1xf32>
    %1085 = vector.shape_cast %1084 : vector<1xf32> to vector<1x1xf32>
    %1086 = arith.fptosi %1085 : vector<1x1xf32> to vector<1x1xi32>
    %c1_i32_414 = arith.constant 1 : i32
    %1087 = arith.subi %1076, %c1_i32_414 : i32
    %1088 = vector.broadcast %1087 : i32 to vector<1x3xi32>
    %1089 = arith.cmpi eq, %1069, %1088 : vector<1x3xi32>
    %1090 = vector.shape_cast %1086 : vector<1x1xi32> to vector<1x1xi32>
    %1091 = vector.broadcast %1090 : vector<1x1xi32> to vector<1x3xi32>
    %1092 = arith.select %1089, %1091, %1075 : vector<1x3xi1>, vector<1x3xi32>
    %c1_i32_415 = arith.constant 1 : i32
    %c2_i32_416 = arith.constant 2 : i32
    %1093 = arith.subi %c2_i32_416, %c1_i32_415 : i32
    %1094 = arith.index_cast %1093 : i32 to index
    %c0_417 = arith.constant 0 : index
    %1095 = vector.load %arg25[%1094, %c0_417] : memref<3x5xi32, #tpu.memory_space<vmem>>, vector<1x5xi32>
    %1096 = arith.sitofp %1095 : vector<1x5xi32> to vector<1x5xf32>
    %1097 = vector.broadcast %1086 : vector<1x1xi32> to vector<1x5xi32>
    %1098 = arith.cmpi eq, %972, %1097 : vector<1x5xi32>
    %cst_418 = arith.constant 0.000000e+00 : f32
    %1099 = vector.broadcast %cst_418 : f32 to vector<1x5xf32>
    %1100 = arith.select %1098, %1096, %1099 : vector<1x5xi1>, vector<1x5xf32>
    %cst_419 = arith.constant dense<0.000000e+00> : vector<1xf32>
    %1101 = vector.multi_reduction <add>, %1100, %cst_419 [1] : vector<1x5xf32> to vector<1xf32>
    %1102 = vector.shape_cast %1101 : vector<1xf32> to vector<1x1xf32>
    %1103 = arith.fptosi %1102 : vector<1x1xf32> to vector<1x1xi32>
    %c1_i32_420 = arith.constant 1 : i32
    %1104 = arith.subi %1093, %c1_i32_420 : i32
    %1105 = vector.broadcast %1104 : i32 to vector<1x3xi32>
    %1106 = arith.cmpi eq, %1069, %1105 : vector<1x3xi32>
    %1107 = vector.shape_cast %1103 : vector<1x1xi32> to vector<1x1xi32>
    %1108 = vector.broadcast %1107 : vector<1x1xi32> to vector<1x3xi32>
    %1109 = arith.select %1106, %1108, %1092 : vector<1x3xi1>, vector<1x3xi32>
    %c2_i32_421 = arith.constant 2 : i32
    %c0_422 = arith.constant 0 : index
    %c0_423 = arith.constant 0 : index
    %1110 = vector.load %arg16[%c0_422, %c0_423] : memref<1x1xf32, #tpu.memory_space<vmem>>, vector<1x1xf32>
    tpu.vector_store %arg16[%c0_422, %c0_423], %1061 {strides = array<i32>} : memref<1x1xf32, #tpu.memory_space<vmem>>, vector<1x1xf32>,
    %c0_424 = arith.constant 0 : index
    %c0_425 = arith.constant 0 : index
    %1111 = vector.load %arg17[%c0_424, %c0_425] : memref<1x3xi32, #tpu.memory_space<vmem>>, vector<1x3xi32>
    tpu.vector_store %arg17[%c0_424, %c0_425], %1109 {strides = array<i32>} : memref<1x3xi32, #tpu.memory_space<vmem>>, vector<1x3xi32>,
    return
  }
}

</mosaic_0001>

<bundles_post_ra>
// kernel: elmo_ncrf_forward.1
= control target key start
LH: loop header
LB: loop body
LE: loop exit
PB: predicated region body
PF: predicated region fallthrough
CT: control target
= control target key end

     0   :  { %s13920_s0 = inlined_call_operand.vmem [shape: s32[4], index: 0, kind: input, shape index: {}]   ;;  %s13921_s1 = inlined_call_operand.vmem [shape: bf16[16,1024], index: 1, kind: input, shape index: {}]   ;;  %s13922_s2 = inlined_call_operand.vmem [shape: bf16[1,1024], index: 2, kind: input, shape index: {}]   ;;  %s13923_s3 = inlined_call_operand.vmem [shape: bf16[1024,512], index: 3, kind: input, shape index: {}]   ;;  %s13924_s4 = inlined_call_operand.vmem [shape: f32[128,512], index: 4, kind: input, shape index: {}]   ;;  %s13925_s5 = inlined_call_operand.vmem [shape: f32[1,512], index: 5, kind: input, shape index: {}]   ;;  %s13926_s6 = inlined_call_operand.vmem [shape: f32[2,128], index: 6, kind: input, shape index: {}]   ;;  %s13927_s7 = inlined_call_operand.vmem [shape: bf16[1024,128], index: 7, kind: input, shape index: {}]   ;;  %s13928_s8 = inlined_call_operand.vmem [shape: f32[1,128], index: 8, kind: input, shape index: {}]   ;;  %s13929_s9 = inlined_call_operand.vmem [shape: f32[128,512], index: 9, kind: input, shape index: {}]   ;;  %s13930_s10 = inlined_call_operand.vmem [shape: f32[128,512], index: 10, kind: input, shape index: {}]   ;;  %s13931_s11 = inlined_call_operand.vmem [shape: f32[1,512], index: 11, kind: input, shape index: {}]   ;;  %s13932_s12 = inlined_call_operand.vmem [shape: f32[2,128], index: 12, kind: input, shape index: {}]   ;;  %s13933_s13 = inlined_call_operand.vmem [shape: f32[128,5], index: 13, kind: input, shape index: {}]   ;;  %s13934_s14 = inlined_call_operand.vmem [shape: f32[1,5], index: 14, kind: input, shape index: {}]   ;;  %s13935_s15 = inlined_call_operand.vmem [shape: f32[5,5], index: 15, kind: input, shape index: {}]   ;;  %s13936_s16 = inlined_call_operand.hbm [shape: f32[1,1], index: 16, kind: output, shape index: {0}]   ;;  %s13937_s17 = inlined_call_operand.hbm [shape: s32[1,3], index: 17, kind: output, shape index: {1}]  }
   0x1   :  { %14209 = sst [smem:[#allocation63_spill]] %s13920_s0 }
   0x2   :  { %14210 = sst [smem:[#allocation64_spill]] %s13921_s1 }
   0x3   :  { %23 = vsyncpa [#allocation12], 0 }
   0x4   :  { %24 = vsyncpa [#allocation11], 0 }
   0x5   :  { %25 = vsyncpa [#allocation15], 0  ;;  %s14211_s26 = sld [smem:[#allocation63_spill]] }
   0xb   :  { %s32_s27 = sshll.u32 %s14211_s26, 4  ;;  %s33_s27 = int_to_ptr.vmem [resolvable:$true] %s32_s27 }
   0xc   :  { %s9075_s28 = scalar_lea.vmem %s33_s27, 16  ;;  %p9080_p1 = scmp.lt.s32.totalorder %s33_s27, %s33_s27 }
   0xd   :  { %p9076_p0 = scmp.ne.s32.totalorder %s33_s27, %s9075_s28  ;;  %p9081_p2 = scmp.lt.s32.totalorder %s9075_s28, %s9075_s28 }
   0xf   :  { %p9082_p3 = por %p9081_p2, %p9080_p1 }
  0x11   :  { %p9083_p4 = pnand %p9082_p3, %p9076_p0 }
  0x13   :  { %9086 = shalt.err (!%p9083_p4)
}
  0x14   :  { %s9133_s29 = smov [#allocation10]  }
  0x15   :  { %35 = dma.vmem_to_smem %s33_s27, 16, %s9133_s29, [#allocation12]  }
  0x16   :  { %9127 = dma.done.wait [#allocation12], 16  }
  0x17   :  { %9128 = vsyncadd [#allocation12], 4294967280 }
  0x18   :  { %69 = sfence }
  0x19   :  { %v8240_v0 = vld [vmem:[%s13923_s3 + $0xe4] ss:$16 sps:$4 sm:$0xff]   ;;  %v8244_v2 = vld [vmem:[%s13923_s3 + $0xe0] ss:$16 sps:$4 sm:$0xff]   ;;  %s14212_s23 = sld [smem:[#allocation64_spill]]  ;;  %vm9136_vm12 = vmmov 0  }
  0x1a   :  { %v8242_v1 = vld [vmem:[%s13923_s3 + $0x2e4] ss:$16 sps:$4 sm:$0xff]   ;;  %1743 = vmatprep.subr.bf16.mxu0 %v8240_v0  ;;  %v8245_v3 = vld [vmem:[%s13923_s3 + $0x2e0] ss:$16 sps:$4 sm:$0xff]   ;;  %s8054_s29 = sld [smem:[#allocation10 + $0x1]] }
  0x1b   :  { %1786 = vmatprep.subr.bf16.mxu1 %v8242_v1  ;;  %v8246_v4 = vld [vmem:[%s13923_s3 + $0xc4] ss:$16 sps:$4 sm:$0xff]   ;;  %1744 = vmatpush1.bf16.msra.mxu0 %v8244_v2  ;;  %v8250_v6 = vld [vmem:[%s13923_s3 + $0xc0] ss:$16 sps:$4 sm:$0xff]   ;;  %s8056_s0 = sld [smem:[#allocation10 + $0x3]] }
  0x1c   :  { %1787 = vmatpush1.bf16.msra.mxu1 %v8245_v3  ;;  %v8248_v5 = vld [vmem:[%s13923_s3 + $0x2c4] ss:$16 sps:$4 sm:$0xff]   ;;  %1745 = vmatprep.subr.bf16.mxu0 %v8246_v4  ;;  %v8251_v7 = vld [vmem:[%s13923_s3 + $0x2c0] ss:$16 sps:$4 sm:$0xff]  }
  0x1d   :  { %1788 = vmatprep.subr.bf16.mxu1 %v8248_v5  ;;  %v8252_v8 = vld [vmem:[%s13923_s3 + $0xa4] ss:$16 sps:$4 sm:$0xff]   ;;  %v8256_v10 = vld [vmem:[%s13923_s3 + $0xa0] ss:$16 sps:$4 sm:$0xff]  }
  0x1e   :  { %v8254_v9 = vld [vmem:[%s13923_s3 + $0x2a4] ss:$16 sps:$4 sm:$0xff]   ;;  %v8257_v11 = vld [vmem:[%s13923_s3 + $0x2a0] ss:$16 sps:$4 sm:$0xff]  }
  0x1f   :  { %1746 = vmatpush1.bf16.msra.mxu0 %v8250_v6  ;;  %v8258_v12 = vld [vmem:[%s13923_s3 + $0x84] ss:$16 sps:$4 sm:$0xff]   ;;  %v8262_v14 = vld [vmem:[%s13923_s3 + $0x80] ss:$16 sps:$4 sm:$0xff]   ;;  %v72_v50 = vld [vmem:[%s14212_s23 + $0x8] sm:$0xff] }
  0x20   :  { %1789 = vmatpush1.bf16.msra.mxu1 %v8251_v7  ;;  %1747 = vmatprep.subr.bf16.mxu0 %v8252_v8  ;;  %v8260_v13 = vld [vmem:[%s13923_s3 + $0x284] ss:$16 sps:$4 sm:$0xff]   ;;  %v8263_v15 = vld [vmem:[%s13923_s3 + $0x280] ss:$16 sps:$4 sm:$0xff]   ;;  %v76_v51 = vld [vmem:[%s14212_s23 + $0x28] sm:$0xff] }
  0x21   :  { %1790 = vmatprep.subr.bf16.mxu1 %v8254_v9  ;;  %v8264_v16 = vld [vmem:[%s13923_s3 + $0x64] ss:$16 sps:$4 sm:$0xff]   ;;  %v8268_v18 = vld [vmem:[%s13923_s3 + $0x60] ss:$16 sps:$4 sm:$0xff]   ;;  %v9398_v55 = vcombine.high %v72_v50, %v76_v51  ;;  %v9452_v9 = vcombine.low %v72_v50, %v76_v51 }
  0x22   :  { %v8266_v17 = vld [vmem:[%s13923_s3 + $0x264] ss:$16 sps:$4 sm:$0xff]   ;;  %v8269_v19 = vld [vmem:[%s13923_s3 + $0x260] ss:$16 sps:$4 sm:$0xff]  }
  0x23   :  { %1748 = vmatpush1.bf16.msra.mxu0 %v8256_v10  ;;  %v8270_v20 = vld [vmem:[%s13923_s3 + $0x44] ss:$16 sps:$4 sm:$0xff]   ;;  %v8274_v22 = vld [vmem:[%s13923_s3 + $0x40] ss:$16 sps:$4 sm:$0xff]   ;;  %1818 = vmatprep.mubr.bf16.mxu1 %v9398_v55 }
  0x24   :  { %1791 = vmatpush1.bf16.msra.mxu1 %v8257_v11  ;;  %1749 = vmatprep.subr.bf16.mxu0 %v8258_v12  ;;  %v8272_v21 = vld [vmem:[%s13923_s3 + $0x244] ss:$16 sps:$4 sm:$0xff]   ;;  %v8275_v23 = vld [vmem:[%s13923_s3 + $0x240] ss:$16 sps:$4 sm:$0xff]  }
  0x25   :  { %1792 = vmatprep.subr.bf16.mxu1 %v8260_v13  ;;  %v8276_v24 = vld [vmem:[%s13923_s3 + $0x24] ss:$16 sps:$4 sm:$0xff]   ;;  %v8280_v26 = vld [vmem:[%s13923_s3 + $0x20] ss:$16 sps:$4 sm:$0xff]  }
  0x26   :  { %v8278_v25 = vld [vmem:[%s13923_s3 + $0x224] ss:$16 sps:$4 sm:$0xff]   ;;  %v8281_v27 = vld [vmem:[%s13923_s3 + $0x220] ss:$16 sps:$4 sm:$0xff]  }
  0x27   :  { %1750 = vmatpush1.bf16.msra.mxu0 %v8262_v14  ;;  %v8282_v28 = vld [vmem:[%s13923_s3 + $0x4] ss:$16 sps:$4 sm:$0xff]   ;;  %v8286_v30 = vld [vmem:[%s13923_s3] ss:$16 sps:$4 sm:$0xff]  }
  0x28   :  { %1793 = vmatpush1.bf16.msra.mxu1 %v8263_v15  ;;  %1751 = vmatprep.subr.bf16.mxu0 %v8264_v16  ;;  %v8284_v29 = vld [vmem:[%s13923_s3 + $0x204] ss:$16 sps:$4 sm:$0xff]   ;;  %v8287_v31 = vld [vmem:[%s13923_s3 + $0x200] ss:$16 sps:$4 sm:$0xff]  }
  0x29   :  { %1794 = vmatprep.subr.bf16.mxu1 %v8266_v17  ;;  %v8288_v32 = vld [vmem:[%s13923_s3 + $0x1e4] ss:$16 sps:$4 sm:$0xff]   ;;  %v8292_v34 = vld [vmem:[%s13923_s3 + $0x1e0] ss:$16 sps:$4 sm:$0xff]  }
  0x2a   :  { %v8290_v33 = vld [vmem:[%s13923_s3 + $0x3e4] ss:$16 sps:$4 sm:$0xff]   ;;  %v8293_v35 = vld [vmem:[%s13923_s3 + $0x3e0] ss:$16 sps:$4 sm:$0xff]  }
  0x2b   :  { %1752 = vmatpush1.bf16.msra.mxu0 %v8268_v18  ;;  %v8294_v36 = vld [vmem:[%s13923_s3 + $0x1c4] ss:$16 sps:$4 sm:$0xff]   ;;  %v8298_v38 = vld [vmem:[%s13923_s3 + $0x1c0] ss:$16 sps:$4 sm:$0xff]  }
  0x2c   :  { %1795 = vmatpush1.bf16.msra.mxu1 %v8269_v19  ;;  %1753 = vmatprep.subr.bf16.mxu0 %v8270_v20  ;;  %v8296_v37 = vld [vmem:[%s13923_s3 + $0x3c4] ss:$16 sps:$4 sm:$0xff]   ;;  %v8299_v39 = vld [vmem:[%s13923_s3 + $0x3c0] ss:$16 sps:$4 sm:$0xff]  }
  0x2d   :  { %1796 = vmatprep.subr.bf16.mxu1 %v8272_v21  ;;  %v8300_v40 = vld [vmem:[%s13923_s3 + $0x1a4] ss:$16 sps:$4 sm:$0xff]   ;;  %v8304_v42 = vld [vmem:[%s13923_s3 + $0x1a0] ss:$16 sps:$4 sm:$0xff]  }
  0x2e   :  { %v8302_v41 = vld [vmem:[%s13923_s3 + $0x3a4] ss:$16 sps:$4 sm:$0xff]   ;;  %v8305_v43 = vld [vmem:[%s13923_s3 + $0x3a0] ss:$16 sps:$4 sm:$0xff]  }
  0x2f   :  { %1754 = vmatpush1.bf16.msra.mxu0 %v8274_v22  ;;  %v8306_v44 = vld [vmem:[%s13923_s3 + $0x184] ss:$16 sps:$4 sm:$0xff]   ;;  %v8310_v46 = vld [vmem:[%s13923_s3 + $0x180] ss:$16 sps:$4 sm:$0xff]  }
  0x30   :  { %1797 = vmatpush1.bf16.msra.mxu1 %v8275_v23  ;;  %1755 = vmatprep.subr.bf16.mxu0 %v8276_v24  ;;  %v8308_v45 = vld [vmem:[%s13923_s3 + $0x384] ss:$16 sps:$4 sm:$0xff]   ;;  %v8311_v47 = vld [vmem:[%s13923_s3 + $0x380] ss:$16 sps:$4 sm:$0xff]  }
  0x31   :  { %1798 = vmatprep.subr.bf16.mxu1 %v8278_v25  ;;  %v71_v48 = vld [vmem:[%s14212_s23] sm:$0xff] }
  0x32   :  { %v75_v49 = vld [vmem:[%s14212_s23 + $0x20] sm:$0xff] }
  0x33   :  { %1756 = vmatpush1.bf16.msra.mxu0 %v8280_v26  ;;  %v8312_v52 = vld [vmem:[%s13923_s3 + $0x164] ss:$16 sps:$4 sm:$0xff]   ;;  %v9393_v53 = vcombine.high %v71_v48, %v75_v49  ;;  %v8316_v56 = vld [vmem:[%s13923_s3 + $0x160] ss:$16 sps:$4 sm:$0xff]   ;;  %v9450_v8 = vcombine.low %v71_v48, %v75_v49 }
  0x34   :  { %1799 = vmatpush1.bf16.msra.mxu1 %v8281_v27  ;;  %1757 = vmatprep.subr.bf16.mxu0 %v8282_v28  ;;  %v8314_v54 = vld [vmem:[%s13923_s3 + $0x364] ss:$16 sps:$4 sm:$0xff]   ;;  %v8317_v57 = vld [vmem:[%s13923_s3 + $0x360] ss:$16 sps:$4 sm:$0xff]  }
  0x35   :  { %1800 = vmatprep.subr.bf16.mxu1 %v8284_v29  ;;  %1775 = vmatprep.mubr.bf16.mxu0 %v9393_v53  ;;  %v8318_v58 = vld [vmem:[%s13923_s3 + $0x144] ss:$16 sps:$4 sm:$0xff]   ;;  %v8322_v60 = vld [vmem:[%s13923_s3 + $0x140] ss:$16 sps:$4 sm:$0xff]  }
  0x36   :  { %v8320_v59 = vld [vmem:[%s13923_s3 + $0x344] ss:$16 sps:$4 sm:$0xff]   ;;  %v8323_v61 = vld [vmem:[%s13923_s3 + $0x340] ss:$16 sps:$4 sm:$0xff]  }
  0x37   :  { %1758 = vmatpush1.bf16.msra.mxu0 %v8286_v30  ;;  %v8324_v62 = vld [vmem:[%s13923_s3 + $0x124] ss:$16 sps:$4 sm:$0xff]   ;;  %v8328_v0 = vld [vmem:[%s13923_s3 + $0x120] ss:$16 sps:$4 sm:$0xff]  }
  0x38   :  { %1801 = vmatpush1.bf16.msra.mxu1 %v8287_v31  ;;  %1759 = vmatprep.subr.bf16.mxu0 %v8288_v32  ;;  %v8326_v63 = vld [vmem:[%s13923_s3 + $0x324] ss:$16 sps:$4 sm:$0xff]   ;;  %v8329_v1 = vld [vmem:[%s13923_s3 + $0x320] ss:$16 sps:$4 sm:$0xff]  }
  0x39   :  { %1802 = vmatprep.subr.bf16.mxu1 %v8290_v33  ;;  %v8330_v2 = vld [vmem:[%s13923_s3 + $0x104] ss:$16 sps:$4 sm:$0xff]   ;;  %v8334_v4 = vld [vmem:[%s13923_s3 + $0x100] ss:$16 sps:$4 sm:$0xff]  }
  0x3a   :  { %v8332_v3 = vld [vmem:[%s13923_s3 + $0x304] ss:$16 sps:$4 sm:$0xff]   ;;  %v8335_v5 = vld [vmem:[%s13923_s3 + $0x300] ss:$16 sps:$4 sm:$0xff]  }
  0x3b   :  { %1760 = vmatpush2.bf16.msra.mxu0 %v8292_v34  ;;  %v8338_v6 = vld [vmem:[%s13923_s3 + $0x4e4] ss:$16 sps:$4 sm:$0xff]   ;;  %v8336_v10 = vld [vmem:[%s13923_s3 + $0x4e0] ss:$16 sps:$4 sm:$0xff]  }
  0x3c   :  { %1803 = vmatpush2.bf16.msra.mxu1 %v8293_v35  ;;  %1761 = vmatprep.subr.bf16.mxu0 %v8294_v36  ;;  %v8341_v7 = vld [vmem:[%s13923_s3 + $0x6e4] ss:$16 sps:$4 sm:$0xff]   ;;  %v8339_v11 = vld [vmem:[%s13923_s3 + $0x6e0] ss:$16 sps:$4 sm:$0xff]  }
  0x3d   :  { %1804 = vmatprep.subr.bf16.mxu1 %v8296_v37  ;;  %v8344_v12 = vld [vmem:[%s13923_s3 + $0x4c4] ss:$16 sps:$4 sm:$0xff]   ;;  %v8342_v14 = vld [vmem:[%s13923_s3 + $0x4c0] ss:$16 sps:$4 sm:$0xff]  }
  0x3e   :  { %v8347_v13 = vld [vmem:[%s13923_s3 + $0x6c4] ss:$16 sps:$4 sm:$0xff]   ;;  %v8345_v15 = vld [vmem:[%s13923_s3 + $0x6c0] ss:$16 sps:$4 sm:$0xff]  }
  0x3f   :  { %1762 = vmatpush2.bf16.msra.mxu0 %v8298_v38  ;;  %v8350_v16 = vld [vmem:[%s13923_s3 + $0x4a4] ss:$16 sps:$4 sm:$0xff]   ;;  %v8348_v18 = vld [vmem:[%s13923_s3 + $0x4a0] ss:$16 sps:$4 sm:$0xff]   ;;  %v9547_v38 = vld [vmem:[%s14212_s23 + $0x18] sm:$0xff] }
  0x40   :  { %1805 = vmatpush2.bf16.msra.mxu1 %v8299_v39  ;;  %1763 = vmatprep.subr.bf16.mxu0 %v8300_v40  ;;  %v8353_v17 = vld [vmem:[%s13923_s3 + $0x6a4] ss:$16 sps:$4 sm:$0xff]   ;;  %v8351_v19 = vld [vmem:[%s13923_s3 + $0x6a0] ss:$16 sps:$4 sm:$0xff]   ;;  %v9552_v39 = vld [vmem:[%s14212_s23 + $0x38] sm:$0xff] }
  0x41   :  { %1806 = vmatprep.subr.bf16.mxu1 %v8302_v41  ;;  %v8356_v20 = vld [vmem:[%s13923_s3 + $0x484] ss:$16 sps:$4 sm:$0xff]   ;;  %v8354_v22 = vld [vmem:[%s13923_s3 + $0x480] ss:$16 sps:$4 sm:$0xff]  }
  0x42   :  { %v8359_v21 = vld [vmem:[%s13923_s3 + $0x684] ss:$16 sps:$4 sm:$0xff]   ;;  %v8357_v23 = vld [vmem:[%s13923_s3 + $0x680] ss:$16 sps:$4 sm:$0xff]  }
  0x43   :  { %1764 = vmatpush2.bf16.msra.mxu0 %v8304_v42  ;;  %v8362_v24 = vld [vmem:[%s13923_s3 + $0x464] ss:$16 sps:$4 sm:$0xff]   ;;  %v8360_v26 = vld [vmem:[%s13923_s3 + $0x460] ss:$16 sps:$4 sm:$0xff]  }
  0x44   :  { %1807 = vmatpush2.bf16.msra.mxu1 %v8305_v43  ;;  %1765 = vmatprep.subr.bf16.mxu0 %v8306_v44  ;;  %v8365_v25 = vld [vmem:[%s13923_s3 + $0x664] ss:$16 sps:$4 sm:$0xff]   ;;  %v8363_v27 = vld [vmem:[%s13923_s3 + $0x660] ss:$16 sps:$4 sm:$0xff]   ;;  %v9566_v43 = vcombine.high %v9547_v38, %v9552_v39 }
  0x45   :  { %1808 = vmatprep.subr.bf16.mxu1 %v8308_v45  ;;  %v8368_v28 = vld [vmem:[%s13923_s3 + $0x444] ss:$16 sps:$4 sm:$0xff]   ;;  %v8366_v30 = vld [vmem:[%s13923_s3 + $0x440] ss:$16 sps:$4 sm:$0xff]  }
  0x46   :  { %v8371_v29 = vld [vmem:[%s13923_s3 + $0x644] ss:$16 sps:$4 sm:$0xff]   ;;  %v8369_v31 = vld [vmem:[%s13923_s3 + $0x640] ss:$16 sps:$4 sm:$0xff]  }
  0x47   :  { %1766 = vmatpush2.bf16.msra.mxu0 %v8310_v46  ;;  %v8374_v32 = vld [vmem:[%s13923_s3 + $0x424] ss:$16 sps:$4 sm:$0xff]   ;;  %v8372_v34 = vld [vmem:[%s13923_s3 + $0x420] ss:$16 sps:$4 sm:$0xff]  }
  0x48   :  { %1809 = vmatpush2.bf16.msra.mxu1 %v8311_v47  ;;  %1767 = vmatprep.subr.bf16.mxu0 %v8312_v52  ;;  %v8377_v33 = vld [vmem:[%s13923_s3 + $0x624] ss:$16 sps:$4 sm:$0xff]   ;;  %v8375_v35 = vld [vmem:[%s13923_s3 + $0x620] ss:$16 sps:$4 sm:$0xff]  }
  0x49   :  { %1810 = vmatprep.subr.bf16.mxu1 %v8314_v54  ;;  %v9537_v36 = vld [vmem:[%s14212_s23 + $0x10] sm:$0xff] }
  0x4a   :  { %v9542_v37 = vld [vmem:[%s14212_s23 + $0x30] sm:$0xff] }
  0x4b   :  { %1768 = vmatpush2.bf16.msra.mxu0 %v8316_v56  ;;  %v8380_v40 = vld [vmem:[%s13923_s3 + $0x404] ss:$16 sps:$4 sm:$0xff]   ;;  %v9559_v41 = vcombine.high %v9537_v36, %v9542_v37  ;;  %v8378_v44 = vld [vmem:[%s13923_s3 + $0x400] ss:$16 sps:$4 sm:$0xff]  }
  0x4c   :  { %1811 = vmatpush2.bf16.msra.mxu1 %v8317_v57  ;;  %1769 = vmatprep.subr.bf16.mxu0 %v8318_v58  ;;  %v8383_v42 = vld [vmem:[%s13923_s3 + $0x604] ss:$16 sps:$4 sm:$0xff]   ;;  %v8381_v45 = vld [vmem:[%s13923_s3 + $0x600] ss:$16 sps:$4 sm:$0xff]  }
  0x4d   :  { %1812 = vmatprep.subr.bf16.mxu1 %v8320_v59  ;;  %v8386_v46 = vld [vmem:[%s13923_s3 + $0x5e4] ss:$16 sps:$4 sm:$0xff]   ;;  %v8384_v48 = vld [vmem:[%s13923_s3 + $0x5e0] ss:$16 sps:$4 sm:$0xff]  }
  0x4e   :  { %v8389_v47 = vld [vmem:[%s13923_s3 + $0x7e4] ss:$16 sps:$4 sm:$0xff]   ;;  %v8387_v49 = vld [vmem:[%s13923_s3 + $0x7e0] ss:$16 sps:$4 sm:$0xff]  }
  0x4f   :  { %1770 = vmatpush2.bf16.msra.mxu0 %v8322_v60  ;;  %v8392_v50 = vld [vmem:[%s13923_s3 + $0x5c4] ss:$16 sps:$4 sm:$0xff]   ;;  %v8390_v52 = vld [vmem:[%s13923_s3 + $0x5c0] ss:$16 sps:$4 sm:$0xff]  }
  0x50   :  { %1813 = vmatpush2.bf16.msra.mxu1 %v8323_v61  ;;  %1771 = vmatprep.subr.bf16.mxu0 %v8324_v62  ;;  %v8395_v51 = vld [vmem:[%s13923_s3 + $0x7c4] ss:$16 sps:$4 sm:$0xff]   ;;  %v8393_v54 = vld [vmem:[%s13923_s3 + $0x7c0] ss:$16 sps:$4 sm:$0xff]  }
  0x51   :  { %1814 = vmatprep.subr.bf16.mxu1 %v8326_v63  ;;  %v8398_v56 = vld [vmem:[%s13923_s3 + $0x5a4] ss:$16 sps:$4 sm:$0xff]   ;;  %v8396_v58 = vld [vmem:[%s13923_s3 + $0x5a0] ss:$16 sps:$4 sm:$0xff]  }
  0x52   :  { %v8401_v57 = vld [vmem:[%s13923_s3 + $0x7a4] ss:$16 sps:$4 sm:$0xff]   ;;  %v8399_v59 = vld [vmem:[%s13923_s3 + $0x7a0] ss:$16 sps:$4 sm:$0xff]  }
  0x53   :  { %1772 = vmatpush2.bf16.msra.mxu0 %v8328_v0  ;;  %v8404_v60 = vld [vmem:[%s13923_s3 + $0x584] ss:$16 sps:$4 sm:$0xff]   ;;  %v8402_v62 = vld [vmem:[%s13923_s3 + $0x580] ss:$16 sps:$4 sm:$0xff]  }
  0x54   :  { %1815 = vmatpush2.bf16.msra.mxu1 %v8329_v1  ;;  %1773 = vmatprep.subr.bf16.mxu0 %v8330_v2  ;;  %v8407_v61 = vld [vmem:[%s13923_s3 + $0x784] ss:$16 sps:$4 sm:$0xff]   ;;  %v8405_v63 = vld [vmem:[%s13923_s3 + $0x780] ss:$16 sps:$4 sm:$0xff]  }
  0x55   :  { %1816 = vmatprep.subr.bf16.mxu1 %v8332_v3  ;;  %v8410_v0 = vld [vmem:[%s13923_s3 + $0x564] ss:$16 sps:$4 sm:$0xff]   ;;  %v8408_v2 = vld [vmem:[%s13923_s3 + $0x560] ss:$16 sps:$4 sm:$0xff]  }
  0x56   :  { %v8413_v1 = vld [vmem:[%s13923_s3 + $0x764] ss:$16 sps:$4 sm:$0xff]   ;;  %v8411_v3 = vld [vmem:[%s13923_s3 + $0x760] ss:$16 sps:$4 sm:$0xff]  }
  0x57   :  { %1774 = vmatpush2.bf16.msra.mxu0 %v8334_v4  ;;  %v8416_v4 = vld [vmem:[%s13923_s3 + $0x544] ss:$16 sps:$4 sm:$0xff]  }
  0x58   :  { %1817 = vmatpush2.bf16.msra.mxu1 %v8335_v5  ;;  %1829 = vmatprep.subr.bf16.mxu0 %v8338_v6  ;;  %v8419_v5 = vld [vmem:[%s13923_s3 + $0x744] ss:$16 sps:$4 sm:$0xff]   ;;  %v8414_v6 = vld [vmem:[%s13923_s3 + $0x540] ss:$16 sps:$4 sm:$0xff]  }
  0x59   :  { %1872 = vmatprep.subr.bf16.mxu1 %v8341_v7  ;;  %v8417_v7 = vld [vmem:[%s13923_s3 + $0x740] ss:$16 sps:$4 sm:$0xff]  }
  0x5a   :  { %1776 = vmatmul.mubr.bf16.vlgmr.msra.gmra.mxu0 %v9450_v8 }
  0x5b   :  { %1819 = vmatmul.mubr.bf16.vlgmr.msra.gmra.mxu1 %v9452_v9  ;;  %1830 = vmatpush1.bf16.msra.mxu0 %v8336_v10  ;;  %v8422_v10 = vld [vmem:[%s13923_s3 + $0x524] ss:$16 sps:$4 sm:$0xff]  }
  0x5c   :  { %1873 = vmatpush1.bf16.msra.mxu1 %v8339_v11  ;;  %1831 = vmatprep.subr.bf16.mxu0 %v8344_v12  ;;  %v8425_v11 = vld [vmem:[%s13923_s3 + $0x724] ss:$16 sps:$4 sm:$0xff]   ;;  %v8420_v12 = vld [vmem:[%s13923_s3 + $0x520] ss:$16 sps:$4 sm:$0xff]  }
  0x5d   :  { %1874 = vmatprep.subr.bf16.mxu1 %v8347_v13  ;;  %1861 = vmatprep.mubr.bf16.mxu0 %v9559_v41  ;;  %v8423_v13 = vld [vmem:[%s13923_s3 + $0x720] ss:$16 sps:$4 sm:$0xff]  }
  0x5e   :  { %1904 = vmatprep.mubr.bf16.mxu1 %v9566_v43 }
  0x5f   :  { %1832 = vmatpush1.bf16.msra.mxu0 %v8342_v14  ;;  %v8428_v14 = vld [vmem:[%s13923_s3 + $0x504] ss:$16 sps:$4 sm:$0xff]  }
  0x60   :  { %1875 = vmatpush1.bf16.msra.mxu1 %v8345_v15  ;;  %1833 = vmatprep.subr.bf16.mxu0 %v8350_v16  ;;  %v8431_v15 = vld [vmem:[%s13923_s3 + $0x704] ss:$16 sps:$4 sm:$0xff]   ;;  %v8426_v16 = vld [vmem:[%s13923_s3 + $0x500] ss:$16 sps:$4 sm:$0xff]  }
  0x61   :  { %1876 = vmatprep.subr.bf16.mxu1 %v8353_v17  ;;  %v8429_v17 = vld [vmem:[%s13923_s3 + $0x700] ss:$16 sps:$4 sm:$0xff]  }
  0x63   :  { %1834 = vmatpush1.bf16.msra.mxu0 %v8348_v18  ;;  %v8434_v18 = vld [vmem:[%s13923_s3 + $0xec] ss:$16 sps:$4 sm:$0xff]  }
  0x64   :  { %1877 = vmatpush1.bf16.msra.mxu1 %v8351_v19  ;;  %1835 = vmatprep.subr.bf16.mxu0 %v8356_v20  ;;  %v8437_v19 = vld [vmem:[%s13923_s3 + $0x2ec] ss:$16 sps:$4 sm:$0xff]   ;;  %v9680_v20 = vcombine.low %v9537_v36, %v9542_v37  ;;  %v8456_v36 = vld [vmem:[%s13923_s3 + $0x68] ss:$16 sps:$4 sm:$0xff]  }
  0x65   :  { %1878 = vmatprep.subr.bf16.mxu1 %v8359_v21  ;;  %v9684_v21 = vcombine.low %v9547_v38, %v9552_v39  ;;  %v8459_v37 = vld [vmem:[%s13923_s3 + $0x268] ss:$16 sps:$4 sm:$0xff]   ;;  %v8464_v38 = vld [vmem:[%s13923_s3 + $0x4c] ss:$16 sps:$4 sm:$0xff]  }
  0x66   :  { %v8467_v39 = vld [vmem:[%s13923_s3 + $0x24c] ss:$16 sps:$4 sm:$0xff]  }
  0x67   :  { %1836 = vmatpush1.bf16.msra.mxu0 %v8354_v22  ;;  %v8432_v22 = vld [vmem:[%s13923_s3 + $0xe8] ss:$16 sps:$4 sm:$0xff]  }
  0x68   :  { %1879 = vmatpush1.bf16.msra.mxu1 %v8357_v23  ;;  %1837 = vmatprep.subr.bf16.mxu0 %v8362_v24  ;;  %v8435_v23 = vld [vmem:[%s13923_s3 + $0x2e8] ss:$16 sps:$4 sm:$0xff]   ;;  %v8440_v24 = vld [vmem:[%s13923_s3 + $0xcc] ss:$16 sps:$4 sm:$0xff]  }
  0x69   :  { %1880 = vmatprep.subr.bf16.mxu1 %v8365_v25  ;;  %v8443_v25 = vld [vmem:[%s13923_s3 + $0x2cc] ss:$16 sps:$4 sm:$0xff]  }
  0x6b   :  { %1838 = vmatpush1.bf16.msra.mxu0 %v8360_v26  ;;  %v8438_v26 = vld [vmem:[%s13923_s3 + $0xc8] ss:$16 sps:$4 sm:$0xff]  }
  0x6c   :  { %1881 = vmatpush1.bf16.msra.mxu1 %v8363_v27  ;;  %1839 = vmatprep.subr.bf16.mxu0 %v8368_v28  ;;  %v8441_v27 = vld [vmem:[%s13923_s3 + $0x2c8] ss:$16 sps:$4 sm:$0xff]   ;;  %v8446_v28 = vld [vmem:[%s13923_s3 + $0xac] ss:$16 sps:$4 sm:$0xff]  }
  0x6d   :  { %1882 = vmatprep.subr.bf16.mxu1 %v8371_v29  ;;  %v8449_v29 = vld [vmem:[%s13923_s3 + $0x2ac] ss:$16 sps:$4 sm:$0xff]  }
  0x6f   :  { %1840 = vmatpush1.bf16.msra.mxu0 %v8366_v30  ;;  %v8444_v30 = vld [vmem:[%s13923_s3 + $0xa8] ss:$16 sps:$4 sm:$0xff]  }
  0x70   :  { %1883 = vmatpush1.bf16.msra.mxu1 %v8369_v31  ;;  %1841 = vmatprep.subr.bf16.mxu0 %v8374_v32  ;;  %v8447_v31 = vld [vmem:[%s13923_s3 + $0x2a8] ss:$16 sps:$4 sm:$0xff]   ;;  %v8452_v32 = vld [vmem:[%s13923_s3 + $0x8c] ss:$16 sps:$4 sm:$0xff]  }
  0x71   :  { %1884 = vmatprep.subr.bf16.mxu1 %v8377_v33  ;;  %v8453_v33 = vld [vmem:[%s13923_s3 + $0x288] ss:$16 sps:$4 sm:$0xff]  }
  0x73   :  { %1842 = vmatpush1.bf16.msra.mxu0 %v8372_v34  ;;  %v8458_v34 = vld [vmem:[%s13923_s3 + $0x6c] ss:$16 sps:$4 sm:$0xff]  }
  0x74   :  { %1885 = vmatpush1.bf16.msra.mxu1 %v8375_v35  ;;  %1843 = vmatprep.subr.bf16.mxu0 %v8380_v40  ;;  %v8461_v35 = vld [vmem:[%s13923_s3 + $0x26c] ss:$16 sps:$4 sm:$0xff]   ;;  %v8462_v40 = vld [vmem:[%s13923_s3 + $0x48] ss:$16 sps:$4 sm:$0xff]  }
  0x75   :  { %1886 = vmatprep.subr.bf16.mxu1 %v8383_v42  ;;  %v8465_v42 = vld [vmem:[%s13923_s3 + $0x248] ss:$16 sps:$4 sm:$0xff]  }
  0x77   :  { %1844 = vmatpush1.bf16.msra.mxu0 %v8378_v44  ;;  %v8470_v44 = vld [vmem:[%s13923_s3 + $0x2c] ss:$16 sps:$4 sm:$0xff]  }
  0x78   :  { %1887 = vmatpush1.bf16.msra.mxu1 %v8381_v45  ;;  %1845 = vmatprep.subr.bf16.mxu0 %v8386_v46  ;;  %v8473_v45 = vld [vmem:[%s13923_s3 + $0x22c] ss:$16 sps:$4 sm:$0xff]   ;;  %v8468_v46 = vld [vmem:[%s13923_s3 + $0x28] ss:$16 sps:$4 sm:$0xff]  }
  0x79   :  { %1888 = vmatprep.subr.bf16.mxu1 %v8389_v47  ;;  %v8471_v47 = vld [vmem:[%s13923_s3 + $0x228] ss:$16 sps:$4 sm:$0xff]  }
  0x7b   :  { %1846 = vmatpush2.bf16.msra.mxu0 %v8384_v48  ;;  %v8476_v48 = vld [vmem:[%s13923_s3 + $0xc] ss:$16 sps:$4 sm:$0xff]  }
  0x7c   :  { %1889 = vmatpush2.bf16.msra.mxu1 %v8387_v49  ;;  %1847 = vmatprep.subr.bf16.mxu0 %v8392_v50  ;;  %v8479_v49 = vld [vmem:[%s13923_s3 + $0x20c] ss:$16 sps:$4 sm:$0xff]   ;;  %v8474_v50 = vld [vmem:[%s13923_s3 + $0x8] ss:$16 sps:$4 sm:$0xff]  }
  0x7d   :  { %1890 = vmatprep.subr.bf16.mxu1 %v8395_v51  ;;  %v8477_v51 = vld [vmem:[%s13923_s3 + $0x208] ss:$16 sps:$4 sm:$0xff]  }
  0x7f   :  { %1848 = vmatpush2.bf16.msra.mxu0 %v8390_v52  ;;  %v8482_v52 = vld [vmem:[%s13923_s3 + $0x1ec] ss:$16 sps:$4 sm:$0xff]  }
  0x80   :  { %1891 = vmatpush2.bf16.msra.mxu1 %v8393_v54  ;;  %1849 = vmatprep.subr.bf16.mxu0 %v8398_v56  ;;  %v8485_v54 = vld [vmem:[%s13923_s3 + $0x3ec] ss:$16 sps:$4 sm:$0xff]   ;;  %v8480_v56 = vld [vmem:[%s13923_s3 + $0x1e8] ss:$16 sps:$4 sm:$0xff]  }
  0x81   :  { %1892 = vmatprep.subr.bf16.mxu1 %v8401_v57  ;;  %v8483_v57 = vld [vmem:[%s13923_s3 + $0x3e8] ss:$16 sps:$4 sm:$0xff]  }
  0x83   :  { %1850 = vmatpush2.bf16.msra.mxu0 %v8396_v58  ;;  %v8488_v58 = vld [vmem:[%s13923_s3 + $0x1cc] ss:$16 sps:$4 sm:$0xff]  }
  0x84   :  { %1893 = vmatpush2.bf16.msra.mxu1 %v8399_v59  ;;  %1851 = vmatprep.subr.bf16.mxu0 %v8404_v60  ;;  %v8491_v59 = vld [vmem:[%s13923_s3 + $0x3cc] ss:$16 sps:$4 sm:$0xff]   ;;  %v8486_v60 = vld [vmem:[%s13923_s3 + $0x1c8] ss:$16 sps:$4 sm:$0xff]  }
  0x85   :  { %1894 = vmatprep.subr.bf16.mxu1 %v8407_v61  ;;  %v8489_v61 = vld [vmem:[%s13923_s3 + $0x3c8] ss:$16 sps:$4 sm:$0xff]  }
  0x87   :  { %1852 = vmatpush2.bf16.msra.mxu0 %v8402_v62  ;;  %v8494_v62 = vld [vmem:[%s13923_s3 + $0x1ac] ss:$16 sps:$4 sm:$0xff]  }
  0x88   :  { %1895 = vmatpush2.bf16.msra.mxu1 %v8405_v63  ;;  %1853 = vmatprep.subr.bf16.mxu0 %v8410_v0  ;;  %v8497_v63 = vld [vmem:[%s13923_s3 + $0x3ac] ss:$16 sps:$4 sm:$0xff]   ;;  %v8492_v0 = vld [vmem:[%s13923_s3 + $0x1a8] ss:$16 sps:$4 sm:$0xff]  }
  0x89   :  { %1896 = vmatprep.subr.bf16.mxu1 %v8413_v1  ;;  %v8495_v1 = vld [vmem:[%s13923_s3 + $0x3a8] ss:$16 sps:$4 sm:$0xff]  }
  0x8b   :  { %1854 = vmatpush2.bf16.msra.mxu0 %v8408_v2  ;;  %v8500_v2 = vld [vmem:[%s13923_s3 + $0x18c] ss:$16 sps:$4 sm:$0xff]  }
  0x8c   :  { %1897 = vmatpush2.bf16.msra.mxu1 %v8411_v3  ;;  %1855 = vmatprep.subr.bf16.mxu0 %v8416_v4  ;;  %v8503_v3 = vld [vmem:[%s13923_s3 + $0x38c] ss:$16 sps:$4 sm:$0xff]   ;;  %v8498_v4 = vld [vmem:[%s13923_s3 + $0x188] ss:$16 sps:$4 sm:$0xff]  }
  0x8d   :  { %1898 = vmatprep.subr.bf16.mxu1 %v8419_v5  ;;  %v8501_v5 = vld [vmem:[%s13923_s3 + $0x388] ss:$16 sps:$4 sm:$0xff]  }
  0x8f   :  { %1856 = vmatpush2.bf16.msra.mxu0 %v8414_v6  ;;  %v8506_v6 = vld [vmem:[%s13923_s3 + $0x16c] ss:$16 sps:$4 sm:$0xff]  }
  0x90   :  { %1899 = vmatpush2.bf16.msra.mxu1 %v8417_v7  ;;  %1857 = vmatprep.subr.bf16.mxu0 %v8422_v10  ;;  %v8509_v7 = vld [vmem:[%s13923_s3 + $0x36c] ss:$16 sps:$4 sm:$0xff]   ;;  %v8504_v10 = vld [vmem:[%s13923_s3 + $0x168] ss:$16 sps:$4 sm:$0xff]  }
  0x91   :  { %1900 = vmatprep.subr.bf16.mxu1 %v8425_v11  ;;  %v8507_v11 = vld [vmem:[%s13923_s3 + $0x368] ss:$16 sps:$4 sm:$0xff]  }
  0x93   :  { %1858 = vmatpush2.bf16.msra.mxu0 %v8420_v12  ;;  %v8512_v12 = vld [vmem:[%s13923_s3 + $0x14c] ss:$16 sps:$4 sm:$0xff]  }
  0x94   :  { %1901 = vmatpush2.bf16.msra.mxu1 %v8423_v13  ;;  %1859 = vmatprep.subr.bf16.mxu0 %v8428_v14  ;;  %v8515_v13 = vld [vmem:[%s13923_s3 + $0x34c] ss:$16 sps:$4 sm:$0xff]   ;;  %v8510_v14 = vld [vmem:[%s13923_s3 + $0x148] ss:$16 sps:$4 sm:$0xff]  }
  0x95   :  { %1902 = vmatprep.subr.bf16.mxu1 %v8431_v15  ;;  %v8513_v15 = vld [vmem:[%s13923_s3 + $0x348] ss:$16 sps:$4 sm:$0xff]  }
  0x97   :  { %1860 = vmatpush2.bf16.msra.mxu0 %v8426_v16  ;;  %v8518_v16 = vld [vmem:[%s13923_s3 + $0x12c] ss:$16 sps:$4 sm:$0xff]  }
  0x98   :  { %1903 = vmatpush2.bf16.msra.mxu1 %v8429_v17  ;;  %1915 = vmatprep.subr.bf16.mxu0 %v8434_v18  ;;  %v8521_v17 = vld [vmem:[%s13923_s3 + $0x32c] ss:$16 sps:$4 sm:$0xff]   ;;  %v8516_v18 = vld [vmem:[%s13923_s3 + $0x128] ss:$16 sps:$4 sm:$0xff]  }
  0x99   :  { %1958 = vmatprep.subr.bf16.mxu1 %v8437_v19  ;;  %v8519_v19 = vld [vmem:[%s13923_s3 + $0x328] ss:$16 sps:$4 sm:$0xff]  }
  0x9a   :  { %1862 = vmatmul.mubr.bf16.vlgmr.msra.gmra.mxu0 %v9680_v20 }
  0x9b   :  { %1905 = vmatmul.mubr.bf16.vlgmr.msra.gmra.mxu1 %v9684_v21  ;;  %1916 = vmatpush1.bf16.msra.mxu0 %v8432_v22  ;;  %v8524_v22 = vld [vmem:[%s13923_s3 + $0x10c] ss:$16 sps:$4 sm:$0xff]  }
  0x9c   :  { %1959 = vmatpush1.bf16.msra.mxu1 %v8435_v23  ;;  %1917 = vmatprep.subr.bf16.mxu0 %v8440_v24  ;;  %v8527_v23 = vld [vmem:[%s13923_s3 + $0x30c] ss:$16 sps:$4 sm:$0xff]   ;;  %v8522_v24 = vld [vmem:[%s13923_s3 + $0x108] ss:$16 sps:$4 sm:$0xff]  }
  0x9d   :  { %1960 = vmatprep.subr.bf16.mxu1 %v8443_v25  ;;  %1947 = vmatprep.mubr.bf16.mxu0 %v9393_v53  ;;  %v8455_v53 = vld [vmem:[%s13923_s3 + $0x28c] ss:$16 sps:$4 sm:$0xff]   ;;  %v8525_v25 = vld [vmem:[%s13923_s3 + $0x308] ss:$16 sps:$4 sm:$0xff]  }
  0x9e   :  { %1990 = vmatprep.mubr.bf16.mxu1 %v9398_v55  ;;  %v8450_v55 = vld [vmem:[%s13923_s3 + $0x88] ss:$16 sps:$4 sm:$0xff]  }
  0x9f   :  { %1918 = vmatpush1.bf16.msra.mxu0 %v8438_v26  ;;  %v8530_v26 = vld [vmem:[%s13923_s3 + $0x4ec] ss:$16 sps:$4 sm:$0xff]  }
  0xa0   :  { %1961 = vmatpush1.bf16.msra.mxu1 %v8441_v27  ;;  %1919 = vmatprep.subr.bf16.mxu0 %v8446_v28  ;;  %v8533_v27 = vld [vmem:[%s13923_s3 + $0x6ec] ss:$16 sps:$4 sm:$0xff]   ;;  %v8528_v28 = vld [vmem:[%s13923_s3 + $0x4e8] ss:$16 sps:$4 sm:$0xff]  }
  0xa1   :  { %1962 = vmatprep.subr.bf16.mxu1 %v8449_v29  ;;  %v8531_v29 = vld [vmem:[%s13923_s3 + $0x6e8] ss:$16 sps:$4 sm:$0xff]  }
  0xa3   :  { %1920 = vmatpush1.bf16.msra.mxu0 %v8444_v30  ;;  %v8536_v30 = vld [vmem:[%s13923_s3 + $0x4cc] ss:$16 sps:$4 sm:$0xff]  }
  0xa4   :  { %1963 = vmatpush1.bf16.msra.mxu1 %v8447_v31  ;;  %1921 = vmatprep.subr.bf16.mxu0 %v8452_v32  ;;  %v8539_v31 = vld [vmem:[%s13923_s3 + $0x6cc] ss:$16 sps:$4 sm:$0xff]   ;;  %v8534_v32 = vld [vmem:[%s13923_s3 + $0x4c8] ss:$16 sps:$4 sm:$0xff]  }
  0xa5   :  { %1964 = vmatprep.subr.bf16.mxu1 %v8455_v53  ;;  %v8537_v53 = vld [vmem:[%s13923_s3 + $0x6c8] ss:$16 sps:$4 sm:$0xff]  }
  0xa7   :  { %1922 = vmatpush1.bf16.msra.mxu0 %v8450_v55  ;;  %v8542_v55 = vld [vmem:[%s13923_s3 + $0x4ac] ss:$16 sps:$4 sm:$0xff]  }
  0xa8   :  { %1965 = vmatpush1.bf16.msra.mxu1 %v8453_v33  ;;  %1923 = vmatprep.subr.bf16.mxu0 %v8458_v34  ;;  %v8545_v33 = vld [vmem:[%s13923_s3 + $0x6ac] ss:$16 sps:$4 sm:$0xff]   ;;  %v8540_v34 = vld [vmem:[%s13923_s3 + $0x4a8] ss:$16 sps:$4 sm:$0xff]  }
  0xa9   :  { %1966 = vmatprep.subr.bf16.mxu1 %v8461_v35  ;;  %v8551_v35 = vld [vmem:[%s13923_s3 + $0x68c] ss:$16 sps:$4 sm:$0xff]  }
  0xab   :  { %1924 = vmatpush1.bf16.msra.mxu0 %v8456_v36  ;;  %v8546_v36 = vld [vmem:[%s13923_s3 + $0x488] ss:$16 sps:$4 sm:$0xff]  }
  0xac   :  { %1967 = vmatpush1.bf16.msra.mxu1 %v8459_v37  ;;  %1925 = vmatprep.subr.bf16.mxu0 %v8464_v38  ;;  %v8557_v37 = vld [vmem:[%s13923_s3 + $0x66c] ss:$16 sps:$4 sm:$0xff]   ;;  %v8552_v38 = vld [vmem:[%s13923_s3 + $0x468] ss:$16 sps:$4 sm:$0xff]  }
  0xad   :  { %1968 = vmatprep.subr.bf16.mxu1 %v8467_v39  ;;  %v8555_v39 = vld [vmem:[%s13923_s3 + $0x668] ss:$16 sps:$4 sm:$0xff]  }
  0xaf   :  { %1926 = vmatpush1.bf16.msra.mxu0 %v8462_v40  ;;  %v8560_v40 = vld [vmem:[%s13923_s3 + $0x44c] ss:$16 sps:$4 sm:$0xff]  }
  0xb0   :  { %1969 = vmatpush1.bf16.msra.mxu1 %v8465_v42  ;;  %1927 = vmatprep.subr.bf16.mxu0 %v8470_v44  ;;  %v8563_v42 = vld [vmem:[%s13923_s3 + $0x64c] ss:$16 sps:$4 sm:$0xff]   ;;  %v8558_v44 = vld [vmem:[%s13923_s3 + $0x448] ss:$16 sps:$4 sm:$0xff]  }
  0xb1   :  { %1970 = vmatprep.subr.bf16.mxu1 %v8473_v45  ;;  %v8561_v45 = vld [vmem:[%s13923_s3 + $0x648] ss:$16 sps:$4 sm:$0xff]  }
  0xb3   :  { %1928 = vmatpush1.bf16.msra.mxu0 %v8468_v46  ;;  %v8566_v46 = vld [vmem:[%s13923_s3 + $0x42c] ss:$16 sps:$4 sm:$0xff]  }
  0xb4   :  { %1971 = vmatpush1.bf16.msra.mxu1 %v8471_v47  ;;  %1929 = vmatprep.subr.bf16.mxu0 %v8476_v48  ;;  %v8569_v47 = vld [vmem:[%s13923_s3 + $0x62c] ss:$16 sps:$4 sm:$0xff]   ;;  %v8564_v48 = vld [vmem:[%s13923_s3 + $0x428] ss:$16 sps:$4 sm:$0xff]  }
  0xb5   :  { %1972 = vmatprep.subr.bf16.mxu1 %v8479_v49  ;;  %v8567_v49 = vld [vmem:[%s13923_s3 + $0x628] ss:$16 sps:$4 sm:$0xff]  }
  0xb7   :  { %1930 = vmatpush1.bf16.msra.mxu0 %v8474_v50  ;;  %v8572_v50 = vld [vmem:[%s13923_s3 + $0x40c] ss:$16 sps:$4 sm:$0xff]  }
  0xb8   :  { %1973 = vmatpush1.bf16.msra.mxu1 %v8477_v51  ;;  %1931 = vmatprep.subr.bf16.mxu0 %v8482_v52  ;;  %v8575_v51 = vld [vmem:[%s13923_s3 + $0x60c] ss:$16 sps:$4 sm:$0xff]   ;;  %v8570_v52 = vld [vmem:[%s13923_s3 + $0x408] ss:$16 sps:$4 sm:$0xff]  }
  0xb9   :  { %1974 = vmatprep.subr.bf16.mxu1 %v8485_v54  ;;  %v8573_v54 = vld [vmem:[%s13923_s3 + $0x608] ss:$16 sps:$4 sm:$0xff]  }
  0xbb   :  { %1932 = vmatpush2.bf16.msra.mxu0 %v8480_v56  ;;  %v8578_v56 = vld [vmem:[%s13923_s3 + $0x5ec] ss:$16 sps:$4 sm:$0xff]  }
  0xbc   :  { %1975 = vmatpush2.bf16.msra.mxu1 %v8483_v57  ;;  %1933 = vmatprep.subr.bf16.mxu0 %v8488_v58  ;;  %v8581_v57 = vld [vmem:[%s13923_s3 + $0x7ec] ss:$16 sps:$4 sm:$0xff]   ;;  %v8576_v58 = vld [vmem:[%s13923_s3 + $0x5e8] ss:$16 sps:$4 sm:$0xff]  }
  0xbd   :  { %1976 = vmatprep.subr.bf16.mxu1 %v8491_v59  ;;  %v8579_v59 = vld [vmem:[%s13923_s3 + $0x7e8] ss:$16 sps:$4 sm:$0xff]  }
  0xbf   :  { %1934 = vmatpush2.bf16.msra.mxu0 %v8486_v60  ;;  %v8584_v60 = vld [vmem:[%s13923_s3 + $0x5cc] ss:$16 sps:$4 sm:$0xff]  }
  0xc0   :  { %1977 = vmatpush2.bf16.msra.mxu1 %v8489_v61  ;;  %1935 = vmatprep.subr.bf16.mxu0 %v8494_v62  ;;  %v8587_v61 = vld [vmem:[%s13923_s3 + $0x7cc] ss:$16 sps:$4 sm:$0xff]   ;;  %v8582_v62 = vld [vmem:[%s13923_s3 + $0x5c8] ss:$16 sps:$4 sm:$0xff]  }
  0xc1   :  { %1978 = vmatprep.subr.bf16.mxu1 %v8497_v63  ;;  %v8585_v63 = vld [vmem:[%s13923_s3 + $0x7c8] ss:$16 sps:$4 sm:$0xff]  }
  0xc3   :  { %1936 = vmatpush2.bf16.msra.mxu0 %v8492_v0  ;;  %v8590_v0 = vld [vmem:[%s13923_s3 + $0x5ac] ss:$16 sps:$4 sm:$0xff]  }
  0xc4   :  { %1979 = vmatpush2.bf16.msra.mxu1 %v8495_v1  ;;  %1937 = vmatprep.subr.bf16.mxu0 %v8500_v2  ;;  %v8593_v1 = vld [vmem:[%s13923_s3 + $0x7ac] ss:$16 sps:$4 sm:$0xff]   ;;  %v8588_v2 = vld [vmem:[%s13923_s3 + $0x5a8] ss:$16 sps:$4 sm:$0xff]  }
  0xc5   :  { %1980 = vmatprep.subr.bf16.mxu1 %v8503_v3  ;;  %v8591_v3 = vld [vmem:[%s13923_s3 + $0x7a8] ss:$16 sps:$4 sm:$0xff]  }
  0xc7   :  { %1938 = vmatpush2.bf16.msra.mxu0 %v8498_v4  ;;  %v8596_v4 = vld [vmem:[%s13923_s3 + $0x58c] ss:$16 sps:$4 sm:$0xff]  }
  0xc8   :  { %1981 = vmatpush2.bf16.msra.mxu1 %v8501_v5  ;;  %1939 = vmatprep.subr.bf16.mxu0 %v8506_v6  ;;  %v8599_v5 = vld [vmem:[%s13923_s3 + $0x78c] ss:$16 sps:$4 sm:$0xff]   ;;  %v8594_v6 = vld [vmem:[%s13923_s3 + $0x588] ss:$16 sps:$4 sm:$0xff]  }
  0xc9   :  { %1982 = vmatprep.subr.bf16.mxu1 %v8509_v7  ;;  %v8597_v7 = vld [vmem:[%s13923_s3 + $0x788] ss:$16 sps:$4 sm:$0xff]  }
  0xcb   :  { %1940 = vmatpush2.bf16.msra.mxu0 %v8504_v10  ;;  %v8602_v10 = vld [vmem:[%s13923_s3 + $0x56c] ss:$16 sps:$4 sm:$0xff]  }
  0xcc   :  { %1983 = vmatpush2.bf16.msra.mxu1 %v8507_v11  ;;  %1941 = vmatprep.subr.bf16.mxu0 %v8512_v12  ;;  %v8605_v11 = vld [vmem:[%s13923_s3 + $0x76c] ss:$16 sps:$4 sm:$0xff]   ;;  %v8600_v12 = vld [vmem:[%s13923_s3 + $0x568] ss:$16 sps:$4 sm:$0xff]  }
  0xcd   :  { %1984 = vmatprep.subr.bf16.mxu1 %v8515_v13  ;;  %v8603_v13 = vld [vmem:[%s13923_s3 + $0x768] ss:$16 sps:$4 sm:$0xff]  }
  0xcf   :  { %1942 = vmatpush2.bf16.msra.mxu0 %v8510_v14  ;;  %v8608_v14 = vld [vmem:[%s13923_s3 + $0x54c] ss:$16 sps:$4 sm:$0xff]  }
  0xd0   :  { %1985 = vmatpush2.bf16.msra.mxu1 %v8513_v15  ;;  %1943 = vmatprep.subr.bf16.mxu0 %v8518_v16  ;;  %v8611_v15 = vld [vmem:[%s13923_s3 + $0x74c] ss:$16 sps:$4 sm:$0xff]   ;;  %v8606_v16 = vld [vmem:[%s13923_s3 + $0x548] ss:$16 sps:$4 sm:$0xff]  }
  0xd1   :  { %1986 = vmatprep.subr.bf16.mxu1 %v8521_v17  ;;  %v8609_v17 = vld [vmem:[%s13923_s3 + $0x748] ss:$16 sps:$4 sm:$0xff]  }
  0xd3   :  { %1944 = vmatpush2.bf16.msra.mxu0 %v8516_v18  ;;  %v8614_v18 = vld [vmem:[%s13923_s3 + $0x52c] ss:$16 sps:$4 sm:$0xff]  }
  0xd4   :  { %1987 = vmatpush2.bf16.msra.mxu1 %v8519_v19  ;;  %1945 = vmatprep.subr.bf16.mxu0 %v8524_v22  ;;  %v8617_v19 = vld [vmem:[%s13923_s3 + $0x72c] ss:$16 sps:$4 sm:$0xff]   ;;  %v8612_v22 = vld [vmem:[%s13923_s3 + $0x528] ss:$16 sps:$4 sm:$0xff]  }
  0xd5   :  { %1988 = vmatprep.subr.bf16.mxu1 %v8527_v23  ;;  %v8615_v23 = vld [vmem:[%s13923_s3 + $0x728] ss:$16 sps:$4 sm:$0xff]  }
  0xd7   :  { %1946 = vmatpush2.bf16.msra.mxu0 %v8522_v24  ;;  %v8620_v24 = vld [vmem:[%s13923_s3 + $0x50c] ss:$16 sps:$4 sm:$0xff]  }
  0xd8   :  { %1989 = vmatpush2.bf16.msra.mxu1 %v8525_v25  ;;  %2001 = vmatprep.subr.bf16.mxu0 %v8530_v26  ;;  %v8623_v25 = vld [vmem:[%s13923_s3 + $0x70c] ss:$16 sps:$4 sm:$0xff]   ;;  %v8618_v26 = vld [vmem:[%s13923_s3 + $0x508] ss:$16 sps:$4 sm:$0xff]  }
  0xd9   :  { %2044 = vmatprep.subr.bf16.mxu1 %v8533_v27  ;;  %v8621_v27 = vld [vmem:[%s13923_s3 + $0x708] ss:$16 sps:$4 sm:$0xff]  }
  0xda   :  { %1948 = vmatmul.mubr.bf16.vlgmr.msra.gmra.mxu0 %v9450_v8  ;;  %v8543_v8 = vld [vmem:[%s13923_s3 + $0x6a8] ss:$16 sps:$4 sm:$0xff]  }
  0xdb   :  { %1991 = vmatmul.mubr.bf16.vlgmr.msra.gmra.mxu1 %v9452_v9  ;;  %2002 = vmatpush1.bf16.msra.mxu0 %v8528_v28  ;;  %v8548_v9 = vld [vmem:[%s13923_s3 + $0x48c] ss:$16 sps:$4 sm:$0xff]  }
  0xdc   :  { %2045 = vmatpush1.bf16.msra.mxu1 %v8531_v29  ;;  %2003 = vmatprep.subr.bf16.mxu0 %v8536_v30  ;;  %v10075_v28 = vld [vmem:[%s13924_s4 + $0x1e8] sm:$0xff]  ;;  %v10080_v29 = vld [vmem:[%s13924_s4 + $0x1f8] sm:$0xff]  ;;  %v10087_v30 = vld [vmem:[%s13924_s4 + $0x1e0] sm:$0xff] }
  0xdd   :  { %2046 = vmatprep.subr.bf16.mxu1 %v8539_v31  ;;  %2033 = vmatprep.mubr.bf16.mxu0 %v9559_v41  ;;  %v8549_v41 = vld [vmem:[%s13923_s3 + $0x688] ss:$16 sps:$4 sm:$0xff]   ;;  %14213 = vst [vmem:[#allocation19_spill] sm:$0xff] %v10075_v28  ;;  %14214 = vst [vmem:[#allocation20_spill] sm:$0xff] %v10080_v29  ;;  %v10092_v31 = vld [vmem:[%s13924_s4 + $0x1f0] sm:$0xff] }
  0xde   :  { %2076 = vmatprep.mubr.bf16.mxu1 %v9566_v43  ;;  %v8554_v43 = vld [vmem:[%s13923_s3 + $0x46c] ss:$16 sps:$4 sm:$0xff]  }
  0xdf   :  { %2004 = vmatpush1.bf16.msra.mxu0 %v8534_v32  ;;  %v10097_v32 = vld [vmem:[%s13924_s4 + $0x1c8] sm:$0xff] }
  0xe0   :  { %2047 = vmatpush1.bf16.msra.mxu1 %v8537_v53  ;;  %2005 = vmatprep.subr.bf16.mxu0 %v8542_v55  ;;  %v10102_v53 = vld [vmem:[%s13924_s4 + $0x1d8] sm:$0xff]  ;;  %v10109_v55 = vld [vmem:[%s13924_s4 + $0x1c0] sm:$0xff] }
  0xe1   :  { %2048 = vmatprep.subr.bf16.mxu1 %v8545_v33  ;;  %v10114_v33 = vld [vmem:[%s13924_s4 + $0x1d0] sm:$0xff] }
  0xe3   :  { %2006 = vmatpush1.bf16.msra.mxu0 %v8540_v34  ;;  %v10133_v34 = vld [vmem:[%s13924_s4 + $0x1a0] sm:$0xff] }
  0xe4   :  { %2049 = vmatpush1.bf16.msra.mxu1 %v8543_v8  ;;  %2007 = vmatprep.subr.bf16.mxu0 %v8548_v9  ;;  %v10138_v8 = vld [vmem:[%s13924_s4 + $0x1b0] sm:$0xff]  ;;  %v10145_v9 = vld [vmem:[%s13924_s4 + $0x188] sm:$0xff] }
  0xe5   :  { %2050 = vmatprep.subr.bf16.mxu1 %v8551_v35  ;;  %v10150_v35 = vld [vmem:[%s13924_s4 + $0x198] sm:$0xff] }
  0xe7   :  { %2008 = vmatpush1.bf16.msra.mxu0 %v8546_v36  ;;  %v10157_v36 = vld [vmem:[%s13924_s4 + $0x180] sm:$0xff] }
  0xe8   :  { %2051 = vmatpush1.bf16.msra.mxu1 %v8549_v41  ;;  %2009 = vmatprep.subr.bf16.mxu0 %v8554_v43  ;;  %v10162_v41 = vld [vmem:[%s13924_s4 + $0x190] sm:$0xff]  ;;  %v10169_v43 = vld [vmem:[%s13924_s4 + $0x168] sm:$0xff] }
  0xe9   :  { %2052 = vmatprep.subr.bf16.mxu1 %v8557_v37  ;;  %v10174_v37 = vld [vmem:[%s13924_s4 + $0x178] sm:$0xff] }
  0xeb   :  { %2010 = vmatpush1.bf16.msra.mxu0 %v8552_v38  ;;  %v10181_v38 = vld [vmem:[%s13924_s4 + $0x160] sm:$0xff] }
  0xec   :  { %2053 = vmatpush1.bf16.msra.mxu1 %v8555_v39  ;;  %2011 = vmatprep.subr.bf16.mxu0 %v8560_v40  ;;  %v10186_v39 = vld [vmem:[%s13924_s4 + $0x170] sm:$0xff]  ;;  %v10193_v40 = vld [vmem:[%s13924_s4 + $0x148] sm:$0xff] }
  0xed   :  { %2054 = vmatprep.subr.bf16.mxu1 %v8563_v42  ;;  %v10198_v42 = vld [vmem:[%s13924_s4 + $0x158] sm:$0xff] }
  0xef   :  { %2012 = vmatpush1.bf16.msra.mxu0 %v8558_v44  ;;  %v10205_v44 = vld [vmem:[%s13924_s4 + $0x140] sm:$0xff] }
  0xf0   :  { %2055 = vmatpush1.bf16.msra.mxu1 %v8561_v45  ;;  %2013 = vmatprep.subr.bf16.mxu0 %v8566_v46  ;;  %14215 = vst [vmem:[#allocation21_spill] sm:$0xff] %v10205_v44  ;;  %v10210_v45 = vld [vmem:[%s13924_s4 + $0x150] sm:$0xff]  ;;  %v10217_v46 = vld [vmem:[%s13924_s4 + $0x128] sm:$0xff] }
  0xf1   :  { %2056 = vmatprep.subr.bf16.mxu1 %v8569_v47  ;;  %14216 = vst [vmem:[#allocation22_spill] sm:$0xff] %v10210_v45  ;;  %v10222_v47 = vld [vmem:[%s13924_s4 + $0x138] sm:$0xff] }
  0xf3   :  { %2014 = vmatpush1.bf16.msra.mxu0 %v8564_v48  ;;  %v10229_v48 = vld [vmem:[%s13924_s4 + $0x120] sm:$0xff] }
  0xf4   :  { %2057 = vmatpush1.bf16.msra.mxu1 %v8567_v49  ;;  %2015 = vmatprep.subr.bf16.mxu0 %v8572_v50  ;;  %v10234_v49 = vld [vmem:[%s13924_s4 + $0x130] sm:$0xff]  ;;  %v10241_v50 = vld [vmem:[%s13924_s4 + $0x108] sm:$0xff] }
  0xf5   :  { %2058 = vmatprep.subr.bf16.mxu1 %v8575_v51  ;;  %v10246_v51 = vld [vmem:[%s13924_s4 + $0x118] sm:$0xff] }
  0xf6   :  { %14217 = vst [vmem:[#allocation23_spill] sm:$0xff] %v10246_v51 }
  0xf7   :  { %2016 = vmatpush1.bf16.msra.mxu0 %v8570_v52  ;;  %v10253_v52 = vld [vmem:[%s13924_s4 + $0x100] sm:$0xff] }
  0xf8   :  { %2059 = vmatpush1.bf16.msra.mxu1 %v8573_v54  ;;  %2017 = vmatprep.subr.bf16.mxu0 %v8578_v56  ;;  %v10258_v54 = vld [vmem:[%s13924_s4 + $0x110] sm:$0xff]  ;;  %v10265_v56 = vld [vmem:[%s13924_s4 + $0xe8] sm:$0xff] }
  0xf9   :  { %2060 = vmatprep.subr.bf16.mxu1 %v8581_v57  ;;  %14218 = vst [vmem:[#allocation24_spill] sm:$0xff] %v10265_v56  ;;  %v10270_v57 = vld [vmem:[%s13924_s4 + $0xf8] sm:$0xff] }
  0xfa   :  { %14219 = vst [vmem:[#allocation25_spill] sm:$0xff] %v10270_v57 }
  0xfb   :  { %2018 = vmatpush2.bf16.msra.mxu0 %v8576_v58  ;;  %v10277_v58 = vld [vmem:[%s13924_s4 + $0xe0] sm:$0xff] }
  0xfc   :  { %2061 = vmatpush2.bf16.msra.mxu1 %v8579_v59  ;;  %2019 = vmatprep.subr.bf16.mxu0 %v8584_v60  ;;  %14220 = vst [vmem:[#allocation26_spill] sm:$0xff] %v10277_v58  ;;  %v10282_v59 = vld [vmem:[%s13924_s4 + $0xf0] sm:$0xff]  ;;  %v10289_v60 = vld [vmem:[%s13924_s4 + $0xc8] sm:$0xff] }
  0xfd   :  { %2062 = vmatprep.subr.bf16.mxu1 %v8587_v61  ;;  %14221 = vst [vmem:[#allocation27_spill] sm:$0xff] %v10282_v59  ;;  %v10294_v61 = vld [vmem:[%s13924_s4 + $0xd8] sm:$0xff] }
  0xff   :  { %2020 = vmatpush2.bf16.msra.mxu0 %v8582_v62  ;;  %v10301_v62 = vld [vmem:[%s13924_s4 + $0xc0] sm:$0xff] }
 0x100   :  { %2063 = vmatpush2.bf16.msra.mxu1 %v8585_v63  ;;  %2021 = vmatprep.subr.bf16.mxu0 %v8590_v0  ;;  %v10306_v63 = vld [vmem:[%s13924_s4 + $0xd0] sm:$0xff]  ;;  %v10313_v0 = vld [vmem:[%s13924_s4 + $0xa8] sm:$0xff] }
 0x101   :  { %2064 = vmatprep.subr.bf16.mxu1 %v8593_v1  ;;  %14222 = vst [vmem:[#allocation28_spill] sm:$0xff] %v10306_v63  ;;  %14223 = vst [vmem:[#allocation29_spill] sm:$0xff] %v10313_v0  ;;  %v10318_v1 = vld [vmem:[%s13924_s4 + $0xb8] sm:$0xff] }
 0x102   :  { %14224 = vst [vmem:[#allocation30_spill] sm:$0xff] %v10318_v1 }
 0x103   :  { %2022 = vmatpush2.bf16.msra.mxu0 %v8588_v2  ;;  %v10325_v2 = vld [vmem:[%s13924_s4 + $0xa0] sm:$0xff] }
 0x104   :  { %2065 = vmatpush2.bf16.msra.mxu1 %v8591_v3  ;;  %2023 = vmatprep.subr.bf16.mxu0 %v8596_v4  ;;  %14225 = vst [vmem:[#allocation31_spill] sm:$0xff] %v10325_v2  ;;  %v10330_v3 = vld [vmem:[%s13924_s4 + $0xb0] sm:$0xff]  ;;  %v10337_v4 = vld [vmem:[%s13924_s4 + $0x88] sm:$0xff] }
 0x105   :  { %2066 = vmatprep.subr.bf16.mxu1 %v8599_v5  ;;  %14226 = vst [vmem:[#allocation32_spill] sm:$0xff] %v10330_v3  ;;  %14227 = vst [vmem:[#allocation33_spill] sm:$0xff] %v10337_v4  ;;  %v10342_v5 = vld [vmem:[%s13924_s4 + $0x98] sm:$0xff] }
 0x106   :  { %14228 = vst [vmem:[#allocation34_spill] sm:$0xff] %v10342_v5 }
 0x107   :  { %2024 = vmatpush2.bf16.msra.mxu0 %v8594_v6  ;;  %v10349_v6 = vld [vmem:[%s13924_s4 + $0x80] sm:$0xff] }
 0x108   :  { %2067 = vmatpush2.bf16.msra.mxu1 %v8597_v7  ;;  %2025 = vmatprep.subr.bf16.mxu0 %v8602_v10  ;;  %14229 = vst [vmem:[#allocation35_spill] sm:$0xff] %v10349_v6  ;;  %v10354_v7 = vld [vmem:[%s13924_s4 + $0x90] sm:$0xff]  ;;  %v10361_v10 = vld [vmem:[%s13924_s4 + $0x68] sm:$0xff] }
 0x109   :  { %2068 = vmatprep.subr.bf16.mxu1 %v8605_v11  ;;  %14230 = vst [vmem:[#allocation36_spill] sm:$0xff] %v10354_v7  ;;  %14231 = vst [vmem:[#allocation37_spill] sm:$0xff] %v10361_v10  ;;  %v10366_v11 = vld [vmem:[%s13924_s4 + $0x78] sm:$0xff] }
 0x10a   :  { %14232 = vst [vmem:[#allocation38_spill] sm:$0xff] %v10366_v11 }
 0x10b   :  { %2026 = vmatpush2.bf16.msra.mxu0 %v8600_v12  ;;  %v10373_v12 = vld [vmem:[%s13924_s4 + $0x60] sm:$0xff] }
 0x10c   :  { %2069 = vmatpush2.bf16.msra.mxu1 %v8603_v13  ;;  %2027 = vmatprep.subr.bf16.mxu0 %v8608_v14  ;;  %14233 = vst [vmem:[#allocation39_spill] sm:$0xff] %v10373_v12  ;;  %v10378_v13 = vld [vmem:[%s13924_s4 + $0x70] sm:$0xff]  ;;  %v10385_v14 = vld [vmem:[%s13924_s4 + $0x48] sm:$0xff] }
 0x10d   :  { %2070 = vmatprep.subr.bf16.mxu1 %v8611_v15  ;;  %14234 = vst [vmem:[#allocation40_spill] sm:$0xff] %v10378_v13  ;;  %14235 = vst [vmem:[#allocation41_spill] sm:$0xff] %v10385_v14  ;;  %v10390_v15 = vld [vmem:[%s13924_s4 + $0x58] sm:$0xff] }
 0x10e   :  { %14236 = vst [vmem:[#allocation42_spill] sm:$0xff] %v10390_v15 }
 0x10f   :  { %2028 = vmatpush2.bf16.msra.mxu0 %v8606_v16  ;;  %v10397_v16 = vld [vmem:[%s13924_s4 + $0x40] sm:$0xff] }
 0x110   :  { %2071 = vmatpush2.bf16.msra.mxu1 %v8609_v17  ;;  %2029 = vmatprep.subr.bf16.mxu0 %v8614_v18  ;;  %14237 = vst [vmem:[#allocation43_spill] sm:$0xff] %v10397_v16  ;;  %v10402_v17 = vld [vmem:[%s13924_s4 + $0x50] sm:$0xff]  ;;  %v10409_v18 = vld [vmem:[%s13924_s4 + $0x28] sm:$0xff] }
 0x111   :  { %2072 = vmatprep.subr.bf16.mxu1 %v8617_v19  ;;  %14238 = vst [vmem:[#allocation44_spill] sm:$0xff] %v10402_v17  ;;  %14239 = vst [vmem:[#allocation45_spill] sm:$0xff] %v10409_v18  ;;  %v10414_v19 = vld [vmem:[%s13924_s4 + $0x38] sm:$0xff] }
 0x112   :  { %14240 = vst [vmem:[#allocation46_spill] sm:$0xff] %v10414_v19 }
 0x113   :  { %2030 = vmatpush2.bf16.msra.mxu0 %v8612_v22  ;;  %v10421_v22 = vld [vmem:[%s13924_s4 + $0x20] sm:$0xff] }
 0x114   :  { %2073 = vmatpush2.bf16.msra.mxu1 %v8615_v23  ;;  %2031 = vmatprep.subr.bf16.mxu0 %v8620_v24  ;;  %14241 = vst [vmem:[#allocation47_spill] sm:$0xff] %v10421_v22  ;;  %v10426_v23 = vld [vmem:[%s13924_s4 + $0x30] sm:$0xff]  ;;  %v10433_v24 = vld [vmem:[%s13924_s4 + $0x8] sm:$0xff] }
 0x115   :  { %2074 = vmatprep.subr.bf16.mxu1 %v8623_v25  ;;  %14242 = vst [vmem:[#allocation48_spill] sm:$0xff] %v10426_v23  ;;  %14243 = vst [vmem:[#allocation49_spill] sm:$0xff] %v10433_v24  ;;  %v10438_v25 = vld [vmem:[%s13924_s4 + $0x18] sm:$0xff] }
 0x116   :  { %14244 = vst [vmem:[#allocation50_spill] sm:$0xff] %v10438_v25 }
 0x117   :  { %2032 = vmatpush2.bf16.msra.mxu0 %v8618_v26  ;;  %v10445_v26 = vld [vmem:[%s13924_s4] sm:$0xff] }
 0x118   :  { %2075 = vmatpush2.bf16.msra.mxu1 %v8621_v27  ;;  %2209 = vmatprep.subr.mxu0 %v10075_v28  ;;  %14245 = vst [vmem:[#allocation51_spill] sm:$0xff] %v10445_v26  ;;  %v10452_v27 = vld [vmem:[%s13924_s4 + $0x10] sm:$0xff] }
 0x119   :  { %2280 = vmatprep.subr.mxu1 %v10080_v29  ;;  %14246 = vst [vmem:[#allocation52_spill] sm:$0xff] %v10452_v27 }
 0x11a   :  { %2034 = vmatmul.mubr.bf16.vlgmr.msra.gmra.mxu0 %v9680_v20  ;;  %v10121_v20 = vld [vmem:[%s13924_s4 + $0x1a8] sm:$0xff] }
 0x11b   :  { %2077 = vmatmul.mubr.bf16.vlgmr.msra.gmra.mxu1 %v9684_v21  ;;  %2210 = vmatpush1.msra.mxu0 %v10087_v30  ;;  %v10126_v21 = vld [vmem:[%s13924_s4 + $0x1b8] sm:$0xff] }
 0x11c   :  { %2281 = vmatpush1.msra.mxu1 %v10092_v31  ;;  %2211 = vmatprep.subr.mxu0 %v10097_v32 }
 0x11d   :  { %2282 = vmatprep.subr.mxu1 %v10102_v53  ;;  %2212 = vmatpush1.msra.mxu0 %v10109_v55 }
 0x11e   :  { %2283 = vmatpush1.msra.mxu1 %v10114_v33  ;;  %2213 = vmatprep.subr.mxu0 %v10121_v20 }
 0x11f   :  { %2284 = vmatprep.subr.mxu1 %v10126_v21  ;;  %2214 = vmatpush1.msra.mxu0 %v10133_v34 }
 0x120   :  { %2285 = vmatpush1.msra.mxu1 %v10138_v8  ;;  %2215 = vmatprep.subr.mxu0 %v10145_v9 }
 0x121   :  { %2286 = vmatprep.subr.mxu1 %v10150_v35  ;;  %2216 = vmatpush1.msra.mxu0 %v10157_v36 }
 0x122   :  { %2287 = vmatpush1.msra.mxu1 %v10162_v41  ;;  %2217 = vmatprep.subr.mxu0 %v10169_v43 }
 0x123   :  { %2288 = vmatprep.subr.mxu1 %v10174_v37  ;;  %2218 = vmatpush1.msra.mxu0 %v10181_v38 }
 0x124   :  { %2289 = vmatpush1.msra.mxu1 %v10186_v39  ;;  %2219 = vmatprep.subr.mxu0 %v10193_v40 }
 0x125   :  { %2290 = vmatprep.subr.mxu1 %v10198_v42  ;;  %2220 = vmatpush1.msra.mxu0 %v10205_v44 }
 0x126   :  { %2291 = vmatpush1.msra.mxu1 %v10210_v45  ;;  %2221 = vmatprep.subr.mxu0 %v10217_v46 }
 0x127   :  { %2292 = vmatprep.subr.mxu1 %v10222_v47  ;;  %2222 = vmatpush1.msra.mxu0 %v10229_v48 }
 0x128   :  { %2293 = vmatpush1.msra.mxu1 %v10234_v49  ;;  %2223 = vmatprep.subr.mxu0 %v10241_v50 }
 0x129   :  { %2294 = vmatprep.subr.mxu1 %v10246_v51  ;;  %2224 = vmatpush1.msra.mxu0 %v10253_v52 }
 0x12a   :  { %2295 = vmatpush1.msra.mxu1 %v10258_v54  ;;  %2225 = vmatprep.subr.mxu0 %v10265_v56 }
 0x12b   :  { %2296 = vmatprep.subr.mxu1 %v10270_v57  ;;  %2226 = vmatpush1.msra.mxu0 %v10277_v58 }
 0x12c   :  { %2297 = vmatpush1.msra.mxu1 %v10282_v59  ;;  %2227 = vmatprep.subr.mxu0 %v10289_v60 }
 0x12d   :  { %2298 = vmatprep.subr.mxu1 %v10294_v61  ;;  %2228 = vmatpush1.msra.mxu0 %v10301_v62 }
 0x12e   :  { %2299 = vmatpush1.msra.mxu1 %v10306_v63  ;;  %2229 = vmatprep.subr.mxu0 %v10313_v0 }
 0x12f   :  { %2300 = vmatprep.subr.mxu1 %v10318_v1  ;;  %2230 = vmatpush1.msra.mxu0 %v10325_v2 }
 0x130   :  { %2301 = vmatpush1.msra.mxu1 %v10330_v3  ;;  %2231 = vmatprep.subr.mxu0 %v10337_v4 }
 0x131   :  { %2302 = vmatprep.subr.mxu1 %v10342_v5  ;;  %2232 = vmatpush1.msra.mxu0 %v10349_v6 }
 0x132   :  { %2303 = vmatpush1.msra.mxu1 %v10354_v7  ;;  %2233 = vmatprep.subr.mxu0 %v10361_v10 }
 0x133   :  { %2304 = vmatprep.subr.mxu1 %v10366_v11  ;;  %2234 = vmatpush1.msra.mxu0 %v10373_v12 }
 0x134   :  { %2305 = vmatpush1.msra.mxu1 %v10378_v13  ;;  %2235 = vmatprep.subr.mxu0 %v10385_v14 }
 0x135   :  { %2306 = vmatprep.subr.mxu1 %v10390_v15  ;;  %2236 = vmatpush1.msra.mxu0 %v10397_v16 }
 0x136   :  { %2307 = vmatpush1.msra.mxu1 %v10402_v17  ;;  %2237 = vmatprep.subr.mxu0 %v10409_v18  ;;  %v13943_v18 = vmov 0.0  }
 0x137   :  { %2308 = vmatprep.subr.mxu1 %v10414_v19  ;;  %2238 = vmatpush1.msra.mxu0 %v10421_v22  ;;  %v400_v19 = vld [vmem:[%s13926_s6] sm:$0x1] }
 0x138   :  { %2309 = vmatpush1.msra.mxu1 %v10426_v23  ;;  %2239 = vmatprep.subr.mxu0 %v10433_v24 }
 0x139   :  { %2310 = vmatprep.subr.mxu1 %v10438_v25  ;;  %2240 = vmatpush1.msra.mxu0 %v10445_v26 }
 0x13a   :  { %2273 = vmatprep.mubr.f32.mxu0 %v13943_v18  ;;  %2311 = vmatpush1.msra.mxu1 %v10452_v27 }
 0x13b   :  { %2344 = vmatprep.mubr.f32.mxu1 %v13943_v18  ;;  %2274 = vmatmul.mubr.f32.vlgmr.msra.gmra.mxu0 %v400_v19 }
 0x13c   :  { %2345 = vmatmul.mubr.f32.vlgmr.msra.gmra.mxu1 %v400_v19  ;;  %2425 = vmatprep.subr.mxu0 %v10075_v28  ;;  %v13949_v19 = vlaneseq }
 0x13d   :  { %2496 = vmatprep.subr.mxu1 %v10080_v29  ;;  %2426 = vmatpush1.msra.mxu0 %v10087_v30 }
 0x13e   :  { %2497 = vmatpush1.msra.mxu1 %v10092_v31  ;;  %2427 = vmatprep.subr.mxu0 %v10097_v32  ;;  %v10490_v18 = vshrl.u32 %v13949_v19, 7 }
 0x13f   :  { %2498 = vmatprep.subr.mxu1 %v10102_v53  ;;  %2428 = vmatpush1.msra.mxu0 %v10109_v55 }
 0x140   :  { %2499 = vmatpush1.msra.mxu1 %v10114_v33  ;;  %2429 = vmatprep.subr.mxu0 %v10121_v20  ;;  %14247 = vst [vmem:[#allocation53_spill] sm:$0xff] %v10490_v18  ;;  %v10501_v19 = vsub.s32 0, %v10490_v18 }
 0x141   :  { %2500 = vmatprep.subr.mxu1 %v10126_v21  ;;  %2430 = vmatpush1.msra.mxu0 %v10133_v34 }
 0x142   :  { %2501 = vmatpush1.msra.mxu1 %v10138_v8  ;;  %2431 = vmatprep.subr.mxu0 %v10145_v9  ;;  %14248 = vst [vmem:[#allocation54_spill] sm:$0xff] %v10501_v19 }
 0x143   :  { %2502 = vmatprep.subr.mxu1 %v10150_v35  ;;  %2432 = vmatpush1.msra.mxu0 %v10157_v36 }
 0x144   :  { %2503 = vmatpush1.msra.mxu1 %v10162_v41  ;;  %2433 = vmatprep.subr.mxu0 %v10169_v43 }
 0x145   :  { %2504 = vmatprep.subr.mxu1 %v10174_v37  ;;  %2434 = vmatpush1.msra.mxu0 %v10181_v38 }
 0x146   :  { %2505 = vmatpush1.msra.mxu1 %v10186_v39  ;;  %2435 = vmatprep.subr.mxu0 %v10193_v40 }
 0x147   :  { %2506 = vmatprep.subr.mxu1 %v10198_v42  ;;  %2436 = vmatpush1.msra.mxu0 %v10205_v44  ;;  %v1820_v44 = vpop.f32.mrf.mxu1 }
 0x148   :  { %2507 = vmatpush1.msra.mxu1 %v10210_v45  ;;  %2437 = vmatprep.subr.mxu0 %v10217_v46  ;;  %v1777_v45 = vpop.f32.mrf.mxu0 }
 0x149   :  { %2508 = vmatprep.subr.mxu1 %v10222_v47  ;;  %2438 = vmatpush1.msra.mxu0 %v10229_v48 }
 0x14a   :  { %2509 = vmatpush1.msra.mxu1 %v10234_v49  ;;  %2439 = vmatprep.subr.mxu0 %v10241_v50 }
 0x14b   :  { %2510 = vmatprep.subr.mxu1 %v10246_v51  ;;  %2440 = vmatpush1.msra.mxu0 %v10253_v52  ;;  %v10508_v51 = vld [vmem:[%s13925_s5] sm:$0xf]  ;;  %s8055_s5 = sld [smem:[#allocation10 + $0x2]] }
 0x14c   :  { %2511 = vmatpush1.msra.mxu1 %v10258_v54  ;;  %2441 = vmatprep.subr.mxu0 %v10265_v56  ;;  %v10513_v56 = vsub.s32 1, %v10490_v18 }
 0x14d   :  { %2512 = vmatprep.subr.mxu1 %v10270_v57  ;;  %2442 = vmatpush1.msra.mxu0 %v10277_v58  ;;  %v1779_v57 = vpop.f32.mrf.mxu0  ;;  %v1822_v58 = vpop.f32.mrf.mxu1 }
 0x14e   :  { %2513 = vmatpush1.msra.mxu1 %v10282_v59  ;;  %2443 = vmatprep.subr.mxu0 %v10289_v60  ;;  %14249 = vst [vmem:[#allocation55_spill] sm:$0xff] %v10513_v56  ;;  %v406_v59 = vrot.slane %v10508_v51, %v10501_v19 }
 0x14f   :  { %2514 = vmatprep.subr.mxu1 %v10294_v61  ;;  %2444 = vmatpush1.msra.mxu0 %v10301_v62 }
 0x150   :  { %2515 = vmatpush1.msra.mxu1 %v10306_v63  ;;  %2445 = vmatprep.subr.mxu0 %v10313_v0  ;;  %v410_v63 = vrot.slane %v10508_v51, %v10513_v56  ;;  %v1781_v0 = vpop.f32.mrf.mxu0 }
 0x151   :  { %2516 = vmatprep.subr.mxu1 %v10318_v1  ;;  %2446 = vmatpush1.msra.mxu0 %v10325_v2  ;;  %v1824_v1 = vpop.f32.mrf.mxu1  ;;  %v1778_v2 = vadd.f32 %v1777_v45, %v406_v59 }
 0x152   :  { %2517 = vmatpush1.msra.mxu1 %v10330_v3  ;;  %2447 = vmatprep.subr.mxu0 %v10337_v4  ;;  %v14250_v4 = vld [vmem:[#allocation45_spill] sm:$0xff] }
 0x153   :  { %2518 = vmatprep.subr.mxu1 %v10342_v5  ;;  %2448 = vmatpush1.msra.mxu0 %v10349_v6  ;;  %v1780_v5 = vadd.f32 %v1779_v57, %v410_v63  ;;  %v1826_v6 = vpop.f32.mrf.mxu1  ;;  %v1821_v45 = vadd.f32 %v1820_v44, %v1778_v2 }
 0x154   :  { %2519 = vmatpush1.msra.mxu1 %v10354_v7  ;;  %2449 = vmatprep.subr.mxu0 %v10361_v10  ;;  %v1783_v7 = vpop.f32.mrf.mxu0  ;;  %v14251_v10 = vld [vmem:[#allocation46_spill] sm:$0xff] }
 0x155   :  { %2520 = vmatprep.subr.mxu1 %v10366_v11  ;;  %2450 = vmatpush1.msra.mxu0 %v10373_v12  ;;  %v1782_v11 = vadd.f32 %v1781_v0, %v406_v59  ;;  %v1823_v57 = vadd.f32 %v1822_v58, %v1780_v5 }
 0x156   :  { %2521 = vmatpush1.msra.mxu1 %v10378_v13  ;;  %2451 = vmatprep.subr.mxu0 %v10385_v14 }
 0x157   :  { %2522 = vmatprep.subr.mxu1 %v10390_v15  ;;  %2452 = vmatpush1.msra.mxu0 %v10397_v16  ;;  %v1825_v59 = vadd.f32 %v1824_v1, %v1782_v11  ;;  %v10550_v11 = vsub.s32 2, %v10490_v18 }
 0x158   :  { %2523 = vmatpush1.msra.mxu1 %v10402_v17  ;;  %2453 = vmatprep.subr.mxu0 %v14250_v4  ;;  %v1784_v17 = vadd.f32 %v1783_v7, %v410_v63  ;;  %v14252_v4 = vmov 0.0  }
 0x159   :  { %2524 = vmatprep.subr.mxu1 %v14251_v10  ;;  %2454 = vmatpush1.msra.mxu0 %v10421_v22  ;;  %14253 = vst [vmem:[#allocation56_spill] sm:$0xff] %v10550_v11 }
 0x15a   :  { %2525 = vmatpush1.msra.mxu1 %v10426_v23  ;;  %v1863_v14 = vpop.f32.mrf.mxu0  ;;  %2455 = vmatprep.subr.mxu0 %v10433_v24  ;;  %v1827_v5 = vadd.f32 %v1826_v6, %v1784_v17  ;;  %v414_v17 = vrot.slane %v10508_v51, %v10550_v11 }
 0x15b   :  { %v1906_v13 = vpop.f32.mrf.mxu1  ;;  %2526 = vmatprep.subr.mxu1 %v10438_v25  ;;  %v1864_v16 = vadd.f32 %v1863_v14, %v1821_v45  ;;  %2456 = vmatpush1.msra.mxu0 %v10445_v26 }
 0x15c   :  { %2489 = vmatprep.mubr.f32.mxu0 %v14252_v4  ;;  %v1865_v10 = vpop.f32.mrf.mxu0  ;;  %2527 = vmatpush1.msra.mxu1 %v10452_v27 }
 0x15d   :  { %v1908_v44 = vpop.f32.mrf.mxu1  ;;  %2560 = vmatprep.mubr.f32.mxu1 %v14252_v4  ;;  %v1866_v0 = vadd.f32 %v1865_v10, %v1823_v57  ;;  %v1907_v2 = vadd.f32 %v1906_v13, %v1864_v16  ;;  %2641 = vmatprep.subr.mxu0 %v10075_v28  ;;  %v10553_v13 = vsub.s32 3, %v10490_v18 }
 0x15e   :  { %2712 = vmatprep.subr.mxu1 %v10080_v29  ;;  %v1867_v58 = vpop.f32.mrf.mxu0 }
 0x15f   :  { %v1910_v63 = vpop.f32.mrf.mxu1  ;;  %2087 = vst [vmem:[#allocation2] sm:$0xff] %v1907_v2  ;;  %v1868_v7 = vadd.f32 %v1867_v58, %v1825_v59  ;;  %v1909_v14 = vadd.f32 %v1908_v44, %v1866_v0  ;;  %14254 = vst [vmem:[#allocation57_spill] sm:$0xff] %v10553_v13  ;;  %v418_v57 = vrot.slane %v10508_v51, %v10553_v13 }
 0x160   :  { %v1869_v45 = vpop.f32.mrf.mxu0 }
 0x161   :  { %v1912_v26 = vpop.f32.mrf.mxu1  ;;  %2088 = vst [vmem:[#allocation2 + $0x8] sm:$0xff] %v1909_v14  ;;  %v1870_v25 = vadd.f32 %v1869_v45, %v1827_v5  ;;  %v1911_v27 = vadd.f32 %v1910_v63, %v1868_v7 }
 0x163   :  { %2091 = vst [vmem:[#allocation2 + $0x20] sm:$0xff] %v1911_v27  ;;  %v1913_v4 = vadd.f32 %v1912_v26, %v1870_v25 }
 0x165   :  { %2092 = vst [vmem:[#allocation2 + $0x28] sm:$0xff] %v1913_v4 }
 0x19a   :  { %v1949_v1 = vpop.f32.mrf.mxu0 }
 0x19b   :  { %v1992_v10 = vpop.f32.mrf.mxu1  ;;  %v1950_v25 = vadd.f32 %v1949_v1, %v414_v17 }
 0x19c   :  { %v1951_v6 = vpop.f32.mrf.mxu0 }
 0x19d   :  { %v1994_v16 = vpop.f32.mrf.mxu1  ;;  %v1952_v4 = vadd.f32 %v1951_v6, %v418_v57  ;;  %v1993_v0 = vadd.f32 %v1992_v10, %v1950_v25 }
 0x19e   :  { %v1953_v44 = vpop.f32.mrf.mxu0 }
 0x19f   :  { %v1996_v27 = vpop.f32.mrf.mxu1  ;;  %v1954_v2 = vadd.f32 %v1953_v44, %v414_v17  ;;  %v1995_v5 = vadd.f32 %v1994_v16, %v1952_v4 }
 0x1a0   :  { %v1955_v26 = vpop.f32.mrf.mxu0 }
 0x1a1   :  { %v1998_v59 = vpop.f32.mrf.mxu1  ;;  %v1956_v7 = vadd.f32 %v1955_v26, %v418_v57  ;;  %v1997_v29 = vadd.f32 %v1996_v27, %v1954_v2  ;;  %v14255_v57 = vlaneseq }
 0x1a3   :  { %v1999_v22 = vadd.f32 %v1998_v59, %v1956_v7  ;;  %v10560_v44 = vand.u32 127, %v14255_v57  ;;  %v14263_v7 = vmov 0 }
 0x1a5   :  { %14256 = vst [vmem:[#allocation58_spill] sm:$0xff] %v10560_v44  ;;  %v2097_v27 = vadd.s32 128, %v10560_v44  ;;  %vm2100_vm0 = vcmp.ge.s32.totalorder %v10560_v44, 16  ;;  %vm2104_vm1 = vcmp.lt.s32.totalorder %v10560_v44, 32 }
 0x1a6   :  { %vm10567_vm4 = vmand %vm2100_vm0, %vm2104_vm1 }
 0x1a7   :  { %vm2113_vm2 = vcmp.ge.s32.totalorder %v2097_v27, 144  ;;  %vm2117_vm3 = vcmp.lt.s32.totalorder %v2097_v27, 160 }
 0x1a8   :  { %vm10573_vm5 = vmand %vm2113_vm2, %vm2117_vm3  ;;  %vm6436_vm3 = vcmask 124928  }
 0x1da   :  { %v2035_v58 = vpop.f32.mrf.mxu0 }
 0x1db   :  { %v2078_v63 = vpop.f32.mrf.mxu1  ;;  %v2036_v14 = vadd.f32 %v2035_v58, %v1993_v0 }
 0x1dc   :  { %v2037_v45 = vpop.f32.mrf.mxu0 }
 0x1dd   :  { %v2080_v18 = vpop.f32.mrf.mxu1  ;;  %v2038_v28 = vadd.f32 %v2037_v45, %v1995_v5  ;;  %v2079_v24 = vadd.f32 %v2078_v63, %v2036_v14  ;;  %v2099_v63 = vadd.s32 384, %v10560_v44 }
 0x1de   :  { %v2039_v23 = vpop.f32.mrf.mxu0 }
 0x1df   :  { %v2082_v51 = vpop.f32.mrf.mxu1  ;;  %2089 = vst [vmem:[#allocation2 + $0x10] sm:$0xff] %v2079_v24  ;;  %v2040_v1 = vadd.f32 %v2039_v23, %v1997_v29  ;;  %v2081_v6 = vadd.f32 %v2080_v18, %v2038_v28  ;;  %v2098_v18 = vadd.s32 256, %v10560_v44  ;;  %v14260_v23 = vmov 0  ;;  %v14292_v44 = vld [vmem:[#allocation45_spill] sm:$0xff] }
 0x1e0   :  { %v2041_v15 = vpop.f32.mrf.mxu0  ;;  %v14261_v23 = vsel %vm10573_vm5, 4294967295, %v14260_v23  ;;  %vm2139_vm9 = vcmp.ge.s32.totalorder %v2099_v63, 400  ;;  %vm2143_vm10 = vcmp.lt.s32.totalorder %v2099_v63, 416 }
 0x1e1   :  { %v2084_v12 = vpop.f32.mrf.mxu1  ;;  %2090 = vst [vmem:[#allocation2 + $0x18] sm:$0xff] %v2081_v6  ;;  %v2042_v10 = vadd.f32 %v2041_v15, %v1999_v22  ;;  %v2083_v17 = vadd.f32 %v2082_v51, %v2040_v1  ;;  %14262 = vst [vmem:[#allocation60_spill] sm:$0xff] %v14261_v23  ;;  %vm2126_vm6 = vcmp.ge.s32.totalorder %v2098_v18, 272  ;;  %vm2130_vm7 = vcmp.lt.s32.totalorder %v2098_v18, 288 }
 0x1e2   :  { %vm10584_vm8 = vmand %vm2126_vm6, %vm2130_vm7  ;;  %vm6450_vm6 = vcmask 130048  }
 0x1e3   :  { %2093 = vst [vmem:[#allocation2 + $0x30] sm:$0xff] %v2083_v17  ;;  %v2085_v16 = vadd.f32 %v2084_v12, %v2042_v10  ;;  %v14257_v12 = vmov 0  ;;  %v14264_v7 = vsel %vm10584_vm8, 4294967295, %v14263_v7  ;;  %vm10592_vm11 = vmand %vm2139_vm9, %vm2143_vm10  ;;  %vm7564_vm9 = vcmask 36864  }
 0x1e4   :  { %v14258_v12 = vsel %vm10567_vm4, 4294967295, %v14257_v12  ;;  %14265 = vst [vmem:[#allocation61_spill] sm:$0xff] %v14264_v7  ;;  %v13553_v7 = vld [vmem:[%s13930_s10 + $0x28] sm:$0xff] }
 0x1e5   :  { %2094 = vst [vmem:[#allocation2 + $0x38] sm:$0xff] %v2085_v16  ;;  %14259 = vst [vmem:[#allocation59_spill] sm:$0xff] %v14258_v12  ;;  %v14266_v16 = vmov 0 }
 0x1e6   :  { %v14267_v16 = vsel %vm10592_vm11, 4294967295, %v14266_v16 }
 0x1e7   :  { %14268 = vst [vmem:[#allocation62_spill] sm:$0xff] %v14267_v16  ;;  %v13546_v16 = vld [vmem:[%s13930_s10 + $0x50] sm:$0xff] }
 0x1e8   :  { %v2160_v29 = vld [vmem:[#allocation2] ss:$8 sm:$0xf] }
 0x1e9   :  { %v2188_v15 = vrot.slane %v2160_v29, %v10501_v19  ;;  %v2192_v26 = vrot.slane %v2160_v29, %v10513_v56  ;;  %v2196_v45 = vrot.slane %v2160_v29, %v10550_v11  ;;  %v2200_v57 = vrot.slane %v2160_v29, %v10553_v13 }
 0x1ec   :  { %v2162_v25 = vld [vmem:[#allocation2 + $0x27] ss:$8 sm:$0xf] }
 0x1ed   :  { %v2167_v28 = vrot.slane %v2162_v25, %v10501_v19  ;;  %v2171_v22 = vrot.slane %v2162_v25, %v10513_v56  ;;  %v2175_v0 = vrot.slane %v2162_v25, %v10550_v11  ;;  %v2179_v17 = vrot.slane %v2162_v25, %v10553_v13  ;;  %v401_v25 = vld [vmem:[%s13926_s6 + $0x1] sm:$0x1] }
 0x1ef   :  { %v2205_v24 = vsel %vm10567_vm4, %v2167_v28, %v2188_v15  ;;  %v2206_v2 = vsel %vm10573_vm5, %v2171_v22, %v2192_v26  ;;  %v2207_v6 = vsel %vm10584_vm8, %v2175_v0, %v2196_v45  ;;  %v2208_v28 = vsel %vm10592_vm11, %v2179_v17, %v2200_v57  ;;  %v14271_v17 = vld [vmem:[#allocation23_spill] sm:$0xff]  ;;  %v14272_v57 = vld [vmem:[#allocation24_spill] sm:$0xff] }
 0x1fb   :  { %v2275_v4 = vpop.f32.mrf.mxu0 }
 0x1fc   :  { %v2351_v59 = vadd.f32 %v2275_v4, %v2205_v24  ;;  %v2346_v51 = vpop.f32.mrf.mxu1 }
 0x1fd   :  { %v2277_v58 = vpop.f32.mrf.mxu0  ;;  %v2353_v10 = vadd.f32 %v2346_v51, %v2207_v6  ;;  %v14269_v6 = vld [vmem:[#allocation21_spill] sm:$0xff] }
 0x1fe   :  { %v2355_v5 = vmul.f32 0.5, %v2351_v59  ;;  %v2352_v14 = vadd.f32 %v2277_v58, %v2206_v2  ;;  %v2348_v27 = vpop.f32.mrf.mxu1 }
 0x1ff   :  { %v2354_v18 = vadd.f32 %v2348_v27, %v2208_v28  ;;  %v14273_v27 = vld [vmem:[#allocation25_spill] sm:$0xff]  ;;  %v14274_v28 = vld [vmem:[#allocation26_spill] sm:$0xff] }
 0x200   :  { %8689 = vtanh.f32 %v2355_v5  ;;  %v2359_v1 = vmul.f32 0.5, %v2352_v14 }
 0x201   :  { %v2364_v15 = vmul.f32 0.5, %v2354_v18  ;;  %v14275_v18 = vld [vmem:[#allocation27_spill] sm:$0xff] }
 0x202   :  { %8691 = vtanh.f32 %v2359_v1 }
 0x203   :  { %8693 = vtanh.f32 %v2353_v10  ;;  %v14270_v10 = vld [vmem:[#allocation22_spill] sm:$0xff] }
 0x204   :  { %8695 = vtanh.f32 %v2364_v15  ;;  %v14276_v15 = vld [vmem:[#allocation28_spill] sm:$0xff] }
 0x20d   :  { %v8690_v22 = vpop.eup %8689 }
 0x20e   :  { %v2357_v24 = vmul.f32 0.5, %v8690_v22  ;;  %v14277_v22 = vld [vmem:[#allocation29_spill] sm:$0xff] }
 0x20f   :  { %v8692_v4 = vpop.eup %8691 }
 0x210   :  { %v2358_v26 = vadd.f32 0.5, %v2357_v24  ;;  %v2361_v59 = vmul.f32 0.5, %v8692_v4  ;;  %v8694_v2 = vpop.eup %8693  ;;  %v14278_v24 = vld [vmem:[#allocation30_spill] sm:$0xff]  ;;  %v14279_v4 = vld [vmem:[#allocation31_spill] sm:$0xff] }
 0x211   :  { %v8696_v5 = vpop.eup %8695 }
 0x212   :  { %v2362_v0 = vadd.f32 0.5, %v2361_v59  ;;  %v2369_v58 = vmul.f32 %v8694_v2, %v2358_v26  ;;  %v2366_v14 = vmul.f32 0.5, %v8696_v5  ;;  %v14280_v26 = vld [vmem:[#allocation33_spill] sm:$0xff]  ;;  %v14281_v59 = vld [vmem:[#allocation34_spill] sm:$0xff]  ;;  %v14287_v5 = vld [vmem:[#allocation40_spill] sm:$0xff] }
 0x213   :  { %v14284_v2 = vld [vmem:[#allocation37_spill] sm:$0xff] }
 0x214   :  { %v2368_v29 = vmul.f32 %v2362_v0, %v401_v25  ;;  %v2367_v45 = vadd.f32 0.5, %v2366_v14  ;;  %v14282_v25 = vld [vmem:[#allocation35_spill] sm:$0xff]  ;;  %v14283_v0 = vld [vmem:[#allocation36_spill] sm:$0xff]  ;;  %v14288_v14 = vld [vmem:[#allocation41_spill] sm:$0xff] }
 0x216   :  { %v10602_v63 = vadd.f32 %v2369_v58, %v2368_v29  ;;  %v14285_v29 = vld [vmem:[#allocation38_spill] sm:$0xff]  ;;  %v14286_v58 = vld [vmem:[#allocation39_spill] sm:$0xff] }
 0x218   :  { %8697 = vtanh.f32 %v10602_v63 }
 0x225   :  { %v8698_v51 = vpop.eup %8697 }
 0x226   :  { %v2372_v1 = vmul.f32 %v8698_v51, %v2367_v45  ;;  %v14289_v45 = vld [vmem:[#allocation42_spill] sm:$0xff]  ;;  %v14290_v51 = vld [vmem:[#allocation43_spill] sm:$0xff] }
 0x228   :  { %2373 = vst [vmem:[#allocation3] sm:$0x1] %v2372_v1  ;;  %2374 = vst [vmem:[#allocation4 + $0xf] sm:$0x1] %v2372_v1  ;;  %2490 = vmatmul.mubr.f32.vlgmr.msra.gmra.mxu0 %v2372_v1  ;;  %2561 = vmatmul.mubr.f32.vlgmr.msra.gmra.mxu1 %v2372_v1  ;;  %v14291_v1 = vld [vmem:[#allocation44_spill] sm:$0xff] }
 0x229   :  { %2642 = vmatpush1.msra.mxu0 %v10087_v30  ;;  %2713 = vmatpush1.msra.mxu1 %v10092_v31 }
 0x22a   :  { %2643 = vmatprep.subr.mxu0 %v10097_v32  ;;  %2714 = vmatprep.subr.mxu1 %v10102_v53 }
 0x22b   :  { %2644 = vmatpush1.msra.mxu0 %v10109_v55  ;;  %2715 = vmatpush1.msra.mxu1 %v10114_v33 }
 0x22c   :  { %2645 = vmatprep.subr.mxu0 %v10121_v20  ;;  %2716 = vmatprep.subr.mxu1 %v10126_v21 }
 0x22d   :  { %2646 = vmatpush1.msra.mxu0 %v10133_v34  ;;  %2717 = vmatpush1.msra.mxu1 %v10138_v8 }
 0x22e   :  { %2647 = vmatprep.subr.mxu0 %v10145_v9  ;;  %2718 = vmatprep.subr.mxu1 %v10150_v35 }
 0x22f   :  { %2648 = vmatpush1.msra.mxu0 %v10157_v36  ;;  %2719 = vmatpush1.msra.mxu1 %v10162_v41 }
 0x230   :  { %2649 = vmatprep.subr.mxu0 %v10169_v43  ;;  %2720 = vmatprep.subr.mxu1 %v10174_v37 }
 0x231   :  { %2650 = vmatpush1.msra.mxu0 %v10181_v38  ;;  %2721 = vmatpush1.msra.mxu1 %v10186_v39 }
 0x232   :  { %2651 = vmatprep.subr.mxu0 %v10193_v40  ;;  %2722 = vmatprep.subr.mxu1 %v10198_v42 }
 0x233   :  { %2652 = vmatpush1.msra.mxu0 %v14269_v6  ;;  %2723 = vmatpush1.msra.mxu1 %v14270_v10 }
 0x234   :  { %2653 = vmatprep.subr.mxu0 %v10217_v46  ;;  %2724 = vmatprep.subr.mxu1 %v10222_v47 }
 0x235   :  { %2654 = vmatpush1.msra.mxu0 %v10229_v48  ;;  %2725 = vmatpush1.msra.mxu1 %v10234_v49 }
 0x236   :  { %2655 = vmatprep.subr.mxu0 %v10241_v50  ;;  %2726 = vmatprep.subr.mxu1 %v14271_v17 }
 0x237   :  { %2656 = vmatpush1.msra.mxu0 %v10253_v52  ;;  %2727 = vmatpush1.msra.mxu1 %v10258_v54 }
 0x238   :  { %2657 = vmatprep.subr.mxu0 %v14272_v57  ;;  %2728 = vmatprep.subr.mxu1 %v14273_v27 }
 0x239   :  { %2658 = vmatpush1.msra.mxu0 %v14274_v28  ;;  %2729 = vmatpush1.msra.mxu1 %v14275_v18 }
 0x23a   :  { %2659 = vmatprep.subr.mxu0 %v10289_v60  ;;  %2730 = vmatprep.subr.mxu1 %v10294_v61 }
 0x23b   :  { %2660 = vmatpush1.msra.mxu0 %v10301_v62  ;;  %2731 = vmatpush1.msra.mxu1 %v14276_v15 }
 0x23c   :  { %2661 = vmatprep.subr.mxu0 %v14277_v22  ;;  %2732 = vmatprep.subr.mxu1 %v14278_v24 }
 0x23d   :  { %2662 = vmatpush1.msra.mxu0 %v14279_v4  ;;  %2733 = vmatpush1.msra.mxu1 %v10330_v3 }
 0x23e   :  { %2663 = vmatprep.subr.mxu0 %v14280_v26  ;;  %2734 = vmatprep.subr.mxu1 %v14281_v59 }
 0x23f   :  { %2664 = vmatpush1.msra.mxu0 %v14282_v25  ;;  %2735 = vmatpush1.msra.mxu1 %v14283_v0  ;;  %v14293_v25 = vld [vmem:[#allocation46_spill] sm:$0xff]  ;;  %v14294_v0 = vld [vmem:[#allocation47_spill] sm:$0xff] }
 0x240   :  { %2665 = vmatprep.subr.mxu0 %v14284_v2  ;;  %2736 = vmatprep.subr.mxu1 %v14285_v29  ;;  %v14295_v2 = vld [vmem:[#allocation48_spill] sm:$0xff]  ;;  %v14296_v29 = vld [vmem:[#allocation49_spill] sm:$0xff] }
 0x241   :  { %2666 = vmatpush1.msra.mxu0 %v14286_v58  ;;  %2737 = vmatpush1.msra.mxu1 %v14287_v5  ;;  %v14297_v58 = vld [vmem:[#allocation50_spill] sm:$0xff]  ;;  %v14298_v5 = vld [vmem:[#allocation51_spill] sm:$0xff] }
 0x242   :  { %2667 = vmatprep.subr.mxu0 %v14288_v14  ;;  %2738 = vmatprep.subr.mxu1 %v14289_v45  ;;  %v14299_v14 = vmov 0.0   ;;  %v14300_v45 = vld [vmem:[#allocation52_spill] sm:$0xff] }
 0x243   :  { %2668 = vmatpush1.msra.mxu0 %v14290_v51  ;;  %2739 = vmatpush1.msra.mxu1 %v14291_v1  ;;  %v14301_v1 = vld [vmem:[#allocation19_spill] sm:$0xff] }
 0x244   :  { %2669 = vmatprep.subr.mxu0 %v14292_v44  ;;  %2740 = vmatprep.subr.mxu1 %v14293_v25  ;;  %v14302_v44 = vld [vmem:[#allocation20_spill] sm:$0xff] }
 0x245   :  { %2670 = vmatpush1.msra.mxu0 %v14294_v0  ;;  %2741 = vmatpush1.msra.mxu1 %v14295_v2  ;;  %v2378_v25 = vld [vmem:[#allocation2 + $0x26] ss:$8 sm:$0xf]  ;;  %v2376_v0 = vld [vmem:[#allocation2 + $0x1] ss:$8 sm:$0xf] }
 0x246   :  { %2671 = vmatprep.subr.mxu0 %v14296_v29  ;;  %2742 = vmatprep.subr.mxu1 %v14297_v58  ;;  %v2383_v2 = vrot.slane %v2378_v25, %v10501_v19  ;;  %v2404_v29 = vrot.slane %v2376_v0, %v10501_v19  ;;  %v2387_v58 = vrot.slane %v2378_v25, %v10513_v56 }
 0x247   :  { %2672 = vmatpush1.msra.mxu0 %v14298_v5  ;;  %2705 = vmatprep.mubr.f32.mxu0 %v14299_v14  ;;  %v2412_v4 = vrot.slane %v2376_v0, %v10550_v11 }
 0x248   :  { %2743 = vmatpush1.msra.mxu1 %v14300_v45  ;;  %2776 = vmatprep.mubr.f32.mxu1 %v14299_v14  ;;  %v2421_v5 = vsel %vm10567_vm4, %v2383_v2, %v2404_v29  ;;  %v2408_v45 = vrot.slane %v2376_v0, %v10513_v56  ;;  %v2391_v14 = vrot.slane %v2378_v25, %v10550_v11 }
 0x249   :  { %2857 = vmatprep.subr.mxu0 %v14301_v1  ;;  %2928 = vmatprep.subr.mxu1 %v14302_v44 }
 0x24a   :  { %v2422_v44 = vsel %vm10573_vm5, %v2387_v58, %v2408_v45  ;;  %v2423_v2 = vsel %vm10584_vm8, %v2391_v14, %v2412_v4 }
 0x2e8   :  { %v2491_v51 = vpop.f32.mrf.mxu0  ;;  %v2562_v19 = vpop.f32.mrf.mxu1 }
 0x2e9   :  { %v2567_v59 = vadd.f32 %v2491_v51, %v2421_v5  ;;  %v2569_v29 = vadd.f32 %v2562_v19, %v2423_v2  ;;  %v2395_v5 = vrot.slane %v2378_v25, %v10553_v13  ;;  %v2416_v51 = vrot.slane %v2376_v0, %v10553_v13 }
 0x2ea   :  { %v2493_v1 = vpop.f32.mrf.mxu0  ;;  %v2564_v12 = vpop.f32.mrf.mxu1 }
 0x2eb   :  { %v2571_v26 = vmul.f32 0.5, %v2567_v59  ;;  %v2568_v3 = vadd.f32 %v2493_v1, %v2422_v44  ;;  %v2424_v59 = vsel %vm10592_vm11, %v2395_v5, %v2416_v51 }
 0x2ec   :  { %v2570_v58 = vadd.f32 %v2564_v12, %v2424_v59 }
 0x2ed   :  { %8699 = vtanh.f32 %v2571_v26  ;;  %v2575_v24 = vmul.f32 0.5, %v2568_v3 }
 0x2ee   :  { %v2580_v45 = vmul.f32 0.5, %v2570_v58 }
 0x2ef   :  { %8701 = vtanh.f32 %v2575_v24 }
 0x2f0   :  { %8703 = vtanh.f32 %v2569_v29 }
 0x2f1   :  { %8705 = vtanh.f32 %v2580_v45 }
 0x2fa   :  { %v8700_v44 = vpop.eup %8699 }
 0x2fb   :  { %v2573_v1 = vmul.f32 0.5, %v8700_v44 }
 0x2fc   :  { %v8702_v26 = vpop.eup %8701 }
 0x2fd   :  { %v2574_v3 = vadd.f32 0.5, %v2573_v1  ;;  %v2577_v23 = vmul.f32 0.5, %v8702_v26  ;;  %v8704_v19 = vpop.eup %8703 }
 0x2fe   :  { %v8706_v0 = vpop.eup %8705 }
 0x2ff   :  { %v2578_v4 = vadd.f32 0.5, %v2577_v23  ;;  %v2585_v25 = vmul.f32 %v8704_v19, %v2574_v3  ;;  %v2582_v2 = vmul.f32 0.5, %v8706_v0 }
 0x301   :  { %v2584_v24 = vmul.f32 %v2578_v4, %v10602_v63  ;;  %v2583_v29 = vadd.f32 0.5, %v2582_v2 }
 0x303   :  { %v10688_v14 = vadd.f32 %v2585_v25, %v2584_v24 }
 0x305   :  { %8707 = vtanh.f32 %v10688_v14 }
 0x312   :  { %v8708_v12 = vpop.eup %8707 }
 0x313   :  { %v2588_v5 = vmul.f32 %v8708_v12, %v2583_v29 }
 0x315   :  { %2589 = vst [vmem:[#allocation3 + $0x1] sm:$0x1] %v2588_v5  ;;  %2590 = vst [vmem:[#allocation4 + $0xe] sm:$0x1] %v2588_v5  ;;  %2706 = vmatmul.mubr.f32.vlgmr.msra.gmra.mxu0 %v2588_v5  ;;  %2777 = vmatmul.mubr.f32.vlgmr.msra.gmra.mxu1 %v2588_v5 }
 0x316   :  { %2858 = vmatpush1.msra.mxu0 %v10087_v30  ;;  %2929 = vmatpush1.msra.mxu1 %v10092_v31  ;;  %v14303_v30 = vld [vmem:[#allocation30_spill] sm:$0xff]  ;;  %v14304_v31 = vld [vmem:[#allocation31_spill] sm:$0xff] }
 0x317   :  { %2859 = vmatprep.subr.mxu0 %v10097_v32  ;;  %2930 = vmatprep.subr.mxu1 %v10102_v53  ;;  %v14305_v32 = vld [vmem:[#allocation32_spill] sm:$0xff]  ;;  %v14306_v53 = vld [vmem:[#allocation33_spill] sm:$0xff] }
 0x318   :  { %2860 = vmatpush1.msra.mxu0 %v10109_v55  ;;  %2931 = vmatpush1.msra.mxu1 %v10114_v33  ;;  %v14307_v55 = vld [vmem:[#allocation34_spill] sm:$0xff]  ;;  %v14308_v33 = vld [vmem:[#allocation35_spill] sm:$0xff] }
 0x319   :  { %2861 = vmatprep.subr.mxu0 %v10121_v20  ;;  %2932 = vmatprep.subr.mxu1 %v10126_v21  ;;  %v14309_v20 = vld [vmem:[#allocation36_spill] sm:$0xff]  ;;  %v14310_v21 = vld [vmem:[#allocation37_spill] sm:$0xff] }
 0x31a   :  { %2862 = vmatpush1.msra.mxu0 %v10133_v34  ;;  %2933 = vmatpush1.msra.mxu1 %v10138_v8  ;;  %v14311_v34 = vld [vmem:[#allocation38_spill] sm:$0xff]  ;;  %v14312_v8 = vld [vmem:[#allocation39_spill] sm:$0xff] }
 0x31b   :  { %2863 = vmatprep.subr.mxu0 %v10145_v9  ;;  %2934 = vmatprep.subr.mxu1 %v10150_v35  ;;  %v14313_v9 = vld [vmem:[#allocation40_spill] sm:$0xff]  ;;  %v14314_v35 = vld [vmem:[#allocation41_spill] sm:$0xff] }
 0x31c   :  { %2864 = vmatpush1.msra.mxu0 %v10157_v36  ;;  %2935 = vmatpush1.msra.mxu1 %v10162_v41  ;;  %v14315_v36 = vld [vmem:[#allocation42_spill] sm:$0xff]  ;;  %v14316_v41 = vld [vmem:[#allocation43_spill] sm:$0xff] }
 0x31d   :  { %2865 = vmatprep.subr.mxu0 %v10169_v43  ;;  %2936 = vmatprep.subr.mxu1 %v10174_v37  ;;  %v14317_v43 = vld [vmem:[#allocation44_spill] sm:$0xff]  ;;  %v14318_v37 = vld [vmem:[#allocation45_spill] sm:$0xff] }
 0x31e   :  { %2866 = vmatpush1.msra.mxu0 %v10181_v38  ;;  %2937 = vmatpush1.msra.mxu1 %v10186_v39  ;;  %v14319_v38 = vld [vmem:[#allocation46_spill] sm:$0xff]  ;;  %v14320_v39 = vld [vmem:[#allocation47_spill] sm:$0xff] }
 0x31f   :  { %2867 = vmatprep.subr.mxu0 %v10193_v40  ;;  %2938 = vmatprep.subr.mxu1 %v10198_v42  ;;  %v14321_v40 = vld [vmem:[#allocation48_spill] sm:$0xff]  ;;  %v14322_v42 = vld [vmem:[#allocation49_spill] sm:$0xff] }
 0x320   :  { %2868 = vmatpush1.msra.mxu0 %v14269_v6  ;;  %2939 = vmatpush1.msra.mxu1 %v14270_v10 }
 0x321   :  { %2869 = vmatprep.subr.mxu0 %v10217_v46  ;;  %2940 = vmatprep.subr.mxu1 %v10222_v47  ;;  %v14323_v46 = vld [vmem:[#allocation50_spill] sm:$0xff]  ;;  %v14324_v47 = vld [vmem:[#allocation51_spill] sm:$0xff] }
 0x322   :  { %2870 = vmatpush1.msra.mxu0 %v10229_v48  ;;  %2941 = vmatpush1.msra.mxu1 %v10234_v49  ;;  %v14325_v48 = vmov 0.0   ;;  %v14326_v49 = vld [vmem:[#allocation52_spill] sm:$0xff] }
 0x323   :  { %2871 = vmatprep.subr.mxu0 %v10241_v50  ;;  %2942 = vmatprep.subr.mxu1 %v14271_v17  ;;  %v10758_v50 = vld [vmem:[%s13924_s4 + $0x1e8] sm:$0xff] }
 0x324   :  { %2872 = vmatpush1.msra.mxu0 %v10253_v52  ;;  %2943 = vmatpush1.msra.mxu1 %v10258_v54  ;;  %14327 = vst [vmem:[#allocation21_spill] sm:$0xff] %v10758_v50  ;;  %v10764_v52 = vld [vmem:[%s13924_s4 + $0x1f8] sm:$0xff] }
 0x325   :  { %2873 = vmatprep.subr.mxu0 %v14272_v57  ;;  %2944 = vmatprep.subr.mxu1 %v14273_v27  ;;  %14328 = vst [vmem:[#allocation22_spill] sm:$0xff] %v10764_v52  ;;  %v2594_v54 = vld [vmem:[#allocation2 + $0x25] ss:$8 sm:$0xf] }
 0x326   :  { %2874 = vmatpush1.msra.mxu0 %v14274_v28  ;;  %2945 = vmatpush1.msra.mxu1 %v14275_v18  ;;  %v2603_v63 = vrot.slane %v2594_v54, %v10513_v56  ;;  %v2607_v28 = vrot.slane %v2594_v54, %v10550_v11  ;;  %v2611_v3 = vrot.slane %v2594_v54, %v10553_v13 }
 0x327   :  { %2875 = vmatprep.subr.mxu0 %v10289_v60  ;;  %2946 = vmatprep.subr.mxu1 %v10294_v61  ;;  %v2592_v60 = vld [vmem:[#allocation2 + $0x2] ss:$8 sm:$0xf] }
 0x328   :  { %2876 = vmatpush1.msra.mxu0 %v10301_v62  ;;  %2947 = vmatpush1.msra.mxu1 %v14276_v15  ;;  %v14329_v61 = vld [vmem:[#allocation54_spill] sm:$0xff]  ;;  %v2624_v57 = vrot.slane %v2592_v60, %v10513_v56  ;;  %v2628_v58 = vrot.slane %v2592_v60, %v10550_v11  ;;  %v2632_v4 = vrot.slane %v2592_v60, %v10553_v13 }
 0x329   :  { %2877 = vmatprep.subr.mxu0 %v14277_v22  ;;  %2948 = vmatprep.subr.mxu1 %v14303_v30  ;;  %v2599_v62 = vrot.slane %v2594_v54, %v14329_v61  ;;  %v2620_v23 = vrot.slane %v2592_v60, %v14329_v61  ;;  %v10868_v54 = vld [vmem:[%s13924_s4 + $0x190] sm:$0xff]  ;;  %v10874_v60 = vld [vmem:[%s13924_s4 + $0x168] sm:$0xff] }
 0x32a   :  { %2878 = vmatpush1.msra.mxu0 %v14304_v31  ;;  %2949 = vmatpush1.msra.mxu1 %v14305_v32  ;;  %v2638_v15 = vsel %vm10573_vm5, %v2603_v63, %v2624_v57  ;;  %v2639_v1 = vsel %vm10584_vm8, %v2607_v28, %v2628_v58  ;;  %v2640_v24 = vsel %vm10592_vm11, %v2611_v3, %v2632_v4  ;;  %v10892_v63 = vld [vmem:[%s13924_s4 + $0x170] sm:$0xff]  ;;  %v10910_v57 = vld [vmem:[%s13924_s4 + $0x140] sm:$0xff]  ;;  %v10922_v28 = vld [vmem:[%s13924_s4 + $0x128] sm:$0xff] }
 0x32b   :  { %2879 = vmatprep.subr.mxu0 %v14306_v53  ;;  %2950 = vmatprep.subr.mxu1 %v14307_v55  ;;  %v2637_v10 = vsel %vm10567_vm4, %v2599_v62, %v2620_v23  ;;  %v10880_v62 = vld [vmem:[%s13924_s4 + $0x178] sm:$0xff]  ;;  %v10886_v23 = vld [vmem:[%s13924_s4 + $0x160] sm:$0xff]  ;;  %v10988_v4 = vld [vmem:[%s13924_s4 + $0xf0] sm:$0xff] }
 0x32c   :  { %2880 = vmatpush1.msra.mxu0 %v14308_v33  ;;  %2951 = vmatpush1.msra.mxu1 %v14309_v20  ;;  %v10952_v58 = vld [vmem:[%s13924_s4 + $0x118] sm:$0xff]  ;;  %v10982_v3 = vld [vmem:[%s13924_s4 + $0xe0] sm:$0xff] }
 0x32d   :  { %2881 = vmatprep.subr.mxu0 %v14310_v21  ;;  %2952 = vmatprep.subr.mxu1 %v14311_v34 }
 0x32e   :  { %2882 = vmatpush1.msra.mxu0 %v14312_v8  ;;  %2953 = vmatpush1.msra.mxu1 %v14313_v9 }
 0x32f   :  { %2883 = vmatprep.subr.mxu0 %v14314_v35  ;;  %2954 = vmatprep.subr.mxu1 %v14315_v36  ;;  %v10790_v35 = vld [vmem:[%s13924_s4 + $0x1e0] sm:$0xff]  ;;  %v10802_v36 = vld [vmem:[%s13924_s4 + $0x1c8] sm:$0xff] }
 0x330   :  { %2884 = vmatpush1.msra.mxu0 %v14316_v41  ;;  %2955 = vmatpush1.msra.mxu1 %v14317_v43  ;;  %v10808_v41 = vld [vmem:[%s13924_s4 + $0x1d8] sm:$0xff]  ;;  %v10814_v43 = vld [vmem:[%s13924_s4 + $0x1c0] sm:$0xff] }
 0x331   :  { %2885 = vmatprep.subr.mxu0 %v14318_v37  ;;  %2956 = vmatprep.subr.mxu1 %v14319_v38  ;;  %v10820_v37 = vld [vmem:[%s13924_s4 + $0x1d0] sm:$0xff]  ;;  %v10826_v38 = vld [vmem:[%s13924_s4 + $0x1a8] sm:$0xff] }
 0x332   :  { %2886 = vmatpush1.msra.mxu0 %v14320_v39  ;;  %2957 = vmatpush1.msra.mxu1 %v14321_v40  ;;  %v10832_v39 = vld [vmem:[%s13924_s4 + $0x1b8] sm:$0xff]  ;;  %v10838_v40 = vld [vmem:[%s13924_s4 + $0x1a0] sm:$0xff] }
 0x333   :  { %2887 = vmatprep.subr.mxu0 %v14322_v42  ;;  %2958 = vmatprep.subr.mxu1 %v14323_v46  ;;  %v10844_v42 = vld [vmem:[%s13924_s4 + $0x1b0] sm:$0xff]  ;;  %v10850_v46 = vld [vmem:[%s13924_s4 + $0x188] sm:$0xff] }
 0x334   :  { %2888 = vmatpush1.msra.mxu0 %v14324_v47  ;;  %2921 = vmatprep.mubr.f32.mxu0 %v14325_v48  ;;  %v10856_v47 = vld [vmem:[%s13924_s4 + $0x198] sm:$0xff] }
 0x335   :  { %2959 = vmatpush1.msra.mxu1 %v14326_v49  ;;  %2992 = vmatprep.mubr.f32.mxu1 %v14325_v48  ;;  %v10862_v49 = vld [vmem:[%s13924_s4 + $0x180] sm:$0xff] }
 0x336   :  { %3073 = vmatprep.subr.mxu0 %v10758_v50  ;;  %3144 = vmatprep.subr.mxu1 %v10764_v52 }
 0x3d5   :  { %v2707_v17 = vpop.f32.mrf.mxu0  ;;  %v2778_v45 = vpop.f32.mrf.mxu1 }
 0x3d6   :  { %v2783_v27 = vadd.f32 %v2707_v17, %v2637_v10  ;;  %v2785_v26 = vadd.f32 %v2778_v45, %v2639_v1  ;;  %v10898_v10 = vld [vmem:[%s13924_s4 + $0x148] sm:$0xff]  ;;  %v10904_v17 = vld [vmem:[%s13924_s4 + $0x158] sm:$0xff]  ;;  %v10958_v45 = vld [vmem:[%s13924_s4 + $0x100] sm:$0xff] }
 0x3d7   :  { %v2709_v22 = vpop.f32.mrf.mxu0  ;;  %v2780_v19 = vpop.f32.mrf.mxu1  ;;  %v10970_v1 = vld [vmem:[%s13924_s4 + $0xe8] sm:$0xff] }
 0x3d8   :  { %v2787_v51 = vmul.f32 0.5, %v2783_v27  ;;  %v2784_v59 = vadd.f32 %v2709_v22, %v2638_v15  ;;  %v2786_v25 = vadd.f32 %v2780_v19, %v2640_v24  ;;  %v10916_v27 = vld [vmem:[%s13924_s4 + $0x150] sm:$0xff]  ;;  %v10928_v15 = vld [vmem:[%s13924_s4 + $0x138] sm:$0xff]  ;;  %v10934_v22 = vld [vmem:[%s13924_s4 + $0x120] sm:$0xff] }
 0x3d9   :  { %v10994_v19 = vld [vmem:[%s13924_s4 + $0xc8] sm:$0xff]  ;;  %v11000_v24 = vld [vmem:[%s13924_s4 + $0xd8] sm:$0xff] }
 0x3da   :  { %8709 = vtanh.f32 %v2787_v51  ;;  %v2791_v44 = vmul.f32 0.5, %v2784_v59  ;;  %v2796_v0 = vmul.f32 0.5, %v2786_v25  ;;  %v10940_v51 = vld [vmem:[%s13924_s4 + $0x130] sm:$0xff]  ;;  %v10946_v59 = vld [vmem:[%s13924_s4 + $0x108] sm:$0xff]  ;;  %v11006_v25 = vld [vmem:[%s13924_s4 + $0xc0] sm:$0xff] }
 0x3dc   :  { %8711 = vtanh.f32 %v2791_v44  ;;  %v10964_v44 = vld [vmem:[%s13924_s4 + $0x110] sm:$0xff] }
 0x3dd   :  { %8713 = vtanh.f32 %v2785_v26  ;;  %v10976_v26 = vld [vmem:[%s13924_s4 + $0xf8] sm:$0xff] }
 0x3de   :  { %8715 = vtanh.f32 %v2796_v0  ;;  %v11012_v0 = vld [vmem:[%s13924_s4 + $0xd0] sm:$0xff] }
 0x3e7   :  { %v8710_v2 = vpop.eup %8709 }
 0x3e8   :  { %v2789_v29 = vmul.f32 0.5, %v8710_v2  ;;  %v11018_v2 = vld [vmem:[%s13924_s4 + $0xa8] sm:$0xff] }
 0x3e9   :  { %v8712_v12 = vpop.eup %8711 }
 0x3ea   :  { %v2790_v5 = vadd.f32 0.5, %v2789_v29  ;;  %v2793_v30 = vmul.f32 0.5, %v8712_v12  ;;  %v8714_v32 = vpop.eup %8713  ;;  %v11024_v29 = vld [vmem:[%s13924_s4 + $0xb8] sm:$0xff]  ;;  %v11030_v12 = vld [vmem:[%s13924_s4 + $0xa0] sm:$0xff] }
 0x3eb   :  { %v8716_v20 = vpop.eup %8715  ;;  %14332 = vst [vmem:[#allocation23_spill] sm:$0xff] %v11024_v29  ;;  %14333 = vst [vmem:[#allocation24_spill] sm:$0xff] %v11030_v12 }
 0x3ec   :  { %v2794_v31 = vadd.f32 0.5, %v2793_v30  ;;  %v2801_v55 = vmul.f32 %v8714_v32, %v2790_v5  ;;  %v2798_v21 = vmul.f32 0.5, %v8716_v20  ;;  %v11036_v5 = vld [vmem:[%s13924_s4 + $0xb0] sm:$0xff]  ;;  %v11042_v30 = vld [vmem:[%s13924_s4 + $0x88] sm:$0xff]  ;;  %v11054_v32 = vld [vmem:[%s13924_s4 + $0x80] sm:$0xff] }
 0x3ed   :  { %14334 = vst [vmem:[#allocation25_spill] sm:$0xff] %v11036_v5  ;;  %14335 = vst [vmem:[#allocation26_spill] sm:$0xff] %v11042_v30  ;;  %v11072_v20 = vld [vmem:[%s13924_s4 + $0x78] sm:$0xff] }
 0x3ee   :  { %v2800_v53 = vmul.f32 %v2794_v31, %v10688_v14  ;;  %v2799_v34 = vadd.f32 0.5, %v2798_v21  ;;  %v10796_v14 = vld [vmem:[%s13924_s4 + $0x1f0] sm:$0xff]  ;;  %v11048_v31 = vld [vmem:[%s13924_s4 + $0x98] sm:$0xff]  ;;  %14337 = vst [vmem:[#allocation28_spill] sm:$0xff] %v11054_v32  ;;  %14340 = vst [vmem:[#allocation20_spill] sm:$0xff] %v11072_v20 }
 0x3ef   :  { %14336 = vst [vmem:[#allocation27_spill] sm:$0xff] %v11048_v31  ;;  %v11078_v21 = vld [vmem:[%s13924_s4 + $0x60] sm:$0xff] }
 0x3f0   :  { %v10784_v33 = vadd.f32 %v2801_v55, %v2800_v53  ;;  %v11060_v53 = vld [vmem:[%s13924_s4 + $0x90] sm:$0xff]  ;;  %v11066_v55 = vld [vmem:[%s13924_s4 + $0x68] sm:$0xff]  ;;  %14341 = vst [vmem:[#allocation30_spill] sm:$0xff] %v11078_v21 }
 0x3f1   :  { %14338 = vst [vmem:[#allocation29_spill] sm:$0xff] %v11060_v53  ;;  %14339 = vst [vmem:[#allocation19_spill] sm:$0xff] %v11066_v55 }
 0x3f2   :  { %8717 = vtanh.f32 %v10784_v33 }
 0x3ff   :  { %v8718_v8 = vpop.eup %8717 }
 0x400   :  { %v2804_v9 = vmul.f32 %v8718_v8, %v2799_v34  ;;  %v11084_v34 = vld [vmem:[%s13924_s4 + $0x70] sm:$0xff]  ;;  %v11090_v8 = vld [vmem:[%s13924_s4 + $0x48] sm:$0xff] }
 0x401   :  { %14342 = vst [vmem:[#allocation31_spill] sm:$0xff] %v11084_v34  ;;  %14343 = vst [vmem:[#allocation32_spill] sm:$0xff] %v11090_v8 }
 0x402   :  { %2805 = vst [vmem:[#allocation3 + $0x2] sm:$0x1] %v2804_v9  ;;  %2806 = vst [vmem:[#allocation4 + $0xd] sm:$0x1] %v2804_v9  ;;  %2922 = vmatmul.mubr.f32.vlgmr.msra.gmra.mxu0 %v2804_v9  ;;  %2993 = vmatmul.mubr.f32.vlgmr.msra.gmra.mxu1 %v2804_v9  ;;  %v11096_v9 = vld [vmem:[%s13924_s4 + $0x58] sm:$0xff] }
 0x403   :  { %3074 = vmatpush1.msra.mxu0 %v10790_v35  ;;  %3145 = vmatpush1.msra.mxu1 %v10796_v14  ;;  %14344 = vst [vmem:[#allocation33_spill] sm:$0xff] %v11096_v9 }
 0x404   :  { %3075 = vmatprep.subr.mxu0 %v10802_v36  ;;  %3146 = vmatprep.subr.mxu1 %v10808_v41 }
 0x405   :  { %3076 = vmatpush1.msra.mxu0 %v10814_v43  ;;  %3147 = vmatpush1.msra.mxu1 %v10820_v37 }
 0x406   :  { %3077 = vmatprep.subr.mxu0 %v10826_v38  ;;  %3148 = vmatprep.subr.mxu1 %v10832_v39 }
 0x407   :  { %3078 = vmatpush1.msra.mxu0 %v10838_v40  ;;  %3149 = vmatpush1.msra.mxu1 %v10844_v42 }
 0x408   :  { %3079 = vmatprep.subr.mxu0 %v10850_v46  ;;  %3150 = vmatprep.subr.mxu1 %v10856_v47 }
 0x409   :  { %3080 = vmatpush1.msra.mxu0 %v10862_v49  ;;  %3151 = vmatpush1.msra.mxu1 %v10868_v54 }
 0x40a   :  { %3081 = vmatprep.subr.mxu0 %v10874_v60  ;;  %3152 = vmatprep.subr.mxu1 %v10880_v62 }
 0x40b   :  { %3082 = vmatpush1.msra.mxu0 %v10886_v23  ;;  %3153 = vmatpush1.msra.mxu1 %v10892_v63 }
 0x40c   :  { %3083 = vmatprep.subr.mxu0 %v10898_v10  ;;  %3154 = vmatprep.subr.mxu1 %v10904_v17 }
 0x40d   :  { %3084 = vmatpush1.msra.mxu0 %v10910_v57  ;;  %3155 = vmatpush1.msra.mxu1 %v10916_v27 }
 0x40e   :  { %3085 = vmatprep.subr.mxu0 %v10922_v28  ;;  %3156 = vmatprep.subr.mxu1 %v10928_v15 }
 0x40f   :  { %3086 = vmatpush1.msra.mxu0 %v10934_v22  ;;  %3157 = vmatpush1.msra.mxu1 %v10940_v51 }
 0x410   :  { %3087 = vmatprep.subr.mxu0 %v10946_v59  ;;  %3158 = vmatprep.subr.mxu1 %v10952_v58 }
 0x411   :  { %3088 = vmatpush1.msra.mxu0 %v10958_v45  ;;  %3159 = vmatpush1.msra.mxu1 %v10964_v44 }
 0x412   :  { %3089 = vmatprep.subr.mxu0 %v10970_v1  ;;  %3160 = vmatprep.subr.mxu1 %v10976_v26 }
 0x413   :  { %3090 = vmatpush1.msra.mxu0 %v10982_v3  ;;  %3161 = vmatpush1.msra.mxu1 %v10988_v4 }
 0x414   :  { %3091 = vmatprep.subr.mxu0 %v10994_v19  ;;  %3162 = vmatprep.subr.mxu1 %v11000_v24 }
 0x415   :  { %3092 = vmatpush1.msra.mxu0 %v11006_v25  ;;  %3163 = vmatpush1.msra.mxu1 %v11012_v0 }
 0x416   :  { %3093 = vmatprep.subr.mxu0 %v11018_v2  ;;  %3164 = vmatprep.subr.mxu1 %v11024_v29 }
 0x417   :  { %3094 = vmatpush1.msra.mxu0 %v11030_v12  ;;  %3165 = vmatpush1.msra.mxu1 %v11036_v5 }
 0x418   :  { %3095 = vmatprep.subr.mxu0 %v11042_v30  ;;  %3166 = vmatprep.subr.mxu1 %v11048_v31 }
 0x419   :  { %3096 = vmatpush1.msra.mxu0 %v11054_v32  ;;  %3167 = vmatpush1.msra.mxu1 %v11060_v53 }
 0x41a   :  { %3097 = vmatprep.subr.mxu0 %v11066_v55  ;;  %3168 = vmatprep.subr.mxu1 %v11072_v20 }
 0x41b   :  { %3098 = vmatpush1.msra.mxu0 %v11078_v21  ;;  %3169 = vmatpush1.msra.mxu1 %v11084_v34  ;;  %v11102_v21 = vld [vmem:[%s13924_s4 + $0x40] sm:$0xff]  ;;  %v11108_v34 = vld [vmem:[%s13924_s4 + $0x50] sm:$0xff] }
 0x41c   :  { %3099 = vmatprep.subr.mxu0 %v11090_v8  ;;  %3170 = vmatprep.subr.mxu1 %v11096_v9  ;;  %14345 = vst [vmem:[#allocation34_spill] sm:$0xff] %v11102_v21  ;;  %14346 = vst [vmem:[#allocation35_spill] sm:$0xff] %v11108_v34  ;;  %v11114_v8 = vld [vmem:[%s13924_s4 + $0x28] sm:$0xff]  ;;  %v11120_v9 = vld [vmem:[%s13924_s4 + $0x38] sm:$0xff] }
 0x41d   :  { %3100 = vmatpush1.msra.mxu0 %v11102_v21  ;;  %3171 = vmatpush1.msra.mxu1 %v11108_v34  ;;  %14347 = vst [vmem:[#allocation36_spill] sm:$0xff] %v11114_v8  ;;  %14348 = vst [vmem:[#allocation37_spill] sm:$0xff] %v11120_v9  ;;  %v11126_v21 = vld [vmem:[%s13924_s4 + $0x20] sm:$0xff]  ;;  %v11132_v34 = vld [vmem:[%s13924_s4 + $0x30] sm:$0xff] }
 0x41e   :  { %3101 = vmatprep.subr.mxu0 %v11114_v8  ;;  %3172 = vmatprep.subr.mxu1 %v11120_v9  ;;  %14349 = vst [vmem:[#allocation38_spill] sm:$0xff] %v11126_v21  ;;  %14350 = vst [vmem:[#allocation39_spill] sm:$0xff] %v11132_v34  ;;  %v11138_v8 = vld [vmem:[%s13924_s4 + $0x8] sm:$0xff]  ;;  %v11144_v9 = vld [vmem:[%s13924_s4 + $0x18] sm:$0xff] }
 0x41f   :  { %3102 = vmatpush1.msra.mxu0 %v11126_v21  ;;  %3173 = vmatpush1.msra.mxu1 %v11132_v34  ;;  %14351 = vst [vmem:[#allocation40_spill] sm:$0xff] %v11138_v8  ;;  %14352 = vst [vmem:[#allocation41_spill] sm:$0xff] %v11144_v9  ;;  %v11150_v21 = vld [vmem:[%s13924_s4] sm:$0xff] }
 0x420   :  { %3103 = vmatprep.subr.mxu0 %v11138_v8  ;;  %3174 = vmatprep.subr.mxu1 %v11144_v9  ;;  %14353 = vst [vmem:[#allocation42_spill] sm:$0xff] %v11150_v21  ;;  %v11157_v8 = vld [vmem:[%s13924_s4 + $0x10] sm:$0xff] }
 0x421   :  { %3104 = vmatpush1.msra.mxu0 %v11150_v21  ;;  %3137 = vmatprep.mubr.f32.mxu0 %v14325_v48  ;;  %14354 = vst [vmem:[#allocation43_spill] sm:$0xff] %v11157_v8  ;;  %v2810_v9 = vld [vmem:[#allocation2 + $0x24] ss:$8 sm:$0xf] }
 0x422   :  { %3175 = vmatpush1.msra.mxu1 %v11157_v8  ;;  %3208 = vmatprep.mubr.f32.mxu1 %v14325_v48  ;;  %v2808_v34 = vld [vmem:[#allocation2 + $0x3] ss:$8 sm:$0xf]  ;;  %v2815_v20 = vrot.slane %v2810_v9, %v14329_v61  ;;  %v2819_v55 = vrot.slane %v2810_v9, %v10513_v56  ;;  %v2823_v48 = vrot.slane %v2810_v9, %v10550_v11 }
 0x423   :  { %3289 = vmatprep.subr.mxu0 %v10758_v50  ;;  %3360 = vmatprep.subr.mxu1 %v10764_v52  ;;  %v2836_v21 = vrot.slane %v2808_v34, %v14329_v61  ;;  %v2840_v8 = vrot.slane %v2808_v34, %v10513_v56  ;;  %v2844_v12 = vrot.slane %v2808_v34, %v10550_v11 }
 0x425   :  { %v2853_v53 = vsel %vm10567_vm4, %v2815_v20, %v2836_v21  ;;  %v2854_v52 = vsel %vm10573_vm5, %v2819_v55, %v2840_v8  ;;  %v2855_v20 = vsel %vm10584_vm8, %v2823_v48, %v2844_v12 }
 0x4c2   :  { %v2923_v32 = vpop.f32.mrf.mxu0  ;;  %v2994_v61 = vpop.f32.mrf.mxu1 }
 0x4c3   :  { %v2999_v31 = vadd.f32 %v2923_v32, %v2853_v53  ;;  %v3001_v21 = vadd.f32 %v2994_v61, %v2855_v20  ;;  %v2827_v32 = vrot.slane %v2810_v9, %v10553_v13  ;;  %v2848_v53 = vrot.slane %v2808_v34, %v10553_v13 }
 0x4c4   :  { %v2925_v50 = vpop.f32.mrf.mxu0  ;;  %v2996_v6 = vpop.f32.mrf.mxu1 }
 0x4c5   :  { %v3003_v30 = vmul.f32 0.5, %v2999_v31  ;;  %v3000_v5 = vadd.f32 %v2925_v50, %v2854_v52  ;;  %v2856_v31 = vsel %vm10592_vm11, %v2827_v32, %v2848_v53  ;;  %v14357_v53 = vld [vmem:[#allocation25_spill] sm:$0xff] }
 0x4c6   :  { %v3002_v50 = vadd.f32 %v2996_v6, %v2856_v31  ;;  %v14358_v31 = vld [vmem:[#allocation26_spill] sm:$0xff] }
 0x4c7   :  { %8719 = vtanh.f32 %v3003_v30  ;;  %v3007_v29 = vmul.f32 0.5, %v3000_v5 }
 0x4c8   :  { %v3012_v52 = vmul.f32 0.5, %v3002_v50  ;;  %v14359_v50 = vld [vmem:[#allocation27_spill] sm:$0xff] }
 0x4c9   :  { %8721 = vtanh.f32 %v3007_v29 }
 0x4ca   :  { %8723 = vtanh.f32 %v3001_v21 }
 0x4cb   :  { %8725 = vtanh.f32 %v3012_v52  ;;  %v14360_v52 = vld [vmem:[#allocation28_spill] sm:$0xff] }
 0x4d4   :  { %v8720_v55 = vpop.eup %8719 }
 0x4d5   :  { %v3005_v8 = vmul.f32 0.5, %v8720_v55  ;;  %v14361_v55 = vld [vmem:[#allocation29_spill] sm:$0xff] }
 0x4d6   :  { %v8722_v30 = vpop.eup %8721 }
 0x4d7   :  { %v3006_v5 = vadd.f32 0.5, %v3005_v8  ;;  %v3009_v18 = vmul.f32 0.5, %v8722_v30  ;;  %v8724_v61 = vpop.eup %8723  ;;  %v14362_v8 = vld [vmem:[#allocation19_spill] sm:$0xff]  ;;  %v14363_v30 = vld [vmem:[#allocation20_spill] sm:$0xff] }
 0x4d8   :  { %v8726_v34 = vpop.eup %8725 }
 0x4d9   :  { %v3010_v48 = vadd.f32 0.5, %v3009_v18  ;;  %v3017_v12 = vmul.f32 %v8724_v61, %v3006_v5  ;;  %v3014_v20 = vmul.f32 0.5, %v8726_v34  ;;  %v14355_v18 = vld [vmem:[#allocation23_spill] sm:$0xff]  ;;  %v14364_v5 = vld [vmem:[#allocation30_spill] sm:$0xff]  ;;  %v14366_v61 = vld [vmem:[#allocation32_spill] sm:$0xff] }
 0x4da   :  { %v14369_v34 = vld [vmem:[#allocation35_spill] sm:$0xff] }
 0x4db   :  { %v3016_v29 = vmul.f32 %v3010_v48, %v10784_v33  ;;  %v3015_v21 = vadd.f32 0.5, %v3014_v20  ;;  %v14356_v33 = vld [vmem:[#allocation24_spill] sm:$0xff]  ;;  %v14365_v48 = vld [vmem:[#allocation31_spill] sm:$0xff] }
 0x4dc   :  { %v14370_v20 = vld [vmem:[#allocation36_spill] sm:$0xff] }
 0x4dd   :  { %v11180_v9 = vadd.f32 %v3017_v12, %v3016_v29  ;;  %v14367_v29 = vld [vmem:[#allocation33_spill] sm:$0xff]  ;;  %v14368_v12 = vld [vmem:[#allocation34_spill] sm:$0xff] }
 0x4df   :  { %8727 = vtanh.f32 %v11180_v9 }
 0x4ec   :  { %v8728_v6 = vpop.eup %8727 }
 0x4ed   :  { %v3020_v32 = vmul.f32 %v8728_v6, %v3015_v21  ;;  %v14371_v21 = vld [vmem:[#allocation37_spill] sm:$0xff]  ;;  %v14372_v6 = vld [vmem:[#allocation38_spill] sm:$0xff] }
 0x4ef   :  { %3021 = vst [vmem:[#allocation3 + $0x3] sm:$0x1] %v3020_v32  ;;  %3022 = vst [vmem:[#allocation4 + $0xc] sm:$0x1] %v3020_v32  ;;  %3138 = vmatmul.mubr.f32.vlgmr.msra.gmra.mxu0 %v3020_v32  ;;  %3209 = vmatmul.mubr.f32.vlgmr.msra.gmra.mxu1 %v3020_v32  ;;  %v14373_v32 = vld [vmem:[#allocation39_spill] sm:$0xff] }
 0x4f0   :  { %3290 = vmatpush1.msra.mxu0 %v10790_v35  ;;  %3361 = vmatpush1.msra.mxu1 %v10796_v14 }
 0x4f1   :  { %3291 = vmatprep.subr.mxu0 %v10802_v36  ;;  %3362 = vmatprep.subr.mxu1 %v10808_v41 }
 0x4f2   :  { %3292 = vmatpush1.msra.mxu0 %v10814_v43  ;;  %3363 = vmatpush1.msra.mxu1 %v10820_v37 }
 0x4f3   :  { %3293 = vmatprep.subr.mxu0 %v10826_v38  ;;  %3364 = vmatprep.subr.mxu1 %v10832_v39 }
 0x4f4   :  { %3294 = vmatpush1.msra.mxu0 %v10838_v40  ;;  %3365 = vmatpush1.msra.mxu1 %v10844_v42 }
 0x4f5   :  { %3295 = vmatprep.subr.mxu0 %v10850_v46  ;;  %3366 = vmatprep.subr.mxu1 %v10856_v47 }
 0x4f6   :  { %3296 = vmatpush1.msra.mxu0 %v10862_v49  ;;  %3367 = vmatpush1.msra.mxu1 %v10868_v54 }
 0x4f7   :  { %3297 = vmatprep.subr.mxu0 %v10874_v60  ;;  %3368 = vmatprep.subr.mxu1 %v10880_v62 }
 0x4f8   :  { %3298 = vmatpush1.msra.mxu0 %v10886_v23  ;;  %3369 = vmatpush1.msra.mxu1 %v10892_v63 }
 0x4f9   :  { %3299 = vmatprep.subr.mxu0 %v10898_v10  ;;  %3370 = vmatprep.subr.mxu1 %v10904_v17 }
 0x4fa   :  { %3300 = vmatpush1.msra.mxu0 %v10910_v57  ;;  %3371 = vmatpush1.msra.mxu1 %v10916_v27 }
 0x4fb   :  { %3301 = vmatprep.subr.mxu0 %v10922_v28  ;;  %3372 = vmatprep.subr.mxu1 %v10928_v15 }
 0x4fc   :  { %3302 = vmatpush1.msra.mxu0 %v10934_v22  ;;  %3373 = vmatpush1.msra.mxu1 %v10940_v51 }
 0x4fd   :  { %3303 = vmatprep.subr.mxu0 %v10946_v59  ;;  %3374 = vmatprep.subr.mxu1 %v10952_v58 }
 0x4fe   :  { %3304 = vmatpush1.msra.mxu0 %v10958_v45  ;;  %3375 = vmatpush1.msra.mxu1 %v10964_v44 }
 0x4ff   :  { %3305 = vmatprep.subr.mxu0 %v10970_v1  ;;  %3376 = vmatprep.subr.mxu1 %v10976_v26 }
 0x500   :  { %3306 = vmatpush1.msra.mxu0 %v10982_v3  ;;  %3377 = vmatpush1.msra.mxu1 %v10988_v4 }
 0x501   :  { %3307 = vmatprep.subr.mxu0 %v10994_v19  ;;  %3378 = vmatprep.subr.mxu1 %v11000_v24 }
 0x502   :  { %3308 = vmatpush1.msra.mxu0 %v11006_v25  ;;  %3379 = vmatpush1.msra.mxu1 %v11012_v0 }
 0x503   :  { %3309 = vmatprep.subr.mxu0 %v11018_v2  ;;  %3380 = vmatprep.subr.mxu1 %v14355_v18 }
 0x504   :  { %3310 = vmatpush1.msra.mxu0 %v14356_v33  ;;  %3381 = vmatpush1.msra.mxu1 %v14357_v53 }
 0x505   :  { %3311 = vmatprep.subr.mxu0 %v14358_v31  ;;  %3382 = vmatprep.subr.mxu1 %v14359_v50 }
 0x506   :  { %3312 = vmatpush1.msra.mxu0 %v14360_v52  ;;  %3383 = vmatpush1.msra.mxu1 %v14361_v55 }
 0x507   :  { %3313 = vmatprep.subr.mxu0 %v14362_v8  ;;  %3384 = vmatprep.subr.mxu1 %v14363_v30  ;;  %v14374_v30 = vld [vmem:[#allocation40_spill] sm:$0xff] }
 0x508   :  { %3314 = vmatpush1.msra.mxu0 %v14364_v5  ;;  %3385 = vmatpush1.msra.mxu1 %v14365_v48  ;;  %v14375_v5 = vld [vmem:[#allocation41_spill] sm:$0xff]  ;;  %v14376_v48 = vld [vmem:[#allocation42_spill] sm:$0xff] }
 0x509   :  { %3315 = vmatprep.subr.mxu0 %v14366_v61  ;;  %3386 = vmatprep.subr.mxu1 %v14367_v29  ;;  %v14377_v61 = vmov 0.0   ;;  %v14378_v29 = vld [vmem:[#allocation43_spill] sm:$0xff] }
 0x50a   :  { %3316 = vmatpush1.msra.mxu0 %v14368_v12  ;;  %3387 = vmatpush1.msra.mxu1 %v14369_v34  ;;  %v14379_v34 = vld [vmem:[#allocation21_spill] sm:$0xff]  ;;  %v14381_v12 = vld [vmem:[#allocation54_spill] sm:$0xff] }
 0x50b   :  { %3317 = vmatprep.subr.mxu0 %v14370_v20  ;;  %3388 = vmatprep.subr.mxu1 %v14371_v21  ;;  %v14380_v20 = vld [vmem:[#allocation22_spill] sm:$0xff] }
 0x50c   :  { %3318 = vmatpush1.msra.mxu0 %v14372_v6  ;;  %3389 = vmatpush1.msra.mxu1 %v14373_v32  ;;  %v3026_v21 = vld [vmem:[#allocation2 + $0x23] ss:$8 sm:$0xf]  ;;  %v3024_v6 = vld [vmem:[#allocation2 + $0x4] ss:$8 sm:$0xf] }
 0x50d   :  { %3319 = vmatprep.subr.mxu0 %v14374_v30  ;;  %3390 = vmatprep.subr.mxu1 %v14375_v5  ;;  %v3031_v32 = vrot.slane %v3026_v21, %v14381_v12  ;;  %v3052_v30 = vrot.slane %v3024_v6, %v14381_v12  ;;  %v3035_v5 = vrot.slane %v3026_v21, %v10513_v56 }
 0x50e   :  { %3320 = vmatpush1.msra.mxu0 %v14376_v48  ;;  %3353 = vmatprep.mubr.f32.mxu0 %v14377_v61  ;;  %v3060_v33 = vrot.slane %v3024_v6, %v10550_v11 }
 0x50f   :  { %3391 = vmatpush1.msra.mxu1 %v14378_v29  ;;  %3424 = vmatprep.mubr.f32.mxu1 %v14377_v61  ;;  %v3069_v48 = vsel %vm10567_vm4, %v3031_v32, %v3052_v30  ;;  %v3056_v29 = vrot.slane %v3024_v6, %v10513_v56  ;;  %v3039_v61 = vrot.slane %v3026_v21, %v10550_v11 }
 0x510   :  { %3505 = vmatprep.subr.mxu0 %v14379_v34  ;;  %3576 = vmatprep.subr.mxu1 %v14380_v20 }
 0x511   :  { %v3070_v20 = vsel %vm10573_vm5, %v3035_v5, %v3056_v29  ;;  %v3071_v30 = vsel %vm10584_vm8, %v3039_v61, %v3060_v33 }
 0x5af   :  { %v3139_v55 = vpop.f32.mrf.mxu0  ;;  %v3210_v12 = vpop.f32.mrf.mxu1 }
 0x5b0   :  { %v3215_v52 = vadd.f32 %v3139_v55, %v3069_v48  ;;  %v3217_v32 = vadd.f32 %v3210_v12, %v3071_v30  ;;  %v3043_v55 = vrot.slane %v3026_v21, %v10553_v13  ;;  %v3064_v48 = vrot.slane %v3024_v6, %v10553_v13 }
 0x5b1   :  { %v3141_v50 = vpop.f32.mrf.mxu0  ;;  %v3212_v8 = vpop.f32.mrf.mxu1 }
 0x5b2   :  { %v3219_v31 = vmul.f32 0.5, %v3215_v52  ;;  %v3216_v53 = vadd.f32 %v3141_v50, %v3070_v20  ;;  %v3072_v52 = vsel %vm10592_vm11, %v3043_v55, %v3064_v48  ;;  %v14386_v48 = vld [vmem:[#allocation25_spill] sm:$0xff] }
 0x5b3   :  { %v3218_v50 = vadd.f32 %v3212_v8, %v3072_v52  ;;  %v14387_v52 = vld [vmem:[#allocation26_spill] sm:$0xff] }
 0x5b4   :  { %8729 = vtanh.f32 %v3219_v31  ;;  %v3223_v18 = vmul.f32 0.5, %v3216_v53 }
 0x5b5   :  { %v3228_v5 = vmul.f32 0.5, %v3218_v50  ;;  %v14388_v50 = vld [vmem:[#allocation27_spill] sm:$0xff] }
 0x5b6   :  { %8731 = vtanh.f32 %v3223_v18 }
 0x5b7   :  { %8733 = vtanh.f32 %v3217_v32 }
 0x5b8   :  { %8735 = vtanh.f32 %v3228_v5  ;;  %v14389_v5 = vld [vmem:[#allocation28_spill] sm:$0xff] }
 0x5c1   :  { %v8730_v29 = vpop.eup %8729 }
 0x5c2   :  { %v3221_v20 = vmul.f32 0.5, %v8730_v29  ;;  %v14390_v29 = vld [vmem:[#allocation29_spill] sm:$0xff] }
 0x5c3   :  { %v8732_v31 = vpop.eup %8731 }
 0x5c4   :  { %v3222_v53 = vadd.f32 0.5, %v3221_v20  ;;  %v3225_v34 = vmul.f32 0.5, %v8732_v31  ;;  %v8734_v61 = vpop.eup %8733  ;;  %v14391_v20 = vld [vmem:[#allocation19_spill] sm:$0xff]  ;;  %v14392_v31 = vld [vmem:[#allocation20_spill] sm:$0xff] }
 0x5c5   :  { %v8736_v6 = vpop.eup %8735 }
 0x5c6   :  { %v3226_v33 = vadd.f32 0.5, %v3225_v34  ;;  %v3233_v12 = vmul.f32 %v8734_v61, %v3222_v53  ;;  %v3230_v30 = vmul.f32 0.5, %v8736_v6  ;;  %v14385_v34 = vld [vmem:[#allocation24_spill] sm:$0xff]  ;;  %v14393_v53 = vld [vmem:[#allocation30_spill] sm:$0xff]  ;;  %v14398_v6 = vld [vmem:[#allocation35_spill] sm:$0xff] }
 0x5c7   :  { %v14395_v61 = vld [vmem:[#allocation32_spill] sm:$0xff] }
 0x5c8   :  { %v3232_v18 = vmul.f32 %v3226_v33, %v11180_v9  ;;  %v3231_v32 = vadd.f32 0.5, %v3230_v30  ;;  %v14384_v9 = vld [vmem:[#allocation23_spill] sm:$0xff]  ;;  %v14399_v30 = vld [vmem:[#allocation36_spill] sm:$0xff] }
 0x5c9   :  { %v14394_v33 = vld [vmem:[#allocation31_spill] sm:$0xff] }
 0x5ca   :  { %v11266_v21 = vadd.f32 %v3233_v12, %v3232_v18  ;;  %v14396_v18 = vld [vmem:[#allocation33_spill] sm:$0xff]  ;;  %v14397_v12 = vld [vmem:[#allocation34_spill] sm:$0xff] }
 0x5cc   :  { %8737 = vtanh.f32 %v11266_v21 }
 0x5d9   :  { %v8738_v8 = vpop.eup %8737 }
 0x5da   :  { %v3236_v55 = vmul.f32 %v8738_v8, %v3231_v32  ;;  %v14400_v32 = vld [vmem:[#allocation37_spill] sm:$0xff]  ;;  %v14401_v8 = vld [vmem:[#allocation38_spill] sm:$0xff] }
 0x5dc   :  { %3237 = vst [vmem:[#allocation3 + $0x4] sm:$0x1] %v3236_v55  ;;  %3238 = vst [vmem:[#allocation4 + $0xb] sm:$0x1] %v3236_v55  ;;  %3354 = vmatmul.mubr.f32.vlgmr.msra.gmra.mxu0 %v3236_v55  ;;  %3425 = vmatmul.mubr.f32.vlgmr.msra.gmra.mxu1 %v3236_v55  ;;  %v14402_v55 = vld [vmem:[#allocation39_spill] sm:$0xff] }
 0x5dd   :  { %3506 = vmatpush1.msra.mxu0 %v10790_v35  ;;  %3577 = vmatpush1.msra.mxu1 %v10796_v14 }
 0x5de   :  { %3507 = vmatprep.subr.mxu0 %v10802_v36  ;;  %3578 = vmatprep.subr.mxu1 %v10808_v41 }
 0x5df   :  { %3508 = vmatpush1.msra.mxu0 %v10814_v43  ;;  %3579 = vmatpush1.msra.mxu1 %v10820_v37 }
 0x5e0   :  { %3509 = vmatprep.subr.mxu0 %v10826_v38  ;;  %3580 = vmatprep.subr.mxu1 %v10832_v39 }
 0x5e1   :  { %3510 = vmatpush1.msra.mxu0 %v10838_v40  ;;  %3581 = vmatpush1.msra.mxu1 %v10844_v42 }
 0x5e2   :  { %3511 = vmatprep.subr.mxu0 %v10850_v46  ;;  %3582 = vmatprep.subr.mxu1 %v10856_v47 }
 0x5e3   :  { %3512 = vmatpush1.msra.mxu0 %v10862_v49  ;;  %3583 = vmatpush1.msra.mxu1 %v10868_v54 }
 0x5e4   :  { %3513 = vmatprep.subr.mxu0 %v10874_v60  ;;  %3584 = vmatprep.subr.mxu1 %v10880_v62 }
 0x5e5   :  { %3514 = vmatpush1.msra.mxu0 %v10886_v23  ;;  %3585 = vmatpush1.msra.mxu1 %v10892_v63 }
 0x5e6   :  { %3515 = vmatprep.subr.mxu0 %v10898_v10  ;;  %3586 = vmatprep.subr.mxu1 %v10904_v17 }
 0x5e7   :  { %3516 = vmatpush1.msra.mxu0 %v10910_v57  ;;  %3587 = vmatpush1.msra.mxu1 %v10916_v27 }
 0x5e8   :  { %3517 = vmatprep.subr.mxu0 %v10922_v28  ;;  %3588 = vmatprep.subr.mxu1 %v10928_v15 }
 0x5e9   :  { %3518 = vmatpush1.msra.mxu0 %v10934_v22  ;;  %3589 = vmatpush1.msra.mxu1 %v10940_v51 }
 0x5ea   :  { %3519 = vmatprep.subr.mxu0 %v10946_v59  ;;  %3590 = vmatprep.subr.mxu1 %v10952_v58 }
 0x5eb   :  { %3520 = vmatpush1.msra.mxu0 %v10958_v45  ;;  %3591 = vmatpush1.msra.mxu1 %v10964_v44 }
 0x5ec   :  { %3521 = vmatprep.subr.mxu0 %v10970_v1  ;;  %3592 = vmatprep.subr.mxu1 %v10976_v26 }
 0x5ed   :  { %3522 = vmatpush1.msra.mxu0 %v10982_v3  ;;  %3593 = vmatpush1.msra.mxu1 %v10988_v4 }
 0x5ee   :  { %3523 = vmatprep.subr.mxu0 %v10994_v19  ;;  %3594 = vmatprep.subr.mxu1 %v11000_v24 }
 0x5ef   :  { %3524 = vmatpush1.msra.mxu0 %v11006_v25  ;;  %3595 = vmatpush1.msra.mxu1 %v11012_v0 }
 0x5f0   :  { %3525 = vmatprep.subr.mxu0 %v11018_v2  ;;  %3596 = vmatprep.subr.mxu1 %v14384_v9 }
 0x5f1   :  { %3526 = vmatpush1.msra.mxu0 %v14385_v34  ;;  %3597 = vmatpush1.msra.mxu1 %v14386_v48 }
 0x5f2   :  { %3527 = vmatprep.subr.mxu0 %v14387_v52  ;;  %3598 = vmatprep.subr.mxu1 %v14388_v50 }
 0x5f3   :  { %3528 = vmatpush1.msra.mxu0 %v14389_v5  ;;  %3599 = vmatpush1.msra.mxu1 %v14390_v29 }
 0x5f4   :  { %3529 = vmatprep.subr.mxu0 %v14391_v20  ;;  %3600 = vmatprep.subr.mxu1 %v14392_v31  ;;  %v14403_v31 = vld [vmem:[#allocation40_spill] sm:$0xff] }
 0x5f5   :  { %3530 = vmatpush1.msra.mxu0 %v14393_v53  ;;  %3601 = vmatpush1.msra.mxu1 %v14394_v33  ;;  %v14404_v53 = vld [vmem:[#allocation41_spill] sm:$0xff]  ;;  %v14405_v33 = vld [vmem:[#allocation42_spill] sm:$0xff] }
 0x5f6   :  { %3531 = vmatprep.subr.mxu0 %v14395_v61  ;;  %3602 = vmatprep.subr.mxu1 %v14396_v18  ;;  %v14406_v61 = vmov 0.0   ;;  %v14407_v18 = vld [vmem:[#allocation43_spill] sm:$0xff] }
 0x5f7   :  { %3532 = vmatpush1.msra.mxu0 %v14397_v12  ;;  %3603 = vmatpush1.msra.mxu1 %v14398_v6  ;;  %v14408_v6 = vld [vmem:[#allocation21_spill] sm:$0xff]  ;;  %v14410_v12 = vld [vmem:[#allocation54_spill] sm:$0xff] }
 0x5f8   :  { %3533 = vmatprep.subr.mxu0 %v14399_v30  ;;  %3604 = vmatprep.subr.mxu1 %v14400_v32  ;;  %v14409_v30 = vld [vmem:[#allocation22_spill] sm:$0xff] }
 0x5f9   :  { %3534 = vmatpush1.msra.mxu0 %v14401_v8  ;;  %3605 = vmatpush1.msra.mxu1 %v14402_v55  ;;  %v3242_v32 = vld [vmem:[#allocation2 + $0x22] ss:$8 sm:$0xf]  ;;  %v3240_v8 = vld [vmem:[#allocation2 + $0x5] ss:$8 sm:$0xf] }
 0x5fa   :  { %3535 = vmatprep.subr.mxu0 %v14403_v31  ;;  %3606 = vmatprep.subr.mxu1 %v14404_v53  ;;  %v3247_v55 = vrot.slane %v3242_v32, %v14410_v12  ;;  %v3268_v31 = vrot.slane %v3240_v8, %v14410_v12  ;;  %v3251_v53 = vrot.slane %v3242_v32, %v10513_v56 }
 0x5fb   :  { %3536 = vmatpush1.msra.mxu0 %v14405_v33  ;;  %3569 = vmatprep.mubr.f32.mxu0 %v14406_v61  ;;  %v3276_v34 = vrot.slane %v3240_v8, %v10550_v11 }
 0x5fc   :  { %3607 = vmatpush1.msra.mxu1 %v14407_v18  ;;  %3640 = vmatprep.mubr.f32.mxu1 %v14406_v61  ;;  %v3285_v33 = vsel %vm10567_vm4, %v3247_v55, %v3268_v31  ;;  %v3272_v18 = vrot.slane %v3240_v8, %v10513_v56  ;;  %v3255_v61 = vrot.slane %v3242_v32, %v10550_v11 }
 0x5fd   :  { %3721 = vmatprep.subr.mxu0 %v14408_v6  ;;  %3792 = vmatprep.subr.mxu1 %v14409_v30 }
 0x5fe   :  { %v3286_v30 = vsel %vm10573_vm5, %v3251_v53, %v3272_v18  ;;  %v3287_v31 = vsel %vm10584_vm8, %v3255_v61, %v3276_v34 }
 0x69c   :  { %v3355_v29 = vpop.f32.mrf.mxu0  ;;  %v3426_v12 = vpop.f32.mrf.mxu1 }
 0x69d   :  { %v3431_v5 = vadd.f32 %v3355_v29, %v3285_v33  ;;  %v3433_v55 = vadd.f32 %v3426_v12, %v3287_v31  ;;  %v3259_v29 = vrot.slane %v3242_v32, %v10553_v13  ;;  %v3280_v33 = vrot.slane %v3240_v8, %v10553_v13 }
 0x69e   :  { %v3357_v50 = vpop.f32.mrf.mxu0  ;;  %v3428_v20 = vpop.f32.mrf.mxu1 }
 0x69f   :  { %v3435_v52 = vmul.f32 0.5, %v3431_v5  ;;  %v3432_v48 = vadd.f32 %v3357_v50, %v3286_v30  ;;  %v3288_v5 = vsel %vm10592_vm11, %v3259_v29, %v3280_v33  ;;  %v14415_v33 = vld [vmem:[#allocation25_spill] sm:$0xff] }
 0x6a0   :  { %v3434_v50 = vadd.f32 %v3428_v20, %v3288_v5  ;;  %v14416_v5 = vld [vmem:[#allocation26_spill] sm:$0xff] }
 0x6a1   :  { %8739 = vtanh.f32 %v3435_v52  ;;  %v3439_v9 = vmul.f32 0.5, %v3432_v48 }
 0x6a2   :  { %v3444_v53 = vmul.f32 0.5, %v3434_v50  ;;  %v14417_v50 = vld [vmem:[#allocation27_spill] sm:$0xff] }
 0x6a3   :  { %8741 = vtanh.f32 %v3439_v9 }
 0x6a4   :  { %8743 = vtanh.f32 %v3433_v55 }
 0x6a5   :  { %8745 = vtanh.f32 %v3444_v53  ;;  %v14418_v53 = vld [vmem:[#allocation28_spill] sm:$0xff] }
 0x6ae   :  { %v8740_v18 = vpop.eup %8739 }
 0x6af   :  { %v3437_v30 = vmul.f32 0.5, %v8740_v18  ;;  %v14419_v18 = vld [vmem:[#allocation29_spill] sm:$0xff] }
 0x6b0   :  { %v8742_v52 = vpop.eup %8741 }
 0x6b1   :  { %v3438_v48 = vadd.f32 0.5, %v3437_v30  ;;  %v3441_v6 = vmul.f32 0.5, %v8742_v52  ;;  %v8744_v61 = vpop.eup %8743  ;;  %v14420_v30 = vld [vmem:[#allocation19_spill] sm:$0xff]  ;;  %v14421_v52 = vld [vmem:[#allocation20_spill] sm:$0xff] }
 0x6b2   :  { %v8746_v8 = vpop.eup %8745 }
 0x6b3   :  { %v3442_v34 = vadd.f32 0.5, %v3441_v6  ;;  %v3449_v12 = vmul.f32 %v8744_v61, %v3438_v48  ;;  %v3446_v31 = vmul.f32 0.5, %v8746_v8  ;;  %v14414_v6 = vld [vmem:[#allocation24_spill] sm:$0xff]  ;;  %v14422_v48 = vld [vmem:[#allocation30_spill] sm:$0xff]  ;;  %v14427_v8 = vld [vmem:[#allocation35_spill] sm:$0xff] }
 0x6b4   :  { %v14424_v61 = vld [vmem:[#allocation32_spill] sm:$0xff] }
 0x6b5   :  { %v3448_v9 = vmul.f32 %v3442_v34, %v11266_v21  ;;  %v3447_v55 = vadd.f32 0.5, %v3446_v31  ;;  %v14413_v21 = vld [vmem:[#allocation23_spill] sm:$0xff]  ;;  %v14428_v31 = vld [vmem:[#allocation36_spill] sm:$0xff] }
 0x6b6   :  { %v14423_v34 = vld [vmem:[#allocation31_spill] sm:$0xff] }
 0x6b7   :  { %v11352_v32 = vadd.f32 %v3449_v12, %v3448_v9  ;;  %v14425_v9 = vld [vmem:[#allocation33_spill] sm:$0xff]  ;;  %v14426_v12 = vld [vmem:[#allocation34_spill] sm:$0xff] }
 0x6b9   :  { %8747 = vtanh.f32 %v11352_v32 }
 0x6c6   :  { %v8748_v20 = vpop.eup %8747 }
 0x6c7   :  { %v3452_v29 = vmul.f32 %v8748_v20, %v3447_v55  ;;  %v14429_v55 = vld [vmem:[#allocation37_spill] sm:$0xff]  ;;  %v14430_v20 = vld [vmem:[#allocation38_spill] sm:$0xff] }
 0x6c9   :  { %3453 = vst [vmem:[#allocation3 + $0x5] sm:$0x1] %v3452_v29  ;;  %3454 = vst [vmem:[#allocation4 + $0xa] sm:$0x1] %v3452_v29  ;;  %3570 = vmatmul.mubr.f32.vlgmr.msra.gmra.mxu0 %v3452_v29  ;;  %3641 = vmatmul.mubr.f32.vlgmr.msra.gmra.mxu1 %v3452_v29  ;;  %v14431_v29 = vld [vmem:[#allocation39_spill] sm:$0xff] }
 0x6ca   :  { %3722 = vmatpush1.msra.mxu0 %v10790_v35  ;;  %3793 = vmatpush1.msra.mxu1 %v10796_v14 }
 0x6cb   :  { %3723 = vmatprep.subr.mxu0 %v10802_v36  ;;  %3794 = vmatprep.subr.mxu1 %v10808_v41 }
 0x6cc   :  { %3724 = vmatpush1.msra.mxu0 %v10814_v43  ;;  %3795 = vmatpush1.msra.mxu1 %v10820_v37 }
 0x6cd   :  { %3725 = vmatprep.subr.mxu0 %v10826_v38  ;;  %3796 = vmatprep.subr.mxu1 %v10832_v39 }
 0x6ce   :  { %3726 = vmatpush1.msra.mxu0 %v10838_v40  ;;  %3797 = vmatpush1.msra.mxu1 %v10844_v42 }
 0x6cf   :  { %3727 = vmatprep.subr.mxu0 %v10850_v46  ;;  %3798 = vmatprep.subr.mxu1 %v10856_v47 }
 0x6d0   :  { %3728 = vmatpush1.msra.mxu0 %v10862_v49  ;;  %3799 = vmatpush1.msra.mxu1 %v10868_v54 }
 0x6d1   :  { %3729 = vmatprep.subr.mxu0 %v10874_v60  ;;  %3800 = vmatprep.subr.mxu1 %v10880_v62 }
 0x6d2   :  { %3730 = vmatpush1.msra.mxu0 %v10886_v23  ;;  %3801 = vmatpush1.msra.mxu1 %v10892_v63 }
 0x6d3   :  { %3731 = vmatprep.subr.mxu0 %v10898_v10  ;;  %3802 = vmatprep.subr.mxu1 %v10904_v17 }
 0x6d4   :  { %3732 = vmatpush1.msra.mxu0 %v10910_v57  ;;  %3803 = vmatpush1.msra.mxu1 %v10916_v27 }
 0x6d5   :  { %3733 = vmatprep.subr.mxu0 %v10922_v28  ;;  %3804 = vmatprep.subr.mxu1 %v10928_v15 }
 0x6d6   :  { %3734 = vmatpush1.msra.mxu0 %v10934_v22  ;;  %3805 = vmatpush1.msra.mxu1 %v10940_v51 }
 0x6d7   :  { %3735 = vmatprep.subr.mxu0 %v10946_v59  ;;  %3806 = vmatprep.subr.mxu1 %v10952_v58 }
 0x6d8   :  { %3736 = vmatpush1.msra.mxu0 %v10958_v45  ;;  %3807 = vmatpush1.msra.mxu1 %v10964_v44 }
 0x6d9   :  { %3737 = vmatprep.subr.mxu0 %v10970_v1  ;;  %3808 = vmatprep.subr.mxu1 %v10976_v26 }
 0x6da   :  { %3738 = vmatpush1.msra.mxu0 %v10982_v3  ;;  %3809 = vmatpush1.msra.mxu1 %v10988_v4 }
 0x6db   :  { %3739 = vmatprep.subr.mxu0 %v10994_v19  ;;  %3810 = vmatprep.subr.mxu1 %v11000_v24 }
 0x6dc   :  { %3740 = vmatpush1.msra.mxu0 %v11006_v25  ;;  %3811 = vmatpush1.msra.mxu1 %v11012_v0 }
 0x6dd   :  { %3741 = vmatprep.subr.mxu0 %v11018_v2  ;;  %3812 = vmatprep.subr.mxu1 %v14413_v21 }
 0x6de   :  { %3742 = vmatpush1.msra.mxu0 %v14414_v6  ;;  %3813 = vmatpush1.msra.mxu1 %v14415_v33 }
 0x6df   :  { %3743 = vmatprep.subr.mxu0 %v14416_v5  ;;  %3814 = vmatprep.subr.mxu1 %v14417_v50 }
 0x6e0   :  { %3744 = vmatpush1.msra.mxu0 %v14418_v53  ;;  %3815 = vmatpush1.msra.mxu1 %v14419_v18 }
 0x6e1   :  { %3745 = vmatprep.subr.mxu0 %v14420_v30  ;;  %3816 = vmatprep.subr.mxu1 %v14421_v52  ;;  %v14432_v52 = vld [vmem:[#allocation40_spill] sm:$0xff] }
 0x6e2   :  { %3746 = vmatpush1.msra.mxu0 %v14422_v48  ;;  %3817 = vmatpush1.msra.mxu1 %v14423_v34  ;;  %v14433_v48 = vld [vmem:[#allocation41_spill] sm:$0xff]  ;;  %v14434_v34 = vld [vmem:[#allocation42_spill] sm:$0xff] }
 0x6e3   :  { %3747 = vmatprep.subr.mxu0 %v14424_v61  ;;  %3818 = vmatprep.subr.mxu1 %v14425_v9  ;;  %v14435_v61 = vmov 0.0   ;;  %v14436_v9 = vld [vmem:[#allocation43_spill] sm:$0xff] }
 0x6e4   :  { %3748 = vmatpush1.msra.mxu0 %v14426_v12  ;;  %3819 = vmatpush1.msra.mxu1 %v14427_v8  ;;  %v14437_v8 = vld [vmem:[#allocation21_spill] sm:$0xff]  ;;  %v14439_v12 = vld [vmem:[#allocation54_spill] sm:$0xff] }
 0x6e5   :  { %3749 = vmatprep.subr.mxu0 %v14428_v31  ;;  %3820 = vmatprep.subr.mxu1 %v14429_v55  ;;  %v14438_v31 = vld [vmem:[#allocation22_spill] sm:$0xff] }
 0x6e6   :  { %3750 = vmatpush1.msra.mxu0 %v14430_v20  ;;  %3821 = vmatpush1.msra.mxu1 %v14431_v29  ;;  %v3458_v55 = vld [vmem:[#allocation2 + $0x21] ss:$8 sm:$0xf]  ;;  %v3456_v20 = vld [vmem:[#allocation2 + $0x6] ss:$8 sm:$0xf] }
 0x6e7   :  { %3751 = vmatprep.subr.mxu0 %v14432_v52  ;;  %3822 = vmatprep.subr.mxu1 %v14433_v48  ;;  %v3463_v29 = vrot.slane %v3458_v55, %v14439_v12  ;;  %v3484_v52 = vrot.slane %v3456_v20, %v14439_v12  ;;  %v3467_v48 = vrot.slane %v3458_v55, %v10513_v56 }
 0x6e8   :  { %3752 = vmatpush1.msra.mxu0 %v14434_v34  ;;  %3785 = vmatprep.mubr.f32.mxu0 %v14435_v61  ;;  %v3492_v6 = vrot.slane %v3456_v20, %v10550_v11 }
 0x6e9   :  { %3823 = vmatpush1.msra.mxu1 %v14436_v9  ;;  %3856 = vmatprep.mubr.f32.mxu1 %v14435_v61  ;;  %v3501_v34 = vsel %vm10567_vm4, %v3463_v29, %v3484_v52  ;;  %v3488_v9 = vrot.slane %v3456_v20, %v10513_v56  ;;  %v3471_v61 = vrot.slane %v3458_v55, %v10550_v11 }
 0x6ea   :  { %3935 = vmatprep.subr.mxu0 %v14437_v8  ;;  %4006 = vmatprep.subr.mxu1 %v14438_v31 }
 0x6eb   :  { %v3502_v31 = vsel %vm10573_vm5, %v3467_v48, %v3488_v9  ;;  %v3503_v52 = vsel %vm10584_vm8, %v3471_v61, %v3492_v6 }
 0x789   :  { %v3571_v18 = vpop.f32.mrf.mxu0  ;;  %v3642_v12 = vpop.f32.mrf.mxu1 }
 0x78a   :  { %v3647_v53 = vadd.f32 %v3571_v18, %v3501_v34  ;;  %v3649_v29 = vadd.f32 %v3642_v12, %v3503_v52  ;;  %v3475_v18 = vrot.slane %v3458_v55, %v10553_v13  ;;  %v3496_v34 = vrot.slane %v3456_v20, %v10553_v13 }
 0x78b   :  { %v3573_v50 = vpop.f32.mrf.mxu0  ;;  %v3644_v30 = vpop.f32.mrf.mxu1 }
 0x78c   :  { %v3651_v5 = vmul.f32 0.5, %v3647_v53  ;;  %v3648_v33 = vadd.f32 %v3573_v50, %v3502_v31  ;;  %v3504_v53 = vsel %vm10592_vm11, %v3475_v18, %v3496_v34 }
 0x78d   :  { %v3650_v50 = vadd.f32 %v3644_v30, %v3504_v53 }
 0x78e   :  { %8749 = vtanh.f32 %v3651_v5  ;;  %v3655_v21 = vmul.f32 0.5, %v3648_v33 }
 0x78f   :  { %v3660_v48 = vmul.f32 0.5, %v3650_v50 }
 0x790   :  { %8751 = vtanh.f32 %v3655_v21 }
 0x791   :  { %8753 = vtanh.f32 %v3649_v29 }
 0x792   :  { %8755 = vtanh.f32 %v3660_v48 }
 0x79b   :  { %v8750_v9 = vpop.eup %8749 }
 0x79c   :  { %v3653_v31 = vmul.f32 0.5, %v8750_v9 }
 0x79d   :  { %v8752_v5 = vpop.eup %8751 }
 0x79e   :  { %v3654_v33 = vadd.f32 0.5, %v3653_v31  ;;  %v3657_v8 = vmul.f32 0.5, %v8752_v5  ;;  %v8754_v61 = vpop.eup %8753 }
 0x79f   :  { %v8756_v20 = vpop.eup %8755 }
 0x7a0   :  { %v3658_v6 = vadd.f32 0.5, %v3657_v8  ;;  %v3665_v12 = vmul.f32 %v8754_v61, %v3654_v33  ;;  %v3662_v52 = vmul.f32 0.5, %v8756_v20 }
 0x7a2   :  { %v3664_v21 = vmul.f32 %v3658_v6, %v11352_v32  ;;  %v3663_v29 = vadd.f32 0.5, %v3662_v52 }
 0x7a4   :  { %v11438_v55 = vadd.f32 %v3665_v12, %v3664_v21 }
 0x7a6   :  { %8757 = vtanh.f32 %v11438_v55 }
 0x7b3   :  { %v8758_v30 = vpop.eup %8757 }
 0x7b4   :  { %v3668_v18 = vmul.f32 %v8758_v30, %v3663_v29 }
 0x7b6   :  { %3669 = vst [vmem:[#allocation3 + $0x6] sm:$0x1] %v3668_v18  ;;  %3670 = vst [vmem:[#allocation4 + $0x9] sm:$0x1] %v3668_v18  ;;  %3786 = vmatmul.mubr.f32.vlgmr.msra.gmra.mxu0 %v3668_v18  ;;  %3857 = vmatmul.mubr.f32.vlgmr.msra.gmra.mxu1 %v3668_v18 }
 0x7b7   :  { %3936 = vmatpush1.msra.mxu0 %v10790_v35  ;;  %4007 = vmatpush1.msra.mxu1 %v10796_v14  ;;  %v14442_v35 = vld [vmem:[#allocation23_spill] sm:$0xff]  ;;  %v14443_v14 = vld [vmem:[#allocation24_spill] sm:$0xff] }
 0x7b8   :  { %3937 = vmatprep.subr.mxu0 %v10802_v36  ;;  %4008 = vmatprep.subr.mxu1 %v10808_v41  ;;  %v14444_v36 = vld [vmem:[#allocation25_spill] sm:$0xff]  ;;  %v14445_v41 = vld [vmem:[#allocation26_spill] sm:$0xff] }
 0x7b9   :  { %3938 = vmatpush1.msra.mxu0 %v10814_v43  ;;  %4009 = vmatpush1.msra.mxu1 %v10820_v37  ;;  %v14446_v43 = vld [vmem:[#allocation27_spill] sm:$0xff]  ;;  %v14447_v37 = vld [vmem:[#allocation28_spill] sm:$0xff] }
 0x7ba   :  { %3939 = vmatprep.subr.mxu0 %v10826_v38  ;;  %4010 = vmatprep.subr.mxu1 %v10832_v39  ;;  %v14448_v38 = vld [vmem:[#allocation29_spill] sm:$0xff]  ;;  %v14449_v39 = vld [vmem:[#allocation19_spill] sm:$0xff] }
 0x7bb   :  { %3940 = vmatpush1.msra.mxu0 %v10838_v40  ;;  %4011 = vmatpush1.msra.mxu1 %v10844_v42  ;;  %v14450_v40 = vld [vmem:[#allocation20_spill] sm:$0xff]  ;;  %v14451_v42 = vld [vmem:[#allocation30_spill] sm:$0xff] }
 0x7bc   :  { %3941 = vmatprep.subr.mxu0 %v10850_v46  ;;  %4012 = vmatprep.subr.mxu1 %v10856_v47  ;;  %v14452_v46 = vld [vmem:[#allocation31_spill] sm:$0xff]  ;;  %v14453_v47 = vld [vmem:[#allocation32_spill] sm:$0xff] }
 0x7bd   :  { %3942 = vmatpush1.msra.mxu0 %v10862_v49  ;;  %4013 = vmatpush1.msra.mxu1 %v10868_v54  ;;  %v14454_v49 = vld [vmem:[#allocation33_spill] sm:$0xff]  ;;  %v14455_v54 = vld [vmem:[#allocation34_spill] sm:$0xff] }
 0x7be   :  { %3943 = vmatprep.subr.mxu0 %v10874_v60  ;;  %4014 = vmatprep.subr.mxu1 %v10880_v62  ;;  %v14456_v60 = vld [vmem:[#allocation35_spill] sm:$0xff]  ;;  %v14457_v62 = vld [vmem:[#allocation36_spill] sm:$0xff] }
 0x7bf   :  { %3944 = vmatpush1.msra.mxu0 %v10886_v23  ;;  %4015 = vmatpush1.msra.mxu1 %v10892_v63  ;;  %v14458_v23 = vld [vmem:[#allocation37_spill] sm:$0xff]  ;;  %v14459_v63 = vld [vmem:[#allocation38_spill] sm:$0xff] }
 0x7c0   :  { %3945 = vmatprep.subr.mxu0 %v10898_v10  ;;  %4016 = vmatprep.subr.mxu1 %v10904_v17  ;;  %v14460_v10 = vld [vmem:[#allocation39_spill] sm:$0xff]  ;;  %v14461_v17 = vld [vmem:[#allocation40_spill] sm:$0xff] }
 0x7c1   :  { %3946 = vmatpush1.msra.mxu0 %v10910_v57  ;;  %4017 = vmatpush1.msra.mxu1 %v10916_v27  ;;  %v14462_v57 = vld [vmem:[#allocation41_spill] sm:$0xff]  ;;  %v14463_v27 = vld [vmem:[#allocation42_spill] sm:$0xff] }
 0x7c2   :  { %3947 = vmatprep.subr.mxu0 %v10922_v28  ;;  %4018 = vmatprep.subr.mxu1 %v10928_v15  ;;  %v14464_v28 = vmov 0.0   ;;  %v14465_v15 = vld [vmem:[#allocation43_spill] sm:$0xff] }
 0x7c3   :  { %3948 = vmatpush1.msra.mxu0 %v10934_v22  ;;  %4019 = vmatpush1.msra.mxu1 %v10940_v51  ;;  %v11508_v22 = vld [vmem:[%s13924_s4 + $0x1e8] sm:$0xff]  ;;  %v11514_v51 = vld [vmem:[%s13924_s4 + $0x1f8] sm:$0xff] }
 0x7c4   :  { %3949 = vmatprep.subr.mxu0 %v10946_v59  ;;  %4020 = vmatprep.subr.mxu1 %v10952_v58  ;;  %14466 = vst [vmem:[#allocation44_spill] sm:$0xff] %v11508_v22  ;;  %14467 = vst [vmem:[#allocation45_spill] sm:$0xff] %v11514_v51  ;;  %v3674_v59 = vld [vmem:[#allocation2 + $0x20] ss:$8 sm:$0xf] }
 0x7c5   :  { %3950 = vmatpush1.msra.mxu0 %v10958_v45  ;;  %4021 = vmatpush1.msra.mxu1 %v10964_v44  ;;  %v3672_v58 = vld [vmem:[#allocation2 + $0x7] ss:$8 sm:$0xf]  ;;  %v3691_v33 = vrot.slane %v3674_v59, %v10553_v13 }
 0x7c6   :  { %3951 = vmatprep.subr.mxu0 %v10970_v1  ;;  %4022 = vmatprep.subr.mxu1 %v10976_v26  ;;  %v14468_v45 = vld [vmem:[#allocation54_spill] sm:$0xff]  ;;  %v3683_v26 = vrot.slane %v3674_v59, %v10513_v56  ;;  %v3708_v50 = vrot.slane %v3672_v58, %v10550_v11  ;;  %v3712_v6 = vrot.slane %v3672_v58, %v10553_v13 }
 0x7c7   :  { %3952 = vmatpush1.msra.mxu0 %v10982_v3  ;;  %4023 = vmatpush1.msra.mxu1 %v10988_v4  ;;  %v3679_v44 = vrot.slane %v3674_v59, %v14468_v45  ;;  %v3700_v1 = vrot.slane %v3672_v58, %v14468_v45 }
 0x7c8   :  { %3953 = vmatprep.subr.mxu0 %v10994_v19  ;;  %4024 = vmatprep.subr.mxu1 %v11000_v24  ;;  %v3704_v24 = vrot.slane %v3672_v58, %v10513_v56  ;;  %v3720_v21 = vsel %vm10592_vm11, %v3691_v33, %v3712_v6  ;;  %v11624_v58 = vld [vmem:[%s13924_s4 + $0x168] sm:$0xff]  ;;  %v11732_v33 = vld [vmem:[%s13924_s4 + $0xe0] sm:$0xff]  ;;  %v11738_v6 = vld [vmem:[%s13924_s4 + $0xf0] sm:$0xff] }
 0x7c9   :  { %3954 = vmatpush1.msra.mxu0 %v11006_v25  ;;  %4025 = vmatpush1.msra.mxu1 %v11012_v0  ;;  %v3717_v4 = vsel %vm10567_vm4, %v3679_v44, %v3700_v1  ;;  %v3687_v0 = vrot.slane %v3674_v59, %v10550_v11  ;;  %v11618_v59 = vld [vmem:[%s13924_s4 + $0x190] sm:$0xff]  ;;  %v11630_v44 = vld [vmem:[%s13924_s4 + $0x178] sm:$0xff]  ;;  %v11636_v1 = vld [vmem:[%s13924_s4 + $0x160] sm:$0xff] }
 0x7ca   :  { %3955 = vmatprep.subr.mxu0 %v11018_v2  ;;  %4026 = vmatprep.subr.mxu1 %v14442_v35  ;;  %v3718_v32 = vsel %vm10573_vm5, %v3683_v26, %v3704_v24  ;;  %v11642_v26 = vld [vmem:[%s13924_s4 + $0x170] sm:$0xff]  ;;  %v11660_v24 = vld [vmem:[%s13924_s4 + $0x140] sm:$0xff] }
 0x7cb   :  { %3956 = vmatpush1.msra.mxu0 %v14443_v14  ;;  %4027 = vmatpush1.msra.mxu1 %v14444_v36  ;;  %v3719_v31 = vsel %vm10584_vm8, %v3687_v0, %v3708_v50  ;;  %v11672_v0 = vld [vmem:[%s13924_s4 + $0x128] sm:$0xff]  ;;  %v11702_v50 = vld [vmem:[%s13924_s4 + $0x118] sm:$0xff] }
 0x7cc   :  { %3957 = vmatprep.subr.mxu0 %v14445_v41  ;;  %4028 = vmatprep.subr.mxu1 %v14446_v43 }
 0x7cd   :  { %3958 = vmatpush1.msra.mxu0 %v14447_v37  ;;  %4029 = vmatpush1.msra.mxu1 %v14448_v38 }
 0x7ce   :  { %3959 = vmatprep.subr.mxu0 %v14449_v39  ;;  %4030 = vmatprep.subr.mxu1 %v14450_v40 }
 0x7cf   :  { %3960 = vmatpush1.msra.mxu0 %v14451_v42  ;;  %4031 = vmatpush1.msra.mxu1 %v14452_v46 }
 0x7d0   :  { %3961 = vmatprep.subr.mxu0 %v14453_v47  ;;  %4032 = vmatprep.subr.mxu1 %v14454_v49  ;;  %v11540_v47 = vld [vmem:[%s13924_s4 + $0x1e0] sm:$0xff]  ;;  %v11552_v49 = vld [vmem:[%s13924_s4 + $0x1c8] sm:$0xff] }
 0x7d1   :  { %3962 = vmatpush1.msra.mxu0 %v14455_v54  ;;  %4033 = vmatpush1.msra.mxu1 %v14456_v60  ;;  %v11558_v54 = vld [vmem:[%s13924_s4 + $0x1d8] sm:$0xff]  ;;  %v11564_v60 = vld [vmem:[%s13924_s4 + $0x1c0] sm:$0xff] }
 0x7d2   :  { %3963 = vmatprep.subr.mxu0 %v14457_v62  ;;  %4034 = vmatprep.subr.mxu1 %v14458_v23  ;;  %v11570_v62 = vld [vmem:[%s13924_s4 + $0x1d0] sm:$0xff]  ;;  %v11576_v23 = vld [vmem:[%s13924_s4 + $0x1a8] sm:$0xff] }
 0x7d3   :  { %3964 = vmatpush1.msra.mxu0 %v14459_v63  ;;  %4035 = vmatpush1.msra.mxu1 %v14460_v10  ;;  %v11582_v63 = vld [vmem:[%s13924_s4 + $0x1b8] sm:$0xff]  ;;  %v11588_v10 = vld [vmem:[%s13924_s4 + $0x1a0] sm:$0xff] }
 0x7d4   :  { %3965 = vmatprep.subr.mxu0 %v14461_v17  ;;  %4036 = vmatprep.subr.mxu1 %v14462_v57  ;;  %v11594_v17 = vld [vmem:[%s13924_s4 + $0x1b0] sm:$0xff]  ;;  %v11600_v57 = vld [vmem:[%s13924_s4 + $0x188] sm:$0xff] }
 0x7d5   :  { %3966 = vmatpush1.msra.mxu0 %v14463_v27  ;;  %3999 = vmatprep.mubr.f32.mxu0 %v14464_v28  ;;  %v11606_v27 = vld [vmem:[%s13924_s4 + $0x198] sm:$0xff] }
 0x7d6   :  { %4037 = vmatpush1.msra.mxu1 %v14465_v15  ;;  %4070 = vmatprep.mubr.f32.mxu1 %v14464_v28  ;;  %v11612_v15 = vld [vmem:[%s13924_s4 + $0x180] sm:$0xff] }
 0x7d7   :  { %4149 = vmatprep.subr.mxu0 %v11508_v22  ;;  %4220 = vmatprep.subr.mxu1 %v11514_v51 }
 0x876   :  { %v3787_v19 = vpop.f32.mrf.mxu0  ;;  %v3858_v48 = vpop.f32.mrf.mxu1 }
 0x877   :  { %v3863_v25 = vadd.f32 %v3787_v19, %v3717_v4  ;;  %v3865_v5 = vadd.f32 %v3858_v48, %v3719_v31  ;;  %v11648_v4 = vld [vmem:[%s13924_s4 + $0x148] sm:$0xff]  ;;  %v11654_v19 = vld [vmem:[%s13924_s4 + $0x158] sm:$0xff]  ;;  %v11708_v48 = vld [vmem:[%s13924_s4 + $0x100] sm:$0xff] }
 0x878   :  { %v3789_v8 = vpop.f32.mrf.mxu0  ;;  %v3860_v61 = vpop.f32.mrf.mxu1  ;;  %v11720_v31 = vld [vmem:[%s13924_s4 + $0xe8] sm:$0xff] }
 0x879   :  { %v3867_v34 = vmul.f32 0.5, %v3863_v25  ;;  %v3864_v53 = vadd.f32 %v3789_v8, %v3718_v32  ;;  %v3866_v12 = vadd.f32 %v3860_v61, %v3720_v21  ;;  %v11666_v25 = vld [vmem:[%s13924_s4 + $0x150] sm:$0xff]  ;;  %v11678_v32 = vld [vmem:[%s13924_s4 + $0x138] sm:$0xff]  ;;  %v11684_v8 = vld [vmem:[%s13924_s4 + $0x120] sm:$0xff] }
 0x87a   :  { %v11744_v61 = vld [vmem:[%s13924_s4 + $0xc8] sm:$0xff]  ;;  %v11750_v21 = vld [vmem:[%s13924_s4 + $0xd8] sm:$0xff] }
 0x87b   :  { %8759 = vtanh.f32 %v3867_v34  ;;  %v3871_v9 = vmul.f32 0.5, %v3864_v53  ;;  %v3876_v20 = vmul.f32 0.5, %v3866_v12  ;;  %v11690_v34 = vld [vmem:[%s13924_s4 + $0x130] sm:$0xff]  ;;  %v11696_v53 = vld [vmem:[%s13924_s4 + $0x108] sm:$0xff]  ;;  %v11756_v12 = vld [vmem:[%s13924_s4 + $0xc0] sm:$0xff] }
 0x87d   :  { %8761 = vtanh.f32 %v3871_v9  ;;  %v11714_v9 = vld [vmem:[%s13924_s4 + $0x110] sm:$0xff] }
 0x87e   :  { %8763 = vtanh.f32 %v3865_v5  ;;  %v11726_v5 = vld [vmem:[%s13924_s4 + $0xf8] sm:$0xff] }
 0x87f   :  { %8765 = vtanh.f32 %v3876_v20  ;;  %v11762_v20 = vld [vmem:[%s13924_s4 + $0xd0] sm:$0xff] }
 0x888   :  { %v8760_v52 = vpop.eup %8759 }
 0x889   :  { %v3869_v29 = vmul.f32 0.5, %v8760_v52  ;;  %v11768_v52 = vld [vmem:[%s13924_s4 + $0xa8] sm:$0xff] }
 0x88a   :  { %v8762_v30 = vpop.eup %8761 }
 0x88b   :  { %v3870_v18 = vadd.f32 0.5, %v3869_v29  ;;  %v3873_v35 = vmul.f32 0.5, %v8762_v30  ;;  %v8764_v36 = vpop.eup %8763  ;;  %v11774_v29 = vld [vmem:[%s13924_s4 + $0xb8] sm:$0xff]  ;;  %v11780_v30 = vld [vmem:[%s13924_s4 + $0xa0] sm:$0xff] }
 0x88c   :  { %v8766_v38 = vpop.eup %8765  ;;  %14471 = vst [vmem:[#allocation46_spill] sm:$0xff] %v11774_v29  ;;  %14472 = vst [vmem:[#allocation47_spill] sm:$0xff] %v11780_v30 }
 0x88d   :  { %v3874_v14 = vadd.f32 0.5, %v3873_v35  ;;  %v3881_v43 = vmul.f32 %v8764_v36, %v3870_v18  ;;  %v3878_v39 = vmul.f32 0.5, %v8766_v38  ;;  %v11786_v18 = vld [vmem:[%s13924_s4 + $0xb0] sm:$0xff]  ;;  %v11792_v35 = vld [vmem:[%s13924_s4 + $0x88] sm:$0xff]  ;;  %v11804_v36 = vld [vmem:[%s13924_s4 + $0x80] sm:$0xff] }
 0x88e   :  { %14473 = vst [vmem:[#allocation48_spill] sm:$0xff] %v11786_v18  ;;  %14474 = vst [vmem:[#allocation49_spill] sm:$0xff] %v11792_v35  ;;  %v11822_v38 = vld [vmem:[%s13924_s4 + $0x78] sm:$0xff] }
 0x88f   :  { %v3880_v41 = vmul.f32 %v3874_v14, %v11438_v55  ;;  %v3879_v40 = vadd.f32 0.5, %v3878_v39  ;;  %v11546_v55 = vld [vmem:[%s13924_s4 + $0x1f0] sm:$0xff]  ;;  %v11798_v14 = vld [vmem:[%s13924_s4 + $0x98] sm:$0xff]  ;;  %14476 = vst [vmem:[#allocation51_spill] sm:$0xff] %v11804_v36  ;;  %14479 = vst [vmem:[#allocation22_spill] sm:$0xff] %v11822_v38 }
 0x890   :  { %14475 = vst [vmem:[#allocation50_spill] sm:$0xff] %v11798_v14  ;;  %v11828_v39 = vld [vmem:[%s13924_s4 + $0x60] sm:$0xff] }
 0x891   :  { %v11534_v37 = vadd.f32 %v3881_v43, %v3880_v41  ;;  %v11810_v41 = vld [vmem:[%s13924_s4 + $0x90] sm:$0xff]  ;;  %v11816_v43 = vld [vmem:[%s13924_s4 + $0x68] sm:$0xff]  ;;  %14480 = vst [vmem:[#allocation23_spill] sm:$0xff] %v11828_v39 }
 0x892   :  { %14477 = vst [vmem:[#allocation52_spill] sm:$0xff] %v11810_v41  ;;  %14478 = vst [vmem:[#allocation21_spill] sm:$0xff] %v11816_v43 }
 0x893   :  { %8767 = vtanh.f32 %v11534_v37 }
 0x8a0   :  { %v8768_v42 = vpop.eup %8767 }
 0x8a1   :  { %v3884_v46 = vmul.f32 %v8768_v42, %v3879_v40  ;;  %v11834_v40 = vld [vmem:[%s13924_s4 + $0x70] sm:$0xff]  ;;  %v11840_v42 = vld [vmem:[%s13924_s4 + $0x48] sm:$0xff] }
 0x8a2   :  { %14481 = vst [vmem:[#allocation24_spill] sm:$0xff] %v11834_v40  ;;  %14482 = vst [vmem:[#allocation25_spill] sm:$0xff] %v11840_v42 }
 0x8a3   :  { %3885 = vst [vmem:[#allocation3 + $0x7] sm:$0x1] %v3884_v46  ;;  %3886 = vst [vmem:[#allocation4 + $0x8] sm:$0x1] %v3884_v46  ;;  %4000 = vmatmul.mubr.f32.vlgmr.msra.gmra.mxu0 %v3884_v46  ;;  %4071 = vmatmul.mubr.f32.vlgmr.msra.gmra.mxu1 %v3884_v46  ;;  %v11846_v46 = vld [vmem:[%s13924_s4 + $0x58] sm:$0xff] }
 0x8a4   :  { %4150 = vmatpush1.msra.mxu0 %v11540_v47  ;;  %4221 = vmatpush1.msra.mxu1 %v11546_v55  ;;  %14483 = vst [vmem:[#allocation26_spill] sm:$0xff] %v11846_v46 }
 0x8a5   :  { %4151 = vmatprep.subr.mxu0 %v11552_v49  ;;  %4222 = vmatprep.subr.mxu1 %v11558_v54 }
 0x8a6   :  { %4152 = vmatpush1.msra.mxu0 %v11564_v60  ;;  %4223 = vmatpush1.msra.mxu1 %v11570_v62 }
 0x8a7   :  { %4153 = vmatprep.subr.mxu0 %v11576_v23  ;;  %4224 = vmatprep.subr.mxu1 %v11582_v63 }
 0x8a8   :  { %4154 = vmatpush1.msra.mxu0 %v11588_v10  ;;  %4225 = vmatpush1.msra.mxu1 %v11594_v17 }
 0x8a9   :  { %4155 = vmatprep.subr.mxu0 %v11600_v57  ;;  %4226 = vmatprep.subr.mxu1 %v11606_v27 }
 0x8aa   :  { %4156 = vmatpush1.msra.mxu0 %v11612_v15  ;;  %4227 = vmatpush1.msra.mxu1 %v11618_v59 }
 0x8ab   :  { %4157 = vmatprep.subr.mxu0 %v11624_v58  ;;  %4228 = vmatprep.subr.mxu1 %v11630_v44 }
 0x8ac   :  { %4158 = vmatpush1.msra.mxu0 %v11636_v1  ;;  %4229 = vmatpush1.msra.mxu1 %v11642_v26 }
 0x8ad   :  { %4159 = vmatprep.subr.mxu0 %v11648_v4  ;;  %4230 = vmatprep.subr.mxu1 %v11654_v19 }
 0x8ae   :  { %4160 = vmatpush1.msra.mxu0 %v11660_v24  ;;  %4231 = vmatpush1.msra.mxu1 %v11666_v25 }
 0x8af   :  { %4161 = vmatprep.subr.mxu0 %v11672_v0  ;;  %4232 = vmatprep.subr.mxu1 %v11678_v32 }
 0x8b0   :  { %4162 = vmatpush1.msra.mxu0 %v11684_v8  ;;  %4233 = vmatpush1.msra.mxu1 %v11690_v34 }
 0x8b1   :  { %4163 = vmatprep.subr.mxu0 %v11696_v53  ;;  %4234 = vmatprep.subr.mxu1 %v11702_v50 }
 0x8b2   :  { %4164 = vmatpush1.msra.mxu0 %v11708_v48  ;;  %4235 = vmatpush1.msra.mxu1 %v11714_v9 }
 0x8b3   :  { %4165 = vmatprep.subr.mxu0 %v11720_v31  ;;  %4236 = vmatprep.subr.mxu1 %v11726_v5 }
 0x8b4   :  { %4166 = vmatpush1.msra.mxu0 %v11732_v33  ;;  %4237 = vmatpush1.msra.mxu1 %v11738_v6 }
 0x8b5   :  { %4167 = vmatprep.subr.mxu0 %v11744_v61  ;;  %4238 = vmatprep.subr.mxu1 %v11750_v21 }
 0x8b6   :  { %4168 = vmatpush1.msra.mxu0 %v11756_v12  ;;  %4239 = vmatpush1.msra.mxu1 %v11762_v20 }
 0x8b7   :  { %4169 = vmatprep.subr.mxu0 %v11768_v52  ;;  %4240 = vmatprep.subr.mxu1 %v11774_v29 }
 0x8b8   :  { %4170 = vmatpush1.msra.mxu0 %v11780_v30  ;;  %4241 = vmatpush1.msra.mxu1 %v11786_v18 }
 0x8b9   :  { %4171 = vmatprep.subr.mxu0 %v11792_v35  ;;  %4242 = vmatprep.subr.mxu1 %v11798_v14 }
 0x8ba   :  { %4172 = vmatpush1.msra.mxu0 %v11804_v36  ;;  %4243 = vmatpush1.msra.mxu1 %v11810_v41 }
 0x8bb   :  { %4173 = vmatprep.subr.mxu0 %v11816_v43  ;;  %4244 = vmatprep.subr.mxu1 %v11822_v38 }
 0x8bc   :  { %4174 = vmatpush1.msra.mxu0 %v11828_v39  ;;  %4245 = vmatpush1.msra.mxu1 %v11834_v40  ;;  %v11852_v39 = vld [vmem:[%s13924_s4 + $0x40] sm:$0xff]  ;;  %v11858_v40 = vld [vmem:[%s13924_s4 + $0x50] sm:$0xff] }
 0x8bd   :  { %4175 = vmatprep.subr.mxu0 %v11840_v42  ;;  %4246 = vmatprep.subr.mxu1 %v11846_v46  ;;  %14484 = vst [vmem:[#allocation27_spill] sm:$0xff] %v11852_v39  ;;  %14485 = vst [vmem:[#allocation28_spill] sm:$0xff] %v11858_v40  ;;  %v11864_v42 = vld [vmem:[%s13924_s4 + $0x28] sm:$0xff]  ;;  %v11870_v46 = vld [vmem:[%s13924_s4 + $0x38] sm:$0xff] }
 0x8be   :  { %4176 = vmatpush1.msra.mxu0 %v11852_v39  ;;  %4247 = vmatpush1.msra.mxu1 %v11858_v40  ;;  %14486 = vst [vmem:[#allocation29_spill] sm:$0xff] %v11864_v42  ;;  %14487 = vst [vmem:[#allocation19_spill] sm:$0xff] %v11870_v46  ;;  %v11876_v39 = vld [vmem:[%s13924_s4 + $0x20] sm:$0xff]  ;;  %v11882_v40 = vld [vmem:[%s13924_s4 + $0x30] sm:$0xff] }
 0x8bf   :  { %4177 = vmatprep.subr.mxu0 %v11864_v42  ;;  %4248 = vmatprep.subr.mxu1 %v11870_v46  ;;  %14488 = vst [vmem:[#allocation20_spill] sm:$0xff] %v11876_v39  ;;  %14489 = vst [vmem:[#allocation30_spill] sm:$0xff] %v11882_v40  ;;  %v11888_v42 = vld [vmem:[%s13924_s4 + $0x8] sm:$0xff]  ;;  %v11894_v46 = vld [vmem:[%s13924_s4 + $0x18] sm:$0xff] }
 0x8c0   :  { %4178 = vmatpush1.msra.mxu0 %v11876_v39  ;;  %4249 = vmatpush1.msra.mxu1 %v11882_v40  ;;  %14490 = vst [vmem:[#allocation31_spill] sm:$0xff] %v11888_v42  ;;  %14491 = vst [vmem:[#allocation32_spill] sm:$0xff] %v11894_v46  ;;  %v11900_v39 = vld [vmem:[%s13924_s4] sm:$0xff] }
 0x8c1   :  { %4179 = vmatprep.subr.mxu0 %v11888_v42  ;;  %4250 = vmatprep.subr.mxu1 %v11894_v46  ;;  %14492 = vst [vmem:[#allocation33_spill] sm:$0xff] %v11900_v39  ;;  %v11907_v42 = vld [vmem:[%s13924_s4 + $0x10] sm:$0xff] }
 0x8c2   :  { %4180 = vmatpush1.msra.mxu0 %v11900_v39  ;;  %4213 = vmatprep.mubr.f32.mxu0 %v14464_v28  ;;  %14493 = vst [vmem:[#allocation34_spill] sm:$0xff] %v11907_v42  ;;  %v3887_v46 = vld [vmem:[#allocation2 + $0x20] ss:$8 sm:$0xf] }
 0x8c3   :  { %4251 = vmatpush1.msra.mxu1 %v11907_v42  ;;  %4284 = vmatprep.mubr.f32.mxu1 %v14464_v28  ;;  %v3888_v40 = vld [vmem:[#allocation2 + $0x7] ss:$8 sm:$0xf]  ;;  %v3914_v38 = vrot.slane %v3887_v46, %v14468_v45  ;;  %v3918_v43 = vrot.slane %v3887_v46, %v10513_v56  ;;  %v3922_v28 = vrot.slane %v3887_v46, %v10550_v11 }
 0x8c4   :  { %4363 = vmatprep.subr.mxu0 %v11508_v22  ;;  %4434 = vmatprep.subr.mxu1 %v11514_v51  ;;  %v3893_v39 = vrot.slane %v3888_v40, %v14468_v45  ;;  %v3897_v42 = vrot.slane %v3888_v40, %v10513_v56  ;;  %v3901_v30 = vrot.slane %v3888_v40, %v10550_v11 }
 0x8c6   :  { %v3931_v41 = vsel %vm10567_vm4, %v3893_v39, %v3914_v38  ;;  %v3932_v51 = vsel %vm10573_vm5, %v3897_v42, %v3918_v43  ;;  %v3933_v38 = vsel %vm10584_vm8, %v3901_v30, %v3922_v28 }
 0x963   :  { %v4001_v36 = vpop.f32.mrf.mxu0  ;;  %v4072_v45 = vpop.f32.mrf.mxu1 }
 0x964   :  { %v4077_v14 = vadd.f32 %v4001_v36, %v3931_v41  ;;  %v4079_v39 = vadd.f32 %v4072_v45, %v3933_v38  ;;  %v3926_v36 = vrot.slane %v3887_v46, %v10553_v13  ;;  %v3905_v41 = vrot.slane %v3888_v40, %v10553_v13 }
 0x965   :  { %v4003_v22 = vpop.f32.mrf.mxu0  ;;  %v4074_v3 = vpop.f32.mrf.mxu1 }
 0x966   :  { %v4081_v35 = vmul.f32 0.5, %v4077_v14  ;;  %v4078_v18 = vadd.f32 %v4003_v22, %v3932_v51  ;;  %v3934_v14 = vsel %vm10592_vm11, %v3905_v41, %v3926_v36  ;;  %v14496_v41 = vld [vmem:[#allocation48_spill] sm:$0xff] }
 0x967   :  { %v4080_v22 = vadd.f32 %v4074_v3, %v3934_v14  ;;  %v14497_v14 = vld [vmem:[#allocation49_spill] sm:$0xff] }
 0x968   :  { %8769 = vtanh.f32 %v4081_v35  ;;  %v4085_v29 = vmul.f32 0.5, %v4078_v18 }
 0x969   :  { %v4090_v51 = vmul.f32 0.5, %v4080_v22  ;;  %v14498_v22 = vld [vmem:[#allocation50_spill] sm:$0xff] }
 0x96a   :  { %8771 = vtanh.f32 %v4085_v29 }
 0x96b   :  { %8773 = vtanh.f32 %v4079_v39 }
 0x96c   :  { %8775 = vtanh.f32 %v4090_v51  ;;  %v14499_v51 = vld [vmem:[#allocation51_spill] sm:$0xff] }
 0x975   :  { %v8770_v43 = vpop.eup %8769 }
 0x976   :  { %v4083_v42 = vmul.f32 0.5, %v8770_v43  ;;  %v14500_v43 = vld [vmem:[#allocation52_spill] sm:$0xff] }
 0x977   :  { %v8772_v35 = vpop.eup %8771 }
 0x978   :  { %v4084_v18 = vadd.f32 0.5, %v4083_v42  ;;  %v4087_v2 = vmul.f32 0.5, %v8772_v35  ;;  %v8774_v45 = vpop.eup %8773  ;;  %v14501_v42 = vld [vmem:[#allocation21_spill] sm:$0xff]  ;;  %v14502_v35 = vld [vmem:[#allocation22_spill] sm:$0xff] }
 0x979   :  { %v8776_v40 = vpop.eup %8775 }
 0x97a   :  { %v4088_v28 = vadd.f32 0.5, %v4087_v2  ;;  %v4095_v30 = vmul.f32 %v8774_v45, %v4084_v18  ;;  %v4092_v38 = vmul.f32 0.5, %v8776_v40  ;;  %v14494_v2 = vld [vmem:[#allocation46_spill] sm:$0xff]  ;;  %v14503_v18 = vld [vmem:[#allocation23_spill] sm:$0xff]  ;;  %v14505_v45 = vld [vmem:[#allocation25_spill] sm:$0xff] }
 0x97b   :  { %v14508_v40 = vld [vmem:[#allocation28_spill] sm:$0xff] }
 0x97c   :  { %v4094_v29 = vmul.f32 %v4088_v28, %v11534_v37  ;;  %v4093_v39 = vadd.f32 0.5, %v4092_v38  ;;  %v14495_v37 = vld [vmem:[#allocation47_spill] sm:$0xff]  ;;  %v14504_v28 = vld [vmem:[#allocation24_spill] sm:$0xff]  ;;  %v14509_v38 = vld [vmem:[#allocation29_spill] sm:$0xff] }
 0x97e   :  { %v11930_v46 = vadd.f32 %v4095_v30, %v4094_v29  ;;  %v14506_v29 = vld [vmem:[#allocation26_spill] sm:$0xff]  ;;  %v14507_v30 = vld [vmem:[#allocation27_spill] sm:$0xff] }
 0x980   :  { %8777 = vtanh.f32 %v11930_v46 }
 0x98d   :  { %v8778_v3 = vpop.eup %8777 }
 0x98e   :  { %v4098_v36 = vmul.f32 %v8778_v3, %v4093_v39  ;;  %v14510_v39 = vld [vmem:[#allocation19_spill] sm:$0xff]  ;;  %v14511_v3 = vld [vmem:[#allocation20_spill] sm:$0xff] }
 0x990   :  { %4099 = vst [vmem:[#allocation3 + $0x8] sm:$0x1] %v4098_v36  ;;  %4100 = vst [vmem:[#allocation4 + $0x7] sm:$0x1] %v4098_v36  ;;  %4214 = vmatmul.mubr.f32.vlgmr.msra.gmra.mxu0 %v4098_v36  ;;  %4285 = vmatmul.mubr.f32.vlgmr.msra.gmra.mxu1 %v4098_v36  ;;  %v14512_v36 = vld [vmem:[#allocation30_spill] sm:$0xff] }
 0x991   :  { %4364 = vmatpush1.msra.mxu0 %v11540_v47  ;;  %4435 = vmatpush1.msra.mxu1 %v11546_v55 }
 0x992   :  { %4365 = vmatprep.subr.mxu0 %v11552_v49  ;;  %4436 = vmatprep.subr.mxu1 %v11558_v54 }
 0x993   :  { %4366 = vmatpush1.msra.mxu0 %v11564_v60  ;;  %4437 = vmatpush1.msra.mxu1 %v11570_v62 }
 0x994   :  { %4367 = vmatprep.subr.mxu0 %v11576_v23  ;;  %4438 = vmatprep.subr.mxu1 %v11582_v63 }
 0x995   :  { %4368 = vmatpush1.msra.mxu0 %v11588_v10  ;;  %4439 = vmatpush1.msra.mxu1 %v11594_v17 }
 0x996   :  { %4369 = vmatprep.subr.mxu0 %v11600_v57  ;;  %4440 = vmatprep.subr.mxu1 %v11606_v27 }
 0x997   :  { %4370 = vmatpush1.msra.mxu0 %v11612_v15  ;;  %4441 = vmatpush1.msra.mxu1 %v11618_v59 }
 0x998   :  { %4371 = vmatprep.subr.mxu0 %v11624_v58  ;;  %4442 = vmatprep.subr.mxu1 %v11630_v44 }
 0x999   :  { %4372 = vmatpush1.msra.mxu0 %v11636_v1  ;;  %4443 = vmatpush1.msra.mxu1 %v11642_v26 }
 0x99a   :  { %4373 = vmatprep.subr.mxu0 %v11648_v4  ;;  %4444 = vmatprep.subr.mxu1 %v11654_v19 }
 0x99b   :  { %4374 = vmatpush1.msra.mxu0 %v11660_v24  ;;  %4445 = vmatpush1.msra.mxu1 %v11666_v25 }
 0x99c   :  { %4375 = vmatprep.subr.mxu0 %v11672_v0  ;;  %4446 = vmatprep.subr.mxu1 %v11678_v32 }
 0x99d   :  { %4376 = vmatpush1.msra.mxu0 %v11684_v8  ;;  %4447 = vmatpush1.msra.mxu1 %v11690_v34 }
 0x99e   :  { %4377 = vmatprep.subr.mxu0 %v11696_v53  ;;  %4448 = vmatprep.subr.mxu1 %v11702_v50 }
 0x99f   :  { %4378 = vmatpush1.msra.mxu0 %v11708_v48  ;;  %4449 = vmatpush1.msra.mxu1 %v11714_v9 }
 0x9a0   :  { %4379 = vmatprep.subr.mxu0 %v11720_v31  ;;  %4450 = vmatprep.subr.mxu1 %v11726_v5 }
 0x9a1   :  { %4380 = vmatpush1.msra.mxu0 %v11732_v33  ;;  %4451 = vmatpush1.msra.mxu1 %v11738_v6 }
 0x9a2   :  { %4381 = vmatprep.subr.mxu0 %v11744_v61  ;;  %4452 = vmatprep.subr.mxu1 %v11750_v21 }
 0x9a3   :  { %4382 = vmatpush1.msra.mxu0 %v11756_v12  ;;  %4453 = vmatpush1.msra.mxu1 %v11762_v20 }
 0x9a4   :  { %4383 = vmatprep.subr.mxu0 %v11768_v52  ;;  %4454 = vmatprep.subr.mxu1 %v14494_v2 }
 0x9a5   :  { %4384 = vmatpush1.msra.mxu0 %v14495_v37  ;;  %4455 = vmatpush1.msra.mxu1 %v14496_v41 }
 0x9a6   :  { %4385 = vmatprep.subr.mxu0 %v14497_v14  ;;  %4456 = vmatprep.subr.mxu1 %v14498_v22 }
 0x9a7   :  { %4386 = vmatpush1.msra.mxu0 %v14499_v51  ;;  %4457 = vmatpush1.msra.mxu1 %v14500_v43 }
 0x9a8   :  { %4387 = vmatprep.subr.mxu0 %v14501_v42  ;;  %4458 = vmatprep.subr.mxu1 %v14502_v35  ;;  %v14513_v35 = vld [vmem:[#allocation31_spill] sm:$0xff] }
 0x9a9   :  { %4388 = vmatpush1.msra.mxu0 %v14503_v18  ;;  %4459 = vmatpush1.msra.mxu1 %v14504_v28  ;;  %v14514_v18 = vld [vmem:[#allocation32_spill] sm:$0xff]  ;;  %v14515_v28 = vld [vmem:[#allocation33_spill] sm:$0xff] }
 0x9aa   :  { %4389 = vmatprep.subr.mxu0 %v14505_v45  ;;  %4460 = vmatprep.subr.mxu1 %v14506_v29  ;;  %v14516_v45 = vmov 0.0   ;;  %v14517_v29 = vld [vmem:[#allocation34_spill] sm:$0xff] }
 0x9ab   :  { %4390 = vmatpush1.msra.mxu0 %v14507_v30  ;;  %4461 = vmatpush1.msra.mxu1 %v14508_v40  ;;  %v14518_v40 = vld [vmem:[#allocation44_spill] sm:$0xff]  ;;  %v14520_v30 = vld [vmem:[#allocation54_spill] sm:$0xff] }
 0x9ac   :  { %4391 = vmatprep.subr.mxu0 %v14509_v38  ;;  %4462 = vmatprep.subr.mxu1 %v14510_v39  ;;  %v14519_v38 = vld [vmem:[#allocation45_spill] sm:$0xff] }
 0x9ad   :  { %4392 = vmatpush1.msra.mxu0 %v14511_v3  ;;  %4463 = vmatpush1.msra.mxu1 %v14512_v36  ;;  %v4101_v39 = vld [vmem:[#allocation2 + $0x21] ss:$8 sm:$0xf]  ;;  %v4102_v3 = vld [vmem:[#allocation2 + $0x6] ss:$8 sm:$0xf] }
 0x9ae   :  { %4393 = vmatprep.subr.mxu0 %v14513_v35  ;;  %4464 = vmatprep.subr.mxu1 %v14514_v18  ;;  %v4128_v36 = vrot.slane %v4101_v39, %v14520_v30  ;;  %v4107_v35 = vrot.slane %v4102_v3, %v14520_v30  ;;  %v4132_v18 = vrot.slane %v4101_v39, %v10513_v56 }
 0x9af   :  { %4394 = vmatpush1.msra.mxu0 %v14515_v28  ;;  %4427 = vmatprep.mubr.f32.mxu0 %v14516_v45  ;;  %v4115_v37 = vrot.slane %v4102_v3, %v10550_v11 }
 0x9b0   :  { %4465 = vmatpush1.msra.mxu1 %v14517_v29  ;;  %4498 = vmatprep.mubr.f32.mxu1 %v14516_v45  ;;  %v4145_v28 = vsel %vm10567_vm4, %v4107_v35, %v4128_v36  ;;  %v4111_v29 = vrot.slane %v4102_v3, %v10513_v56  ;;  %v4136_v45 = vrot.slane %v4101_v39, %v10550_v11 }
 0x9b1   :  { %4577 = vmatprep.subr.mxu0 %v14518_v40  ;;  %4648 = vmatprep.subr.mxu1 %v14519_v38 }
 0x9b2   :  { %v4146_v38 = vsel %vm10573_vm5, %v4111_v29, %v4132_v18  ;;  %v4147_v35 = vsel %vm10584_vm8, %v4115_v37, %v4136_v45 }
 0xa50   :  { %v4215_v43 = vpop.f32.mrf.mxu0  ;;  %v4286_v30 = vpop.f32.mrf.mxu1 }
 0xa51   :  { %v4291_v51 = vadd.f32 %v4215_v43, %v4145_v28  ;;  %v4293_v36 = vadd.f32 %v4286_v30, %v4147_v35  ;;  %v4140_v43 = vrot.slane %v4101_v39, %v10553_v13  ;;  %v4119_v28 = vrot.slane %v4102_v3, %v10553_v13 }
 0xa52   :  { %v4217_v22 = vpop.f32.mrf.mxu0  ;;  %v4288_v42 = vpop.f32.mrf.mxu1 }
 0xa53   :  { %v4295_v14 = vmul.f32 0.5, %v4291_v51  ;;  %v4292_v41 = vadd.f32 %v4217_v22, %v4146_v38  ;;  %v4148_v51 = vsel %vm10592_vm11, %v4119_v28, %v4140_v43  ;;  %v14525_v28 = vld [vmem:[#allocation48_spill] sm:$0xff] }
 0xa54   :  { %v4294_v22 = vadd.f32 %v4288_v42, %v4148_v51  ;;  %v14526_v51 = vld [vmem:[#allocation49_spill] sm:$0xff] }
 0xa55   :  { %8779 = vtanh.f32 %v4295_v14  ;;  %v4299_v2 = vmul.f32 0.5, %v4292_v41 }
 0xa56   :  { %v4304_v18 = vmul.f32 0.5, %v4294_v22  ;;  %v14527_v22 = vld [vmem:[#allocation50_spill] sm:$0xff] }
 0xa57   :  { %8781 = vtanh.f32 %v4299_v2 }
 0xa58   :  { %8783 = vtanh.f32 %v4293_v36 }
 0xa59   :  { %8785 = vtanh.f32 %v4304_v18  ;;  %v14528_v18 = vld [vmem:[#allocation51_spill] sm:$0xff] }
 0xa62   :  { %v8780_v29 = vpop.eup %8779 }
 0xa63   :  { %v4297_v38 = vmul.f32 0.5, %v8780_v29  ;;  %v14529_v29 = vld [vmem:[#allocation52_spill] sm:$0xff] }
 0xa64   :  { %v8782_v14 = vpop.eup %8781 }
 0xa65   :  { %v4298_v41 = vadd.f32 0.5, %v4297_v38  ;;  %v4301_v40 = vmul.f32 0.5, %v8782_v14  ;;  %v8784_v45 = vpop.eup %8783  ;;  %v14530_v38 = vld [vmem:[#allocation21_spill] sm:$0xff]  ;;  %v14531_v14 = vld [vmem:[#allocation22_spill] sm:$0xff] }
 0xa66   :  { %v8786_v3 = vpop.eup %8785 }
 0xa67   :  { %v4302_v37 = vadd.f32 0.5, %v4301_v40  ;;  %v4309_v30 = vmul.f32 %v8784_v45, %v4298_v41  ;;  %v4306_v35 = vmul.f32 0.5, %v8786_v3  ;;  %v14524_v40 = vld [vmem:[#allocation47_spill] sm:$0xff]  ;;  %v14534_v45 = vld [vmem:[#allocation25_spill] sm:$0xff]  ;;  %v14537_v3 = vld [vmem:[#allocation28_spill] sm:$0xff] }
 0xa68   :  { %v14532_v41 = vld [vmem:[#allocation23_spill] sm:$0xff] }
 0xa69   :  { %v4308_v2 = vmul.f32 %v4302_v37, %v11930_v46  ;;  %v4307_v36 = vadd.f32 0.5, %v4306_v35  ;;  %v14523_v46 = vld [vmem:[#allocation46_spill] sm:$0xff]  ;;  %v14533_v37 = vld [vmem:[#allocation24_spill] sm:$0xff]  ;;  %v14538_v35 = vld [vmem:[#allocation29_spill] sm:$0xff] }
 0xa6b   :  { %v12016_v39 = vadd.f32 %v4309_v30, %v4308_v2  ;;  %v14535_v2 = vld [vmem:[#allocation26_spill] sm:$0xff]  ;;  %v14536_v30 = vld [vmem:[#allocation27_spill] sm:$0xff] }
 0xa6d   :  { %8787 = vtanh.f32 %v12016_v39 }
 0xa7a   :  { %v8788_v42 = vpop.eup %8787 }
 0xa7b   :  { %v4312_v43 = vmul.f32 %v8788_v42, %v4307_v36  ;;  %v14539_v36 = vld [vmem:[#allocation19_spill] sm:$0xff]  ;;  %v14540_v42 = vld [vmem:[#allocation20_spill] sm:$0xff] }
 0xa7d   :  { %4313 = vst [vmem:[#allocation3 + $0x9] sm:$0x1] %v4312_v43  ;;  %4314 = vst [vmem:[#allocation4 + $0x6] sm:$0x1] %v4312_v43  ;;  %4428 = vmatmul.mubr.f32.vlgmr.msra.gmra.mxu0 %v4312_v43  ;;  %4499 = vmatmul.mubr.f32.vlgmr.msra.gmra.mxu1 %v4312_v43  ;;  %v14541_v43 = vld [vmem:[#allocation30_spill] sm:$0xff] }
 0xa7e   :  { %4578 = vmatpush1.msra.mxu0 %v11540_v47  ;;  %4649 = vmatpush1.msra.mxu1 %v11546_v55 }
 0xa7f   :  { %4579 = vmatprep.subr.mxu0 %v11552_v49  ;;  %4650 = vmatprep.subr.mxu1 %v11558_v54 }
 0xa80   :  { %4580 = vmatpush1.msra.mxu0 %v11564_v60  ;;  %4651 = vmatpush1.msra.mxu1 %v11570_v62 }
 0xa81   :  { %4581 = vmatprep.subr.mxu0 %v11576_v23  ;;  %4652 = vmatprep.subr.mxu1 %v11582_v63 }
 0xa82   :  { %4582 = vmatpush1.msra.mxu0 %v11588_v10  ;;  %4653 = vmatpush1.msra.mxu1 %v11594_v17 }
 0xa83   :  { %4583 = vmatprep.subr.mxu0 %v11600_v57  ;;  %4654 = vmatprep.subr.mxu1 %v11606_v27 }
 0xa84   :  { %4584 = vmatpush1.msra.mxu0 %v11612_v15  ;;  %4655 = vmatpush1.msra.mxu1 %v11618_v59 }
 0xa85   :  { %4585 = vmatprep.subr.mxu0 %v11624_v58  ;;  %4656 = vmatprep.subr.mxu1 %v11630_v44 }
 0xa86   :  { %4586 = vmatpush1.msra.mxu0 %v11636_v1  ;;  %4657 = vmatpush1.msra.mxu1 %v11642_v26 }
 0xa87   :  { %4587 = vmatprep.subr.mxu0 %v11648_v4  ;;  %4658 = vmatprep.subr.mxu1 %v11654_v19 }
 0xa88   :  { %4588 = vmatpush1.msra.mxu0 %v11660_v24  ;;  %4659 = vmatpush1.msra.mxu1 %v11666_v25 }
 0xa89   :  { %4589 = vmatprep.subr.mxu0 %v11672_v0  ;;  %4660 = vmatprep.subr.mxu1 %v11678_v32 }
 0xa8a   :  { %4590 = vmatpush1.msra.mxu0 %v11684_v8  ;;  %4661 = vmatpush1.msra.mxu1 %v11690_v34 }
 0xa8b   :  { %4591 = vmatprep.subr.mxu0 %v11696_v53  ;;  %4662 = vmatprep.subr.mxu1 %v11702_v50 }
 0xa8c   :  { %4592 = vmatpush1.msra.mxu0 %v11708_v48  ;;  %4663 = vmatpush1.msra.mxu1 %v11714_v9 }
 0xa8d   :  { %4593 = vmatprep.subr.mxu0 %v11720_v31  ;;  %4664 = vmatprep.subr.mxu1 %v11726_v5 }
 0xa8e   :  { %4594 = vmatpush1.msra.mxu0 %v11732_v33  ;;  %4665 = vmatpush1.msra.mxu1 %v11738_v6 }
 0xa8f   :  { %4595 = vmatprep.subr.mxu0 %v11744_v61  ;;  %4666 = vmatprep.subr.mxu1 %v11750_v21 }
 0xa90   :  { %4596 = vmatpush1.msra.mxu0 %v11756_v12  ;;  %4667 = vmatpush1.msra.mxu1 %v11762_v20 }
 0xa91   :  { %4597 = vmatprep.subr.mxu0 %v11768_v52  ;;  %4668 = vmatprep.subr.mxu1 %v14523_v46 }
 0xa92   :  { %4598 = vmatpush1.msra.mxu0 %v14524_v40  ;;  %4669 = vmatpush1.msra.mxu1 %v14525_v28 }
 0xa93   :  { %4599 = vmatprep.subr.mxu0 %v14526_v51  ;;  %4670 = vmatprep.subr.mxu1 %v14527_v22 }
 0xa94   :  { %4600 = vmatpush1.msra.mxu0 %v14528_v18  ;;  %4671 = vmatpush1.msra.mxu1 %v14529_v29 }
 0xa95   :  { %4601 = vmatprep.subr.mxu0 %v14530_v38  ;;  %4672 = vmatprep.subr.mxu1 %v14531_v14  ;;  %v14542_v14 = vld [vmem:[#allocation31_spill] sm:$0xff] }
 0xa96   :  { %4602 = vmatpush1.msra.mxu0 %v14532_v41  ;;  %4673 = vmatpush1.msra.mxu1 %v14533_v37  ;;  %v14543_v41 = vld [vmem:[#allocation32_spill] sm:$0xff]  ;;  %v14544_v37 = vld [vmem:[#allocation33_spill] sm:$0xff] }
 0xa97   :  { %4603 = vmatprep.subr.mxu0 %v14534_v45  ;;  %4674 = vmatprep.subr.mxu1 %v14535_v2  ;;  %v14545_v45 = vmov 0.0   ;;  %v14546_v2 = vld [vmem:[#allocation34_spill] sm:$0xff] }
 0xa98   :  { %4604 = vmatpush1.msra.mxu0 %v14536_v30  ;;  %4675 = vmatpush1.msra.mxu1 %v14537_v3  ;;  %v14547_v3 = vld [vmem:[#allocation44_spill] sm:$0xff]  ;;  %v14549_v30 = vld [vmem:[#allocation54_spill] sm:$0xff] }
 0xa99   :  { %4605 = vmatprep.subr.mxu0 %v14538_v35  ;;  %4676 = vmatprep.subr.mxu1 %v14539_v36  ;;  %v14548_v35 = vld [vmem:[#allocation45_spill] sm:$0xff] }
 0xa9a   :  { %4606 = vmatpush1.msra.mxu0 %v14540_v42  ;;  %4677 = vmatpush1.msra.mxu1 %v14541_v43  ;;  %v4315_v36 = vld [vmem:[#allocation2 + $0x22] ss:$8 sm:$0xf]  ;;  %v4316_v42 = vld [vmem:[#allocation2 + $0x5] ss:$8 sm:$0xf] }
 0xa9b   :  { %4607 = vmatprep.subr.mxu0 %v14542_v14  ;;  %4678 = vmatprep.subr.mxu1 %v14543_v41  ;;  %v4342_v43 = vrot.slane %v4315_v36, %v14549_v30  ;;  %v4321_v14 = vrot.slane %v4316_v42, %v14549_v30  ;;  %v4346_v41 = vrot.slane %v4315_v36, %v10513_v56 }
 0xa9c   :  { %4608 = vmatpush1.msra.mxu0 %v14544_v37  ;;  %4641 = vmatprep.mubr.f32.mxu0 %v14545_v45  ;;  %v4329_v40 = vrot.slane %v4316_v42, %v10550_v11 }
 0xa9d   :  { %4679 = vmatpush1.msra.mxu1 %v14546_v2  ;;  %4712 = vmatprep.mubr.f32.mxu1 %v14545_v45  ;;  %v4359_v37 = vsel %vm10567_vm4, %v4321_v14, %v4342_v43  ;;  %v4325_v2 = vrot.slane %v4316_v42, %v10513_v56  ;;  %v4350_v45 = vrot.slane %v4315_v36, %v10550_v11 }
 0xa9e   :  { %4791 = vmatprep.subr.mxu0 %v14547_v3  ;;  %4862 = vmatprep.subr.mxu1 %v14548_v35 }
 0xa9f   :  { %v4360_v35 = vsel %vm10573_vm5, %v4325_v2, %v4346_v41  ;;  %v4361_v14 = vsel %vm10584_vm8, %v4329_v40, %v4350_v45 }
 0xb3d   :  { %v4429_v29 = vpop.f32.mrf.mxu0  ;;  %v4500_v30 = vpop.f32.mrf.mxu1 }
 0xb3e   :  { %v4505_v18 = vadd.f32 %v4429_v29, %v4359_v37  ;;  %v4507_v43 = vadd.f32 %v4500_v30, %v4361_v14  ;;  %v4354_v29 = vrot.slane %v4315_v36, %v10553_v13  ;;  %v4333_v37 = vrot.slane %v4316_v42, %v10553_v13 }
 0xb3f   :  { %v4431_v22 = vpop.f32.mrf.mxu0  ;;  %v4502_v38 = vpop.f32.mrf.mxu1 }
 0xb40   :  { %v4509_v51 = vmul.f32 0.5, %v4505_v18  ;;  %v4506_v28 = vadd.f32 %v4431_v22, %v4360_v35  ;;  %v4362_v18 = vsel %vm10592_vm11, %v4333_v37, %v4354_v29  ;;  %v14554_v37 = vld [vmem:[#allocation48_spill] sm:$0xff] }
 0xb41   :  { %v4508_v22 = vadd.f32 %v4502_v38, %v4362_v18  ;;  %v14555_v18 = vld [vmem:[#allocation49_spill] sm:$0xff] }
 0xb42   :  { %8789 = vtanh.f32 %v4509_v51  ;;  %v4513_v46 = vmul.f32 0.5, %v4506_v28 }
 0xb43   :  { %v4518_v41 = vmul.f32 0.5, %v4508_v22  ;;  %v14556_v22 = vld [vmem:[#allocation50_spill] sm:$0xff] }
 0xb44   :  { %8791 = vtanh.f32 %v4513_v46 }
 0xb45   :  { %8793 = vtanh.f32 %v4507_v43 }
 0xb46   :  { %8795 = vtanh.f32 %v4518_v41  ;;  %v14557_v41 = vld [vmem:[#allocation51_spill] sm:$0xff] }
 0xb4f   :  { %v8790_v2 = vpop.eup %8789 }
 0xb50   :  { %v4511_v35 = vmul.f32 0.5, %v8790_v2  ;;  %v14558_v2 = vld [vmem:[#allocation52_spill] sm:$0xff] }
 0xb51   :  { %v8792_v51 = vpop.eup %8791 }
 0xb52   :  { %v4512_v28 = vadd.f32 0.5, %v4511_v35  ;;  %v4515_v3 = vmul.f32 0.5, %v8792_v51  ;;  %v8794_v45 = vpop.eup %8793  ;;  %v14559_v35 = vld [vmem:[#allocation21_spill] sm:$0xff]  ;;  %v14560_v51 = vld [vmem:[#allocation22_spill] sm:$0xff] }
 0xb53   :  { %v8796_v42 = vpop.eup %8795 }
 0xb54   :  { %v4516_v40 = vadd.f32 0.5, %v4515_v3  ;;  %v4523_v30 = vmul.f32 %v8794_v45, %v4512_v28  ;;  %v4520_v14 = vmul.f32 0.5, %v8796_v42  ;;  %v14553_v3 = vld [vmem:[#allocation47_spill] sm:$0xff]  ;;  %v14563_v45 = vld [vmem:[#allocation25_spill] sm:$0xff]  ;;  %v14566_v42 = vld [vmem:[#allocation28_spill] sm:$0xff] }
 0xb55   :  { %v14561_v28 = vld [vmem:[#allocation23_spill] sm:$0xff] }
 0xb56   :  { %v4522_v46 = vmul.f32 %v4516_v40, %v12016_v39  ;;  %v4521_v43 = vadd.f32 0.5, %v4520_v14  ;;  %v14552_v39 = vld [vmem:[#allocation46_spill] sm:$0xff]  ;;  %v14562_v40 = vld [vmem:[#allocation24_spill] sm:$0xff]  ;;  %v14567_v14 = vld [vmem:[#allocation29_spill] sm:$0xff] }
 0xb58   :  { %v12102_v36 = vadd.f32 %v4523_v30, %v4522_v46  ;;  %v14564_v46 = vld [vmem:[#allocation26_spill] sm:$0xff]  ;;  %v14565_v30 = vld [vmem:[#allocation27_spill] sm:$0xff] }
 0xb5a   :  { %8797 = vtanh.f32 %v12102_v36 }
 0xb67   :  { %v8798_v38 = vpop.eup %8797 }
 0xb68   :  { %v4526_v29 = vmul.f32 %v8798_v38, %v4521_v43  ;;  %v14568_v43 = vld [vmem:[#allocation19_spill] sm:$0xff]  ;;  %v14569_v38 = vld [vmem:[#allocation20_spill] sm:$0xff] }
 0xb6a   :  { %4527 = vst [vmem:[#allocation3 + $0xa] sm:$0x1] %v4526_v29  ;;  %4528 = vst [vmem:[#allocation4 + $0x5] sm:$0x1] %v4526_v29  ;;  %4642 = vmatmul.mubr.f32.vlgmr.msra.gmra.mxu0 %v4526_v29  ;;  %4713 = vmatmul.mubr.f32.vlgmr.msra.gmra.mxu1 %v4526_v29  ;;  %v14570_v29 = vld [vmem:[#allocation30_spill] sm:$0xff] }
 0xb6b   :  { %4792 = vmatpush1.msra.mxu0 %v11540_v47  ;;  %4863 = vmatpush1.msra.mxu1 %v11546_v55 }
 0xb6c   :  { %4793 = vmatprep.subr.mxu0 %v11552_v49  ;;  %4864 = vmatprep.subr.mxu1 %v11558_v54 }
 0xb6d   :  { %4794 = vmatpush1.msra.mxu0 %v11564_v60  ;;  %4865 = vmatpush1.msra.mxu1 %v11570_v62 }
 0xb6e   :  { %4795 = vmatprep.subr.mxu0 %v11576_v23  ;;  %4866 = vmatprep.subr.mxu1 %v11582_v63 }
 0xb6f   :  { %4796 = vmatpush1.msra.mxu0 %v11588_v10  ;;  %4867 = vmatpush1.msra.mxu1 %v11594_v17 }
 0xb70   :  { %4797 = vmatprep.subr.mxu0 %v11600_v57  ;;  %4868 = vmatprep.subr.mxu1 %v11606_v27 }
 0xb71   :  { %4798 = vmatpush1.msra.mxu0 %v11612_v15  ;;  %4869 = vmatpush1.msra.mxu1 %v11618_v59 }
 0xb72   :  { %4799 = vmatprep.subr.mxu0 %v11624_v58  ;;  %4870 = vmatprep.subr.mxu1 %v11630_v44 }
 0xb73   :  { %4800 = vmatpush1.msra.mxu0 %v11636_v1  ;;  %4871 = vmatpush1.msra.mxu1 %v11642_v26 }
 0xb74   :  { %4801 = vmatprep.subr.mxu0 %v11648_v4  ;;  %4872 = vmatprep.subr.mxu1 %v11654_v19 }
 0xb75   :  { %4802 = vmatpush1.msra.mxu0 %v11660_v24  ;;  %4873 = vmatpush1.msra.mxu1 %v11666_v25 }
 0xb76   :  { %4803 = vmatprep.subr.mxu0 %v11672_v0  ;;  %4874 = vmatprep.subr.mxu1 %v11678_v32 }
 0xb77   :  { %4804 = vmatpush1.msra.mxu0 %v11684_v8  ;;  %4875 = vmatpush1.msra.mxu1 %v11690_v34 }
 0xb78   :  { %4805 = vmatprep.subr.mxu0 %v11696_v53  ;;  %4876 = vmatprep.subr.mxu1 %v11702_v50 }
 0xb79   :  { %4806 = vmatpush1.msra.mxu0 %v11708_v48  ;;  %4877 = vmatpush1.msra.mxu1 %v11714_v9 }
 0xb7a   :  { %4807 = vmatprep.subr.mxu0 %v11720_v31  ;;  %4878 = vmatprep.subr.mxu1 %v11726_v5 }
 0xb7b   :  { %4808 = vmatpush1.msra.mxu0 %v11732_v33  ;;  %4879 = vmatpush1.msra.mxu1 %v11738_v6 }
 0xb7c   :  { %4809 = vmatprep.subr.mxu0 %v11744_v61  ;;  %4880 = vmatprep.subr.mxu1 %v11750_v21 }
 0xb7d   :  { %4810 = vmatpush1.msra.mxu0 %v11756_v12  ;;  %4881 = vmatpush1.msra.mxu1 %v11762_v20 }
 0xb7e   :  { %4811 = vmatprep.subr.mxu0 %v11768_v52  ;;  %4882 = vmatprep.subr.mxu1 %v14552_v39 }
 0xb7f   :  { %4812 = vmatpush1.msra.mxu0 %v14553_v3  ;;  %4883 = vmatpush1.msra.mxu1 %v14554_v37 }
 0xb80   :  { %4813 = vmatprep.subr.mxu0 %v14555_v18  ;;  %4884 = vmatprep.subr.mxu1 %v14556_v22 }
 0xb81   :  { %4814 = vmatpush1.msra.mxu0 %v14557_v41  ;;  %4885 = vmatpush1.msra.mxu1 %v14558_v2 }
 0xb82   :  { %4815 = vmatprep.subr.mxu0 %v14559_v35  ;;  %4886 = vmatprep.subr.mxu1 %v14560_v51  ;;  %v14571_v51 = vld [vmem:[#allocation31_spill] sm:$0xff] }
 0xb83   :  { %4816 = vmatpush1.msra.mxu0 %v14561_v28  ;;  %4887 = vmatpush1.msra.mxu1 %v14562_v40  ;;  %v14572_v28 = vld [vmem:[#allocation32_spill] sm:$0xff]  ;;  %v14573_v40 = vld [vmem:[#allocation33_spill] sm:$0xff] }
 0xb84   :  { %4817 = vmatprep.subr.mxu0 %v14563_v45  ;;  %4888 = vmatprep.subr.mxu1 %v14564_v46  ;;  %v14574_v45 = vmov 0.0   ;;  %v14575_v46 = vld [vmem:[#allocation34_spill] sm:$0xff] }
 0xb85   :  { %4818 = vmatpush1.msra.mxu0 %v14565_v30  ;;  %4889 = vmatpush1.msra.mxu1 %v14566_v42  ;;  %v14576_v42 = vld [vmem:[#allocation44_spill] sm:$0xff]  ;;  %v14578_v30 = vld [vmem:[#allocation54_spill] sm:$0xff] }
 0xb86   :  { %4819 = vmatprep.subr.mxu0 %v14567_v14  ;;  %4890 = vmatprep.subr.mxu1 %v14568_v43  ;;  %v14577_v14 = vld [vmem:[#allocation45_spill] sm:$0xff] }
 0xb87   :  { %4820 = vmatpush1.msra.mxu0 %v14569_v38  ;;  %4891 = vmatpush1.msra.mxu1 %v14570_v29  ;;  %v4529_v43 = vld [vmem:[#allocation2 + $0x23] ss:$8 sm:$0xf]  ;;  %v4530_v38 = vld [vmem:[#allocation2 + $0x4] ss:$8 sm:$0xf] }
 0xb88   :  { %4821 = vmatprep.subr.mxu0 %v14571_v51  ;;  %4892 = vmatprep.subr.mxu1 %v14572_v28  ;;  %v4556_v29 = vrot.slane %v4529_v43, %v14578_v30  ;;  %v4535_v51 = vrot.slane %v4530_v38, %v14578_v30  ;;  %v4560_v28 = vrot.slane %v4529_v43, %v10513_v56 }
 0xb89   :  { %4822 = vmatpush1.msra.mxu0 %v14573_v40  ;;  %4855 = vmatprep.mubr.f32.mxu0 %v14574_v45  ;;  %v4543_v3 = vrot.slane %v4530_v38, %v10550_v11 }
 0xb8a   :  { %4893 = vmatpush1.msra.mxu1 %v14575_v46  ;;  %4926 = vmatprep.mubr.f32.mxu1 %v14574_v45  ;;  %v4573_v40 = vsel %vm10567_vm4, %v4535_v51, %v4556_v29  ;;  %v4539_v46 = vrot.slane %v4530_v38, %v10513_v56  ;;  %v4564_v45 = vrot.slane %v4529_v43, %v10550_v11 }
 0xb8b   :  { %5005 = vmatprep.subr.mxu0 %v14576_v42  ;;  %5076 = vmatprep.subr.mxu1 %v14577_v14 }
 0xb8c   :  { %v4574_v14 = vsel %vm10573_vm5, %v4539_v46, %v4560_v28  ;;  %v4575_v51 = vsel %vm10584_vm8, %v4543_v3, %v4564_v45 }
 0xc2a   :  { %v4643_v2 = vpop.f32.mrf.mxu0  ;;  %v4714_v30 = vpop.f32.mrf.mxu1 }
 0xc2b   :  { %v4719_v41 = vadd.f32 %v4643_v2, %v4573_v40  ;;  %v4721_v29 = vadd.f32 %v4714_v30, %v4575_v51  ;;  %v4568_v2 = vrot.slane %v4529_v43, %v10553_v13  ;;  %v4547_v40 = vrot.slane %v4530_v38, %v10553_v13 }
 0xc2c   :  { %v4645_v22 = vpop.f32.mrf.mxu0  ;;  %v4716_v35 = vpop.f32.mrf.mxu1 }
 0xc2d   :  { %v4723_v18 = vmul.f32 0.5, %v4719_v41  ;;  %v4720_v37 = vadd.f32 %v4645_v22, %v4574_v14  ;;  %v4576_v41 = vsel %vm10592_vm11, %v4547_v40, %v4568_v2 }
 0xc2e   :  { %v4722_v22 = vadd.f32 %v4716_v35, %v4576_v41 }
 0xc2f   :  { %8799 = vtanh.f32 %v4723_v18  ;;  %v4727_v39 = vmul.f32 0.5, %v4720_v37 }
 0xc30   :  { %v4732_v28 = vmul.f32 0.5, %v4722_v22 }
 0xc31   :  { %8801 = vtanh.f32 %v4727_v39 }
 0xc32   :  { %8803 = vtanh.f32 %v4721_v29 }
 0xc33   :  { %8805 = vtanh.f32 %v4732_v28 }
 0xc3c   :  { %v8800_v46 = vpop.eup %8799 }
 0xc3d   :  { %v4725_v14 = vmul.f32 0.5, %v8800_v46 }
 0xc3e   :  { %v8802_v18 = vpop.eup %8801 }
 0xc3f   :  { %v4726_v37 = vadd.f32 0.5, %v4725_v14  ;;  %v4729_v42 = vmul.f32 0.5, %v8802_v18  ;;  %v8804_v45 = vpop.eup %8803 }
 0xc40   :  { %v8806_v38 = vpop.eup %8805 }
 0xc41   :  { %v4730_v3 = vadd.f32 0.5, %v4729_v42  ;;  %v4737_v30 = vmul.f32 %v8804_v45, %v4726_v37  ;;  %v4734_v51 = vmul.f32 0.5, %v8806_v38 }
 0xc43   :  { %v4736_v39 = vmul.f32 %v4730_v3, %v12102_v36  ;;  %v4735_v29 = vadd.f32 0.5, %v4734_v51 }
 0xc45   :  { %v12188_v43 = vadd.f32 %v4737_v30, %v4736_v39 }
 0xc47   :  { %8807 = vtanh.f32 %v12188_v43 }
 0xc54   :  { %v8808_v35 = vpop.eup %8807 }
 0xc55   :  { %v4740_v2 = vmul.f32 %v8808_v35, %v4735_v29 }
 0xc57   :  { %4741 = vst [vmem:[#allocation3 + $0xb] sm:$0x1] %v4740_v2  ;;  %4742 = vst [vmem:[#allocation4 + $0x4] sm:$0x1] %v4740_v2  ;;  %4856 = vmatmul.mubr.f32.vlgmr.msra.gmra.mxu0 %v4740_v2  ;;  %4927 = vmatmul.mubr.f32.vlgmr.msra.gmra.mxu1 %v4740_v2 }
 0xc58   :  { %5006 = vmatpush1.msra.mxu0 %v11540_v47  ;;  %5077 = vmatpush1.msra.mxu1 %v11546_v55  ;;  %v14581_v47 = vld [vmem:[#allocation46_spill] sm:$0xff]  ;;  %v14582_v55 = vld [vmem:[#allocation47_spill] sm:$0xff] }
 0xc59   :  { %5007 = vmatprep.subr.mxu0 %v11552_v49  ;;  %5078 = vmatprep.subr.mxu1 %v11558_v54  ;;  %v14583_v49 = vld [vmem:[#allocation48_spill] sm:$0xff]  ;;  %v14584_v54 = vld [vmem:[#allocation49_spill] sm:$0xff] }
 0xc5a   :  { %5008 = vmatpush1.msra.mxu0 %v11564_v60  ;;  %5079 = vmatpush1.msra.mxu1 %v11570_v62  ;;  %v14585_v60 = vld [vmem:[#allocation50_spill] sm:$0xff]  ;;  %v14586_v62 = vld [vmem:[#allocation51_spill] sm:$0xff] }
 0xc5b   :  { %5009 = vmatprep.subr.mxu0 %v11576_v23  ;;  %5080 = vmatprep.subr.mxu1 %v11582_v63  ;;  %v14587_v23 = vld [vmem:[#allocation52_spill] sm:$0xff]  ;;  %v14588_v63 = vld [vmem:[#allocation21_spill] sm:$0xff] }
 0xc5c   :  { %5010 = vmatpush1.msra.mxu0 %v11588_v10  ;;  %5081 = vmatpush1.msra.mxu1 %v11594_v17  ;;  %v14589_v10 = vld [vmem:[#allocation22_spill] sm:$0xff]  ;;  %v14590_v17 = vld [vmem:[#allocation23_spill] sm:$0xff] }
 0xc5d   :  { %5011 = vmatprep.subr.mxu0 %v11600_v57  ;;  %5082 = vmatprep.subr.mxu1 %v11606_v27  ;;  %v14591_v57 = vld [vmem:[#allocation24_spill] sm:$0xff]  ;;  %v14592_v27 = vld [vmem:[#allocation25_spill] sm:$0xff] }
 0xc5e   :  { %5012 = vmatpush1.msra.mxu0 %v11612_v15  ;;  %5083 = vmatpush1.msra.mxu1 %v11618_v59  ;;  %v14593_v15 = vld [vmem:[#allocation26_spill] sm:$0xff]  ;;  %v14594_v59 = vld [vmem:[#allocation27_spill] sm:$0xff] }
 0xc5f   :  { %5013 = vmatprep.subr.mxu0 %v11624_v58  ;;  %5084 = vmatprep.subr.mxu1 %v11630_v44  ;;  %v14595_v58 = vld [vmem:[#allocation28_spill] sm:$0xff]  ;;  %v14596_v44 = vld [vmem:[#allocation29_spill] sm:$0xff] }
 0xc60   :  { %5014 = vmatpush1.msra.mxu0 %v11636_v1  ;;  %5085 = vmatpush1.msra.mxu1 %v11642_v26  ;;  %v14597_v1 = vld [vmem:[#allocation19_spill] sm:$0xff]  ;;  %v14598_v26 = vld [vmem:[#allocation20_spill] sm:$0xff] }
 0xc61   :  { %5015 = vmatprep.subr.mxu0 %v11648_v4  ;;  %5086 = vmatprep.subr.mxu1 %v11654_v19  ;;  %v14599_v4 = vld [vmem:[#allocation30_spill] sm:$0xff]  ;;  %v14600_v19 = vld [vmem:[#allocation31_spill] sm:$0xff] }
 0xc62   :  { %5016 = vmatpush1.msra.mxu0 %v11660_v24  ;;  %5087 = vmatpush1.msra.mxu1 %v11666_v25  ;;  %v14601_v24 = vld [vmem:[#allocation32_spill] sm:$0xff]  ;;  %v14602_v25 = vld [vmem:[#allocation33_spill] sm:$0xff] }
 0xc63   :  { %5017 = vmatprep.subr.mxu0 %v11672_v0  ;;  %5088 = vmatprep.subr.mxu1 %v11678_v32  ;;  %v14603_v0 = vmov 0.0   ;;  %v14604_v32 = vld [vmem:[#allocation34_spill] sm:$0xff] }
 0xc64   :  { %5018 = vmatpush1.msra.mxu0 %v11684_v8  ;;  %5089 = vmatpush1.msra.mxu1 %v11690_v34  ;;  %v12258_v8 = vld [vmem:[%s13924_s4 + $0x1e8] sm:$0xff]  ;;  %v12264_v34 = vld [vmem:[%s13924_s4 + $0x1f8] sm:$0xff] }
 0xc65   :  { %5019 = vmatprep.subr.mxu0 %v11696_v53  ;;  %5090 = vmatprep.subr.mxu1 %v11702_v50  ;;  %v4743_v53 = vld [vmem:[#allocation2 + $0x24] ss:$8 sm:$0xf]  ;;  %v4744_v50 = vld [vmem:[#allocation2 + $0x3] ss:$8 sm:$0xf] }
 0xc66   :  { %5020 = vmatpush1.msra.mxu0 %v11708_v48  ;;  %5091 = vmatpush1.msra.mxu1 %v11714_v9  ;;  %v14605_v48 = vld [vmem:[#allocation54_spill] sm:$0xff]  ;;  %v4757_v22 = vrot.slane %v4744_v50, %v10550_v11  ;;  %v4782_v37 = vrot.slane %v4743_v53, %v10553_v13  ;;  %v4761_v3 = vrot.slane %v4744_v50, %v10553_v13 }
 0xc67   :  { %5021 = vmatprep.subr.mxu0 %v11720_v31  ;;  %5092 = vmatprep.subr.mxu1 %v11726_v5  ;;  %v4770_v9 = vrot.slane %v4743_v53, %v14605_v48  ;;  %v4749_v31 = vrot.slane %v4744_v50, %v14605_v48  ;;  %v4774_v5 = vrot.slane %v4743_v53, %v10513_v56 }
 0xc68   :  { %5022 = vmatpush1.msra.mxu0 %v11732_v33  ;;  %5093 = vmatpush1.msra.mxu1 %v11738_v6  ;;  %v4790_v39 = vsel %vm10592_vm11, %v4761_v3, %v4782_v37  ;;  %v12482_v37 = vld [vmem:[%s13924_s4 + $0xe0] sm:$0xff]  ;;  %v12488_v3 = vld [vmem:[%s13924_s4 + $0xf0] sm:$0xff] }
 0xc69   :  { %5023 = vmatprep.subr.mxu0 %v11744_v61  ;;  %5094 = vmatprep.subr.mxu1 %v11750_v21  ;;  %v4787_v6 = vsel %vm10567_vm4, %v4749_v31, %v4770_v9  ;;  %v4753_v21 = vrot.slane %v4744_v50, %v10513_v56  ;;  %v12374_v50 = vld [vmem:[%s13924_s4 + $0x168] sm:$0xff]  ;;  %v12380_v9 = vld [vmem:[%s13924_s4 + $0x178] sm:$0xff]  ;;  %v12386_v31 = vld [vmem:[%s13924_s4 + $0x160] sm:$0xff] }
 0xc6a   :  { %5024 = vmatpush1.msra.mxu0 %v11756_v12  ;;  %5095 = vmatpush1.msra.mxu1 %v11762_v20  ;;  %v4778_v20 = vrot.slane %v4743_v53, %v10550_v11  ;;  %v12368_v53 = vld [vmem:[%s13924_s4 + $0x190] sm:$0xff] }
 0xc6b   :  { %5025 = vmatprep.subr.mxu0 %v11768_v52  ;;  %5096 = vmatprep.subr.mxu1 %v14581_v47  ;;  %v4788_v36 = vsel %vm10573_vm5, %v4753_v21, %v4774_v5  ;;  %v12392_v5 = vld [vmem:[%s13924_s4 + $0x170] sm:$0xff]  ;;  %v12410_v21 = vld [vmem:[%s13924_s4 + $0x140] sm:$0xff] }
 0xc6c   :  { %5026 = vmatpush1.msra.mxu0 %v14582_v55  ;;  %5097 = vmatpush1.msra.mxu1 %v14583_v49  ;;  %v4789_v14 = vsel %vm10584_vm8, %v4757_v22, %v4778_v20  ;;  %v12422_v20 = vld [vmem:[%s13924_s4 + $0x128] sm:$0xff]  ;;  %v12452_v22 = vld [vmem:[%s13924_s4 + $0x118] sm:$0xff] }
 0xc6d   :  { %5027 = vmatprep.subr.mxu0 %v14584_v54  ;;  %5098 = vmatprep.subr.mxu1 %v14585_v60 }
 0xc6e   :  { %5028 = vmatpush1.msra.mxu0 %v14586_v62  ;;  %5099 = vmatpush1.msra.mxu1 %v14587_v23 }
 0xc6f   :  { %5029 = vmatprep.subr.mxu0 %v14588_v63  ;;  %5100 = vmatprep.subr.mxu1 %v14589_v10 }
 0xc70   :  { %5030 = vmatpush1.msra.mxu0 %v14590_v17  ;;  %5101 = vmatpush1.msra.mxu1 %v14591_v57 }
 0xc71   :  { %5031 = vmatprep.subr.mxu0 %v14592_v27  ;;  %5102 = vmatprep.subr.mxu1 %v14593_v15  ;;  %v12290_v27 = vld [vmem:[%s13924_s4 + $0x1e0] sm:$0xff]  ;;  %v12302_v15 = vld [vmem:[%s13924_s4 + $0x1c8] sm:$0xff] }
 0xc72   :  { %5032 = vmatpush1.msra.mxu0 %v14594_v59  ;;  %5103 = vmatpush1.msra.mxu1 %v14595_v58  ;;  %v12308_v59 = vld [vmem:[%s13924_s4 + $0x1d8] sm:$0xff]  ;;  %v12314_v58 = vld [vmem:[%s13924_s4 + $0x1c0] sm:$0xff] }
 0xc73   :  { %5033 = vmatprep.subr.mxu0 %v14596_v44  ;;  %5104 = vmatprep.subr.mxu1 %v14597_v1  ;;  %v12320_v44 = vld [vmem:[%s13924_s4 + $0x1d0] sm:$0xff]  ;;  %v12326_v1 = vld [vmem:[%s13924_s4 + $0x1a8] sm:$0xff] }
 0xc74   :  { %5034 = vmatpush1.msra.mxu0 %v14598_v26  ;;  %5105 = vmatpush1.msra.mxu1 %v14599_v4  ;;  %v12332_v26 = vld [vmem:[%s13924_s4 + $0x1b8] sm:$0xff]  ;;  %v12338_v4 = vld [vmem:[%s13924_s4 + $0x1a0] sm:$0xff] }
 0xc75   :  { %5035 = vmatprep.subr.mxu0 %v14600_v19  ;;  %5106 = vmatprep.subr.mxu1 %v14601_v24  ;;  %v12344_v19 = vld [vmem:[%s13924_s4 + $0x1b0] sm:$0xff]  ;;  %v12350_v24 = vld [vmem:[%s13924_s4 + $0x188] sm:$0xff] }
 0xc76   :  { %5036 = vmatpush1.msra.mxu0 %v14602_v25  ;;  %5069 = vmatprep.mubr.f32.mxu0 %v14603_v0  ;;  %v12356_v25 = vld [vmem:[%s13924_s4 + $0x198] sm:$0xff] }
 0xc77   :  { %5107 = vmatpush1.msra.mxu1 %v14604_v32  ;;  %5140 = vmatprep.mubr.f32.mxu1 %v14603_v0  ;;  %v12362_v32 = vld [vmem:[%s13924_s4 + $0x180] sm:$0xff] }
 0xc78   :  { %5219 = vmatprep.subr.mxu0 %v12258_v8  ;;  %5290 = vmatprep.subr.mxu1 %v12264_v34 }
 0xd17   :  { %v4857_v61 = vpop.f32.mrf.mxu0  ;;  %v4928_v28 = vpop.f32.mrf.mxu1 }
 0xd18   :  { %v4933_v12 = vadd.f32 %v4857_v61, %v4787_v6  ;;  %v4935_v18 = vadd.f32 %v4928_v28, %v4789_v14  ;;  %v12398_v6 = vld [vmem:[%s13924_s4 + $0x148] sm:$0xff]  ;;  %v12404_v61 = vld [vmem:[%s13924_s4 + $0x158] sm:$0xff]  ;;  %v12458_v28 = vld [vmem:[%s13924_s4 + $0x100] sm:$0xff] }
 0xd19   :  { %v4859_v42 = vpop.f32.mrf.mxu0  ;;  %v4930_v45 = vpop.f32.mrf.mxu1  ;;  %v12470_v14 = vld [vmem:[%s13924_s4 + $0xe8] sm:$0xff] }
 0xd1a   :  { %v4937_v40 = vmul.f32 0.5, %v4933_v12  ;;  %v4934_v41 = vadd.f32 %v4859_v42, %v4788_v36  ;;  %v4936_v30 = vadd.f32 %v4930_v45, %v4790_v39  ;;  %v12416_v12 = vld [vmem:[%s13924_s4 + $0x150] sm:$0xff]  ;;  %v12428_v36 = vld [vmem:[%s13924_s4 + $0x138] sm:$0xff]  ;;  %v12434_v42 = vld [vmem:[%s13924_s4 + $0x120] sm:$0xff] }
 0xd1b   :  { %v12494_v45 = vld [vmem:[%s13924_s4 + $0xc8] sm:$0xff]  ;;  %v12500_v39 = vld [vmem:[%s13924_s4 + $0xd8] sm:$0xff] }
 0xd1c   :  { %8809 = vtanh.f32 %v4937_v40  ;;  %v4941_v46 = vmul.f32 0.5, %v4934_v41  ;;  %v4946_v38 = vmul.f32 0.5, %v4936_v30  ;;  %v12440_v40 = vld [vmem:[%s13924_s4 + $0x130] sm:$0xff]  ;;  %v12446_v41 = vld [vmem:[%s13924_s4 + $0x108] sm:$0xff]  ;;  %v12506_v30 = vld [vmem:[%s13924_s4 + $0xc0] sm:$0xff] }
 0xd1e   :  { %8811 = vtanh.f32 %v4941_v46  ;;  %v12464_v46 = vld [vmem:[%s13924_s4 + $0x110] sm:$0xff] }
 0xd1f   :  { %8813 = vtanh.f32 %v4935_v18  ;;  %v12476_v18 = vld [vmem:[%s13924_s4 + $0xf8] sm:$0xff] }
 0xd20   :  { %8815 = vtanh.f32 %v4946_v38  ;;  %v12512_v38 = vld [vmem:[%s13924_s4 + $0xd0] sm:$0xff] }
 0xd29   :  { %v8810_v51 = vpop.eup %8809 }
 0xd2a   :  { %v4939_v29 = vmul.f32 0.5, %v8810_v51  ;;  %v12518_v51 = vld [vmem:[%s13924_s4 + $0xa8] sm:$0xff] }
 0xd2b   :  { %v8812_v35 = vpop.eup %8811 }
 0xd2c   :  { %v4940_v2 = vadd.f32 0.5, %v4939_v29  ;;  %v4943_v47 = vmul.f32 0.5, %v8812_v35  ;;  %v8814_v49 = vpop.eup %8813  ;;  %v12524_v29 = vld [vmem:[%s13924_s4 + $0xb8] sm:$0xff]  ;;  %v12530_v35 = vld [vmem:[%s13924_s4 + $0xa0] sm:$0xff] }
 0xd2d   :  { %v8816_v23 = vpop.eup %8815  ;;  %14608 = vst [vmem:[#allocation35_spill] sm:$0xff] %v12524_v29  ;;  %14609 = vst [vmem:[#allocation36_spill] sm:$0xff] %v12530_v35 }
 0xd2e   :  { %v4944_v55 = vadd.f32 0.5, %v4943_v47  ;;  %v4951_v60 = vmul.f32 %v8814_v49, %v4940_v2  ;;  %v4948_v63 = vmul.f32 0.5, %v8816_v23  ;;  %v12536_v2 = vld [vmem:[%s13924_s4 + $0xb0] sm:$0xff]  ;;  %v12542_v47 = vld [vmem:[%s13924_s4 + $0x88] sm:$0xff]  ;;  %v12554_v49 = vld [vmem:[%s13924_s4 + $0x80] sm:$0xff] }
 0xd2f   :  { %14610 = vst [vmem:[#allocation37_spill] sm:$0xff] %v12536_v2  ;;  %14611 = vst [vmem:[#allocation38_spill] sm:$0xff] %v12542_v47  ;;  %v12572_v23 = vld [vmem:[%s13924_s4 + $0x78] sm:$0xff] }
 0xd30   :  { %v4950_v54 = vmul.f32 %v4944_v55, %v12188_v43  ;;  %v4949_v10 = vadd.f32 0.5, %v4948_v63  ;;  %v12296_v43 = vld [vmem:[%s13924_s4 + $0x1f0] sm:$0xff]  ;;  %v12548_v55 = vld [vmem:[%s13924_s4 + $0x98] sm:$0xff]  ;;  %14613 = vst [vmem:[#allocation40_spill] sm:$0xff] %v12554_v49  ;;  %14616 = vst [vmem:[#allocation43_spill] sm:$0xff] %v12572_v23 }
 0xd31   :  { %14612 = vst [vmem:[#allocation39_spill] sm:$0xff] %v12548_v55  ;;  %v12578_v63 = vld [vmem:[%s13924_s4 + $0x60] sm:$0xff] }
 0xd32   :  { %v12284_v62 = vadd.f32 %v4951_v60, %v4950_v54  ;;  %v12560_v54 = vld [vmem:[%s13924_s4 + $0x90] sm:$0xff]  ;;  %v12566_v60 = vld [vmem:[%s13924_s4 + $0x68] sm:$0xff]  ;;  %14617 = vst [vmem:[#allocation44_spill] sm:$0xff] %v12578_v63 }
 0xd33   :  { %14614 = vst [vmem:[#allocation41_spill] sm:$0xff] %v12560_v54  ;;  %14615 = vst [vmem:[#allocation42_spill] sm:$0xff] %v12566_v60 }
 0xd34   :  { %8817 = vtanh.f32 %v12284_v62 }
 0xd41   :  { %v8818_v17 = vpop.eup %8817 }
 0xd42   :  { %v4954_v57 = vmul.f32 %v8818_v17, %v4949_v10  ;;  %v12584_v10 = vld [vmem:[%s13924_s4 + $0x70] sm:$0xff]  ;;  %v12590_v17 = vld [vmem:[%s13924_s4 + $0x48] sm:$0xff] }
 0xd43   :  { %14618 = vst [vmem:[#allocation45_spill] sm:$0xff] %v12584_v10  ;;  %14619 = vst [vmem:[#allocation46_spill] sm:$0xff] %v12590_v17 }
 0xd44   :  { %4955 = vst [vmem:[#allocation3 + $0xc] sm:$0x1] %v4954_v57  ;;  %4956 = vst [vmem:[#allocation4 + $0x3] sm:$0x1] %v4954_v57  ;;  %5070 = vmatmul.mubr.f32.vlgmr.msra.gmra.mxu0 %v4954_v57  ;;  %5141 = vmatmul.mubr.f32.vlgmr.msra.gmra.mxu1 %v4954_v57  ;;  %v12596_v57 = vld [vmem:[%s13924_s4 + $0x58] sm:$0xff] }
 0xd45   :  { %5220 = vmatpush1.msra.mxu0 %v12290_v27  ;;  %5291 = vmatpush1.msra.mxu1 %v12296_v43  ;;  %14620 = vst [vmem:[#allocation47_spill] sm:$0xff] %v12596_v57 }
 0xd46   :  { %5221 = vmatprep.subr.mxu0 %v12302_v15  ;;  %5292 = vmatprep.subr.mxu1 %v12308_v59 }
 0xd47   :  { %5222 = vmatpush1.msra.mxu0 %v12314_v58  ;;  %5293 = vmatpush1.msra.mxu1 %v12320_v44 }
 0xd48   :  { %5223 = vmatprep.subr.mxu0 %v12326_v1  ;;  %5294 = vmatprep.subr.mxu1 %v12332_v26 }
 0xd49   :  { %5224 = vmatpush1.msra.mxu0 %v12338_v4  ;;  %5295 = vmatpush1.msra.mxu1 %v12344_v19 }
 0xd4a   :  { %5225 = vmatprep.subr.mxu0 %v12350_v24  ;;  %5296 = vmatprep.subr.mxu1 %v12356_v25 }
 0xd4b   :  { %5226 = vmatpush1.msra.mxu0 %v12362_v32  ;;  %5297 = vmatpush1.msra.mxu1 %v12368_v53 }
 0xd4c   :  { %5227 = vmatprep.subr.mxu0 %v12374_v50  ;;  %5298 = vmatprep.subr.mxu1 %v12380_v9 }
 0xd4d   :  { %5228 = vmatpush1.msra.mxu0 %v12386_v31  ;;  %5299 = vmatpush1.msra.mxu1 %v12392_v5 }
 0xd4e   :  { %5229 = vmatprep.subr.mxu0 %v12398_v6  ;;  %5300 = vmatprep.subr.mxu1 %v12404_v61 }
 0xd4f   :  { %5230 = vmatpush1.msra.mxu0 %v12410_v21  ;;  %5301 = vmatpush1.msra.mxu1 %v12416_v12 }
 0xd50   :  { %5231 = vmatprep.subr.mxu0 %v12422_v20  ;;  %5302 = vmatprep.subr.mxu1 %v12428_v36 }
 0xd51   :  { %5232 = vmatpush1.msra.mxu0 %v12434_v42  ;;  %5303 = vmatpush1.msra.mxu1 %v12440_v40 }
 0xd52   :  { %5233 = vmatprep.subr.mxu0 %v12446_v41  ;;  %5304 = vmatprep.subr.mxu1 %v12452_v22 }
 0xd53   :  { %5234 = vmatpush1.msra.mxu0 %v12458_v28  ;;  %5305 = vmatpush1.msra.mxu1 %v12464_v46 }
 0xd54   :  { %5235 = vmatprep.subr.mxu0 %v12470_v14  ;;  %5306 = vmatprep.subr.mxu1 %v12476_v18 }
 0xd55   :  { %5236 = vmatpush1.msra.mxu0 %v12482_v37  ;;  %5307 = vmatpush1.msra.mxu1 %v12488_v3 }
 0xd56   :  { %5237 = vmatprep.subr.mxu0 %v12494_v45  ;;  %5308 = vmatprep.subr.mxu1 %v12500_v39 }
 0xd57   :  { %5238 = vmatpush1.msra.mxu0 %v12506_v30  ;;  %5309 = vmatpush1.msra.mxu1 %v12512_v38 }
 0xd58   :  { %5239 = vmatprep.subr.mxu0 %v12518_v51  ;;  %5310 = vmatprep.subr.mxu1 %v12524_v29 }
 0xd59   :  { %5240 = vmatpush1.msra.mxu0 %v12530_v35  ;;  %5311 = vmatpush1.msra.mxu1 %v12536_v2 }
 0xd5a   :  { %5241 = vmatprep.subr.mxu0 %v12542_v47  ;;  %5312 = vmatprep.subr.mxu1 %v12548_v55 }
 0xd5b   :  { %5242 = vmatpush1.msra.mxu0 %v12554_v49  ;;  %5313 = vmatpush1.msra.mxu1 %v12560_v54 }
 0xd5c   :  { %5243 = vmatprep.subr.mxu0 %v12566_v60  ;;  %5314 = vmatprep.subr.mxu1 %v12572_v23 }
 0xd5d   :  { %5244 = vmatpush1.msra.mxu0 %v12578_v63  ;;  %5315 = vmatpush1.msra.mxu1 %v12584_v10  ;;  %v12602_v63 = vld [vmem:[%s13924_s4 + $0x40] sm:$0xff]  ;;  %v12608_v10 = vld [vmem:[%s13924_s4 + $0x50] sm:$0xff] }
 0xd5e   :  { %5245 = vmatprep.subr.mxu0 %v12590_v17  ;;  %5316 = vmatprep.subr.mxu1 %v12596_v57  ;;  %14621 = vst [vmem:[#allocation48_spill] sm:$0xff] %v12602_v63  ;;  %14622 = vst [vmem:[#allocation49_spill] sm:$0xff] %v12608_v10  ;;  %v12614_v17 = vld [vmem:[%s13924_s4 + $0x28] sm:$0xff]  ;;  %v12620_v57 = vld [vmem:[%s13924_s4 + $0x38] sm:$0xff] }
 0xd5f   :  { %5246 = vmatpush1.msra.mxu0 %v12602_v63  ;;  %5317 = vmatpush1.msra.mxu1 %v12608_v10  ;;  %14623 = vst [vmem:[#allocation50_spill] sm:$0xff] %v12614_v17  ;;  %14624 = vst [vmem:[#allocation51_spill] sm:$0xff] %v12620_v57  ;;  %v12626_v63 = vld [vmem:[%s13924_s4 + $0x20] sm:$0xff]  ;;  %v12632_v10 = vld [vmem:[%s13924_s4 + $0x30] sm:$0xff] }
 0xd60   :  { %5247 = vmatprep.subr.mxu0 %v12614_v17  ;;  %5318 = vmatprep.subr.mxu1 %v12620_v57  ;;  %14625 = vst [vmem:[#allocation52_spill] sm:$0xff] %v12626_v63  ;;  %14626 = vst [vmem:[#allocation21_spill] sm:$0xff] %v12632_v10  ;;  %v12638_v17 = vld [vmem:[%s13924_s4 + $0x8] sm:$0xff]  ;;  %v12644_v57 = vld [vmem:[%s13924_s4 + $0x18] sm:$0xff] }
 0xd61   :  { %5248 = vmatpush1.msra.mxu0 %v12626_v63  ;;  %5319 = vmatpush1.msra.mxu1 %v12632_v10  ;;  %14627 = vst [vmem:[#allocation22_spill] sm:$0xff] %v12638_v17  ;;  %14628 = vst [vmem:[#allocation23_spill] sm:$0xff] %v12644_v57  ;;  %v12650_v63 = vld [vmem:[%s13924_s4] sm:$0xff] }
 0xd62   :  { %5249 = vmatprep.subr.mxu0 %v12638_v17  ;;  %5320 = vmatprep.subr.mxu1 %v12644_v57  ;;  %14629 = vst [vmem:[#allocation24_spill] sm:$0xff] %v12650_v63  ;;  %v12657_v17 = vld [vmem:[%s13924_s4 + $0x10] sm:$0xff] }
 0xd63   :  { %5250 = vmatpush1.msra.mxu0 %v12650_v63  ;;  %5283 = vmatprep.mubr.f32.mxu0 %v14603_v0  ;;  %14630 = vst [vmem:[#allocation25_spill] sm:$0xff] %v12657_v17  ;;  %v4957_v57 = vld [vmem:[#allocation2 + $0x25] ss:$8 sm:$0xf] }
 0xd64   :  { %5321 = vmatpush1.msra.mxu1 %v12657_v17  ;;  %5354 = vmatprep.mubr.f32.mxu1 %v14603_v0  ;;  %v4958_v10 = vld [vmem:[#allocation2 + $0x2] ss:$8 sm:$0xf]  ;;  %v4984_v23 = vrot.slane %v4957_v57, %v14605_v48  ;;  %v4988_v60 = vrot.slane %v4957_v57, %v10513_v56  ;;  %v4992_v0 = vrot.slane %v4957_v57, %v10550_v11 }
 0xd65   :  { %5433 = vmatprep.subr.mxu0 %v12258_v8  ;;  %5504 = vmatprep.subr.mxu1 %v12264_v34  ;;  %v4963_v63 = vrot.slane %v4958_v10, %v14605_v48  ;;  %v4967_v17 = vrot.slane %v4958_v10, %v10513_v56  ;;  %v4971_v35 = vrot.slane %v4958_v10, %v10550_v11 }
 0xd67   :  { %v5001_v54 = vsel %vm10567_vm4, %v4963_v63, %v4984_v23  ;;  %v5002_v8 = vsel %vm10573_vm5, %v4967_v17, %v4988_v60  ;;  %v5003_v23 = vsel %vm10584_vm8, %v4971_v35, %v4992_v0 }
 0xe04   :  { %v5071_v49 = vpop.f32.mrf.mxu0  ;;  %v5142_v48 = vpop.f32.mrf.mxu1 }
 0xe05   :  { %v5147_v55 = vadd.f32 %v5071_v49, %v5001_v54  ;;  %v5149_v63 = vadd.f32 %v5142_v48, %v5003_v23  ;;  %v4996_v49 = vrot.slane %v4957_v57, %v10553_v13  ;;  %v4975_v54 = vrot.slane %v4958_v10, %v10553_v13 }
 0xe06   :  { %v5073_v34 = vpop.f32.mrf.mxu0  ;;  %v5144_v33 = vpop.f32.mrf.mxu1 }
 0xe07   :  { %v5151_v47 = vmul.f32 0.5, %v5147_v55  ;;  %v5148_v2 = vadd.f32 %v5073_v34, %v5002_v8  ;;  %v5004_v55 = vsel %vm10592_vm11, %v4975_v54, %v4996_v49 }
 0xe08   :  { %v5150_v60 = vadd.f32 %v5144_v33, %v5004_v55 }
 0xe09   :  { %8819 = vtanh.f32 %v5151_v47  ;;  %v5155_v29 = vmul.f32 0.5, %v5148_v2 }
 0xe0a   :  { %v5160_v17 = vmul.f32 0.5, %v5150_v60 }
 0xe0b   :  { %8821 = vtanh.f32 %v5155_v29 }
 0xe0c   :  { %8823 = vtanh.f32 %v5149_v63 }
 0xe0d   :  { %8825 = vtanh.f32 %v5160_v17 }
 0xe16   :  { %v8820_v8 = vpop.eup %8819 }
 0xe17   :  { %v5153_v34 = vmul.f32 0.5, %v8820_v8 }
 0xe18   :  { %v8822_v47 = vpop.eup %8821 }
 0xe19   :  { %v5154_v2 = vadd.f32 0.5, %v5153_v34  ;;  %v5157_v52 = vmul.f32 0.5, %v8822_v47  ;;  %v8824_v48 = vpop.eup %8823 }
 0xe1a   :  { %v8826_v10 = vpop.eup %8825 }
 0xe1b   :  { %v5158_v0 = vadd.f32 0.5, %v5157_v52  ;;  %v5165_v35 = vmul.f32 %v8824_v48, %v5154_v2  ;;  %v5162_v23 = vmul.f32 0.5, %v8826_v10  ;;  %v14631_v52 = vld [vmem:[#allocation35_spill] sm:$0xff] }
 0xe1d   :  { %v5164_v29 = vmul.f32 %v5158_v0, %v12284_v62  ;;  %v5163_v63 = vadd.f32 0.5, %v5162_v23  ;;  %v14632_v62 = vld [vmem:[#allocation36_spill] sm:$0xff] }
 0xe1f   :  { %v12680_v57 = vadd.f32 %v5165_v35, %v5164_v29 }
 0xe21   :  { %8827 = vtanh.f32 %v12680_v57 }
 0xe2e   :  { %v8828_v33 = vpop.eup %8827 }
 0xe2f   :  { %v5168_v49 = vmul.f32 %v8828_v33, %v5163_v63 }
 0xe31   :  { %5169 = vst [vmem:[#allocation3 + $0xd] sm:$0x1] %v5168_v49  ;;  %5170 = vst [vmem:[#allocation4 + $0x2] sm:$0x1] %v5168_v49  ;;  %5284 = vmatmul.mubr.f32.vlgmr.msra.gmra.mxu0 %v5168_v49  ;;  %5355 = vmatmul.mubr.f32.vlgmr.msra.gmra.mxu1 %v5168_v49  ;;  %v9135_v49 = vmov 1966171168  }
 0xe32   :  { %5434 = vmatpush1.msra.mxu0 %v12290_v27  ;;  %5505 = vmatpush1.msra.mxu1 %v12296_v43  ;;  %v14633_v27 = vld [vmem:[#allocation37_spill] sm:$0xff]  ;;  %v14634_v43 = vld [vmem:[#allocation38_spill] sm:$0xff] }
 0xe33   :  { %5435 = vmatprep.subr.mxu0 %v12302_v15  ;;  %5506 = vmatprep.subr.mxu1 %v12308_v59  ;;  %v14635_v15 = vld [vmem:[#allocation39_spill] sm:$0xff]  ;;  %v14636_v59 = vld [vmem:[#allocation40_spill] sm:$0xff] }
 0xe34   :  { %5436 = vmatpush1.msra.mxu0 %v12314_v58  ;;  %5507 = vmatpush1.msra.mxu1 %v12320_v44  ;;  %v14637_v58 = vld [vmem:[#allocation41_spill] sm:$0xff]  ;;  %v14638_v44 = vld [vmem:[#allocation42_spill] sm:$0xff]  ;;  %14675 = vst [vmem:[#allocation39_spill] sm:$0xff] %v13546_v16  ;;  %14676 = vst [vmem:[#allocation40_spill] sm:$0xff] %v13553_v7 }
 0xe35   :  { %5437 = vmatprep.subr.mxu0 %v12326_v1  ;;  %5508 = vmatprep.subr.mxu1 %v12332_v26  ;;  %v14639_v1 = vld [vmem:[#allocation43_spill] sm:$0xff]  ;;  %v14640_v26 = vld [vmem:[#allocation44_spill] sm:$0xff] }
 0xe36   :  { %5438 = vmatpush1.msra.mxu0 %v12338_v4  ;;  %5509 = vmatpush1.msra.mxu1 %v12344_v19  ;;  %v14641_v4 = vld [vmem:[#allocation45_spill] sm:$0xff]  ;;  %v14642_v19 = vld [vmem:[#allocation46_spill] sm:$0xff] }
 0xe37   :  { %5439 = vmatprep.subr.mxu0 %v12350_v24  ;;  %5510 = vmatprep.subr.mxu1 %v12356_v25  ;;  %v14643_v24 = vld [vmem:[#allocation47_spill] sm:$0xff]  ;;  %v14644_v25 = vld [vmem:[#allocation48_spill] sm:$0xff] }
 0xe38   :  { %5440 = vmatpush1.msra.mxu0 %v12362_v32  ;;  %5511 = vmatpush1.msra.mxu1 %v12368_v53  ;;  %v14645_v32 = vld [vmem:[#allocation49_spill] sm:$0xff]  ;;  %v14646_v53 = vld [vmem:[#allocation50_spill] sm:$0xff] }
 0xe39   :  { %5441 = vmatprep.subr.mxu0 %v12374_v50  ;;  %5512 = vmatprep.subr.mxu1 %v12380_v9  ;;  %v14647_v50 = vld [vmem:[#allocation51_spill] sm:$0xff]  ;;  %v14648_v9 = vld [vmem:[#allocation52_spill] sm:$0xff] }
 0xe3a   :  { %5442 = vmatpush1.msra.mxu0 %v12386_v31  ;;  %5513 = vmatpush1.msra.mxu1 %v12392_v5  ;;  %v14649_v31 = vld [vmem:[#allocation21_spill] sm:$0xff]  ;;  %v14650_v5 = vld [vmem:[#allocation22_spill] sm:$0xff] }
 0xe3b   :  { %5443 = vmatprep.subr.mxu0 %v12398_v6  ;;  %5514 = vmatprep.subr.mxu1 %v12404_v61  ;;  %v14651_v6 = vld [vmem:[#allocation23_spill] sm:$0xff]  ;;  %v14652_v61 = vld [vmem:[#allocation24_spill] sm:$0xff] }
 0xe3c   :  { %5444 = vmatpush1.msra.mxu0 %v12410_v21  ;;  %5515 = vmatpush1.msra.mxu1 %v12416_v12  ;;  %v14653_v21 = vld [vmem:[#allocation25_spill] sm:$0xff]  ;;  %v14654_v12 = vmov 0.0  }
 0xe3d   :  { %5445 = vmatprep.subr.mxu0 %v12422_v20  ;;  %5516 = vmatprep.subr.mxu1 %v12428_v36  ;;  %v8624_v20 = vld [vmem:[%s13927_s7 + $0x78] sm:$0xff]  }
 0xe3e   :  { %5446 = vmatpush1.msra.mxu0 %v12434_v42  ;;  %5517 = vmatpush1.msra.mxu1 %v12440_v40  ;;  %v8625_v36 = vld [vmem:[%s13927_s7 + $0xf8] sm:$0xff]  }
 0xe3f   :  { %5447 = vmatprep.subr.mxu0 %v12446_v41  ;;  %5518 = vmatprep.subr.mxu1 %v12452_v22  ;;  %v5171_v42 = vld [vmem:[#allocation2 + $0x26] ss:$8 sm:$0xf]  ;;  %v5172_v40 = vld [vmem:[#allocation2 + $0x1] ss:$8 sm:$0xf] }
 0xe40   :  { %5448 = vmatpush1.msra.mxu0 %v12458_v28  ;;  %5519 = vmatpush1.msra.mxu1 %v12464_v46  ;;  %v14655_v41 = vld [vmem:[#allocation54_spill] sm:$0xff]  ;;  %v5202_v46 = vrot.slane %v5171_v42, %v10513_v56  ;;  %v5185_v60 = vrot.slane %v5172_v40, %v10550_v11  ;;  %v5210_v2 = vrot.slane %v5171_v42, %v10553_v13 }
 0xe41   :  { %5449 = vmatprep.subr.mxu0 %v12470_v14  ;;  %5520 = vmatprep.subr.mxu1 %v12476_v18  ;;  %v5198_v22 = vrot.slane %v5171_v42, %v14655_v41  ;;  %v5177_v28 = vrot.slane %v5172_v40, %v14655_v41  ;;  %v5189_v0 = vrot.slane %v5172_v40, %v10553_v13  ;;  %v13565_v14 = vld [vmem:[%s13930_s10 + $0x20] sm:$0xff] }
 0xe42   :  { %5450 = vmatpush1.msra.mxu0 %v12482_v37  ;;  %5521 = vmatpush1.msra.mxu1 %v12488_v3  ;;  %v5181_v3 = vrot.slane %v5172_v40, %v10513_v56  ;;  %v8632_v40 = vld [vmem:[%s13927_s7 + $0x68] sm:$0xff]   ;;  %14678 = vst [vmem:[#allocation42_spill] sm:$0xff] %v13565_v14 }
 0xe43   :  { %5451 = vmatprep.subr.mxu0 %v12494_v45  ;;  %5522 = vmatprep.subr.mxu1 %v12500_v39  ;;  %v5215_v18 = vsel %vm10567_vm4, %v5177_v28, %v5198_v22  ;;  %v5206_v39 = vrot.slane %v5171_v42, %v10550_v11  ;;  %v5218_v29 = vsel %vm10592_vm11, %v5189_v0, %v5210_v2  ;;  %v8631_v42 = vld [vmem:[%s13927_s7 + $0xb0] sm:$0xff]   ;;  %v8633_v22 = vld [vmem:[%s13927_s7 + $0xe8] sm:$0xff]  }
 0xe44   :  { %5452 = vmatpush1.msra.mxu0 %v12506_v30  ;;  %5523 = vmatpush1.msra.mxu1 %v12512_v38  ;;  %v5216_v38 = vsel %vm10573_vm5, %v5181_v3, %v5202_v46  ;;  %v8634_v28 = vld [vmem:[%s13927_s7 + $0x28] sm:$0xff]   ;;  %v8638_v3 = vld [vmem:[%s13927_s7 + $0x20] sm:$0xff]   ;;  %v13558_v30 = vld [vmem:[%s13930_s10 + $0x38] sm:$0xff] }
 0xe45   :  { %5453 = vmatprep.subr.mxu0 %v12518_v51  ;;  %5524 = vmatprep.subr.mxu1 %v14631_v52  ;;  %v5217_v34 = vsel %vm10584_vm8, %v5185_v60, %v5206_v39  ;;  %v5739_v52 = vunpack.c.l.s4 %v9135_v49  ;;  %v8635_v46 = vld [vmem:[%s13927_s7 + $0xa8] sm:$0xff]   ;;  %v8640_v39 = vld [vmem:[%s13927_s7 + $0x58] sm:$0xff]   ;;  %v8645_v60 = vld [vmem:[%s13927_s7 + $0xd0] sm:$0xff]   ;;  %14677 = vst [vmem:[#allocation41_spill] sm:$0xff] %v13558_v30 }
 0xe46   :  { %5454 = vmatpush1.msra.mxu0 %v14632_v62  ;;  %5525 = vmatpush1.msra.mxu1 %v14633_v27  ;;  %v8649_v2 = vld [vmem:[%s13927_s7 + $0xc8] sm:$0xff]   ;;  %v8655_v49 = vld [vmem:[%s13927_s7 + $0x80] sm:$0xff]  }
 0xe47   :  { %5455 = vmatprep.subr.mxu0 %v14634_v43  ;;  %5526 = vmatprep.subr.mxu1 %v14635_v15 }
 0xe48   :  { %5456 = vmatpush1.msra.mxu0 %v14636_v59  ;;  %5527 = vmatpush1.msra.mxu1 %v14637_v58  ;;  %v5740_v59 = vunpack.c.0.s8 %v5739_v52  ;;  %v8656_v52 = vld [vmem:[%s13927_s7 + $0x178] sm:$0xff]  }
 0xe49   :  { %5457 = vmatprep.subr.mxu0 %v14638_v44  ;;  %5528 = vmatprep.subr.mxu1 %v14639_v1 }
 0xe4a   :  { %5458 = vmatpush1.msra.mxu0 %v14640_v26  ;;  %5529 = vmatpush1.msra.mxu1 %v14641_v4  ;;  %v14658_v26 = vld [vmem:[#allocation53_spill] sm:$0xff] }
 0xe4b   :  { %5459 = vmatprep.subr.mxu0 %v14642_v19  ;;  %5530 = vmatprep.subr.mxu1 %v14643_v24  ;;  %v12773_v4 = vsub.s32 %v5740_v59, %v14658_v26  ;;  %v5606_v19 = vld [vmem:[%s13922_s2] sm:$0xff]  ;;  %v8659_v59 = vld [vmem:[%s13927_s7 + $0x1b8] sm:$0xff]  }
 0xe4c   :  { %5460 = vmatpush1.msra.mxu0 %v14644_v25  ;;  %5531 = vmatpush1.msra.mxu1 %v14645_v32 }
 0xe4d   :  { %5461 = vmatprep.subr.mxu0 %v14646_v53  ;;  %5532 = vmatprep.subr.mxu1 %v14647_v50  ;;  %14659 = vst [vmem:[#allocation26_spill] sm:$0xff] %v12773_v4  ;;  %v12780_v24 = vrot.slane %v5606_v19, %v12773_v4 }
 0xe4e   :  { %5462 = vmatpush1.msra.mxu0 %v14648_v9  ;;  %5533 = vmatpush1.msra.mxu1 %v14649_v31  ;;  %v8626_v31 = vld [vmem:[%s13927_s7 + $0x38] sm:$0xff]  }
 0xe4f   :  { %5463 = vmatprep.subr.mxu0 %v14650_v5  ;;  %5534 = vmatprep.subr.mxu1 %v14651_v6  ;;  %v5752_v32 = vcombine.high %v12780_v24, %v12780_v24  ;;  %v8627_v5 = vld [vmem:[%s13927_s7 + $0xb8] sm:$0xff]  }
 0xe50   :  { %5464 = vmatpush1.msra.mxu0 %v14652_v61  ;;  %5535 = vmatpush1.msra.mxu1 %v14653_v21  ;;  %v8628_v61 = vld [vmem:[%s13927_s7 + $0x70] sm:$0xff]  }
 0xe51   :  { %5497 = vmatprep.mubr.f32.mxu0 %v14654_v12  ;;  %5568 = vmatprep.mubr.f32.mxu1 %v14654_v12  ;;  %v5774_v53 = vrot.slane %v5752_v32, %v12773_v4  ;;  %v8629_v21 = vld [vmem:[%s13927_s7 + $0xf0] sm:$0xff]   ;;  %v8664_v32 = vld [vmem:[%s13927_s7 + $0x168] sm:$0xff]  }
 0xe52   :  { %8060 = vmatprep.subr.bf16.mxu0 %v8624_v20  ;;  %8082 = vmatprep.subr.bf16.mxu1 %v8625_v36  ;;  %v8630_v36 = vld [vmem:[%s13927_s7 + $0x30] sm:$0xff]  }
 0xe53   :  { %v5784_v20 = vcombine.high %v5774_v53, %v5774_v53 }
 0xef1   :  { %v5285_v37 = vpop.f32.mrf.mxu0  ;;  %v5356_v17 = vpop.f32.mrf.mxu1 }
 0xef2   :  { %v5361_v45 = vadd.f32 %v5285_v37, %v5215_v18  ;;  %v5363_v47 = vadd.f32 %v5356_v17, %v5217_v34  ;;  %v8636_v18 = vld [vmem:[%s13927_s7 + $0x60] sm:$0xff]   ;;  %v5737_v17 = vcombine.high %v5606_v19, %v5606_v19  ;;  %v8647_v34 = vld [vmem:[%s13927_s7 + $0x90] sm:$0xff]  }
 0xef3   :  { %v5287_v51 = vpop.f32.mrf.mxu0  ;;  %v5358_v48 = vpop.f32.mrf.mxu1  ;;  %v8637_v37 = vld [vmem:[%s13927_s7 + $0xe0] sm:$0xff]  }
 0xef4   :  { %v5365_v54 = vmul.f32 0.5, %v5361_v45  ;;  %v5362_v55 = vadd.f32 %v5287_v51, %v5216_v38  ;;  %v5364_v35 = vadd.f32 %v5358_v48, %v5218_v29  ;;  %v8639_v45 = vld [vmem:[%s13927_s7 + $0xa0] sm:$0xff]   ;;  %v8641_v38 = vld [vmem:[%s13927_s7 + $0xd8] sm:$0xff]   ;;  %v12858_v0 = vrot.slane %v5737_v17, %v12773_v4  ;;  %v8650_v48 = vld [vmem:[%s13927_s7 + $0x8] sm:$0xff]  }
 0xef5   :  { %v8642_v51 = vld [vmem:[%s13927_s7 + $0x18] sm:$0xff]   ;;  %v8651_v29 = vld [vmem:[%s13927_s7 + $0x88] sm:$0xff]  }
 0xef6   :  { %8829 = vtanh.f32 %v5365_v54  ;;  %v5369_v8 = vmul.f32 0.5, %v5362_v55  ;;  %v5374_v10 = vmul.f32 0.5, %v5364_v35  ;;  %v8643_v54 = vld [vmem:[%s13927_s7 + $0x98] sm:$0xff]   ;;  %v8644_v55 = vld [vmem:[%s13927_s7 + $0x50] sm:$0xff]   ;;  %v8652_v35 = vld [vmem:[%s13927_s7 + $0x40] sm:$0xff]  }
 0xef7   :  { %v5386_v17 = vld [vmem:[#allocation2] ss:$8 sm:$0xf] }
 0xef8   :  { %8831 = vtanh.f32 %v5369_v8  ;;  %v8646_v8 = vld [vmem:[%s13927_s7 + $0x10] sm:$0xff]  }
 0xef9   :  { %8833 = vtanh.f32 %v5363_v47  ;;  %v8648_v47 = vld [vmem:[%s13927_s7 + $0x48] sm:$0xff]  }
 0xefa   :  { %8835 = vtanh.f32 %v5374_v10  ;;  %v8653_v10 = vld [vmem:[%s13927_s7 + $0xc0] sm:$0xff]  }
 0xf03   :  { %v8830_v23 = vpop.eup %8829 }
 0xf04   :  { %v5367_v63 = vmul.f32 0.5, %v8830_v23  ;;  %v5753_v23 = vcombine.high %v12858_v0, %v12858_v0 }
 0xf05   :  { %v8832_v33 = vpop.eup %8831 }
 0xf06   :  { %v5368_v62 = vadd.f32 0.5, %v5367_v63  ;;  %v5371_v27 = vmul.f32 0.5, %v8832_v33  ;;  %v8834_v15 = vpop.eup %8833  ;;  %v5760_v63 = vrot.slane %v12780_v24, %v12773_v4  ;;  %v8654_v33 = vld [vmem:[%s13927_s7] sm:$0xff]   ;;  %v8662_v24 = vld [vmem:[%s13927_s7 + $0x130] sm:$0xff]  }
 0xf07   :  { %v8836_v25 = vpop.eup %8835 }
 0xf08   :  { %v5372_v43 = vadd.f32 0.5, %v5371_v27  ;;  %v5379_v44 = vmul.f32 %v8834_v15, %v5368_v62  ;;  %v8657_v62 = vld [vmem:[%s13927_s7 + $0x1f8] sm:$0xff]   ;;  %v5781_v27 = vrot.slane %v5753_v23, %v12773_v4 }
 0xf09   :  { %v8658_v15 = vld [vmem:[%s13927_s7 + $0x138] sm:$0xff]  }
 0xf0a   :  { %v5378_v58 = vmul.f32 %v5372_v43, %v12680_v57  ;;  %v5376_v57 = vmul.f32 0.5, %v8836_v25  ;;  %v5782_v43 = vcombine.high %v5760_v63, %v5760_v63  ;;  %v5785_v19 = vcombine.high %v5781_v27, %v5781_v27  ;;  %v8663_v25 = vld [vmem:[%s13927_s7 + $0x1b0] sm:$0xff]  }
 0xf0c   :  { %v12770_v1 = vadd.f32 %v5379_v44, %v5378_v58  ;;  %v5377_v50 = vadd.f32 0.5, %v5376_v57  ;;  %v8660_v58 = vld [vmem:[%s13927_s7 + $0x170] sm:$0xff]   ;;  %v8665_v57 = vld [vmem:[%s13927_s7 + $0x1e8] sm:$0xff]  }
 0xf0d   :  { %v8661_v44 = vld [vmem:[%s13927_s7 + $0x1f0] sm:$0xff]  }
 0xf0e   :  { %8837 = vtanh.f32 %v12770_v1 }
 0xf1b   :  { %v8838_v9 = vpop.eup %8837 }
 0xf1c   :  { %v5382_v6 = vmul.f32 %v8838_v9, %v5377_v50  ;;  %v8667_v50 = vld [vmem:[%s13927_s7 + $0x1a8] sm:$0xff]   ;;  %v8668_v9 = vld [vmem:[%s13927_s7 + $0x160] sm:$0xff]  }
 0xf1e   :  { %5383 = vst [vmem:[#allocation3 + $0xe] sm:$0x1] %v5382_v6  ;;  %5384 = vst [vmem:[#allocation4 + $0x1] sm:$0x1] %v5382_v6  ;;  %5498 = vmatmul.mubr.f32.vlgmr.msra.gmra.mxu0 %v5382_v6  ;;  %5569 = vmatmul.mubr.f32.vlgmr.msra.gmra.mxu1 %v5382_v6  ;;  %v8671_v6 = vld [vmem:[%s13927_s7 + $0x1a0] sm:$0xff]  }
 0xf1f   :  { %8061 = vmatpush3.bf16.msra.mxu0 %v8626_v31  ;;  %8083 = vmatpush3.bf16.msra.mxu1 %v8627_v5  ;;  %v8669_v31 = vld [vmem:[%s13927_s7 + $0x1e0] sm:$0xff]  }
 0xf20   :  { %8062 = vmatprep.subr.bf16.mxu0 %v8628_v61  ;;  %8084 = vmatprep.subr.bf16.mxu1 %v8629_v21  ;;  %v8670_v5 = vld [vmem:[%s13927_s7 + $0x120] sm:$0xff]   ;;  %v8672_v61 = vld [vmem:[%s13927_s7 + $0x158] sm:$0xff]  }
 0xf21   :  { %6210 = vmatprep.mubr.bf16.mxu0 %v5774_v53  ;;  %6250 = vmatprep.mubr.bf16.mxu1 %v5784_v20  ;;  %v8666_v53 = vld [vmem:[%s13927_s7 + $0x128] sm:$0xff]   ;;  %v8673_v21 = vld [vmem:[%s13927_s7 + $0x1d8] sm:$0xff]  }
 0xf22   :  { %v8674_v20 = vld [vmem:[%s13927_s7 + $0x118] sm:$0xff]  }
 0xf23   :  { %8063 = vmatpush3.bf16.msra.mxu0 %v8630_v36  ;;  %8085 = vmatpush3.bf16.msra.mxu1 %v8631_v42  ;;  %v8675_v36 = vld [vmem:[%s13927_s7 + $0x198] sm:$0xff]   ;;  %v8676_v42 = vld [vmem:[%s13927_s7 + $0x150] sm:$0xff]  }
 0xf24   :  { %8064 = vmatprep.subr.bf16.mxu0 %v8632_v40  ;;  %8086 = vmatprep.subr.bf16.mxu1 %v8633_v22  ;;  %v8677_v40 = vld [vmem:[%s13927_s7 + $0x1d0] sm:$0xff]  }
 0xf25   :  { %v8678_v22 = vld [vmem:[%s13927_s7 + $0x110] sm:$0xff]  }
 0xf27   :  { %8065 = vmatpush3.bf16.msra.mxu0 %v8634_v28  ;;  %8087 = vmatpush3.bf16.msra.mxu1 %v8635_v46  ;;  %v8679_v28 = vld [vmem:[%s13927_s7 + $0x190] sm:$0xff]   ;;  %v8680_v46 = vld [vmem:[%s13927_s7 + $0x148] sm:$0xff]  }
 0xf28   :  { %8066 = vmatprep.subr.bf16.mxu0 %v8636_v18  ;;  %8088 = vmatprep.subr.bf16.mxu1 %v8637_v37  ;;  %v8681_v18 = vld [vmem:[%s13927_s7 + $0x1c8] sm:$0xff]  }
 0xf29   :  { %v8682_v37 = vld [vmem:[%s13927_s7 + $0x108] sm:$0xff]  }
 0xf2b   :  { %8067 = vmatpush3.bf16.msra.mxu0 %v8638_v3  ;;  %8089 = vmatpush3.bf16.msra.mxu1 %v8639_v45  ;;  %v8683_v3 = vld [vmem:[%s13927_s7 + $0x188] sm:$0xff]   ;;  %v8684_v45 = vld [vmem:[%s13927_s7 + $0x140] sm:$0xff]  }
 0xf2c   :  { %8068 = vmatprep.subr.bf16.mxu0 %v8640_v39  ;;  %8090 = vmatprep.subr.bf16.mxu1 %v8641_v38  ;;  %v8685_v39 = vld [vmem:[%s13927_s7 + $0x1c0] sm:$0xff]   ;;  %v5767_v38 = vrot.slane %v12858_v0, %v12773_v4 }
 0xf2d   :  { %v13541_v4 = vld [vmem:[%s13930_s10 + $0x40] sm:$0xff] }
 0xf2e   :  { %14674 = vst [vmem:[#allocation38_spill] sm:$0xff] %v13541_v4 }
 0xf2f   :  { %8069 = vmatpush3.bf16.msra.mxu0 %v8642_v51  ;;  %8091 = vmatpush3.bf16.msra.mxu1 %v8643_v54  ;;  %v8686_v51 = vld [vmem:[%s13927_s7 + $0x100] sm:$0xff]  }
 0xf30   :  { %8070 = vmatprep.subr.bf16.mxu0 %v8644_v55  ;;  %8092 = vmatprep.subr.bf16.mxu1 %v8645_v60  ;;  %v8687_v54 = vld [vmem:[%s13927_s7 + $0x180] sm:$0xff]   ;;  %v5783_v55 = vcombine.high %v5767_v38, %v5767_v38 }
 0xf31   :  { %v5385_v60 = vld [vmem:[#allocation2 + $0x27] ss:$8 sm:$0xf] }
 0xf33   :  { %8071 = vmatpush3.bf16.msra.mxu0 %v8646_v8  ;;  %8093 = vmatpush3.bf16.msra.mxu1 %v8647_v34  ;;  %v5412_v8 = vrot.slane %v5385_v60, %v14655_v41  ;;  %v5391_v34 = vrot.slane %v5386_v17, %v14655_v41 }
 0xf34   :  { %8072 = vmatprep.subr.bf16.mxu0 %v8648_v47  ;;  %8094 = vmatprep.subr.bf16.mxu1 %v8649_v2  ;;  %v5416_v47 = vrot.slane %v5385_v60, %v10513_v56 }
 0xf35   :  { %v5429_v2 = vsel %vm10567_vm4, %v5391_v34, %v5412_v8  ;;  %v5735_v34 = vld [vmem:[%s13928_s8] sm:$0x1]  ;;  %s6408_s8 = sld [smem:[#allocation10]] }
 0xf37   :  { %8073 = vmatpush3.bf16.msra.mxu0 %v8650_v48  ;;  %8095 = vmatpush3.bf16.msra.mxu1 %v8651_v29  ;;  %v5395_v48 = vrot.slane %v5386_v17, %v10513_v56  ;;  %v13577_v56 = vld [vmem:[%s13930_s10 + $0x8] sm:$0xff] }
 0xf38   :  { %8074 = vmatprep.subr.bf16.mxu0 %v8652_v35  ;;  %8096 = vmatprep.subr.bf16.mxu1 %v8653_v10  ;;  %v5420_v35 = vrot.slane %v5385_v60, %v10550_v11  ;;  %14680 = vst [vmem:[#allocation44_spill] sm:$0xff] %v13577_v56 }
 0xf39   :  { %v5430_v10 = vsel %vm10573_vm5, %v5395_v48, %v5416_v47 }
 0xf3b   :  { %8075 = vmatpush3.bf16.msra.mxu0 %v8654_v33  ;;  %8097 = vmatpush3.bf16.msra.mxu1 %v8655_v49  ;;  %v5399_v49 = vrot.slane %v5386_v17, %v10550_v11  ;;  %v13582_v11 = vld [vmem:[%s13930_s10 + $0x18] sm:$0xff] }
 0xf3c   :  { %8104 = vmatprep.subr.bf16.mxu0 %v8656_v52  ;;  %8126 = vmatprep.subr.bf16.mxu1 %v8657_v62  ;;  %14681 = vst [vmem:[#allocation45_spill] sm:$0xff] %v13582_v11 }
 0xf3e   :  { %6211 = vmatmul.mubr.bf16.vlgmr.msra.gmra.mxu0 %v5760_v63  ;;  %6251 = vmatmul.mubr.bf16.vlgmr.msra.gmra.mxu1 %v5782_v43 }
 0xf3f   :  { %8105 = vmatpush3.bf16.msra.mxu0 %v8658_v15  ;;  %8127 = vmatpush3.bf16.msra.mxu1 %v8659_v59  ;;  %v5424_v15 = vrot.slane %v5385_v60, %v10553_v13  ;;  %v5403_v59 = vrot.slane %v5386_v17, %v10553_v13  ;;  %v5600_v60 = vld [vmem:[#allocation3] sm:$0xff]  ;;  %v13570_v13 = vld [vmem:[%s13930_s10 + $0x30] sm:$0xff] }
 0xf40   :  { %8106 = vmatprep.subr.bf16.mxu0 %v8660_v58  ;;  %8128 = vmatprep.subr.bf16.mxu1 %v8661_v44  ;;  %14679 = vst [vmem:[#allocation43_spill] sm:$0xff] %v13570_v13 }
 0xf41   :  { %6290 = vmatprep.mubr.bf16.mxu0 %v5781_v27  ;;  %6330 = vmatprep.mubr.bf16.mxu1 %v5785_v19  ;;  %v5431_v27 = vsel %vm10584_vm8, %v5399_v49, %v5420_v35  ;;  %v5432_v44 = vsel %vm10592_vm11, %v5403_v59, %v5424_v15  ;;  %v6409_v15 = vstv %s6408_s8  ;;  %v6414_v59 = vstv %s8054_s29 }
 0xf43   :  { %8107 = vmatpush3.bf16.msra.mxu0 %v8662_v24  ;;  %8129 = vmatpush3.bf16.msra.mxu1 %v8663_v25 }
 0xf44   :  { %8108 = vmatprep.subr.bf16.mxu0 %v8664_v32  ;;  %8130 = vmatprep.subr.bf16.mxu1 %v8665_v57 }
 0xf47   :  { %8109 = vmatpush3.bf16.msra.mxu0 %v8666_v53  ;;  %8131 = vmatpush3.bf16.msra.mxu1 %v8667_v50 }
 0xf48   :  { %8110 = vmatprep.subr.bf16.mxu0 %v8668_v9  ;;  %8132 = vmatprep.subr.bf16.mxu1 %v8669_v31 }
 0xf4b   :  { %8111 = vmatpush3.bf16.msra.mxu0 %v8670_v5  ;;  %8133 = vmatpush3.bf16.msra.mxu1 %v8671_v6 }
 0xf4c   :  { %8112 = vmatprep.subr.bf16.mxu0 %v8672_v61  ;;  %8134 = vmatprep.subr.bf16.mxu1 %v8673_v21 }
 0xf4f   :  { %8113 = vmatpush3.bf16.msra.mxu0 %v8674_v20  ;;  %8135 = vmatpush3.bf16.msra.mxu1 %v8675_v36 }
 0xf50   :  { %8114 = vmatprep.subr.bf16.mxu0 %v8676_v42  ;;  %8136 = vmatprep.subr.bf16.mxu1 %v8677_v40 }
 0xf53   :  { %8115 = vmatpush3.bf16.msra.mxu0 %v8678_v22  ;;  %8137 = vmatpush3.bf16.msra.mxu1 %v8679_v28 }
 0xf54   :  { %8116 = vmatprep.subr.bf16.mxu0 %v8680_v46  ;;  %8138 = vmatprep.subr.bf16.mxu1 %v8681_v18 }
 0xf57   :  { %8117 = vmatpush3.bf16.msra.mxu0 %v8682_v37  ;;  %8139 = vmatpush3.bf16.msra.mxu1 %v8683_v3 }
 0xf58   :  { %8118 = vmatprep.subr.bf16.mxu0 %v8684_v45  ;;  %8140 = vmatprep.subr.bf16.mxu1 %v8685_v39 }
 0xf5b   :  { %8119 = vmatpush3.bf16.msra.mxu0 %v8686_v51  ;;  %8141 = vmatpush3.bf16.msra.mxu1 %v8687_v54  ;;  %v5603_v51 = vld [vmem:[#allocation4 + $0x8] sm:$0xff] }
 0xf5c   :  { %8171 = vmatprep.subr.mxu1 %v14654_v12 }
 0xf5e   :  { %6291 = vmatmul.mubr.bf16.vlgmr.msra.gmra.mxu0 %v5767_v38  ;;  %6331 = vmatmul.mubr.bf16.vlgmr.msra.gmra.mxu1 %v5783_v55  ;;  %v14660_v38 = vld [vmem:[#allocation58_spill] sm:$0xff] }
 0xf5f   :  { %6740 = vmatprep.mubr.f32.mxu0 %v14654_v12  ;;  %8175 = vmatprep.mubr.msk.f32.mxu1 %vm9136_vm12, %v14654_v12  ;;  %vm5599_vm13 = vcmp.lt.s32.totalorder %v14660_v38, 16  ;;  %vm6410_vm14 = vcmp.lt.s32.totalorder %v6409_v15, %v14660_v38  ;;  %vm6415_vm15 = vcmp.lt.s32.totalorder %v6414_v59, %v14660_v38  ;;  %v6532_v15 = vld [vmem:[%s13929_s9 + $0x40] sm:$0xff]  ;;  %v6529_v59 = vld [vmem:[%s13929_s9 + $0x28] sm:$0xff] }
 0xfde   :  { %v5499_v0 = vpop.f32.mrf.mxu0  ;;  %v5570_v52 = vpop.f32.mrf.mxu1 }
 0xfdf   :  { %v5575_v29 = vadd.f32 %v5499_v0, %v5429_v2  ;;  %v5577_v43 = vadd.f32 %v5570_v52, %v5431_v27 }
 0xfe0   :  { %v5501_v23 = vpop.f32.mrf.mxu0  ;;  %v5572_v58 = vpop.f32.mrf.mxu1 }
 0xfe1   :  { %v5579_v63 = vmul.f32 0.5, %v5575_v29  ;;  %v5576_v33 = vadd.f32 %v5501_v23, %v5430_v10  ;;  %v5578_v19 = vadd.f32 %v5572_v58, %v5432_v44  ;;  %v9137_v58 = vmov 0  }
 0xfe2   :  { %v6411_v44 = vsel %vm6410_vm14, 1, %v9137_v58 }
 0xfe3   :  { %8839 = vtanh.f32 %v5579_v63  ;;  %v5583_v62 = vmul.f32 0.5, %v5576_v33  ;;  %v5588_v24 = vmul.f32 0.5, %v5578_v19  ;;  %v6419_v19 = vstv %s8055_s5 }
 0xfe4   :  { %vm6420_vm0 = vcmp.lt.s32.totalorder %v6419_v19, %v14660_v38  ;;  %v6524_v19 = vld [vmem:[%s13929_s9] sm:$0xff] }
 0xfe5   :  { %8841 = vtanh.f32 %v5583_v62 }
 0xfe6   :  { %8843 = vtanh.f32 %v5577_v43 }
 0xfe7   :  { %8845 = vtanh.f32 %v5588_v24  ;;  %v6412_v24 = vadd.s32 4294967295, %v6411_v44  ;;  %v6525_v44 = vld [vmem:[%s13929_s9 + $0x8] sm:$0xff] }
 0xff0   :  { %v8840_v25 = vpop.eup %8839 }
 0xff1   :  { %v5581_v32 = vmul.f32 0.5, %v8840_v25  ;;  %v6416_v25 = vsel %vm6415_vm15, 1, %v9137_v58 }
 0xff2   :  { %v8842_v57 = vpop.eup %8841 }
 0xff3   :  { %v5582_v53 = vadd.f32 0.5, %v5581_v32  ;;  %v5585_v50 = vmul.f32 0.5, %v8842_v57  ;;  %v8844_v31 = vpop.eup %8843  ;;  %v6424_v32 = vstv %s8056_s0  ;;  %v6417_v57 = vadd.s32 %v6416_v25, %v6412_v24 }
 0xff4   :  { %v8846_v36 = vpop.eup %8845  ;;  %vm6425_vm1 = vcmp.lt.s32.totalorder %v6424_v32, %v14660_v38  ;;  %v13534_v38 = vld [vmem:[%s13930_s10 + $0x58] sm:$0xff] }
 0xff5   :  { %v5586_v9 = vadd.f32 0.5, %v5585_v50  ;;  %v5593_v6 = vmul.f32 %v8844_v31, %v5582_v53  ;;  %v5590_v46 = vmul.f32 0.5, %v8846_v36  ;;  %v6421_v53 = vsel %vm6420_vm0, 1, %v9137_v58  ;;  %14673 = vst [vmem:[#allocation37_spill] sm:$0xff] %v13534_v38 }
 0xff6   :  { %v6422_v50 = vadd.s32 %v6421_v53, %v6417_v57  ;;  %v6586_v53 = vld [vmem:[%s13929_s9 + $0x1f0] sm:$0xff] }
 0xff7   :  { %v5592_v5 = vmul.f32 %v5586_v9, %v12770_v1  ;;  %v5591_v3 = vadd.f32 0.5, %v5590_v46  ;;  %v6426_v9 = vsel %vm6425_vm1, 1, %v9137_v58  ;;  %v6528_v58 = vld [vmem:[%s13929_s9 + $0x20] sm:$0xff] }
 0xff8   :  { %v6427_v31 = vadd.s32 %v6426_v9, %v6422_v50  ;;  %v6583_v50 = vld [vmem:[%s13929_s9 + $0x1d8] sm:$0xff]  ;;  %v6582_v9 = vld [vmem:[%s13929_s9 + $0x1d0] sm:$0xff] }
 0xff9   :  { %v5594_v61 = vadd.f32 %v5593_v6, %v5592_v5 }
 0xffa   :  { %vm6430_vm2 = vcmp.eq.s32.totalorder %v6427_v31, %v14658_v26  ;;  %v6579_v31 = vld [vmem:[%s13929_s9 + $0x1b8] sm:$0xff]  ;;  %v13529_v26 = vld [vmem:[%s13930_s10 + $0x48] sm:$0xff] }
 0xffb   :  { %8847 = vtanh.f32 %v5594_v61  ;;  %14672 = vst [vmem:[#allocation36_spill] sm:$0xff] %v13529_v26 }
 0xffe   :  { %v8076_v21 = vpop.f32.mrf.mxu0  ;;  %v8098_v20 = vpop.f32.mrf.mxu1 }
0x1000   :  { %v8077_v42 = vpop.f32.mrf.mxu0  ;;  %v8099_v40 = vpop.f32.mrf.mxu1 }
0x1001   :  { %v8078_v8 = vadd.f32 %v8077_v42, %v8076_v21  ;;  %v8100_v2 = vadd.f32 %v8099_v40, %v8098_v20 }
0x1002   :  { %v8079_v22 = vpop.f32.mrf.mxu0  ;;  %v8101_v28 = vpop.f32.mrf.mxu1 }
0x1003   :  { %v6213_v47 = vadd.f32 %v8078_v8, %v5735_v34  ;;  %v6565_v8 = vld [vmem:[%s13929_s9 + $0x148] sm:$0xff]  ;;  %v6564_v34 = vld [vmem:[%s13929_s9 + $0x140] sm:$0xff] }
0x1004   :  { %v8080_v18 = vpop.f32.mrf.mxu0  ;;  %v8102_v37 = vpop.f32.mrf.mxu1 }
0x1005   :  { %v6253_v10 = vadd.f32 %v8100_v2, %v6213_v47  ;;  %v6585_v18 = vld [vmem:[%s13929_s9 + $0x1e8] sm:$0xff]  ;;  %v6587_v37 = vld [vmem:[%s13929_s9 + $0x1f8] sm:$0xff]  ;;  %v6560_v2 = vld [vmem:[%s13929_s9 + $0x120] sm:$0xff] }
0x1006   :  { %6676 = vmatprep.subr.mxu0 %v6585_v18  ;;  %v6561_v47 = vld [vmem:[%s13929_s9 + $0x128] sm:$0xff]  ;;  %v6555_v18 = vld [vmem:[%s13929_s9 + $0xf8] sm:$0xff] }
0x1008   :  { %v8848_v45 = vpop.eup %8847 }
0x1009   :  { %v5596_v39 = vmul.f32 %v8848_v45, %v5591_v3  ;;  %v6584_v3 = vld [vmem:[%s13929_s9 + $0x1e0] sm:$0xff]  ;;  %v6581_v45 = vld [vmem:[%s13929_s9 + $0x1c8] sm:$0xff] }
0x100a   :  { %6677 = vmatpush1.msra.mxu0 %v6584_v3  ;;  %v6551_v3 = vld [vmem:[%s13929_s9 + $0xd8] sm:$0xff] }
0x100b   :  { %5597 = vst [vmem:[#allocation3 + $0xf] sm:$0x1] %v5596_v39  ;;  %5598 = vst [vmem:[#allocation4] sm:$0x1] %v5596_v39  ;;  %v6580_v39 = vld [vmem:[%s13929_s9 + $0x1c0] sm:$0xff]  ;;  %6678 = vmatprep.subr.mxu0 %v6581_v45  ;;  %v6550_v45 = vld [vmem:[%s13929_s9 + $0xd0] sm:$0xff] }
0x100c   :  { %6679 = vmatpush1.msra.mxu0 %v6580_v39  ;;  %v6547_v39 = vld [vmem:[%s13929_s9 + $0xb8] sm:$0xff] }
0x1012   :  { %v5601_v1 = vld [vmem:[#allocation3 + $0x8] sm:$0xff]  ;;  %v5602_v55 = vld [vmem:[#allocation4] sm:$0xff] }
0x1013   :  { %v5605_v54 = vsel %vm5599_vm13, %v5601_v1, %v5603_v51  ;;  %v5604_v17 = vsel %vm5599_vm13, %v5600_v60, %v5602_v55  ;;  %v6577_v1 = vld [vmem:[%s13929_s9 + $0x1a8] sm:$0xff]  ;;  %v6576_v51 = vld [vmem:[%s13929_s9 + $0x1a0] sm:$0xff] }
0x1014   :  { %8172 = vmatpush3.xpose.msra.mxu1 %v5605_v54  ;;  %6680 = vmatprep.subr.mxu0 %v6577_v1  ;;  %v6572_v55 = vld [vmem:[%s13929_s9 + $0x180] sm:$0xff]  ;;  %v6569_v60 = vld [vmem:[%s13929_s9 + $0x168] sm:$0xff]  ;;  %v6546_v1 = vld [vmem:[%s13929_s9 + $0xb0] sm:$0xff] }
0x1015   :  { %8173 = vmatprep.subr.mxu1 %v14654_v12  ;;  %6681 = vmatpush1.msra.mxu0 %v6576_v51  ;;  %v6543_v51 = vld [vmem:[%s13929_s9 + $0x98] sm:$0xff] }
0x1018   :  { %8174 = vmatpush3.xpose.msra.mxu1 %v5604_v17 }
0x1019   :  { %8178 = vmatprep.subr.mxu1 %v14654_v12 }
0x101e   :  { %v8120_v0 = vpop.f32.mrf.mxu0  ;;  %v8142_v48 = vpop.f32.mrf.mxu1 }
0x1020   :  { %v8121_v29 = vpop.f32.mrf.mxu0  ;;  %v8143_v35 = vpop.f32.mrf.mxu1 }
0x1021   :  { %v8122_v23 = vadd.f32 %v8121_v29, %v8120_v0  ;;  %v8144_v52 = vadd.f32 %v8143_v35, %v8142_v48  ;;  %v6557_v0 = vld [vmem:[%s13929_s9 + $0x108] sm:$0xff]  ;;  %v6556_v48 = vld [vmem:[%s13929_s9 + $0x100] sm:$0xff] }
0x1022   :  { %v8123_v63 = vpop.f32.mrf.mxu0  ;;  %v8145_v33 = vpop.f32.mrf.mxu1  ;;  %v6553_v29 = vld [vmem:[%s13929_s9 + $0xe8] sm:$0xff]  ;;  %v6552_v35 = vld [vmem:[%s13929_s9 + $0xe0] sm:$0xff] }
0x1023   :  { %v6293_v49 = vadd.f32 %v8122_v23, %v6253_v10  ;;  %v6549_v10 = vld [vmem:[%s13929_s9 + $0xc8] sm:$0xff]  ;;  %v6548_v23 = vld [vmem:[%s13929_s9 + $0xc0] sm:$0xff] }
0x1024   :  { %v8124_v62 = vpop.f32.mrf.mxu0  ;;  %v8146_v27 = vpop.f32.mrf.mxu1  ;;  %v6545_v63 = vld [vmem:[%s13929_s9 + $0xa8] sm:$0xff]  ;;  %v6544_v33 = vld [vmem:[%s13929_s9 + $0xa0] sm:$0xff] }
0x1025   :  { %v6333_v43 = vadd.f32 %v8144_v52, %v6293_v49  ;;  %v6541_v49 = vld [vmem:[%s13929_s9 + $0x88] sm:$0xff]  ;;  %v6540_v52 = vld [vmem:[%s13929_s9 + $0x80] sm:$0xff] }
0x1026   :  { %v6537_v62 = vld [vmem:[%s13929_s9 + $0x68] sm:$0xff]  ;;  %v6536_v27 = vld [vmem:[%s13929_s9 + $0x60] sm:$0xff] }
0x1027   :  { %8176 = vmatmul.mubr.f32.vlgmr.msra.gmra.mxu1 %v6333_v43  ;;  %v6533_v43 = vld [vmem:[%s13929_s9 + $0x48] sm:$0xff] }
0x1028   :  { %8179 = vmatpush3.msra.mxu1 %v5605_v54  ;;  %8182 = vmatprep.mubr.msk.f32.mxu1 %vm9136_vm12, %v14654_v12  ;;  %v6573_v54 = vld [vmem:[%s13929_s9 + $0x188] sm:$0xff] }
0x1029   :  { %8180 = vmatprep.subr.mxu1 %v14654_v12  ;;  %6682 = vmatprep.subr.mxu0 %v6573_v54  ;;  %v6542_v54 = vld [vmem:[%s13929_s9 + $0x90] sm:$0xff] }
0x102a   :  { %8181 = vmatpush3.msra.mxu1 %v5604_v17  ;;  %6683 = vmatpush1.msra.mxu0 %v6572_v55  ;;  %v6568_v17 = vld [vmem:[%s13929_s9 + $0x160] sm:$0xff]  ;;  %v6539_v55 = vld [vmem:[%s13929_s9 + $0x78] sm:$0xff] }
0x102b   :  { %6747 = vmatprep.subr.mxu1 %v6587_v37  ;;  %6684 = vmatprep.subr.mxu0 %v6569_v60  ;;  %v6554_v37 = vld [vmem:[%s13929_s9 + $0xf0] sm:$0xff] }
0x102c   :  { %6685 = vmatpush1.msra.mxu0 %v6568_v17  ;;  %v6538_v60 = vld [vmem:[%s13929_s9 + $0x70] sm:$0xff]  ;;  %v6535_v17 = vld [vmem:[%s13929_s9 + $0x58] sm:$0xff] }
0x102d   :  { %6686 = vmatprep.subr.mxu0 %v6565_v8  ;;  %v6534_v8 = vld [vmem:[%s13929_s9 + $0x50] sm:$0xff] }
0x102e   :  { %6687 = vmatpush1.msra.mxu0 %v6564_v34  ;;  %v6531_v34 = vld [vmem:[%s13929_s9 + $0x38] sm:$0xff] }
0x102f   :  { %6688 = vmatprep.subr.mxu0 %v6561_v47  ;;  %v6530_v47 = vld [vmem:[%s13929_s9 + $0x30] sm:$0xff] }
0x1030   :  { %6689 = vmatpush1.msra.mxu0 %v6560_v2  ;;  %v6527_v2 = vld [vmem:[%s13929_s9 + $0x18] sm:$0xff] }
0x1031   :  { %6690 = vmatprep.subr.mxu0 %v6557_v0  ;;  %v6526_v0 = vld [vmem:[%s13929_s9 + $0x10] sm:$0xff] }
0x1032   :  { %6691 = vmatpush1.msra.mxu0 %v6556_v48  ;;  %v13221_v48 = vld [vmem:[%s13930_s10 + $0x1e8] sm:$0xff] }
0x1033   :  { %6692 = vmatprep.subr.mxu0 %v6553_v29  ;;  %v13226_v29 = vld [vmem:[%s13930_s10 + $0x1f8] sm:$0xff] }
0x1034   :  { %6693 = vmatpush1.msra.mxu0 %v6552_v35  ;;  %v13233_v35 = vld [vmem:[%s13930_s10 + $0x1e0] sm:$0xff] }
0x1035   :  { %6694 = vmatprep.subr.mxu0 %v6549_v10  ;;  %v13238_v10 = vld [vmem:[%s13930_s10 + $0x1f0] sm:$0xff] }
0x1036   :  { %6695 = vmatpush1.msra.mxu0 %v6548_v23 }
0x1037   :  { %6696 = vmatprep.subr.mxu0 %v6545_v63  ;;  %v13243_v63 = vld [vmem:[%s13930_s10 + $0x1c8] sm:$0xff] }
0x1038   :  { %6697 = vmatpush1.msra.mxu0 %v6544_v33  ;;  %v13248_v33 = vld [vmem:[%s13930_s10 + $0x1d8] sm:$0xff] }
0x1039   :  { %6698 = vmatprep.subr.mxu0 %v6541_v49  ;;  %v13253_v49 = vld [vmem:[%s13930_s10 + $0x1c0] sm:$0xff] }
0x103a   :  { %6699 = vmatpush1.msra.mxu0 %v6540_v52  ;;  %v13258_v52 = vld [vmem:[%s13930_s10 + $0x1d0] sm:$0xff] }
0x103b   :  { %6700 = vmatprep.subr.mxu0 %v6537_v62 }
0x103c   :  { %6701 = vmatpush1.msra.mxu0 %v6536_v27  ;;  %v13265_v27 = vld [vmem:[%s13930_s10 + $0x1a8] sm:$0xff] }
0x103d   :  { %6702 = vmatprep.subr.mxu0 %v6533_v43  ;;  %v13270_v43 = vld [vmem:[%s13930_s10 + $0x1b8] sm:$0xff] }
0x103e   :  { %6703 = vmatpush1.msra.mxu0 %v6532_v15  ;;  %v13277_v15 = vld [vmem:[%s13930_s10 + $0x1a0] sm:$0xff] }
0x103f   :  { %6704 = vmatprep.subr.mxu0 %v6529_v59  ;;  %v13282_v59 = vld [vmem:[%s13930_s10 + $0x1b0] sm:$0xff] }
0x1040   :  { %6705 = vmatpush1.msra.mxu0 %v6528_v58  ;;  %v13289_v58 = vld [vmem:[%s13930_s10 + $0x188] sm:$0xff] }
0x1041   :  { %6706 = vmatprep.subr.mxu0 %v6525_v44  ;;  %v13294_v44 = vld [vmem:[%s13930_s10 + $0x198] sm:$0xff] }
0x1042   :  { %6707 = vmatpush1.msra.mxu0 %v6524_v19  ;;  %v13301_v19 = vld [vmem:[%s13930_s10 + $0x180] sm:$0xff] }
0x1043   :  { %6877 = vmatprep.subr.mxu0 %v13221_v48 }
0x10e7   :  { %v6404_v5 = vpop.f32.mrf.mxu1 }
0x10e8   :  { %v6434_v6 = vrot.slane %v6404_v5, %v14655_v41  ;;  %v6578_v5 = vld [vmem:[%s13929_s9 + $0x1b0] sm:$0xff]  ;;  %v13589_v41 = vld [vmem:[%s13930_s10] sm:$0xff] }
0x10e9   :  { %v8177_v61 = vpop.f32.mrf.mxu1  ;;  %14682 = vst [vmem:[#allocation46_spill] sm:$0xff] %v13589_v41 }
0x10ea   :  { %v6435_v21 = vsel %vm6430_vm2, %v6434_v6, -1e+30  ;;  %v6575_v6 = vld [vmem:[%s13929_s9 + $0x198] sm:$0xff]  ;;  %v6574_v61 = vld [vmem:[%s13929_s9 + $0x190] sm:$0xff] }
0x10eb   :  { %v6437_v20 = vsel %vm6436_vm3, %v6435_v21, -inf }
0x10ec   :  { %6438 = vmax.xlane.f32.xlu0 %v6437_v20  ;;  %v6570_v20 = vld [vmem:[%s13929_s9 + $0x170] sm:$0xff] }
0x1175   :  { %v6439_v36 = vpop.xlane.xlu0 %6438 }
0x1176   :  { %v6440_v42 = vsub.f32 %v6435_v21, %v6439_v36  ;;  %v6571_v21 = vld [vmem:[%s13929_s9 + $0x178] sm:$0xff] }
0x1177   :  { %v6567_v36 = vld [vmem:[%s13929_s9 + $0x158] sm:$0xff] }
0x1178   :  { %v6441_v40 = vmul.f32 1.442695, %v6440_v42  ;;  %v6566_v42 = vld [vmem:[%s13929_s9 + $0x150] sm:$0xff] }
0x117a   :  { %8849 = vpow2.f32 %v6441_v40  ;;  %v6563_v40 = vld [vmem:[%s13929_s9 + $0x138] sm:$0xff] }
0x1187   :  { %v8850_v22 = vpop.eup %8849 }
0x1188   :  { %v13021_v28 = vsel %vm6430_vm2, %v8850_v22, 0.0  ;;  %v6562_v22 = vld [vmem:[%s13929_s9 + $0x130] sm:$0xff] }
0x1189   :  { %v6444_v46 = vsel %vm6436_vm3, %v13021_v28, 0.0 }
0x118a   :  { %6445 = vadd.xlane.f32.xlu0 %v6444_v46  ;;  %v6558_v46 = vld [vmem:[%s13929_s9 + $0x110] sm:$0xff] }
0x1213   :  { %v6446_v24 = vpop.xlane.xlu0 %6445 }
0x1214   :  { %v6447_v25 = vmax.f32 %v6446_v24, 1e-30  ;;  %v13306_v24 = vld [vmem:[%s13930_s10 + $0x190] sm:$0xff] }
0x1216   :  { %8851 = vrcp.f32 %v6447_v25  ;;  %v13313_v25 = vld [vmem:[%s13930_s10 + $0x168] sm:$0xff] }
0x1223   :  { %v8852_v32 = vpop.eup %8851 }
0x1224   :  { %v6449_v57 = vmul.f32 %v8852_v32, %v13021_v28  ;;  %v6559_v28 = vld [vmem:[%s13929_s9 + $0x118] sm:$0xff] }
0x1225   :  { %v13318_v32 = vld [vmem:[%s13930_s10 + $0x178] sm:$0xff] }
0x1226   :  { %8183 = vmatmul.mubr.msk.f32.vlgmr.msra.gmra.mxu1 %vm6450_vm6, %v6449_v57  ;;  %v13325_v57 = vld [vmem:[%s13930_s10 + $0x160] sm:$0xff] }
0x1227   :  { %6748 = vmatpush1.msra.mxu1 %v6586_v53  ;;  %6811 = vmatprep.mubr.f32.mxu1 %v14654_v12  ;;  %v13330_v53 = vld [vmem:[%s13930_s10 + $0x170] sm:$0xff] }
0x1228   :  { %6749 = vmatprep.subr.mxu1 %v6583_v50  ;;  %v13337_v50 = vld [vmem:[%s13930_s10 + $0x148] sm:$0xff] }
0x1229   :  { %6750 = vmatpush1.msra.mxu1 %v6582_v9  ;;  %v13342_v9 = vld [vmem:[%s13930_s10 + $0x158] sm:$0xff] }
0x122a   :  { %6751 = vmatprep.subr.mxu1 %v6579_v31  ;;  %v13349_v31 = vld [vmem:[%s13930_s10 + $0x140] sm:$0xff] }
0x122b   :  { %6752 = vmatpush1.msra.mxu1 %v6578_v5  ;;  %v13354_v5 = vld [vmem:[%s13930_s10 + $0x150] sm:$0xff] }
0x122c   :  { %6753 = vmatprep.subr.mxu1 %v6575_v6  ;;  %v13361_v6 = vld [vmem:[%s13930_s10 + $0x128] sm:$0xff] }
0x122d   :  { %6754 = vmatpush1.msra.mxu1 %v6574_v61  ;;  %v13366_v61 = vld [vmem:[%s13930_s10 + $0x138] sm:$0xff] }
0x122e   :  { %6755 = vmatprep.subr.mxu1 %v6571_v21  ;;  %v13373_v21 = vld [vmem:[%s13930_s10 + $0x120] sm:$0xff] }
0x122f   :  { %6756 = vmatpush1.msra.mxu1 %v6570_v20  ;;  %v13378_v20 = vld [vmem:[%s13930_s10 + $0x130] sm:$0xff] }
0x1230   :  { %6757 = vmatprep.subr.mxu1 %v6567_v36  ;;  %v13385_v36 = vld [vmem:[%s13930_s10 + $0x108] sm:$0xff] }
0x1231   :  { %6758 = vmatpush1.msra.mxu1 %v6566_v42  ;;  %v13390_v42 = vld [vmem:[%s13930_s10 + $0x118] sm:$0xff] }
0x1232   :  { %6759 = vmatprep.subr.mxu1 %v6563_v40  ;;  %v13397_v40 = vld [vmem:[%s13930_s10 + $0x100] sm:$0xff] }
0x1233   :  { %6760 = vmatpush1.msra.mxu1 %v6562_v22  ;;  %v13402_v22 = vld [vmem:[%s13930_s10 + $0x110] sm:$0xff] }
0x1234   :  { %6761 = vmatprep.subr.mxu1 %v6559_v28  ;;  %v13409_v28 = vld [vmem:[%s13930_s10 + $0xe8] sm:$0xff] }
0x1235   :  { %6762 = vmatpush1.msra.mxu1 %v6558_v46  ;;  %v13414_v46 = vld [vmem:[%s13930_s10 + $0xf8] sm:$0xff] }
0x1236   :  { %6763 = vmatprep.subr.mxu1 %v6555_v18  ;;  %v13421_v18 = vld [vmem:[%s13930_s10 + $0xe0] sm:$0xff] }
0x1237   :  { %6764 = vmatpush1.msra.mxu1 %v6554_v37  ;;  %v13426_v37 = vld [vmem:[%s13930_s10 + $0xf0] sm:$0xff] }
0x1238   :  { %6765 = vmatprep.subr.mxu1 %v6551_v3  ;;  %v13433_v3 = vld [vmem:[%s13930_s10 + $0xc8] sm:$0xff] }
0x1239   :  { %6766 = vmatpush1.msra.mxu1 %v6550_v45  ;;  %v13438_v45 = vld [vmem:[%s13930_s10 + $0xd8] sm:$0xff] }
0x123a   :  { %6767 = vmatprep.subr.mxu1 %v6547_v39  ;;  %v13445_v39 = vld [vmem:[%s13930_s10 + $0xc0] sm:$0xff] }
0x123b   :  { %6768 = vmatpush1.msra.mxu1 %v6546_v1  ;;  %v13450_v1 = vld [vmem:[%s13930_s10 + $0xd0] sm:$0xff] }
0x123c   :  { %6769 = vmatprep.subr.mxu1 %v6543_v51  ;;  %v13457_v51 = vld [vmem:[%s13930_s10 + $0xa8] sm:$0xff] }
0x123d   :  { %6770 = vmatpush1.msra.mxu1 %v6542_v54  ;;  %v13462_v54 = vld [vmem:[%s13930_s10 + $0xb8] sm:$0xff] }
0x123e   :  { %6771 = vmatprep.subr.mxu1 %v6539_v55  ;;  %14661 = vst [vmem:[#allocation27_spill] sm:$0xff] %v13462_v54  ;;  %v13469_v55 = vld [vmem:[%s13930_s10 + $0xa0] sm:$0xff] }
0x123f   :  { %6772 = vmatpush1.msra.mxu1 %v6538_v60  ;;  %14662 = vst [vmem:[#allocation28_spill] sm:$0xff] %v13469_v55  ;;  %v13474_v60 = vld [vmem:[%s13930_s10 + $0xb0] sm:$0xff] }
0x1240   :  { %6773 = vmatprep.subr.mxu1 %v6535_v17  ;;  %14663 = vst [vmem:[#allocation29_spill] sm:$0xff] %v13474_v60  ;;  %v13481_v17 = vld [vmem:[%s13930_s10 + $0x88] sm:$0xff] }
0x1241   :  { %6774 = vmatpush1.msra.mxu1 %v6534_v8  ;;  %14664 = vst [vmem:[#allocation19_spill] sm:$0xff] %v13481_v17  ;;  %v13486_v8 = vld [vmem:[%s13930_s10 + $0x98] sm:$0xff] }
0x1242   :  { %6775 = vmatprep.subr.mxu1 %v6531_v34  ;;  %14665 = vst [vmem:[#allocation20_spill] sm:$0xff] %v13486_v8  ;;  %v13493_v34 = vld [vmem:[%s13930_s10 + $0x80] sm:$0xff] }
0x1243   :  { %6776 = vmatpush1.msra.mxu1 %v6530_v47  ;;  %14666 = vst [vmem:[#allocation30_spill] sm:$0xff] %v13493_v34  ;;  %v13498_v47 = vld [vmem:[%s13930_s10 + $0x90] sm:$0xff] }
0x1244   :  { %6777 = vmatprep.subr.mxu1 %v6527_v2  ;;  %14667 = vst [vmem:[#allocation31_spill] sm:$0xff] %v13498_v47  ;;  %v13505_v2 = vld [vmem:[%s13930_s10 + $0x68] sm:$0xff] }
0x1245   :  { %6778 = vmatpush1.msra.mxu1 %v6526_v0  ;;  %14668 = vst [vmem:[#allocation32_spill] sm:$0xff] %v13505_v2  ;;  %v13510_v0 = vld [vmem:[%s13930_s10 + $0x78] sm:$0xff] }
0x1246   :  { %6948 = vmatprep.subr.mxu1 %v13226_v29  ;;  %14669 = vst [vmem:[#allocation33_spill] sm:$0xff] %v13510_v0 }
0x12e6   :  { %v6520_v23 = vpop.f32.mrf.mxu1 }
0x12e7   :  { %6741 = vmatmul.mubr.f32.vlgmr.msra.gmra.mxu0 %v6520_v23  ;;  %6812 = vmatmul.mubr.f32.vlgmr.msra.gmra.mxu1 %v6520_v23  ;;  %v13517_v23 = vld [vmem:[%s13930_s10 + $0x60] sm:$0xff] }
0x12e8   :  { %6878 = vmatpush1.msra.mxu0 %v13233_v35  ;;  %6949 = vmatpush1.msra.mxu1 %v13238_v10  ;;  %v8184_v62 = vpop.f32.mrf.mxu1  ;;  %14670 = vst [vmem:[#allocation34_spill] sm:$0xff] %v13517_v23 }
0x12e9   :  { %6879 = vmatprep.subr.mxu0 %v13243_v63  ;;  %6950 = vmatprep.subr.mxu1 %v13248_v33  ;;  %v13522_v62 = vld [vmem:[%s13930_s10 + $0x70] sm:$0xff] }
0x12ea   :  { %6880 = vmatpush1.msra.mxu0 %v13253_v49  ;;  %6951 = vmatpush1.msra.mxu1 %v13258_v52  ;;  %14671 = vst [vmem:[#allocation35_spill] sm:$0xff] %v13522_v62 }
0x12eb   :  { %6881 = vmatprep.subr.mxu0 %v13265_v27  ;;  %6952 = vmatprep.subr.mxu1 %v13270_v43 }
0x12ec   :  { %6882 = vmatpush1.msra.mxu0 %v13277_v15  ;;  %6953 = vmatpush1.msra.mxu1 %v13282_v59 }
0x12ed   :  { %6883 = vmatprep.subr.mxu0 %v13289_v58  ;;  %6954 = vmatprep.subr.mxu1 %v13294_v44 }
0x12ee   :  { %6884 = vmatpush1.msra.mxu0 %v13301_v19  ;;  %6955 = vmatpush1.msra.mxu1 %v13306_v24 }
0x12ef   :  { %6885 = vmatprep.subr.mxu0 %v13313_v25  ;;  %6956 = vmatprep.subr.mxu1 %v13318_v32 }
0x12f0   :  { %6886 = vmatpush1.msra.mxu0 %v13325_v57  ;;  %6957 = vmatpush1.msra.mxu1 %v13330_v53 }
0x12f1   :  { %6887 = vmatprep.subr.mxu0 %v13337_v50  ;;  %6958 = vmatprep.subr.mxu1 %v13342_v9 }
0x12f2   :  { %6888 = vmatpush1.msra.mxu0 %v13349_v31  ;;  %6959 = vmatpush1.msra.mxu1 %v13354_v5 }
0x12f3   :  { %6889 = vmatprep.subr.mxu0 %v13361_v6  ;;  %6960 = vmatprep.subr.mxu1 %v13366_v61 }
0x12f4   :  { %6890 = vmatpush1.msra.mxu0 %v13373_v21  ;;  %6961 = vmatpush1.msra.mxu1 %v13378_v20 }
0x12f5   :  { %6891 = vmatprep.subr.mxu0 %v13385_v36  ;;  %6962 = vmatprep.subr.mxu1 %v13390_v42 }
0x12f6   :  { %6892 = vmatpush1.msra.mxu0 %v13397_v40  ;;  %6963 = vmatpush1.msra.mxu1 %v13402_v22 }
0x12f7   :  { %6893 = vmatprep.subr.mxu0 %v13409_v28  ;;  %6964 = vmatprep.subr.mxu1 %v13414_v46 }
0x12f8   :  { %6894 = vmatpush1.msra.mxu0 %v13421_v18  ;;  %6965 = vmatpush1.msra.mxu1 %v13426_v37 }
0x12f9   :  { %6895 = vmatprep.subr.mxu0 %v13433_v3  ;;  %6966 = vmatprep.subr.mxu1 %v13438_v45 }
0x12fa   :  { %6896 = vmatpush1.msra.mxu0 %v13445_v39  ;;  %6967 = vmatpush1.msra.mxu1 %v13450_v1 }
0x12fb   :  { %6897 = vmatprep.subr.mxu0 %v13457_v51  ;;  %6968 = vmatprep.subr.mxu1 %v13462_v54 }
0x12fc   :  { %6898 = vmatpush1.msra.mxu0 %v13469_v55  ;;  %6969 = vmatpush1.msra.mxu1 %v13474_v60 }
0x12fd   :  { %6899 = vmatprep.subr.mxu0 %v13481_v17  ;;  %6970 = vmatprep.subr.mxu1 %v13486_v8 }
0x12fe   :  { %6900 = vmatpush1.msra.mxu0 %v13493_v34  ;;  %6971 = vmatpush1.msra.mxu1 %v13498_v47 }
0x12ff   :  { %6901 = vmatprep.subr.mxu0 %v13505_v2  ;;  %6972 = vmatprep.subr.mxu1 %v13510_v0 }
0x1300   :  { %6902 = vmatpush1.msra.mxu0 %v13517_v23  ;;  %6973 = vmatpush1.msra.mxu1 %v13522_v62 }
0x1301   :  { %6903 = vmatprep.subr.mxu0 %v13529_v26  ;;  %6974 = vmatprep.subr.mxu1 %v13534_v38 }
0x1302   :  { %6904 = vmatpush1.msra.mxu0 %v13541_v4  ;;  %6975 = vmatpush1.msra.mxu1 %v13546_v16  ;;  %v13596_v16 = vld [vmem:[%s13930_s10 + $0x10] sm:$0xff] }
0x1303   :  { %6905 = vmatprep.subr.mxu0 %v13553_v7  ;;  %6976 = vmatprep.subr.mxu1 %v13558_v30  ;;  %14683 = vst [vmem:[#allocation47_spill] sm:$0xff] %v13596_v16  ;;  %v6653_v30 = vld [vmem:[%s13932_s12] sm:$0x1] }
0x1304   :  { %6906 = vmatpush1.msra.mxu0 %v13565_v14  ;;  %6977 = vmatpush1.msra.mxu1 %v13570_v13 }
0x1305   :  { %6907 = vmatprep.subr.mxu0 %v13577_v56  ;;  %6978 = vmatprep.subr.mxu1 %v13582_v11 }
0x1306   :  { %6908 = vmatpush1.msra.mxu0 %v13589_v41  ;;  %6941 = vmatprep.mubr.f32.mxu0 %v14654_v12 }
0x1307   :  { %6979 = vmatpush1.msra.mxu1 %v13596_v16  ;;  %7012 = vmatprep.mubr.f32.mxu1 %v14654_v12 }
0x1308   :  { %6942 = vmatmul.mubr.f32.vlgmr.msra.gmra.mxu0 %v6653_v30  ;;  %7013 = vmatmul.mubr.f32.vlgmr.msra.gmra.mxu1 %v6653_v30  ;;  %v14684_v30 = vld [vmem:[#allocation39_spill] sm:$0xff] }
0x1309   :  { %7045 = vmatprep.subr.mxu0 %v13221_v48  ;;  %7116 = vmatprep.subr.mxu1 %v13226_v29 }
0x130a   :  { %7046 = vmatpush1.msra.mxu0 %v13233_v35  ;;  %7117 = vmatpush1.msra.mxu1 %v13238_v10 }
0x130b   :  { %7047 = vmatprep.subr.mxu0 %v13243_v63  ;;  %7118 = vmatprep.subr.mxu1 %v13248_v33 }
0x130c   :  { %7048 = vmatpush1.msra.mxu0 %v13253_v49  ;;  %7119 = vmatpush1.msra.mxu1 %v13258_v52 }
0x130d   :  { %7049 = vmatprep.subr.mxu0 %v13265_v27  ;;  %7120 = vmatprep.subr.mxu1 %v13270_v43 }
0x130e   :  { %7050 = vmatpush1.msra.mxu0 %v13277_v15  ;;  %7121 = vmatpush1.msra.mxu1 %v13282_v59 }
0x130f   :  { %7051 = vmatprep.subr.mxu0 %v13289_v58  ;;  %7122 = vmatprep.subr.mxu1 %v13294_v44 }
0x1310   :  { %7052 = vmatpush1.msra.mxu0 %v13301_v19  ;;  %7123 = vmatpush1.msra.mxu1 %v13306_v24 }
0x1311   :  { %7053 = vmatprep.subr.mxu0 %v13313_v25  ;;  %7124 = vmatprep.subr.mxu1 %v13318_v32 }
0x1312   :  { %7054 = vmatpush1.msra.mxu0 %v13325_v57  ;;  %7125 = vmatpush1.msra.mxu1 %v13330_v53 }
0x1313   :  { %7055 = vmatprep.subr.mxu0 %v13337_v50  ;;  %7126 = vmatprep.subr.mxu1 %v13342_v9 }
0x1314   :  { %7056 = vmatpush1.msra.mxu0 %v13349_v31  ;;  %7127 = vmatpush1.msra.mxu1 %v13354_v5 }
0x1315   :  { %7057 = vmatprep.subr.mxu0 %v13361_v6  ;;  %7128 = vmatprep.subr.mxu1 %v13366_v61 }
0x1316   :  { %7058 = vmatpush1.msra.mxu0 %v13373_v21  ;;  %7129 = vmatpush1.msra.mxu1 %v13378_v20 }
0x1317   :  { %7059 = vmatprep.subr.mxu0 %v13385_v36  ;;  %7130 = vmatprep.subr.mxu1 %v13390_v42 }
0x1318   :  { %7060 = vmatpush1.msra.mxu0 %v13397_v40  ;;  %7131 = vmatpush1.msra.mxu1 %v13402_v22 }
0x1319   :  { %7061 = vmatprep.subr.mxu0 %v13409_v28  ;;  %7132 = vmatprep.subr.mxu1 %v13414_v46 }
0x131a   :  { %7062 = vmatpush1.msra.mxu0 %v13421_v18  ;;  %7133 = vmatpush1.msra.mxu1 %v13426_v37 }
0x131b   :  { %7063 = vmatprep.subr.mxu0 %v13433_v3  ;;  %7134 = vmatprep.subr.mxu1 %v13438_v45 }
0x131c   :  { %7064 = vmatpush1.msra.mxu0 %v13445_v39  ;;  %7135 = vmatpush1.msra.mxu1 %v13450_v1 }
0x131d   :  { %7065 = vmatprep.subr.mxu0 %v13457_v51  ;;  %7136 = vmatprep.subr.mxu1 %v13462_v54 }
0x131e   :  { %7066 = vmatpush1.msra.mxu0 %v13469_v55  ;;  %7137 = vmatpush1.msra.mxu1 %v13474_v60 }
0x131f   :  { %7067 = vmatprep.subr.mxu0 %v13481_v17  ;;  %7138 = vmatprep.subr.mxu1 %v13486_v8 }
0x1320   :  { %7068 = vmatpush1.msra.mxu0 %v13493_v34  ;;  %7139 = vmatpush1.msra.mxu1 %v13498_v47  ;;  %v14685_v34 = vld [vmem:[#allocation41_spill] sm:$0xff] }
0x1321   :  { %7069 = vmatprep.subr.mxu0 %v13505_v2  ;;  %7140 = vmatprep.subr.mxu1 %v13510_v0 }
0x1322   :  { %7070 = vmatpush1.msra.mxu0 %v13517_v23  ;;  %7141 = vmatpush1.msra.mxu1 %v13522_v62 }
0x1323   :  { %7071 = vmatprep.subr.mxu0 %v13529_v26  ;;  %7142 = vmatprep.subr.mxu1 %v13534_v38 }
0x1324   :  { %7072 = vmatpush1.msra.mxu0 %v13541_v4  ;;  %7143 = vmatpush1.msra.mxu1 %v14684_v30  ;;  %v14689_v30 = vld [vmem:[#allocation57_spill] sm:$0xff] }
0x1325   :  { %7073 = vmatprep.subr.mxu0 %v13553_v7  ;;  %7144 = vmatprep.subr.mxu1 %v14685_v34  ;;  %v14687_v34 = vld [vmem:[#allocation56_spill] sm:$0xff]  ;;  %v14688_v7 = vld [vmem:[#allocation55_spill] sm:$0xff] }
0x1326   :  { %7074 = vmatpush1.msra.mxu0 %v13565_v14  ;;  %7145 = vmatpush1.msra.mxu1 %v13570_v13  ;;  %v6588_v13 = vld [vmem:[%s13931_s11] sm:$0xf] }
0x1327   :  { %7075 = vmatprep.subr.mxu0 %v13577_v56  ;;  %7146 = vmatprep.subr.mxu1 %v13582_v11  ;;  %v14686_v14 = vld [vmem:[#allocation54_spill] sm:$0xff]  ;;  %v6667_v11 = vrot.slane %v6588_v13, %v14687_v34  ;;  %v6671_v4 = vrot.slane %v6588_v13, %v14689_v30 }
0x1328   :  { %7076 = vmatpush1.msra.mxu0 %v13589_v41  ;;  %7109 = vmatprep.mubr.f32.mxu0 %v14654_v12  ;;  %v6659_v56 = vrot.slane %v6588_v13, %v14686_v14  ;;  %v6663_v41 = vrot.slane %v6588_v13, %v14688_v7 }
0x1329   :  { %7147 = vmatpush1.msra.mxu1 %v13596_v16  ;;  %7180 = vmatprep.mubr.f32.mxu1 %v14654_v12 }
0x132a   :  { %7292 = vmatprep.subr.mxu0 %v13221_v48  ;;  %7363 = vmatprep.subr.mxu1 %v13226_v29 }
0x13a7   :  { %v6742_v38 = vpop.f32.mrf.mxu0  ;;  %v6813_v16 = vpop.f32.mrf.mxu1 }
0x13a8   :  { %v6743_v62 = vadd.f32 %v6742_v38, %v6659_v56  ;;  %v6814_v48 = vadd.f32 %v6813_v16, %v6667_v11 }
0x13a9   :  { %v6744_v26 = vpop.f32.mrf.mxu0  ;;  %v6815_v12 = vpop.f32.mrf.mxu1 }
0x13aa   :  { %v6745_v23 = vadd.f32 %v6744_v26, %v6663_v41  ;;  %v6816_v29 = vadd.f32 %v6815_v12, %v6671_v4 }
0x13ac   :  { %v6822_v0 = vcombine.low %v6743_v62, %v6745_v23  ;;  %v6823_v2 = vcombine.low %v6814_v48, %v6816_v29 }
0x13ae   :  { %6826 = vst [vmem:[#allocation5] sm:$0x77] %v6822_v0  ;;  %6827 = vst [vmem:[#allocation5 + $0x8] sm:$0x77] %v6823_v2 }
0x13b5   :  { %v6828_v47 = vld [vmem:[#allocation5] ss:$4 sm:$0xf]  ;;  %v6830_v8 = vld [vmem:[#allocation5 + $0x2] ss:$4 sm:$0xf] }
0x13b6   :  { %v6835_v17 = vrot.slane %v6830_v8, %v14686_v14  ;;  %v6856_v60 = vrot.slane %v6828_v47, %v14686_v14  ;;  %v6839_v13 = vrot.slane %v6830_v8, %v14688_v7  ;;  %v6860_v55 = vrot.slane %v6828_v47, %v14688_v7 }
0x13b7   :  { %v6843_v12 = vrot.slane %v6830_v8, %v14687_v34  ;;  %v6864_v41 = vrot.slane %v6828_v47, %v14687_v34 }
0x13b8   :  { %v6873_v56 = vsel %vm10567_vm4, %v6835_v17, %v6856_v60  ;;  %v6874_v4 = vsel %vm10573_vm5, %v6839_v13, %v6860_v55  ;;  %v6847_v60 = vrot.slane %v6830_v8, %v14689_v30  ;;  %v6868_v17 = vrot.slane %v6828_v47, %v14689_v30 }
0x13b9   :  { %v6875_v29 = vsel %vm10584_vm8, %v6843_v12, %v6864_v41  ;;  %v6654_v12 = vld [vmem:[%s13932_s12 + $0x1] sm:$0x1] }
0x13ba   :  { %v6876_v55 = vsel %vm10592_vm11, %v6847_v60, %v6868_v17 }
0x13c8   :  { %v6943_v11 = vpop.f32.mrf.mxu0  ;;  %v7014_v23 = vpop.f32.mrf.mxu1 }
0x13c9   :  { %v7019_v16 = vadd.f32 %v6943_v11, %v6873_v56  ;;  %v7021_v54 = vadd.f32 %v7014_v23, %v6875_v29 }
0x13ca   :  { %v6945_v38 = vpop.f32.mrf.mxu0  ;;  %v7016_v56 = vpop.f32.mrf.mxu1 }
0x13cb   :  { %v7023_v2 = vmul.f32 0.5, %v7019_v16  ;;  %v7020_v0 = vadd.f32 %v6945_v38, %v6874_v4  ;;  %v7022_v13 = vadd.f32 %v7016_v56, %v6876_v55 }
0x13cd   :  { %8853 = vtanh.f32 %v7023_v2  ;;  %v7027_v62 = vmul.f32 0.5, %v7020_v0  ;;  %v7032_v16 = vmul.f32 0.5, %v7022_v13 }
0x13cf   :  { %8855 = vtanh.f32 %v7027_v62 }
0x13d0   :  { %8857 = vtanh.f32 %v7021_v54 }
0x13d1   :  { %8859 = vtanh.f32 %v7032_v16 }
0x13da   :  { %v8854_v4 = vpop.eup %8853 }
0x13db   :  { %v7025_v38 = vmul.f32 0.5, %v8854_v4 }
0x13dc   :  { %v8856_v2 = vpop.eup %8855 }
0x13dd   :  { %v7026_v0 = vadd.f32 0.5, %v7025_v38  ;;  %v7029_v26 = vmul.f32 0.5, %v8856_v2  ;;  %v8858_v41 = vpop.eup %8857 }
0x13de   :  { %v8860_v62 = vpop.eup %8859 }
0x13df   :  { %v7030_v8 = vadd.f32 0.5, %v7029_v26  ;;  %v7037_v23 = vmul.f32 %v8858_v41, %v7026_v0  ;;  %v7034_v29 = vmul.f32 0.5, %v8860_v62 }
0x13e1   :  { %v7036_v47 = vmul.f32 %v7030_v8, %v6654_v12  ;;  %v7035_v60 = vadd.f32 0.5, %v7034_v29 }
0x13e3   :  { %v13701_v54 = vadd.f32 %v7037_v23, %v7036_v47 }
0x13e5   :  { %8861 = vtanh.f32 %v13701_v54 }
0x13f2   :  { %v8862_v17 = vpop.eup %8861 }
0x13f3   :  { %v7040_v56 = vmul.f32 %v8862_v17, %v7035_v60 }
0x13f5   :  { %7041 = vst [vmem:[#allocation6] sm:$0x1] %v7040_v56  ;;  %7042 = vst [vmem:[#allocation7 + $0x2] sm:$0x1] %v7040_v56  ;;  %7110 = vmatmul.mubr.f32.vlgmr.msra.gmra.mxu0 %v7040_v56  ;;  %7181 = vmatmul.mubr.f32.vlgmr.msra.gmra.mxu1 %v7040_v56 }
0x13f6   :  { %7293 = vmatpush1.msra.mxu0 %v13233_v35  ;;  %7364 = vmatpush1.msra.mxu1 %v13238_v10  ;;  %v14694_v35 = vld [vmem:[#allocation27_spill] sm:$0xff]  ;;  %v14695_v10 = vld [vmem:[#allocation28_spill] sm:$0xff] }
0x13f7   :  { %7294 = vmatprep.subr.mxu0 %v13243_v63  ;;  %7365 = vmatprep.subr.mxu1 %v13248_v33  ;;  %v14696_v63 = vld [vmem:[#allocation29_spill] sm:$0xff]  ;;  %v14697_v33 = vld [vmem:[#allocation19_spill] sm:$0xff] }
0x13f8   :  { %7295 = vmatpush1.msra.mxu0 %v13253_v49  ;;  %7366 = vmatpush1.msra.mxu1 %v13258_v52  ;;  %v14698_v49 = vld [vmem:[#allocation20_spill] sm:$0xff]  ;;  %v14699_v52 = vld [vmem:[#allocation30_spill] sm:$0xff] }
0x13f9   :  { %7296 = vmatprep.subr.mxu0 %v13265_v27  ;;  %7367 = vmatprep.subr.mxu1 %v13270_v43  ;;  %v14700_v27 = vld [vmem:[#allocation31_spill] sm:$0xff]  ;;  %v14701_v43 = vld [vmem:[#allocation32_spill] sm:$0xff] }
0x13fa   :  { %7297 = vmatpush1.msra.mxu0 %v13277_v15  ;;  %7368 = vmatpush1.msra.mxu1 %v13282_v59  ;;  %v14702_v15 = vld [vmem:[#allocation33_spill] sm:$0xff]  ;;  %v14703_v59 = vld [vmem:[#allocation34_spill] sm:$0xff] }
0x13fb   :  { %7298 = vmatprep.subr.mxu0 %v13289_v58  ;;  %7369 = vmatprep.subr.mxu1 %v13294_v44  ;;  %v14704_v58 = vld [vmem:[#allocation35_spill] sm:$0xff]  ;;  %v14705_v44 = vld [vmem:[#allocation36_spill] sm:$0xff] }
0x13fc   :  { %7299 = vmatpush1.msra.mxu0 %v13301_v19  ;;  %7370 = vmatpush1.msra.mxu1 %v13306_v24  ;;  %v14706_v19 = vld [vmem:[#allocation37_spill] sm:$0xff]  ;;  %v14707_v24 = vld [vmem:[#allocation38_spill] sm:$0xff] }
0x13fd   :  { %7300 = vmatprep.subr.mxu0 %v13313_v25  ;;  %7371 = vmatprep.subr.mxu1 %v13318_v32  ;;  %v14708_v25 = vld [vmem:[#allocation39_spill] sm:$0xff]  ;;  %v14709_v32 = vld [vmem:[#allocation40_spill] sm:$0xff] }
0x13fe   :  { %7301 = vmatpush1.msra.mxu0 %v13325_v57  ;;  %7372 = vmatpush1.msra.mxu1 %v13330_v53  ;;  %v14710_v57 = vld [vmem:[#allocation41_spill] sm:$0xff]  ;;  %v14711_v53 = vld [vmem:[#allocation42_spill] sm:$0xff] }
0x13ff   :  { %7302 = vmatprep.subr.mxu0 %v13337_v50  ;;  %7373 = vmatprep.subr.mxu1 %v13342_v9  ;;  %v14712_v50 = vld [vmem:[#allocation43_spill] sm:$0xff]  ;;  %v14713_v9 = vld [vmem:[#allocation44_spill] sm:$0xff] }
0x1400   :  { %7303 = vmatpush1.msra.mxu0 %v13349_v31  ;;  %7374 = vmatpush1.msra.mxu1 %v13354_v5  ;;  %v14714_v31 = vld [vmem:[#allocation45_spill] sm:$0xff]  ;;  %v14715_v5 = vld [vmem:[#allocation46_spill] sm:$0xff] }
0x1401   :  { %7304 = vmatprep.subr.mxu0 %v13361_v6  ;;  %7375 = vmatprep.subr.mxu1 %v13366_v61  ;;  %v14716_v6 = vmov 0.0   ;;  %v14717_v61 = vld [vmem:[#allocation47_spill] sm:$0xff] }
0x1402   :  { %7305 = vmatpush1.msra.mxu0 %v13373_v21  ;;  %7376 = vmatpush1.msra.mxu1 %v13378_v20 }
0x1403   :  { %7306 = vmatprep.subr.mxu0 %v13385_v36  ;;  %7377 = vmatprep.subr.mxu1 %v13390_v42 }
0x1404   :  { %7307 = vmatpush1.msra.mxu0 %v13397_v40  ;;  %7378 = vmatpush1.msra.mxu1 %v13402_v22 }
0x1405   :  { %7308 = vmatprep.subr.mxu0 %v13409_v28  ;;  %7379 = vmatprep.subr.mxu1 %v13414_v46  ;;  %v14718_v28 = vld [vmem:[#allocation26_spill] sm:$0xff] }
0x1406   :  { %7309 = vmatpush1.msra.mxu0 %v13421_v18  ;;  %7380 = vmatpush1.msra.mxu1 %v13426_v37 }
0x1407   :  { %7310 = vmatprep.subr.mxu0 %v13433_v3  ;;  %7381 = vmatprep.subr.mxu1 %v13438_v45  ;;  %v7044_v45 = vld [vmem:[#allocation5 + $0x1] ss:$4 sm:$0xf] }
0x1408   :  { %7311 = vmatpush1.msra.mxu0 %v13445_v39  ;;  %7382 = vmatpush1.msra.mxu1 %v13450_v1 }
0x1409   :  { %7312 = vmatprep.subr.mxu0 %v13457_v51  ;;  %7383 = vmatprep.subr.mxu1 %v14694_v35 }
0x140a   :  { %7313 = vmatpush1.msra.mxu0 %v14695_v10  ;;  %7384 = vmatpush1.msra.mxu1 %v14696_v63  ;;  %v7475_v10 = vld [vmem:[%s13933_s13 + $0x70] sm:$0xff]  ;;  %v7474_v63 = vld [vmem:[%s13933_s13 + $0x68] sm:$0xff] }
0x140b   :  { %7314 = vmatprep.subr.mxu0 %v14697_v33  ;;  %7385 = vmatprep.subr.mxu1 %v14698_v49  ;;  %v7473_v33 = vld [vmem:[%s13933_s13 + $0x60] sm:$0xff]  ;;  %v7472_v49 = vld [vmem:[%s13933_s13 + $0x58] sm:$0xff] }
0x140c   :  { %7315 = vmatpush1.msra.mxu0 %v14699_v52  ;;  %7386 = vmatpush1.msra.mxu1 %v14700_v27  ;;  %v7471_v52 = vld [vmem:[%s13933_s13 + $0x50] sm:$0xff]  ;;  %v13803_v27 = vld [vmem:[%s13935_s15] sm:$0x1f] }
0x140d   :  { %7316 = vmatprep.subr.mxu0 %v14701_v43  ;;  %7387 = vmatprep.subr.mxu1 %v14702_v15  ;;  %v14719_v43 = vld [vmem:[#allocation58_spill] sm:$0xff]  ;;  %v7470_v15 = vld [vmem:[%s13933_s13 + $0x48] sm:$0xff] }
0x140e   :  { %7317 = vmatpush1.msra.mxu0 %v14703_v59  ;;  %7388 = vmatpush1.msra.mxu1 %v14704_v58  ;;  %vm7561_vm7 = vcmp.eq.s32.totalorder %v14719_v43, 3  ;;  %v9138_v59 = vmov -10000.0   ;;  %vm7671_vm0 = vcmp.eq.s32.totalorder %v14719_v43, 2  ;;  %vm7681_vm1 = vcmp.eq.s32.totalorder %v14719_v43, 1 }
0x140f   :  { %7318 = vmatprep.subr.mxu0 %v14705_v44  ;;  %7389 = vmatprep.subr.mxu1 %v14706_v19  ;;  %v7562_v58 = vsel %vm7561_vm7, 0.0, %v9138_v59  ;;  %v7469_v19 = vld [vmem:[%s13933_s13 + $0x40] sm:$0xff] }
0x1410   :  { %7319 = vmatpush1.msra.mxu0 %v14707_v24  ;;  %7390 = vmatpush1.msra.mxu1 %v14708_v25  ;;  %v13811_v44 = vadd.f32 %v7562_v58, %v13803_v27  ;;  %v7468_v25 = vld [vmem:[%s13933_s13 + $0x38] sm:$0xff] }
0x1411   :  { %7320 = vmatprep.subr.mxu0 %v14709_v32  ;;  %7391 = vmatprep.subr.mxu1 %v14710_v57  ;;  %v7467_v32 = vld [vmem:[%s13933_s13 + $0x30] sm:$0xff]  ;;  %v7466_v57 = vld [vmem:[%s13933_s13 + $0x28] sm:$0xff] }
0x1412   :  { %7321 = vmatpush1.msra.mxu0 %v14711_v53  ;;  %7392 = vmatpush1.msra.mxu1 %v14712_v50  ;;  %v7565_v24 = vsel %vm7564_vm9, %v13811_v44, -inf  ;;  %v7465_v53 = vld [vmem:[%s13933_s13 + $0x20] sm:$0xff]  ;;  %v7464_v50 = vld [vmem:[%s13933_s13 + $0x18] sm:$0xff] }
0x1413   :  { %7322 = vmatprep.subr.mxu0 %v14713_v9  ;;  %7393 = vmatprep.subr.mxu1 %v14714_v31  ;;  %v7463_v9 = vld [vmem:[%s13933_s13 + $0x10] sm:$0xff]  ;;  %v7462_v31 = vld [vmem:[%s13933_s13 + $0x8] sm:$0xff] }
0x1414   :  { %7323 = vmatpush1.msra.mxu0 %v14715_v5  ;;  %7356 = vmatprep.mubr.f32.mxu0 %v14716_v6  ;;  %v7461_v5 = vld [vmem:[%s13933_s13] sm:$0xff] }
0x1415   :  { %7394 = vmatpush1.msra.mxu1 %v14717_v61  ;;  %7427 = vmatprep.mubr.f32.mxu1 %v14716_v6  ;;  %v7244_v61 = vld [vmem:[#allocation5 + $0x2] ss:$4 sm:$0xf] }
0x1416   :  { %8185 = vmatprep.subr.mxu0 %v14716_v6  ;;  %7566 = vmax.xlane.f32.xlu1 %v7565_v24 }
0x14b5   :  { %v7111_v21 = vpop.f32.mrf.mxu0  ;;  %v7182_v20 = vpop.f32.mrf.mxu1 }
0x14b7   :  { %v7113_v36 = vpop.f32.mrf.mxu0  ;;  %v7184_v42 = vpop.f32.mrf.mxu1 }
0x14b8   :  { %v7191_v40 = vcombine.low %v7111_v21, %v7113_v36  ;;  %v7192_v22 = vcombine.low %v7182_v20, %v7184_v42  ;;  %v7245_v21 = vld [vmem:[#allocation5] ss:$4 sm:$0xf]  ;;  %v7271_v36 = vrot.slane %v7244_v61, %v14686_v14 }
0x14b9   :  { %v7250_v20 = vrot.slane %v7245_v21, %v14686_v14  ;;  %v7254_v42 = vrot.slane %v7245_v21, %v14688_v7 }
0x14ba   :  { %v7199_v46 = vrot.slane %v7191_v40, %v14718_v28  ;;  %v7206_v18 = vrot.slane %v7192_v22, %v14718_v28  ;;  %v7275_v40 = vrot.slane %v7244_v61, %v14688_v7 }
0x14bc   :  { %v7207_v37 = vcombine.low %v7199_v46, %v7206_v18 }
0x14be   :  { %v7214_v3 = vrot.slane %v7207_v37, %v14718_v28  ;;  %v7288_v28 = vsel %vm10567_vm4, %v7250_v20, %v7271_v36  ;;  %v7258_v37 = vrot.slane %v7245_v21, %v14687_v34 }
0x14c0   :  { %v7216_v39 = vadd.f32 %v7214_v3, %v7044_v45  ;;  %v7279_v3 = vrot.slane %v7244_v61, %v14687_v34 }
0x14c2   :  { %v7217_v1 = vmul.f32 0.5, %v7216_v39  ;;  %v7222_v51 = vrot.slane %v7216_v39, 1  ;;  %v7228_v55 = vrot.slane %v7216_v39, 2  ;;  %v7231_v13 = vrot.slane %v7216_v39, 3 }
0x14c3   :  { %v7289_v39 = vsel %vm10573_vm5, %v7254_v42, %v7275_v40  ;;  %v7290_v7 = vsel %vm10584_vm8, %v7258_v37, %v7279_v3  ;;  %vm7554_vm5 = vcmask 34816  }
0x14c4   :  { %8863 = vtanh.f32 %v7217_v1  ;;  %v7224_v26 = vmul.f32 0.5, %v7222_v51  ;;  %v7233_v16 = vmul.f32 0.5, %v7231_v13 }
0x14c6   :  { %8865 = vtanh.f32 %v7224_v26 }
0x14c7   :  { %8867 = vtanh.f32 %v7228_v55 }
0x14c8   :  { %8869 = vtanh.f32 %v7233_v16 }
0x14d1   :  { %v8864_v4 = vpop.eup %8863 }
0x14d2   :  { %v7219_v38 = vmul.f32 0.5, %v8864_v4  ;;  %v7262_v4 = vrot.slane %v7245_v21, %v14689_v30 }
0x14d3   :  { %v8866_v2 = vpop.eup %8865 }
0x14d4   :  { %v7220_v0 = vadd.f32 0.5, %v7219_v38  ;;  %v7226_v12 = vmul.f32 0.5, %v8866_v2  ;;  %v8868_v41 = vpop.eup %8867  ;;  %v7283_v38 = vrot.slane %v7244_v61, %v14689_v30 }
0x14d5   :  { %v8870_v29 = vpop.eup %8869 }
0x14d6   :  { %v7227_v8 = vadd.f32 0.5, %v7226_v12  ;;  %v7238_v23 = vmul.f32 %v8868_v41, %v7220_v0  ;;  %v7235_v60 = vmul.f32 0.5, %v8870_v29  ;;  %v7291_v34 = vsel %vm10592_vm11, %v7262_v4, %v7283_v38 }
0x14d8   :  { %v7237_v47 = vmul.f32 %v7227_v8, %v13701_v54  ;;  %v7236_v17 = vadd.f32 0.5, %v7235_v60  ;;  %v7476_v54 = vld [vmem:[%s13933_s13 + $0x78] sm:$0xff] }
0x14da   :  { %v13773_v62 = vadd.f32 %v7238_v23, %v7237_v47 }
0x14dc   :  { %8871 = vtanh.f32 %v13773_v62 }
0x14e9   :  { %v8872_v56 = vpop.eup %8871 }
0x14ea   :  { %v7241_v35 = vmul.f32 %v8872_v56, %v7236_v17 }
0x14ec   :  { %7242 = vst [vmem:[#allocation6 + $0x1] sm:$0x1] %v7241_v35  ;;  %7243 = vst [vmem:[#allocation7 + $0x1] sm:$0x1] %v7241_v35  ;;  %7357 = vmatmul.mubr.f32.vlgmr.msra.gmra.mxu0 %v7241_v35  ;;  %7428 = vmatmul.mubr.f32.vlgmr.msra.gmra.mxu1 %v7241_v35 }
0x14ed   :  { %8217 = vmatprep.mubr.msk.f32.mxu0 %vm9136_vm12, %v14716_v6  ;;  %8186 = vmatpush3.msra.mxu0 %v7476_v54  ;;  %vm7590_vm12 = vcmask 32768  }
0x14ee   :  { %8187 = vmatprep.subr.mxu0 %v14716_v6 }
0x14ef   :  { %8188 = vmatpush3.msra.mxu0 %v7475_v10 }
0x14f0   :  { %8189 = vmatprep.subr.mxu0 %v14716_v6 }
0x14f1   :  { %8190 = vmatpush3.msra.mxu0 %v7474_v63 }
0x14f2   :  { %8191 = vmatprep.subr.mxu0 %v14716_v6 }
0x14f3   :  { %8192 = vmatpush3.msra.mxu0 %v7473_v33 }
0x14f4   :  { %8193 = vmatprep.subr.mxu0 %v14716_v6 }
0x14f5   :  { %8194 = vmatpush3.msra.mxu0 %v7472_v49 }
0x14f6   :  { %8195 = vmatprep.subr.mxu0 %v14716_v6 }
0x14f7   :  { %8196 = vmatpush3.msra.mxu0 %v7471_v52 }
0x14f8   :  { %8197 = vmatprep.subr.mxu0 %v14716_v6 }
0x14f9   :  { %8198 = vmatpush3.msra.mxu0 %v7470_v15  ;;  %v14722_v15 = vld [vmem:[#allocation53_spill] sm:$0xff] }
0x14fa   :  { %8199 = vmatprep.subr.mxu0 %v14716_v6  ;;  %vm7558_vm4 = vcmp.eq.s32.totalorder %v14722_v15, %v14719_v43 }
0x14fb   :  { %8200 = vmatpush3.msra.mxu0 %v7469_v19  ;;  %v13874_v59 = vsel %vm7558_vm4, 1.0, %v14716_v6 }
0x14fc   :  { %8201 = vmatprep.subr.mxu0 %v14716_v6 }
0x14fd   :  { %8202 = vmatpush3.msra.mxu0 %v7468_v25 }
0x14fe   :  { %8203 = vmatprep.subr.mxu0 %v14716_v6 }
0x14ff   :  { %8204 = vmatpush3.msra.mxu0 %v7467_v32 }
0x1500   :  { %8205 = vmatprep.subr.mxu0 %v14716_v6 }
0x1501   :  { %8206 = vmatpush3.msra.mxu0 %v7466_v57  ;;  %v8058_v57 = vld [vmem:[%s13934_s14] ss:$0 sm:$0xff] }
0x1502   :  { %8207 = vmatprep.subr.mxu0 %v14716_v6 }
0x1503   :  { %8208 = vmatpush3.msra.mxu0 %v7465_v53 }
0x1504   :  { %8209 = vmatprep.subr.mxu0 %v14716_v6 }
0x1505   :  { %8210 = vmatpush3.msra.mxu0 %v7464_v50 }
0x1506   :  { %8211 = vmatprep.subr.mxu0 %v14716_v6 }
0x1507   :  { %8212 = vmatpush3.msra.mxu0 %v7463_v9 }
0x1508   :  { %8213 = vmatprep.subr.mxu0 %v14716_v6 }
0x1509   :  { %8214 = vmatpush3.msra.mxu0 %v7462_v31 }
0x150a   :  { %8215 = vmatprep.subr.mxu0 %v14716_v6 }
0x150b   :  { %8216 = vmatpush3.msra.mxu0 %v7461_v5 }
0x15ac   :  { %v7358_v46 = vpop.f32.mrf.mxu0  ;;  %v7429_v55 = vpop.f32.mrf.mxu1 }
0x15ad   :  { %v7434_v18 = vadd.f32 %v7358_v46, %v7288_v28  ;;  %v7436_v16 = vadd.f32 %v7429_v55, %v7290_v7 }
0x15ae   :  { %v7360_v1 = vpop.f32.mrf.mxu0  ;;  %v7431_v2 = vpop.f32.mrf.mxu1 }
0x15af   :  { %v7438_v51 = vmul.f32 0.5, %v7434_v18  ;;  %v7435_v26 = vadd.f32 %v7360_v1, %v7289_v39  ;;  %v7437_v0 = vadd.f32 %v7431_v2, %v7291_v34 }
0x15b1   :  { %8873 = vtanh.f32 %v7438_v51  ;;  %v7442_v13 = vmul.f32 0.5, %v7435_v26  ;;  %v7447_v12 = vmul.f32 0.5, %v7437_v0 }
0x15b3   :  { %8875 = vtanh.f32 %v7442_v13 }
0x15b4   :  { %8877 = vtanh.f32 %v7436_v16  ;;  %v7557_v16 = vcvt.s32.f32 %v14719_v43 }
0x15b5   :  { %8879 = vtanh.f32 %v7447_v12 }
0x15be   :  { %v8874_v8 = vpop.eup %8873 }
0x15bf   :  { %v7440_v41 = vmul.f32 0.5, %v8874_v8 }
0x15c0   :  { %v8876_v47 = vpop.eup %8875 }
0x15c1   :  { %v7441_v23 = vadd.f32 0.5, %v7440_v41  ;;  %v7444_v29 = vmul.f32 0.5, %v8876_v47  ;;  %v8878_v60 = vpop.eup %8877 }
0x15c2   :  { %v8880_v30 = vpop.eup %8879 }
0x15c3   :  { %v7445_v48 = vadd.f32 0.5, %v7444_v29  ;;  %v7452_v56 = vmul.f32 %v8878_v60, %v7441_v23  ;;  %v7449_v54 = vmul.f32 0.5, %v8880_v30 }
0x15c5   :  { %v7451_v17 = vmul.f32 %v7445_v48, %v13773_v62  ;;  %v7450_v10 = vadd.f32 0.5, %v7449_v54  ;;  %v7567_v62 = vpop.xlane.xlu1 %7566 }
0x15c6   :  { %v7573_v58 = vmul.f32 %v13874_v59, %v7567_v62  ;;  %vm7568_vm11 = vcmp.eq.f32.partialorder %v13811_v44, %v7567_v62 }
0x15c7   :  { %v7453_v35 = vadd.f32 %v7452_v56, %v7451_v17  ;;  %v7569_v41 = vsel %vm7568_vm11, %v7557_v16, 5.0  ;;  %v7660_v17 = vld [vmem:[%s13935_s15 + $0x4] sm:$0x1]  ;;  %s9139_s15 = smov [#allocation13]  }
0x15c8   :  { %v7574_v19 = vsel %vm7564_vm9, %v7573_v58, 0.0  ;;  %v7570_v23 = vsel %vm7564_vm9, %v7569_v41, inf  ;;  %s7703_s0 = sshll.u32 %s9139_s15, 4  ;;  %s7704_s0 = int_to_ptr.vmem [resolvable:$true] %s7703_s0 }
0x15c9   :  { %8881 = vtanh.f32 %v7453_v35  ;;  %v7575_v24 = vrot.slane %v7574_v19, 4  ;;  %s9087_s6 = scalar_lea.vmem %s7704_s0, 16  ;;  %s9091_s3 = scalar_lea.vmem %s7704_s0, 32 }
0x15ca   :  { %p9088_p5 = scmp.ne.s32.totalorder %s7704_s0, %s9087_s6  ;;  %p9092_p6 = scmp.lt.s32.totalorder %s7704_s0, %s7704_s0 }
0x15cb   :  { %v7576_v25 = vadd.f32 %v7575_v24, %v7574_v19  ;;  %p9093_p7 = scmp.lt.s32.totalorder %s9091_s3, %s9087_s6 }
0x15cd   :  { %v7577_v32 = vrot.slane %v7576_v25, 2  ;;  %p9094_p8 = por %p9093_p7, %p9092_p6 }
0x15cf   :  { %v7578_v50 = vadd.f32 %v7577_v32, %v7576_v25  ;;  %p9095_p9 = pnand %p9094_p8, %p9088_p5 }
0x15d1   :  { %v7579_v5 = vrot.slane %v7578_v50, 1 }
0x15d3   :  { %v7580_v6 = vadd.f32 %v7579_v5, %v7578_v50 }
0x15d6   :  { %v8882_v11 = vpop.eup %8881 }
0x15d7   :  { %v7455_v63 = vmul.f32 %v8882_v11, %v7450_v10 }
0x15d9   :  { %7456 = vst [vmem:[#allocation6 + $0x2] sm:$0x1] %v7455_v63  ;;  %7457 = vst [vmem:[#allocation7] sm:$0x1] %v7455_v63 }
0x15e0   :  { %v7458_v33 = vld [vmem:[#allocation6] sm:$0x7]  ;;  %v7459_v49 = vld [vmem:[#allocation7] sm:$0x7] }
0x15e1   :  { %v7460_v52 = vsel %vm5599_vm13, %v7458_v33, %v7459_v49  ;;  %vm7693_vm13 = vcmask 0  }
0x15e2   :  { %8218 = vmatmul.mubr.f32.vlgmr.msra.gmra.mxu0 %v7460_v52 }
0x16a2   :  { %v7550_v53 = vpop.f32.mrf.mxu0 }
0x16a3   :  { %v7551_v9 = vadd.f32 %v8058_v57, %v7550_v53 }
0x16a4   :  { %v8219_v31 = vpop.f32.mrf.mxu0 }
0x16a5   :  { %7555 = vst.msk [vmem:[#allocation8] sm:$0x7] %vm7554_vm5, %v7551_v9 }
0x16ac   :  { %v7592_v61 = vld [vmem:[#allocation8] sm:$0x1]  ;;  %v7625_v1 = vld [vmem:[#allocation8 + $0x1] sm:$0x1]  ;;  %v7658_v60 = vld [vmem:[#allocation8 + $0x2] sm:$0x1] }
0x16ad   :  { %v7593_v21 = vadd.f32 %v7592_v61, %v7580_v6 }
0x16af   :  { %v7597_v20 = vrot.slane %v7593_v21, %v14686_v14 }
0x16b1   :  { %v7598_v36 = vadd.f32 %v7597_v20, %v13803_v27 }
0x16b3   :  { %v7599_v42 = vsel %vm7564_vm9, %v7598_v36, -inf }
0x16b4   :  { %7600 = vmax.xlane.f32.xlu1 %v7599_v42 }
0x173d   :  { %v7601_v40 = vpop.xlane.xlu1 %7600 }
0x173e   :  { %v7607_v22 = vmul.f32 %v13874_v59, %v7601_v40  ;;  %vm7602_vm8 = vcmp.eq.f32.partialorder %v7598_v36, %v7601_v40 }
0x1740   :  { %v7608_v28 = vsel %vm7564_vm9, %v7607_v22, 0.0 }
0x1741   :  { %v7609_v46 = vrot.slane %v7608_v28, 4 }
0x1743   :  { %v7610_v18 = vadd.f32 %v7609_v46, %v7608_v28 }
0x1745   :  { %v7611_v37 = vrot.slane %v7610_v18, 2 }
0x1747   :  { %v7612_v3 = vadd.f32 %v7611_v37, %v7610_v18 }
0x1749   :  { %v7613_v45 = vrot.slane %v7612_v3, 1 }
0x174b   :  { %v7614_v39 = vadd.f32 %v7613_v45, %v7612_v3 }
0x174d   :  { %v7626_v51 = vadd.f32 %v7625_v1, %v7614_v39 }
0x174f   :  { %v7630_v26 = vrot.slane %v7626_v51, %v14686_v14  ;;  %v7603_v14 = vsel %vm7602_vm8, %v7557_v16, 5.0 }
0x1750   :  { %v7604_v12 = vsel %vm7564_vm9, %v7603_v14, inf }
0x1751   :  { %v7631_v55 = vadd.f32 %v7630_v26, %v13803_v27 }
0x1753   :  { %v7632_v13 = vsel %vm7564_vm9, %v7631_v55, -inf }
0x1754   :  { %7633 = vmax.xlane.f32.xlu0 %v7632_v13 }
0x17dd   :  { %v7634_v7 = vpop.xlane.xlu0 %7633 }
0x17de   :  { %vm7635_vm10 = vcmp.eq.f32.partialorder %v7631_v55, %v7634_v7  ;;  %v7640_v4 = vmul.f32 %v13874_v59, %v7634_v7 }
0x17df   :  { %v7636_v38 = vsel %vm7635_vm10, %v7557_v16, 5.0 }
0x17e0   :  { %v7641_v2 = vsel %vm7564_vm9, %v7640_v4, 0.0  ;;  %v7637_v34 = vsel %vm7564_vm9, %v7636_v38, inf }
0x17e1   :  { %v7642_v0 = vrot.slane %v7641_v2, 4  ;;  %7638 = vmin.xlane.f32.xlu0 %v7637_v34 }
0x17e3   :  { %v7643_v27 = vadd.f32 %v7642_v0, %v7641_v2 }
0x17e5   :  { %v7644_v8 = vrot.slane %v7643_v27, 2  ;;  %7605 = vmin.xlane.f32.xlu0 %v7604_v12 }
0x17e7   :  { %v7645_v47 = vadd.f32 %v7644_v8, %v7643_v27 }
0x17e9   :  { %7571 = vmin.xlane.f32.xlu0 %v7570_v23  ;;  %v7646_v29 = vrot.slane %v7645_v47, 1 }
0x17eb   :  { %v7647_v48 = vadd.f32 %v7646_v29, %v7645_v47 }
0x17ed   :  { %v7659_v56 = vadd.f32 %v7658_v60, %v7647_v48 }
0x17ef   :  { %v7661_v44 = vadd.f32 %v7660_v17, %v7659_v56 }
0x17f1   :  { %v7662_v35 = vsel %vm7590_vm12, %v7661_v44, -inf }
0x17f2   :  { %7663 = vmax.xlane.f32.xlu1 %v7662_v35 }
0x186a   :  { %v7639_v30 = vpop.xlane.xlu0 %7638 }
0x186b   :  { %v7648_v54 = vmul.f32 %v13874_v59, %v7639_v30 }
0x186d   :  { %v7649_v10 = vsel %vm7564_vm9, %v7648_v54, 0.0 }
0x186e   :  { %v7650_v11 = vrot.slane %v7649_v10, 4  ;;  %v7606_v63 = vpop.xlane.xlu0 %7605 }
0x186f   :  { %v7615_v33 = vmul.f32 %v13874_v59, %v7606_v63 }
0x1870   :  { %v7651_v49 = vadd.f32 %v7650_v11, %v7649_v10 }
0x1871   :  { %v7616_v52 = vsel %vm7564_vm9, %v7615_v33, 0.0 }
0x1872   :  { %v7652_v15 = vrot.slane %v7651_v49, 2  ;;  %v7617_v62 = vrot.slane %v7616_v52, 4  ;;  %v7572_v58 = vpop.xlane.xlu0 %7571 }
0x1874   :  { %v7653_v19 = vadd.f32 %v7652_v15, %v7651_v49  ;;  %v7618_v24 = vadd.f32 %v7617_v62, %v7616_v52 }
0x1876   :  { %v7654_v25 = vrot.slane %v7653_v19, 1  ;;  %v7619_v32 = vrot.slane %v7618_v24, 2 }
0x1878   :  { %v7655_v57 = vadd.f32 %v7654_v25, %v7653_v19  ;;  %v7620_v53 = vadd.f32 %v7619_v32, %v7618_v24 }
0x187a   :  { %v8224_v50 = vtrunc.f32 %v7655_v57  ;;  %v7621_v9 = vrot.slane %v7620_v53, 1 }
0x187b   :  { %v7664_v31 = vpop.xlane.xlu1 %7663 }
0x187c   :  { %v8225_v5 = vcvt.f32.s32 %v8224_v50  ;;  %v7622_v6 = vadd.f32 %v7621_v9, %v7620_v53  ;;  %vm7665_vm14 = vcmp.eq.f32.partialorder %v7661_v44, %v7664_v31  ;;  %7694 = vst.msk [vmem:[#allocation13] sm:$0x1] %vm7693_vm13, %v7664_v31 }
0x187d   :  { %v7666_v59 = vsel %vm7665_vm14, %v7557_v16, 5.0 }
0x187e   :  { %7657 = vst.msk [vmem:[#allocation9 + $0x2] sm:$0x1] %vm7590_vm12, %v8225_v5  ;;  %v8222_v61 = vtrunc.f32 %v7622_v6  ;;  %v7667_v21 = vsel %vm7590_vm12, %v7666_v59, inf }
0x187f   :  { %7668 = vmin.xlane.f32.xlu1 %v7667_v21 }
0x1880   :  { %v8223_v20 = vcvt.f32.s32 %v8222_v61 }
0x1882   :  { %7624 = vst.msk [vmem:[#allocation9 + $0x1] sm:$0x1] %vm7590_vm12, %v8223_v20 }
0x1885   :  { %v7673_v40 = vld [vmem:[#allocation9 + $0x2] sm:$0x1] }
0x1886   :  { %v7674_v28 = vcvt.s32.f32 %v7673_v40 }
0x1889   :  { %v7683_v45 = vld [vmem:[#allocation9 + $0x1] sm:$0x1] }
0x188a   :  { %v7684_v51 = vcvt.s32.f32 %v7683_v45 }
0x1908   :  { %v7669_v36 = vpop.xlane.xlu1 %7668 }
0x1909   :  { %v8226_v42 = vtrunc.f32 %v7669_v36 }
0x190b   :  { %v8227_v22 = vcvt.f32.s32 %v8226_v42 }
0x190d   :  { %vm7675_vm15 = vcmp.eq.s32.totalorder %v14719_v43, %v8227_v22  ;;  %v7672_v1 = vsel %vm7671_vm0, %v8227_v22, 0 }
0x190e   :  { %v7676_v46 = vsel %vm7675_vm15, %v7674_v28, 0.0 }
0x190f   :  { %v7677_v18 = vsel %vm7590_vm12, %v7676_v46, 0.0 }
0x1910   :  { %7678 = vadd.xlane.f32.xlu1 %v7677_v18 }
0x1999   :  { %v7679_v37 = vpop.xlane.xlu1 %7678 }
0x199a   :  { %v8228_v3 = vtrunc.f32 %v7679_v37 }
0x199c   :  { %v8229_v39 = vcvt.f32.s32 %v8228_v3 }
0x199e   :  { %vm7685_vm2 = vcmp.eq.s32.totalorder %v14719_v43, %v8229_v39  ;;  %v7682_v26 = vsel %vm7681_vm1, %v8229_v39, %v7672_v1 }
0x199f   :  { %v7686_v55 = vsel %vm7685_vm2, %v7684_v51, 0.0 }
0x19a0   :  { %v7687_v13 = vsel %vm7590_vm12, %v7686_v55, 0.0 }
0x19a1   :  { %7688 = vadd.xlane.f32.xlu1 %v7687_v13 }
0x19a2   :  { %9098 = shalt.err (!%p9095_p9)
}
0x19a3   :  { %7706 = dma.vmem_to_hbm [thread:$0]  %s7704_s0, 16, %s13936_s16, [#allocation11]   ;;  %vm7691_vm3 = vcmp.eq.s32.totalorder %v14719_v43, 0  ;;  %vm7695_vm6 = vcmask 16384  }
0x19a4   :  { %s9140_s23 = smov [#allocation14]  }
0x19a5   :  { %s7713_s18 = sshll.u32 %s9140_s23, 4  ;;  %s7714_s18 = int_to_ptr.vmem [resolvable:$true] %s7713_s18 }
0x19a6   :  { %s9107_s19 = scalar_lea.vmem %s7714_s18, 16  ;;  %s9111_s4 = scalar_lea.vmem %s7714_s18, 32 }
0x19a7   :  { %p9108_p10 = scmp.ne.s32.totalorder %s7714_s18, %s9107_s19  ;;  %p9112_p11 = scmp.lt.s32.totalorder %s7714_s18, %s7714_s18 }
0x19a8   :  { %p9113_p12 = scmp.lt.s32.totalorder %s9111_s4, %s9107_s19 }
0x19aa   :  { %p9114_p13 = por %p9113_p12, %p9112_p11 }
0x19ac   :  { %p9115_p0 = pnand %p9114_p13, %p9108_p10 }
0x1a2a   :  { %v7689_v7 = vpop.xlane.xlu1 %7688 }
0x1a2b   :  { %v8230_v16 = vtrunc.f32 %v7689_v7 }
0x1a2d   :  { %v8231_v4 = vcvt.f32.s32 %v8230_v16 }
0x1a2f   :  { %v7692_v38 = vsel %vm7691_vm3, %v8231_v4, %v7682_v26 }
0x1a30   :  { %7696 = vst.msk [vmem:[#allocation14] sm:$0x1] %vm7695_vm6, %v7692_v38 }
0x1a31   :  { %9118 = shalt.err (!%p9115_p0)
}
0x1a32   :  { %7716 = dma.vmem_to_hbm [thread:$0]  %s7714_s18, 16, %s13937_s17, [#allocation15]  }
0x1a33   :  { %9129 = dma.done.wait [#allocation11], 16  }
0x1a34   :  { %9130 = vsyncadd [#allocation11], 4294967280 }
0x1a35   :  { %9131 = dma.done.wait [#allocation15], 16  }
0x1a36   :  { %9132 = vsyncadd [#allocation15], 4294967280 }
0x1a37   :  { %7723 = vsyncpa [#allocation11], 1 }
0x1a38   :  { %7724 = vsyncpa [#allocation15], 1 }
0x1a39   :  { %7725 = vsyncpa [#allocation12], 1 }

</bundles_post_ra>
